<compile_context>
chip_gen: v6e
topology: v6e:2x2x1
jax: 0.10.0
libtpu: 0.0.40
codegen_flags: <defaults>
</compile_context>

<pallas_src>
import numpy as np

import jax
import jax.numpy as jnp
from jax.experimental import pallas as pl
from jax.experimental.pallas import tpu as pltpu

ACTIONS = 3

_VMEM_LIMIT = 48 * 1024 * 1024  # explicit scoped-VMEM budget (fits v7x 64 MiB)


def _round_up(x, m):
    return ((x + m - 1) // m) * m


def _cparams(*sem):
    return pltpu.CompilerParams(dimension_semantics=sem,
                                vmem_limit_bytes=_VMEM_LIMIT)


# ----------------------------- Pallas kernels ------------------------------

def _conv1_pool_kernel(x_ref, w_ref, b_ref, o_ref):
    """Fused conv_1 GEMM + 2x2/s2 max-pool + bias + ReLU.

    x_ref: (tm, 256) bf16 -- for each pooled output position, the 8x8x4 input
           window packed as a 2x2 group of 4x4x4 pixel blocks.
    w_ref: (4, 256, 128) bf16 -- conv_1 weights remapped onto that packing,
           one (256,128) slab per pool-window member (32 real out channels,
           zero-padded to 128).
    b_ref: (1, 128) f32.
    o_ref: (tm, 128) bf16 -- pooled, biased, ReLU'd conv_1 output (lane-dense).

    NOTE: bias/ReLU are applied AFTER the pool.  This is exact because the
    bias is a per-channel constant across the pool window
    (max_i(s_i) + b == max_i(s_i + b)) and ReLU is monotone
    (relu(max) == max(relu)); do not reorder if either property changes.
    """
    x = x_ref[...]
    m = jnp.maximum(
        jnp.dot(x, w_ref[0], preferred_element_type=jnp.float32),
        jnp.dot(x, w_ref[1], preferred_element_type=jnp.float32))
    m = jnp.maximum(m, jnp.dot(x, w_ref[2], preferred_element_type=jnp.float32))
    m = jnp.maximum(m, jnp.dot(x, w_ref[3], preferred_element_type=jnp.float32))
    o_ref[...] = jnp.maximum(m + b_ref[...], 0.0).astype(o_ref.dtype)


def conv1_pool(cols, w, b, *, tm_max=3200):
    """cols: (M, 256) bf16, M = N*20*20. Returns (M, 128) bf16."""
    M, K = cols.shape
    tm = min(tm_max, _round_up(M, 8))
    mp = _round_up(M, tm)
    if mp != M:  # pad rows so no tail is dropped; padded rows sliced off below
        cols = jnp.pad(cols, ((0, mp - M), (0, 0)))
    out = pl.pallas_call(
        _conv1_pool_kernel,
        out_shape=jax.ShapeDtypeStruct((mp, 128), jnp.bfloat16),
        grid=(mp // tm,),
        in_specs=[
            pl.BlockSpec((tm, K), lambda i: (i, 0)),
            pl.BlockSpec((4, K, 128), lambda i: (0, 0, 0)),
            pl.BlockSpec((1, 128), lambda i: (0, 0)),
        ],
        out_specs=pl.BlockSpec((tm, 128), lambda i: (i, 0)),
        compiler_params=_cparams("parallel"),
    )(cols, w, b)
    return out[:M]


def _gemm_bias_relu_kernel(x_ref, w_ref, b_ref, o_ref):
    """o = relu(x @ w + b); bf16 inputs, f32 accumulate, bf16 store."""
    acc = jnp.dot(x_ref[...], w_ref[...], preferred_element_type=jnp.float32)
    o_ref[...] = jnp.maximum(acc + b_ref[...], 0.0).astype(o_ref.dtype)


def conv_gemm(cols, w, b, *, tm_max=1024):
    """Conv GEMM (conv_2 / conv_3), tiled over rows. cols:(M,K) bf16."""
    M, K = cols.shape
    Np = w.shape[1]
    tm = min(tm_max, _round_up(M, 8))
    mp = _round_up(M, tm)
    if mp != M:
        cols = jnp.pad(cols, ((0, mp - M), (0, 0)))
    out = pl.pallas_call(
        _gemm_bias_relu_kernel,
        out_shape=jax.ShapeDtypeStruct((mp, Np), jnp.bfloat16),
        grid=(mp // tm,),
        in_specs=[
            pl.BlockSpec((tm, K), lambda i: (i, 0)),
            pl.BlockSpec((K, Np), lambda i: (0, 0)),
            pl.BlockSpec((1, Np), lambda i: (0, 0)),
        ],
        out_specs=pl.BlockSpec((tm, Np), lambda i: (i, 0)),
        compiler_params=_cparams("parallel"),
    )(cols, w, b)
    return out[:M]


def _linear_head_kernel(x_ref, w1_ref, b1_ref, w2_ref, b2_ref, o_ref):
    """Fused linear_1 + ReLU + linear_2.

    Grid = (batch tiles [parallel], hidden 256-wide blocks [arbitrary]).
    The f32 output block is resident across the hidden axis and is used
    directly as the accumulator (no scratch); bias_2 seeds it at j == 0.
    """
    j = pl.program_id(1)

    @pl.when(j == 0)
    def _():
        o_ref[...] = jnp.zeros_like(o_ref) + b2_ref[...]

    h = jnp.dot(x_ref[...], w1_ref[...], preferred_element_type=jnp.float32)
    h = jnp.maximum(h + b1_ref[...], 0.0)
    o_ref[...] += jnp.dot(h.astype(jnp.bfloat16), w2_ref[...],
                          preferred_element_type=jnp.float32)


def linear_head(x, w1, b1, w2, b2, *, tm_max=256, tn=256):
    """x:(M,3136) bf16, w1:(3136,1024) bf16, w2:(1024,128) bf16 -> (M,128) f32."""
    M, K = x.shape
    Np = w1.shape[1]
    No = w2.shape[1]
    tm = min(tm_max, _round_up(M, 8))
    mp = _round_up(M, tm)
    if mp != M:
        x = jnp.pad(x, ((0, mp - M), (0, 0)))
    out = pl.pallas_call(
        _linear_head_kernel,
        out_shape=jax.ShapeDtypeStruct((mp, No), jnp.float32),
        grid=(mp // tm, Np // tn),
        in_specs=[
            pl.BlockSpec((tm, K), lambda m, j: (m, 0)),   # constant over j
            pl.BlockSpec((K, tn), lambda m, j: (0, j)),
            pl.BlockSpec((1, tn), lambda m, j: (0, j)),
            pl.BlockSpec((tn, No), lambda m, j: (j, 0)),
            pl.BlockSpec((1, No), lambda m, j: (0, 0)),
        ],
        out_specs=pl.BlockSpec((tm, No), lambda m, j: (m, 0)),
        compiler_params=_cparams("parallel", "arbitrary"),
    )(x, w1, b1, w2, b2)
    return out[:M]


# ------------------------------- JAX glue ----------------------------------

def im2col(x, kh, kw, stride):
    """x: (N,H,W,C) NHWC -> (N*Ho*Wo, kh*kw*C) with feature order (kh,kw,C)."""
    n, h, w, c = x.shape
    ho = (h - kh) // stride + 1
    wo = (w - kw) // stride + 1
    patches = []
    for i in range(kh):
        for j in range(kw):
            patches.append(
                x[:, i:i + stride * (ho - 1) + 1:stride,
                     j:j + stride * (wo - 1) + 1:stride, :])
    p = jnp.stack(patches, axis=3)            # (N, Ho, Wo, kh*kw, C)
    return p.reshape(n * ho * wo, kh * kw * c), (n, ho, wo)


def _build_conv1_pool_weight(w_torch):
    """Remap torch conv_1 weights (32,4,6,6) onto the block-packed input.

    Input feature index g = Bidx*64 + rr*16 + cc*4 + ch, where the 8x8 input
    window of a pooled output position is split into a 2x2 group (Bidx) of
    4x4 pixel blocks (rr, cc) with 4 channels (ch).  Output slab `member`
    (= 2*di + dj) holds the conv weights of pool-window member (di, dj),
    32 real output channels zero-padded to 128.
    Returns (4, 256, 128) bf16.
    """
    w = np.asarray(w_torch, dtype=np.float32)          # (co, ci, kh, kw)
    big = np.zeros((4, 4, 4, 4, 4, 128), dtype=np.float32)
    # axes: [member, Bidx, rr, cc, ch, co_padded]
    for member in range(4):
        di, dj = member // 2, member % 2
        for bidx in range(4):
            br, bq = bidx // 2, bidx % 2
            for rr in range(4):
                for cc in range(4):
                    dr, dc = 4 * br + rr, 4 * bq + cc
                    ki, kj = dr - 2 * di, dc - 2 * dj
                    if 0 <= ki < 6 and 0 <= kj < 6:
                        big[member, bidx, rr, cc, :, :32] = w[:, :, ki, kj].T
    return jnp.asarray(big.reshape(4, 256, 128), dtype=jnp.bfloat16)


def init_params(key):
    """PyTorch-default uniform(-1/sqrt(fan_in), +) init, then one-time layout
    transforms: GEMM-ready transposes, pool-packed conv_1 weights, NHWC row
    permutation for wl1, zero-pad of output dims to 128 multiples (hidden to
    1024 = 4*256 for the 256-wide v6e/v7x MXU), bf16 weights, f32 biases."""
    ks = jax.random.split(key, 10)

    def u(k, shape, fan_in):
        bound = 1.0 / (fan_in ** 0.5)
        return jax.random.uniform(k, shape, jnp.float32, -bound, bound)

    def pad_cols(w, n_to):
        return jnp.pad(w, ((0, 0), (0, n_to - w.shape[1])))

    p = {}
    # conv_1: torch (32, 4, 6, 6) -> pool-packed (4, 256, 128)
    w = u(ks[0], (32, 4, 6, 6), 4 * 6 * 6)
    p["w1"] = _build_conv1_pool_weight(w)
    p["b1"] = jnp.pad(u(ks[1], (32,), 144), (0, 96)).reshape(1, 128)
    # conv_2: torch (64, 32, 4, 4) -> (512, 64) -> pad to 128
    w = u(ks[2], (64, 32, 4, 4), 32 * 4 * 4)
    w = jnp.transpose(w, (2, 3, 1, 0)).reshape(512, 64)
    p["w2"] = pad_cols(w, 128).astype(jnp.bfloat16)
    p["b2"] = jnp.pad(u(ks[3], (64,), 512), (0, 64)).reshape(1, 128)
    # conv_3: torch (64, 64, 3, 3) -> (576, 64) -> pad to 128
    w = u(ks[4], (64, 64, 3, 3), 64 * 3 * 3)
    w = jnp.transpose(w, (2, 3, 1, 0)).reshape(576, 64)
    p["w3"] = pad_cols(w, 128).astype(jnp.bfloat16)
    p["b3"] = jnp.pad(u(ks[5], (64,), 576), (0, 64)).reshape(1, 128)
    # linear_1: torch (784, 3136); rows (C,H,W) -> permute to NHWC (H,W,C),
    # transpose to (3136, 784), pad hidden 784 -> 1024 = 4*256.
    w = u(ks[6], (784, 3136), 3136)
    w = w.T.reshape(64, 7, 7, 784).transpose(1, 2, 0, 3).reshape(3136, 784)
    p["wl1"] = pad_cols(w, 1024).astype(jnp.bfloat16)
    p["bl1"] = jnp.pad(u(ks[7], (784,), 3136), (0, 240)).reshape(1, 1024)
    # linear_2: torch (3, 784) -> (784, 3) -> pad to (1024, 128)
    w = u(ks[8], (ACTIONS, 784), 784)
    p["wl2"] = jnp.pad(w.T, ((0, 240), (0, 128 - ACTIONS))).astype(jnp.bfloat16)
    p["bl2"] = jnp.pad(u(ks[9], (ACTIONS,), 784),
                       (0, 128 - ACTIONS)).reshape(1, 128)
    return p


def cnn_pool_forward(params, x_nchw):
    """x_nchw: (N, 4, 84, 84) float32 -> (N, ACTIONS) float32."""
    x = jnp.transpose(x_nchw, (0, 2, 3, 1)).astype(jnp.bfloat16)   # NHWC bf16
    n = x.shape[0]

    # conv_1 (k=6, s=2) + 2x2/s2 max-pool + ReLU, fused.
    # Pack the 8x8x4 input window of each pooled output position as a 2x2
    # group of 4x4x4 pixel blocks: one small reshape/transpose + a 4-slice
    # concat instead of 4 full 144-wide im2cols (~2.3x less materialized HBM).
    xb = x.reshape(n, 21, 4, 21, 4, 4).transpose(0, 1, 3, 2, 4, 5)
    xb = xb.reshape(n, 21, 21, 64)                       # 4x4x4 pixel blocks
    cols = jnp.concatenate(
        [xb[:, :20, :20], xb[:, :20, 1:], xb[:, 1:, :20], xb[:, 1:, 1:]],
        axis=-1).reshape(n * 400, 256)                   # (N*400, 256)
    y = conv1_pool(cols, params["w1"], params["b1"])     # (N*400, 128) bf16
    y = y.reshape(n, 20, 20, 128)

    # conv_2: k=4, s=2, ReLU  ->  (N, 9, 9, 64[padded 128])
    cols, (_, ho, wo) = im2col(y[..., :32], 4, 4, 2)     # (N*81, 512)
    y = conv_gemm(cols, params["w2"], params["b2"]).reshape(n, ho, wo, 128)

    # conv_3: k=3, s=1, ReLU  ->  (N, 7, 7, 64[padded 128])
    cols, (_, ho, wo) = im2col(y[..., :64], 3, 3, 1)     # (N*49, 576)
    y = conv_gemm(cols, params["w3"], params["b3"]).reshape(n, ho, wo, 128)

    # Flatten in NHWC order (wl1 rows were pre-permuted to match).
    feat = y[..., :64].reshape(n, 7 * 7 * 64)            # (N, 3136) bf16

    # Fused linear_1 + ReLU + linear_2 (batch-tiled, streams wl1 in 256-col
    # blocks, accumulates directly into the resident f32 output block).
    out = linear_head(feat, params["wl1"], params["bl1"],
                      params["wl2"], params["bl2"])      # (N, 128) f32
    return out[:, :ACTIONS]


if __name__ == "__main__":
    key = jax.random.PRNGKey(0)
    pkey, xkey = jax.random.split(key)
    params = init_params(pkey)
    # Input spatial size is fixed by linear_1 (3136 = 64*7*7) -> 84x84, 4 ch.
    x = jax.random.normal(xkey, (2, 4, 84, 84), jnp.float32)

    out = jax.block_until_ready(jax.jit(cnn_pool_forward)(params, x))
    assert out.shape == (2, ACTIONS), out.shape
    assert bool(jnp.all(jnp.isfinite(out)))
    print("KERNEL_OK")
</pallas_src>

<mosaic_0001>
module attributes {stable_mosaic.version = 11 : i64} {
  func.func @_conv1_pool_kernel(%arg0: i32, %arg1: memref<800x256xbf16, #tpu.memory_space<vmem>>, %arg2: memref<4x256x128xbf16, #tpu.memory_space<vmem>>, %arg3: memref<1x128xf32, #tpu.memory_space<vmem>>, %arg4: memref<800x128xbf16, #tpu.memory_space<vmem>>) attributes {dimension_semantics = [#tpu.dimension_semantics<parallel>], iteration_bounds = array<i64: 1>, scalar_prefetch = 0 : i64, scratch_operands = 0 : i64, tpu.core_type = #tpu.core_type<tc>, window_params = [{transform_indices = @transform_0, window_bounds = array<i64: 800, 256>}, {pipeline_mode = #tpu.pipeline_mode<synchronous>, transform_indices = @transform_1, window_bounds = array<i64: 4, 256, 128>}, {pipeline_mode = #tpu.pipeline_mode<synchronous>, transform_indices = @transform_2, window_bounds = array<i64: 1, 128>}, {transform_indices = @transform_3, window_bounds = array<i64: 800, 128>}]} {
    %c0 = arith.constant 0 : index
    %c0_0 = arith.constant 0 : index
    %0 = vector.load %arg1[%c0, %c0_0] : memref<800x256xbf16, #tpu.memory_space<vmem>>, vector<800x256xbf16>
    %c0_1 = arith.constant 0 : index
    %c0_2 = arith.constant 0 : index
    %c0_3 = arith.constant 0 : index
    %1 = vector.load %arg2[%c0_1, %c0_2, %c0_3] : memref<4x256x128xbf16, #tpu.memory_space<vmem>>, vector<1x256x128xbf16>
    %2 = vector.shape_cast %1 : vector<1x256x128xbf16> to vector<256x128xbf16>
    %cst = arith.constant dense<0.000000e+00> : vector<800x128xf32>
    %3 = tpu.matmul %0, %2, %cst {dimension_numbers = #tpu.dot_dimension_numbers<[1], [0], [0], [1], [0, 0, 1, 1], [], []>} : vector<800x256xbf16>, vector<256x128xbf16>, vector<800x128xf32> -> vector<800x128xf32>
    %c1 = arith.constant 1 : index
    %c0_4 = arith.constant 0 : index
    %c0_5 = arith.constant 0 : index
    %4 = vector.load %arg2[%c1, %c0_4, %c0_5] : memref<4x256x128xbf16, #tpu.memory_space<vmem>>, vector<1x256x128xbf16>
    %5 = vector.shape_cast %4 : vector<1x256x128xbf16> to vector<256x128xbf16>
    %cst_6 = arith.constant dense<0.000000e+00> : vector<800x128xf32>
    %6 = tpu.matmul %0, %5, %cst_6 {dimension_numbers = #tpu.dot_dimension_numbers<[1], [0], [0], [1], [0, 0, 1, 1], [], []>} : vector<800x256xbf16>, vector<256x128xbf16>, vector<800x128xf32> -> vector<800x128xf32>
    %7 = arith.maximumf %3, %6 : vector<800x128xf32>
    %c2 = arith.constant 2 : index
    %c0_7 = arith.constant 0 : index
    %c0_8 = arith.constant 0 : index
    %8 = vector.load %arg2[%c2, %c0_7, %c0_8] : memref<4x256x128xbf16, #tpu.memory_space<vmem>>, vector<1x256x128xbf16>
    %9 = vector.shape_cast %8 : vector<1x256x128xbf16> to vector<256x128xbf16>
    %cst_9 = arith.constant dense<0.000000e+00> : vector<800x128xf32>
    %10 = tpu.matmul %0, %9, %cst_9 {dimension_numbers = #tpu.dot_dimension_numbers<[1], [0], [0], [1], [0, 0, 1, 1], [], []>} : vector<800x256xbf16>, vector<256x128xbf16>, vector<800x128xf32> -> vector<800x128xf32>
    %11 = arith.maximumf %7, %10 : vector<800x128xf32>
    %c3 = arith.constant 3 : index
    %c0_10 = arith.constant 0 : index
    %c0_11 = arith.constant 0 : index
    %12 = vector.load %arg2[%c3, %c0_10, %c0_11] : memref<4x256x128xbf16, #tpu.memory_space<vmem>>, vector<1x256x128xbf16>
    %13 = vector.shape_cast %12 : vector<1x256x128xbf16> to vector<256x128xbf16>
    %cst_12 = arith.constant dense<0.000000e+00> : vector<800x128xf32>
    %14 = tpu.matmul %0, %13, %cst_12 {dimension_numbers = #tpu.dot_dimension_numbers<[1], [0], [0], [1], [0, 0, 1, 1], [], []>} : vector<800x256xbf16>, vector<256x128xbf16>, vector<800x128xf32> -> vector<800x128xf32>
    %15 = arith.maximumf %11, %14 : vector<800x128xf32>
    %c0_13 = arith.constant 0 : index
    %c0_14 = arith.constant 0 : index
    %16 = vector.load %arg3[%c0_13, %c0_14] : memref<1x128xf32, #tpu.memory_space<vmem>>, vector<1x128xf32>
    %17 = vector.broadcast %16 : vector<1x128xf32> to vector<800x128xf32>
    %18 = arith.addf %15, %17 : vector<800x128xf32>
    %cst_15 = arith.constant 0.000000e+00 : f32
    %19 = vector.broadcast %cst_15 : f32 to vector<800x128xf32>
    %20 = arith.maximumf %18, %19 : vector<800x128xf32>
    %21 = arith.truncf %20 : vector<800x128xf32> to vector<800x128xbf16>
    %c0_16 = arith.constant 0 : index
    %c0_17 = arith.constant 0 : index
    %22 = vector.load %arg4[%c0_16, %c0_17] : memref<800x128xbf16, #tpu.memory_space<vmem>>, vector<800x128xbf16>
    tpu.vector_store %arg4[%c0_16, %c0_17], %21 {strides = array<i32>} : memref<800x128xbf16, #tpu.memory_space<vmem>>, vector<800x128xbf16>,
    return
  }
  func.func @transform_0(%arg0: i32) -> (i32, i32) {
    %c0_i32 = arith.constant 0 : i32
    %c0_i32_0 = arith.constant 0 : i32
    return %arg0, %c0_i32 : i32, i32
  }
  func.func @transform_1(%arg0: i32) -> (i32, i32, i32) {
    %c0_i32 = arith.constant 0 : i32
    %c0_i32_0 = arith.constant 0 : i32
    %c0_i32_1 = arith.constant 0 : i32
    %c0_i32_2 = arith.constant 0 : i32
    return %c0_i32, %c0_i32_0, %c0_i32_1 : i32, i32, i32
  }
  func.func @transform_2(%arg0: i32) -> (i32, i32) {
    %c0_i32 = arith.constant 0 : i32
    %c0_i32_0 = arith.constant 0 : i32
    %c0_i32_1 = arith.constant 0 : i32
    return %c0_i32, %c0_i32_0 : i32, i32
  }
  func.func @transform_3(%arg0: i32) -> (i32, i32) {
    %c0_i32 = arith.constant 0 : i32
    %c0_i32_0 = arith.constant 0 : i32
    return %arg0, %c0_i32 : i32, i32
  }
}

module attributes {stable_mosaic.version = 11 : i64} {
  func.func @_gemm_bias_relu_kernel(%arg0: i32, %arg1: memref<168x512xbf16, #tpu.memory_space<vmem>>, %arg2: memref<512x128xbf16, #tpu.memory_space<vmem>>, %arg3: memref<1x128xf32, #tpu.memory_space<vmem>>, %arg4: memref<168x128xbf16, #tpu.memory_space<vmem>>) attributes {dimension_semantics = [#tpu.dimension_semantics<parallel>], iteration_bounds = array<i64: 1>, scalar_prefetch = 0 : i64, scratch_operands = 0 : i64, tpu.core_type = #tpu.core_type<tc>, window_params = [{transform_indices = @transform_0, window_bounds = array<i64: 168, 512>}, {pipeline_mode = #tpu.pipeline_mode<synchronous>, transform_indices = @transform_1, window_bounds = array<i64: 512, 128>}, {pipeline_mode = #tpu.pipeline_mode<synchronous>, transform_indices = @transform_2, window_bounds = array<i64: 1, 128>}, {transform_indices = @transform_3, window_bounds = array<i64: 168, 128>}]} {
    %c0 = arith.constant 0 : index
    %c0_0 = arith.constant 0 : index
    %0 = vector.load %arg1[%c0, %c0_0] : memref<168x512xbf16, #tpu.memory_space<vmem>>, vector<168x512xbf16>
    %c0_1 = arith.constant 0 : index
    %c0_2 = arith.constant 0 : index
    %1 = vector.load %arg2[%c0_1, %c0_2] : memref<512x128xbf16, #tpu.memory_space<vmem>>, vector<512x128xbf16>
    %cst = arith.constant dense<0.000000e+00> : vector<168x128xf32>
    %2 = tpu.matmul %0, %1, %cst {dimension_numbers = #tpu.dot_dimension_numbers<[1], [0], [0], [1], [0, 0, 1, 1], [], []>} : vector<168x512xbf16>, vector<512x128xbf16>, vector<168x128xf32> -> vector<168x128xf32>
    %c0_3 = arith.constant 0 : index
    %c0_4 = arith.constant 0 : index
    %3 = vector.load %arg3[%c0_3, %c0_4] : memref<1x128xf32, #tpu.memory_space<vmem>>, vector<1x128xf32>
    %4 = vector.broadcast %3 : vector<1x128xf32> to vector<168x128xf32>
    %5 = arith.addf %2, %4 : vector<168x128xf32>
    %cst_5 = arith.constant 0.000000e+00 : f32
    %6 = vector.broadcast %cst_5 : f32 to vector<168x128xf32>
    %7 = arith.maximumf %5, %6 : vector<168x128xf32>
    %8 = arith.truncf %7 : vector<168x128xf32> to vector<168x128xbf16>
    %c0_6 = arith.constant 0 : index
    %c0_7 = arith.constant 0 : index
    %9 = vector.load %arg4[%c0_6, %c0_7] : memref<168x128xbf16, #tpu.memory_space<vmem>>, vector<168x128xbf16>
    tpu.vector_store %arg4[%c0_6, %c0_7], %8 {strides = array<i32>} : memref<168x128xbf16, #tpu.memory_space<vmem>>, vector<168x128xbf16>,
    return
  }
  func.func @transform_0(%arg0: i32) -> (i32, i32) {
    %c0_i32 = arith.constant 0 : i32
    %c0_i32_0 = arith.constant 0 : i32
    return %arg0, %c0_i32 : i32, i32
  }
  func.func @transform_1(%arg0: i32) -> (i32, i32) {
    %c0_i32 = arith.constant 0 : i32
    %c0_i32_0 = arith.constant 0 : i32
    %c0_i32_1 = arith.constant 0 : i32
    return %c0_i32, %c0_i32_0 : i32, i32
  }
  func.func @transform_2(%arg0: i32) -> (i32, i32) {
    %c0_i32 = arith.constant 0 : i32
    %c0_i32_0 = arith.constant 0 : i32
    %c0_i32_1 = arith.constant 0 : i32
    return %c0_i32, %c0_i32_0 : i32, i32
  }
  func.func @transform_3(%arg0: i32) -> (i32, i32) {
    %c0_i32 = arith.constant 0 : i32
    %c0_i32_0 = arith.constant 0 : i32
    return %arg0, %c0_i32 : i32, i32
  }
}

module attributes {stable_mosaic.version = 11 : i64} {
  func.func @_gemm_bias_relu_kernel(%arg0: i32, %arg1: memref<104x576xbf16, #tpu.memory_space<vmem>>, %arg2: memref<576x128xbf16, #tpu.memory_space<vmem>>, %arg3: memref<1x128xf32, #tpu.memory_space<vmem>>, %arg4: memref<104x128xbf16, #tpu.memory_space<vmem>>) attributes {dimension_semantics = [#tpu.dimension_semantics<parallel>], iteration_bounds = array<i64: 1>, scalar_prefetch = 0 : i64, scratch_operands = 0 : i64, tpu.core_type = #tpu.core_type<tc>, window_params = [{transform_indices = @transform_0, window_bounds = array<i64: 104, 576>}, {pipeline_mode = #tpu.pipeline_mode<synchronous>, transform_indices = @transform_1, window_bounds = array<i64: 576, 128>}, {pipeline_mode = #tpu.pipeline_mode<synchronous>, transform_indices = @transform_2, window_bounds = array<i64: 1, 128>}, {transform_indices = @transform_3, window_bounds = array<i64: 104, 128>}]} {
    %c0 = arith.constant 0 : index
    %c0_0 = arith.constant 0 : index
    %0 = vector.load %arg1[%c0, %c0_0] : memref<104x576xbf16, #tpu.memory_space<vmem>>, vector<104x576xbf16>
    %c0_1 = arith.constant 0 : index
    %c0_2 = arith.constant 0 : index
    %1 = vector.load %arg2[%c0_1, %c0_2] : memref<576x128xbf16, #tpu.memory_space<vmem>>, vector<576x128xbf16>
    %cst = arith.constant dense<0.000000e+00> : vector<104x128xf32>
    %2 = tpu.matmul %0, %1, %cst {dimension_numbers = #tpu.dot_dimension_numbers<[1], [0], [0], [1], [0, 0, 1, 1], [], []>} : vector<104x576xbf16>, vector<576x128xbf16>, vector<104x128xf32> -> vector<104x128xf32>
    %c0_3 = arith.constant 0 : index
    %c0_4 = arith.constant 0 : index
    %3 = vector.load %arg3[%c0_3, %c0_4] : memref<1x128xf32, #tpu.memory_space<vmem>>, vector<1x128xf32>
    %4 = vector.broadcast %3 : vector<1x128xf32> to vector<104x128xf32>
    %5 = arith.addf %2, %4 : vector<104x128xf32>
    %cst_5 = arith.constant 0.000000e+00 : f32
    %6 = vector.broadcast %cst_5 : f32 to vector<104x128xf32>
    %7 = arith.maximumf %5, %6 : vector<104x128xf32>
    %8 = arith.truncf %7 : vector<104x128xf32> to vector<104x128xbf16>
    %c0_6 = arith.constant 0 : index
    %c0_7 = arith.constant 0 : index
    %9 = vector.load %arg4[%c0_6, %c0_7] : memref<104x128xbf16, #tpu.memory_space<vmem>>, vector<104x128xbf16>
    tpu.vector_store %arg4[%c0_6, %c0_7], %8 {strides = array<i32>} : memref<104x128xbf16, #tpu.memory_space<vmem>>, vector<104x128xbf16>,
    return
  }
  func.func @transform_0(%arg0: i32) -> (i32, i32) {
    %c0_i32 = arith.constant 0 : i32
    %c0_i32_0 = arith.constant 0 : i32
    return %arg0, %c0_i32 : i32, i32
  }
  func.func @transform_1(%arg0: i32) -> (i32, i32) {
    %c0_i32 = arith.constant 0 : i32
    %c0_i32_0 = arith.constant 0 : i32
    %c0_i32_1 = arith.constant 0 : i32
    return %c0_i32, %c0_i32_0 : i32, i32
  }
  func.func @transform_2(%arg0: i32) -> (i32, i32) {
    %c0_i32 = arith.constant 0 : i32
    %c0_i32_0 = arith.constant 0 : i32
    %c0_i32_1 = arith.constant 0 : i32
    return %c0_i32, %c0_i32_0 : i32, i32
  }
  func.func @transform_3(%arg0: i32) -> (i32, i32) {
    %c0_i32 = arith.constant 0 : i32
    %c0_i32_0 = arith.constant 0 : i32
    return %arg0, %c0_i32 : i32, i32
  }
}

module attributes {stable_mosaic.version = 11 : i64} {
  func.func @_linear_head_kernel(%arg0: i32, %arg1: i32, %arg2: memref<8x3136xbf16, #tpu.memory_space<vmem>>, %arg3: memref<3136x256xbf16, #tpu.memory_space<vmem>>, %arg4: memref<1x256xf32, #tpu.memory_space<vmem>>, %arg5: memref<256x128xbf16, #tpu.memory_space<vmem>>, %arg6: memref<1x128xf32, #tpu.memory_space<vmem>>, %arg7: memref<8x128xf32, #tpu.memory_space<vmem>>) attributes {dimension_semantics = [#tpu.dimension_semantics<parallel>, #tpu.dimension_semantics<arbitrary>], iteration_bounds = array<i64: 1, 4>, scalar_prefetch = 0 : i64, scratch_operands = 0 : i64, tpu.core_type = #tpu.core_type<tc>, window_params = [{transform_indices = @transform_0, window_bounds = array<i64: 8, 3136>}, {transform_indices = @transform_1, window_bounds = array<i64: 3136, 256>}, {transform_indices = @transform_2, window_bounds = array<i64: 1, 256>}, {transform_indices = @transform_3, window_bounds = array<i64: 256, 128>}, {pipeline_mode = #tpu.pipeline_mode<synchronous>, transform_indices = @transform_4, window_bounds = array<i64: 1, 128>}, {transform_indices = @transform_5, window_bounds = array<i64: 8, 128>}]} {
    %c0_i32 = arith.constant 0 : i32
    %0 = arith.cmpi eq, %arg1, %c0_i32 : i32
    %1 = arith.extui %0 : i1 to i32
    %c0_i32_0 = arith.constant 0 : i32
    %2 = arith.cmpi ne, %1, %c0_i32_0 : i32
    scf.if %2 {
      %cst_14 = arith.constant 0.000000e+00 : f32
      %17 = vector.broadcast %cst_14 : f32 to vector<8x128xf32>
      %c0_15 = arith.constant 0 : index
      %c0_16 = arith.constant 0 : index
      %18 = vector.load %arg6[%c0_15, %c0_16] : memref<1x128xf32, #tpu.memory_space<vmem>>, vector<1x128xf32>
      %19 = vector.broadcast %18 : vector<1x128xf32> to vector<8x128xf32>
      %20 = arith.addf %17, %19 : vector<8x128xf32>
      %c0_17 = arith.constant 0 : index
      %c0_18 = arith.constant 0 : index
      %21 = vector.load %arg7[%c0_17, %c0_18] : memref<8x128xf32, #tpu.memory_space<vmem>>, vector<8x128xf32>
      tpu.vector_store %arg7[%c0_17, %c0_18], %20 {strides = array<i32>} : memref<8x128xf32, #tpu.memory_space<vmem>>, vector<8x128xf32>,
    } else {
    }
    %c0 = arith.constant 0 : index
    %c0_1 = arith.constant 0 : index
    %3 = vector.load %arg2[%c0, %c0_1] : memref<8x3136xbf16, #tpu.memory_space<vmem>>, vector<8x3136xbf16>
    %c0_2 = arith.constant 0 : index
    %c0_3 = arith.constant 0 : index
    %4 = vector.load %arg3[%c0_2, %c0_3] : memref<3136x256xbf16, #tpu.memory_space<vmem>>, vector<3136x256xbf16>
    %cst = arith.constant dense<0.000000e+00> : vector<8x256xf32>
    %5 = tpu.matmul %3, %4, %cst {dimension_numbers = #tpu.dot_dimension_numbers<[1], [0], [0], [1], [0, 0, 1, 1], [], []>} : vector<8x3136xbf16>, vector<3136x256xbf16>, vector<8x256xf32> -> vector<8x256xf32>
    %c0_4 = arith.constant 0 : index
    %c0_5 = arith.constant 0 : index
    %6 = vector.load %arg4[%c0_4, %c0_5] : memref<1x256xf32, #tpu.memory_space<vmem>>, vector<1x256xf32>
    %7 = vector.broadcast %6 : vector<1x256xf32> to vector<8x256xf32>
    %8 = arith.addf %5, %7 : vector<8x256xf32>
    %cst_6 = arith.constant 0.000000e+00 : f32
    %9 = vector.broadcast %cst_6 : f32 to vector<8x256xf32>
    %10 = arith.maximumf %8, %9 : vector<8x256xf32>
    %c0_7 = arith.constant 0 : index
    %c0_8 = arith.constant 0 : index
    %11 = vector.load %arg7[%c0_7, %c0_8] : memref<8x128xf32, #tpu.memory_space<vmem>>, vector<8x128xf32>
    %12 = arith.truncf %10 : vector<8x256xf32> to vector<8x256xbf16>
    %c0_9 = arith.constant 0 : index
    %c0_10 = arith.constant 0 : index
    %13 = vector.load %arg5[%c0_9, %c0_10] : memref<256x128xbf16, #tpu.memory_space<vmem>>, vector<256x128xbf16>
    %cst_11 = arith.constant dense<0.000000e+00> : vector<8x128xf32>
    %14 = tpu.matmul %12, %13, %cst_11 {dimension_numbers = #tpu.dot_dimension_numbers<[1], [0], [0], [1], [0, 0, 1, 1], [], []>} : vector<8x256xbf16>, vector<256x128xbf16>, vector<8x128xf32> -> vector<8x128xf32>
    %15 = arith.addf %11, %14 : vector<8x128xf32>
    %c0_12 = arith.constant 0 : index
    %c0_13 = arith.constant 0 : index
    %16 = vector.load %arg7[%c0_12, %c0_13] : memref<8x128xf32, #tpu.memory_space<vmem>>, vector<8x128xf32>
    tpu.vector_store %arg7[%c0_12, %c0_13], %15 {strides = array<i32>} : memref<8x128xf32, #tpu.memory_space<vmem>>, vector<8x128xf32>,
    return
  }
  func.func @transform_0(%arg0: i32, %arg1: i32) -> (i32, i32) {
    %c0_i32 = arith.constant 0 : i32
    %c0_i32_0 = arith.constant 0 : i32
    return %arg0, %c0_i32 : i32, i32
  }
  func.func @transform_1(%arg0: i32, %arg1: i32) -> (i32, i32) {
    %c0_i32 = arith.constant 0 : i32
    %c0_i32_0 = arith.constant 0 : i32
    return %c0_i32, %arg1 : i32, i32
  }
  func.func @transform_2(%arg0: i32, %arg1: i32) -> (i32, i32) {
    %c0_i32 = arith.constant 0 : i32
    %c0_i32_0 = arith.constant 0 : i32
    return %c0_i32, %arg1 : i32, i32
  }
  func.func @transform_3(%arg0: i32, %arg1: i32) -> (i32, i32) {
    %c0_i32 = arith.constant 0 : i32
    %c0_i32_0 = arith.constant 0 : i32
    return %arg1, %c0_i32 : i32, i32
  }
  func.func @transform_4(%arg0: i32, %arg1: i32) -> (i32, i32) {
    %c0_i32 = arith.constant 0 : i32
    %c0_i32_0 = arith.constant 0 : i32
    %c0_i32_1 = arith.constant 0 : i32
    return %c0_i32, %c0_i32_0 : i32, i32
  }
  func.func @transform_5(%arg0: i32, %arg1: i32) -> (i32, i32) {
    %c0_i32 = arith.constant 0 : i32
    %c0_i32_0 = arith.constant 0 : i32
    return %arg0, %c0_i32 : i32, i32
  }
}

</mosaic_0001>

<bundles_post_ra>
// kernel: cnn_pool_forward.4
= control target key start
LH: loop header
LB: loop body
LE: loop exit
PB: predicated region body
PF: predicated region fallthrough
CT: control target
= control target key end

     0   :  { %v4949_v0 = vmov 0   ;;  %s6986_s1 = inlined_call_operand.vmem [shape: bf16[4,256,128], index: 1, kind: input, shape index: {}]   ;;  %s6987_s0 = inlined_call_operand.vmem [shape: bf16[800,256], index: 0, kind: input, shape index: {}]   ;;  %s6988_s2 = inlined_call_operand.vmem [shape: f32[1,128], index: 2, kind: input, shape index: {}]   ;;  %s6989_s3 = inlined_call_operand.vmem [shape: bf16[800,128], index: 3, kind: output, shape index: {}]  }
   0x1   :  { %743 = vmatprep.subr.bf16.mxu0 %v4949_v0  ;;  %1305 = vmatprep.subr.bf16.mxu1 %v4949_v0  ;;  %v4634_v1 = vld [vmem:[%s6986_s1 + $0x38] sm:$0xff]   ;;  %v4636_v3 = vld [vmem:[%s6986_s1 + $0x30] sm:$0xff]   ;;  %v4638_v5 = vld [vmem:[%s6986_s1 + $0x28] sm:$0xff]  }
   0x2   :  { %v4635_v2 = vld [vmem:[%s6986_s1 + $0xb8] sm:$0xff]   ;;  %744 = vmatpush1.bf16.msra.mxu0 %v4634_v1  ;;  %v4637_v4 = vld [vmem:[%s6986_s1 + $0xb0] sm:$0xff]   ;;  %v4639_v6 = vld [vmem:[%s6986_s1 + $0xa8] sm:$0xff]  }
   0x3   :  { %1306 = vmatpush1.bf16.msra.mxu1 %v4635_v2  ;;  %745 = vmatprep.subr.bf16.mxu0 %v4949_v0  ;;  %v4640_v7 = vld [vmem:[%s6986_s1 + $0x20] sm:$0xff]   ;;  %v4642_v9 = vld [vmem:[%s6986_s1 + $0x18] sm:$0xff]   ;;  %v4644_v11 = vld [vmem:[%s6986_s1 + $0x10] sm:$0xff]  }
   0x4   :  { %1307 = vmatprep.subr.bf16.mxu1 %v4949_v0  ;;  %v4641_v8 = vld [vmem:[%s6986_s1 + $0xa0] sm:$0xff]   ;;  %v4643_v10 = vld [vmem:[%s6986_s1 + $0x98] sm:$0xff]   ;;  %v4645_v12 = vld [vmem:[%s6986_s1 + $0x90] sm:$0xff]  }
   0x5   :  { %v4646_v13 = vld [vmem:[%s6986_s1 + $0x8] sm:$0xff]   ;;  %v4648_v15 = vld [vmem:[%s6986_s1] sm:$0xff]   ;;  %v4650_v17 = vld [vmem:[%s6986_s1 + $0x78] sm:$0xff]  }
   0x6   :  { %746 = vmatpush1.bf16.msra.mxu0 %v4636_v3  ;;  %v4647_v14 = vld [vmem:[%s6986_s1 + $0x88] sm:$0xff]   ;;  %v4649_v16 = vld [vmem:[%s6986_s1 + $0x80] sm:$0xff]   ;;  %v4651_v18 = vld [vmem:[%s6986_s1 + $0xf8] sm:$0xff]  }
   0x7   :  { %1308 = vmatpush1.bf16.msra.mxu1 %v4637_v4  ;;  %747 = vmatprep.subr.bf16.mxu0 %v4949_v0  ;;  %v4666_v19 = vld [vmem:[%s6987_s0 + $0x4] ss:$8 sps:$4 sm:$0xff]   ;;  %v4652_v20 = vld [vmem:[%s6986_s1 + $0x70] sm:$0xff]   ;;  %v4658_v26 = vld [vmem:[%s6986_s1 + $0x58] sm:$0xff]  }
   0x8   :  { %1309 = vmatprep.subr.bf16.mxu1 %v4949_v0  ;;  %775 = vmatprep.mubr.bf16.mxu0 %v4666_v19  ;;  %v4653_v21 = vld [vmem:[%s6986_s1 + $0xf0] sm:$0xff]   ;;  %v4654_v22 = vld [vmem:[%s6986_s1 + $0x68] sm:$0xff]   ;;  %v4656_v24 = vld [vmem:[%s6986_s1 + $0x60] sm:$0xff]  }
   0x9   :  { %1337 = vmatprep.mubr.bf16.mxu1 %v4666_v19  ;;  %v4655_v23 = vld [vmem:[%s6986_s1 + $0xe8] sm:$0xff]   ;;  %v4657_v25 = vld [vmem:[%s6986_s1 + $0xe0] sm:$0xff]   ;;  %v4659_v27 = vld [vmem:[%s6986_s1 + $0xd8] sm:$0xff]  }
   0xa   :  { %748 = vmatpush1.bf16.msra.mxu0 %v4638_v5  ;;  %v4660_v28 = vld [vmem:[%s6986_s1 + $0x50] sm:$0xff]   ;;  %v4662_v30 = vld [vmem:[%s6986_s1 + $0x48] sm:$0xff]   ;;  %v4664_v32 = vld [vmem:[%s6986_s1 + $0x40] sm:$0xff]  }
   0xb   :  { %1310 = vmatpush1.bf16.msra.mxu1 %v4639_v6  ;;  %749 = vmatprep.subr.bf16.mxu0 %v4949_v0  ;;  %v4661_v29 = vld [vmem:[%s6986_s1 + $0xd0] sm:$0xff]   ;;  %v4663_v31 = vld [vmem:[%s6986_s1 + $0xc8] sm:$0xff]   ;;  %v4665_v33 = vld [vmem:[%s6986_s1 + $0xc0] sm:$0xff]  }
   0xc   :  { %1311 = vmatprep.subr.bf16.mxu1 %v4949_v0  ;;  %v4668_v34 = vld [vmem:[%s6987_s0] ss:$8 sps:$4 sm:$0xff]   ;;  %v4669_v35 = vld [vmem:[%s6986_s1 + $0x138] sm:$0xff]   ;;  %v4680_v38 = vld [vmem:[%s6986_s1 + $0x130] sm:$0xff]  }
   0xd   :  { %v4670_v36 = vld [vmem:[%s6986_s1 + $0x1b8] sm:$0xff]   ;;  %v4681_v40 = vld [vmem:[%s6986_s1 + $0x1b0] sm:$0xff]   ;;  %v4674_v41 = vld [vmem:[%s6987_s0 + $0x24] ss:$8 sps:$4 sm:$0xff]  }
   0xe   :  { %750 = vmatpush1.bf16.msra.mxu0 %v4640_v7  ;;  %v4671_v37 = vld [vmem:[%s6987_s0 + $0x14] ss:$8 sps:$4 sm:$0xff]   ;;  %v4673_v39 = vld [vmem:[%s6987_s0 + $0x10] ss:$8 sps:$4 sm:$0xff]   ;;  %v4691_v42 = vld [vmem:[%s6986_s1 + $0x128] sm:$0xff]  }
   0xf   :  { %1312 = vmatpush1.bf16.msra.mxu1 %v4641_v8  ;;  %751 = vmatprep.subr.bf16.mxu0 %v4949_v0  ;;  %v4692_v43 = vld [vmem:[%s6986_s1 + $0x1a8] sm:$0xff]   ;;  %v4702_v44 = vld [vmem:[%s6986_s1 + $0x120] sm:$0xff]   ;;  %v4677_v47 = vld [vmem:[%s6987_s0 + $0x34] ss:$8 sps:$4 sm:$0xff]  }
  0x10   :  { %1313 = vmatprep.subr.bf16.mxu1 %v4949_v0  ;;  %v4676_v45 = vld [vmem:[%s6987_s0 + $0x20] ss:$8 sps:$4 sm:$0xff]   ;;  %v4713_v48 = vld [vmem:[%s6986_s1 + $0x118] sm:$0xff]   ;;  %v4724_v51 = vld [vmem:[%s6986_s1 + $0x110] sm:$0xff]  }
  0x11   :  { %v4703_v46 = vld [vmem:[%s6986_s1 + $0x1a0] sm:$0xff]   ;;  %v4716_v49 = vld [vmem:[%s6986_s1 + $0x198] sm:$0xff]   ;;  %v4728_v52 = vld [vmem:[%s6986_s1 + $0x190] sm:$0xff]  }
  0x12   :  { %752 = vmatpush1.bf16.msra.mxu0 %v4642_v9  ;;  %v4679_v50 = vld [vmem:[%s6987_s0 + $0x30] ss:$8 sps:$4 sm:$0xff]   ;;  %v4682_v53 = vld [vmem:[%s6987_s0 + $0x44] ss:$8 sps:$4 sm:$0xff]   ;;  %v4684_v56 = vld [vmem:[%s6987_s0 + $0x40] ss:$8 sps:$4 sm:$0xff]  }
  0x13   :  { %1314 = vmatpush1.bf16.msra.mxu1 %v4643_v10  ;;  %753 = vmatprep.subr.bf16.mxu0 %v4949_v0  ;;  %v4737_v54 = vld [vmem:[%s6986_s1 + $0x108] sm:$0xff]   ;;  %v4685_v57 = vld [vmem:[%s6987_s0 + $0x54] ss:$8 sps:$4 sm:$0xff]   ;;  %v4687_v58 = vld [vmem:[%s6987_s0 + $0x50] ss:$8 sps:$4 sm:$0xff]  }
  0x14   :  { %1315 = vmatprep.subr.bf16.mxu1 %v4949_v0  ;;  %v4739_v55 = vld [vmem:[%s6986_s1 + $0x188] sm:$0xff]   ;;  %v4693_v61 = vld [vmem:[%s6987_s0 + $0x74] ss:$8 sps:$4 sm:$0xff]   ;;  %v4749_v62 = vld [vmem:[%s6986_s1 + $0x100] sm:$0xff]  }
  0x15   :  { %v4688_v59 = vld [vmem:[%s6987_s0 + $0x64] ss:$8 sps:$4 sm:$0xff]   ;;  %v4690_v60 = vld [vmem:[%s6987_s0 + $0x60] ss:$8 sps:$4 sm:$0xff]   ;;  %v4695_v1 = vld [vmem:[%s6987_s0 + $0x70] ss:$8 sps:$4 sm:$0xff]  }
  0x16   :  { %754 = vmatpush1.bf16.msra.mxu0 %v4644_v11  ;;  %v4750_v63 = vld [vmem:[%s6986_s1 + $0x180] sm:$0xff]   ;;  %v4699_v4 = vld [vmem:[%s6987_s0 + $0x94] ss:$8 sps:$4 sm:$0xff]   ;;  %v4701_v5 = vld [vmem:[%s6987_s0 + $0x90] ss:$8 sps:$4 sm:$0xff]  }
  0x17   :  { %1316 = vmatpush1.bf16.msra.mxu1 %v4645_v12  ;;  %755 = vmatprep.subr.bf16.mxu0 %v4949_v0  ;;  %v4696_v2 = vld [vmem:[%s6987_s0 + $0x84] ss:$8 sps:$4 sm:$0xff]   ;;  %v4698_v3 = vld [vmem:[%s6987_s0 + $0x80] ss:$8 sps:$4 sm:$0xff]   ;;  %v4760_v7 = vld [vmem:[%s6986_s1 + $0x178] sm:$0xff]  }
  0x18   :  { %1317 = vmatprep.subr.bf16.mxu1 %v4949_v0  ;;  %v4704_v6 = vld [vmem:[%s6987_s0 + $0xa4] ss:$8 sps:$4 sm:$0xff]   ;;  %v4761_v8 = vld [vmem:[%s6986_s1 + $0x1f8] sm:$0xff]   ;;  %v4706_v9 = vld [vmem:[%s6987_s0 + $0xa0] ss:$8 sps:$4 sm:$0xff]  }
  0x19   :  { %v4707_v10 = vld [vmem:[%s6987_s0 + $0xb4] ss:$8 sps:$4 sm:$0xff]   ;;  %v4709_v11 = vld [vmem:[%s6987_s0 + $0xb0] ss:$8 sps:$4 sm:$0xff]   ;;  %v4710_v12 = vld [vmem:[%s6987_s0 + $0xc4] ss:$8 sps:$4 sm:$0xff]  }
  0x1a   :  { %756 = vmatpush1.bf16.msra.mxu0 %v4646_v13  ;;  %v4712_v13 = vld [vmem:[%s6987_s0 + $0xc0] ss:$8 sps:$4 sm:$0xff]  }
  0x1b   :  { %1318 = vmatpush1.bf16.msra.mxu1 %v4647_v14  ;;  %757 = vmatprep.subr.bf16.mxu0 %v4949_v0  ;;  %v4714_v14 = vld [vmem:[%s6987_s0 + $0xd4] ss:$8 sps:$4 sm:$0xff]   ;;  %v4720_v19 = vld [vmem:[%s6987_s0 + $0xe0] ss:$8 sps:$4 sm:$0xff]  }
  0x1c   :  { %1319 = vmatprep.subr.bf16.mxu1 %v4949_v0 }
  0x1e   :  { %758 = vmatpush1.bf16.msra.mxu0 %v4648_v15  ;;  %v4771_v15 = vld [vmem:[%s6986_s1 + $0x170] sm:$0xff]  }
  0x1f   :  { %1320 = vmatpush1.bf16.msra.mxu1 %v4649_v16  ;;  %759 = vmatprep.subr.bf16.mxu0 %v4949_v0  ;;  %v4717_v16 = vld [vmem:[%s6987_s0 + $0xd0] ss:$8 sps:$4 sm:$0xff]  }
  0x20   :  { %1321 = vmatprep.subr.bf16.mxu1 %v4949_v0 }
  0x22   :  { %760 = vmatpush2.bf16.msra.mxu0 %v4650_v17  ;;  %v4718_v17 = vld [vmem:[%s6987_s0 + $0xe4] ss:$8 sps:$4 sm:$0xff]  }
  0x23   :  { %1322 = vmatpush2.bf16.msra.mxu1 %v4651_v18  ;;  %761 = vmatprep.subr.bf16.mxu0 %v4949_v0  ;;  %v4772_v18 = vld [vmem:[%s6986_s1 + $0x1f0] sm:$0xff]  }
  0x24   :  { %1323 = vmatprep.subr.bf16.mxu1 %v4949_v0 }
  0x26   :  { %762 = vmatpush2.bf16.msra.mxu0 %v4652_v20  ;;  %v4721_v20 = vld [vmem:[%s6987_s0 + $0xf4] ss:$8 sps:$4 sm:$0xff]  }
  0x27   :  { %1324 = vmatpush2.bf16.msra.mxu1 %v4653_v21  ;;  %763 = vmatprep.subr.bf16.mxu0 %v4949_v0  ;;  %v4723_v21 = vld [vmem:[%s6987_s0 + $0xf0] ss:$8 sps:$4 sm:$0xff]  }
  0x28   :  { %1325 = vmatprep.subr.bf16.mxu1 %v4949_v0 }
  0x2a   :  { %764 = vmatpush2.bf16.msra.mxu0 %v4654_v22  ;;  %v4725_v22 = vld [vmem:[%s6987_s0 + $0x104] ss:$8 sps:$4 sm:$0xff]  }
  0x2b   :  { %1326 = vmatpush2.bf16.msra.mxu1 %v4655_v23  ;;  %765 = vmatprep.subr.bf16.mxu0 %v4949_v0  ;;  %v4782_v23 = vld [vmem:[%s6986_s1 + $0x168] sm:$0xff]  }
  0x2c   :  { %1327 = vmatprep.subr.bf16.mxu1 %v4949_v0 }
  0x2e   :  { %766 = vmatpush2.bf16.msra.mxu0 %v4656_v24  ;;  %v4727_v24 = vld [vmem:[%s6987_s0 + $0x100] ss:$8 sps:$4 sm:$0xff]  }
  0x2f   :  { %1328 = vmatpush2.bf16.msra.mxu1 %v4657_v25  ;;  %767 = vmatprep.subr.bf16.mxu0 %v4949_v0  ;;  %v4729_v25 = vld [vmem:[%s6987_s0 + $0x114] ss:$8 sps:$4 sm:$0xff]  }
  0x30   :  { %1329 = vmatprep.subr.bf16.mxu1 %v4949_v0 }
  0x32   :  { %768 = vmatpush2.bf16.msra.mxu0 %v4658_v26  ;;  %v4783_v26 = vld [vmem:[%s6986_s1 + $0x1e8] sm:$0xff]  }
  0x33   :  { %1330 = vmatpush2.bf16.msra.mxu1 %v4659_v27  ;;  %769 = vmatprep.subr.bf16.mxu0 %v4949_v0  ;;  %v4731_v27 = vld [vmem:[%s6987_s0 + $0x110] ss:$8 sps:$4 sm:$0xff]  }
  0x34   :  { %1331 = vmatprep.subr.bf16.mxu1 %v4949_v0 }
  0x36   :  { %770 = vmatpush2.bf16.msra.mxu0 %v4660_v28  ;;  %v4732_v28 = vld [vmem:[%s6987_s0 + $0x124] ss:$8 sps:$4 sm:$0xff]  }
  0x37   :  { %1332 = vmatpush2.bf16.msra.mxu1 %v4661_v29  ;;  %771 = vmatprep.subr.bf16.mxu0 %v4949_v0  ;;  %v4734_v29 = vld [vmem:[%s6987_s0 + $0x120] ss:$8 sps:$4 sm:$0xff]  }
  0x38   :  { %1333 = vmatprep.subr.bf16.mxu1 %v4949_v0 }
  0x3a   :  { %772 = vmatpush2.bf16.msra.mxu0 %v4662_v30  ;;  %v4735_v30 = vld [vmem:[%s6987_s0 + $0x134] ss:$8 sps:$4 sm:$0xff]  }
  0x3b   :  { %1334 = vmatpush2.bf16.msra.mxu1 %v4663_v31  ;;  %773 = vmatprep.subr.bf16.mxu0 %v4949_v0  ;;  %v4738_v31 = vld [vmem:[%s6987_s0 + $0x130] ss:$8 sps:$4 sm:$0xff]  }
  0x3c   :  { %1335 = vmatprep.subr.bf16.mxu1 %v4949_v0 }
  0x3e   :  { %774 = vmatpush2.bf16.msra.mxu0 %v4664_v32  ;;  %v4740_v32 = vld [vmem:[%s6987_s0 + $0x144] ss:$8 sps:$4 sm:$0xff]  }
  0x3f   :  { %1336 = vmatpush2.bf16.msra.mxu1 %v4665_v33  ;;  %1967 = vmatprep.subr.bf16.mxu0 %v4949_v0  ;;  %v4793_v33 = vld [vmem:[%s6986_s1 + $0x160] sm:$0xff]  }
  0x40   :  { %2629 = vmatprep.subr.bf16.mxu1 %v4949_v0 }
  0x41   :  { %776 = vmatmul.mubr.bf16.vlgmr.msra.gmra.mxu0 %v4668_v34 }
  0x42   :  { %1338 = vmatmul.mubr.bf16.vlgmr.msra.gmra.mxu1 %v4668_v34  ;;  %1968 = vmatpush1.bf16.msra.mxu0 %v4669_v35  ;;  %v4794_v34 = vld [vmem:[%s6986_s1 + $0x1e0] sm:$0xff]  }
  0x43   :  { %2630 = vmatpush1.bf16.msra.mxu1 %v4670_v36  ;;  %783 = vmatprep.mubr.bf16.mxu0 %v4671_v37  ;;  %v4742_v35 = vld [vmem:[%s6987_s0 + $0x140] ss:$8 sps:$4 sm:$0xff]   ;;  %v4743_v36 = vld [vmem:[%s6987_s0 + $0x154] ss:$8 sps:$4 sm:$0xff]  }
  0x44   :  { %1345 = vmatprep.mubr.bf16.mxu1 %v4671_v37  ;;  %1969 = vmatprep.subr.bf16.mxu0 %v4949_v0  ;;  %v4745_v37 = vld [vmem:[%s6987_s0 + $0x150] ss:$8 sps:$4 sm:$0xff]  }
  0x45   :  { %2631 = vmatprep.subr.bf16.mxu1 %v4949_v0 }
  0x46   :  { %1970 = vmatpush1.bf16.msra.mxu0 %v4680_v38  ;;  %v4746_v38 = vld [vmem:[%s6987_s0 + $0x164] ss:$8 sps:$4 sm:$0xff]  }
  0x47   :  { %2632 = vmatpush1.bf16.msra.mxu1 %v4681_v40  ;;  %1971 = vmatprep.subr.bf16.mxu0 %v4949_v0  ;;  %v4751_v40 = vld [vmem:[%s6987_s0 + $0x174] ss:$8 sps:$4 sm:$0xff]  }
  0x48   :  { %2633 = vmatprep.subr.bf16.mxu1 %v4949_v0 }
  0x49   :  { %784 = vmatmul.mubr.bf16.gmra.mxu0 %v4673_v39 }
  0x4a   :  { %1346 = vmatmul.mubr.bf16.gmra.mxu1 %v4673_v39  ;;  %791 = vmatprep.mubr.bf16.mxu0 %v4674_v41  ;;  %v4748_v39 = vld [vmem:[%s6987_s0 + $0x160] ss:$8 sps:$4 sm:$0xff]  }
  0x4b   :  { %1353 = vmatprep.mubr.bf16.mxu1 %v4674_v41  ;;  %1972 = vmatpush1.bf16.msra.mxu0 %v4691_v42  ;;  %v4804_v41 = vld [vmem:[%s6986_s1 + $0x158] sm:$0xff]  }
  0x4c   :  { %2634 = vmatpush1.bf16.msra.mxu1 %v4692_v43  ;;  %1973 = vmatprep.subr.bf16.mxu0 %v4949_v0  ;;  %v4807_v42 = vld [vmem:[%s6986_s1 + $0x1d8] sm:$0xff]  }
  0x4d   :  { %2635 = vmatprep.subr.bf16.mxu1 %v4949_v0  ;;  %v4753_v43 = vld [vmem:[%s6987_s0 + $0x170] ss:$8 sps:$4 sm:$0xff]  }
  0x4f   :  { %1974 = vmatpush1.bf16.msra.mxu0 %v4702_v44  ;;  %v4754_v44 = vld [vmem:[%s6987_s0 + $0x184] ss:$8 sps:$4 sm:$0xff]  }
  0x50   :  { %2636 = vmatpush1.bf16.msra.mxu1 %v4703_v46  ;;  %1975 = vmatprep.subr.bf16.mxu0 %v4949_v0  ;;  %v4757_v46 = vld [vmem:[%s6987_s0 + $0x194] ss:$8 sps:$4 sm:$0xff]  }
  0x51   :  { %792 = vmatmul.mubr.bf16.gmra.mxu0 %v4676_v45  ;;  %2637 = vmatprep.subr.bf16.mxu1 %v4949_v0 }
  0x52   :  { %1354 = vmatmul.mubr.bf16.gmra.mxu1 %v4676_v45  ;;  %799 = vmatprep.mubr.bf16.mxu0 %v4677_v47  ;;  %v4756_v45 = vld [vmem:[%s6987_s0 + $0x180] ss:$8 sps:$4 sm:$0xff]  }
  0x53   :  { %1361 = vmatprep.mubr.bf16.mxu1 %v4677_v47  ;;  %1976 = vmatpush1.bf16.msra.mxu0 %v4713_v48 }
  0x54   :  { %2638 = vmatpush1.bf16.msra.mxu1 %v4716_v49  ;;  %1977 = vmatprep.subr.bf16.mxu0 %v4949_v0 }
  0x55   :  { %2639 = vmatprep.subr.bf16.mxu1 %v4949_v0 }
  0x57   :  { %1978 = vmatpush1.bf16.msra.mxu0 %v4724_v51 }
  0x58   :  { %2640 = vmatpush1.bf16.msra.mxu1 %v4728_v52  ;;  %1979 = vmatprep.subr.bf16.mxu0 %v4949_v0 }
  0x59   :  { %800 = vmatmul.mubr.bf16.gmra.mxu0 %v4679_v50  ;;  %2641 = vmatprep.subr.bf16.mxu1 %v4949_v0 }
  0x5a   :  { %1362 = vmatmul.mubr.bf16.gmra.mxu1 %v4679_v50  ;;  %807 = vmatprep.mubr.bf16.mxu0 %v4682_v53 }
  0x5b   :  { %1369 = vmatprep.mubr.bf16.mxu1 %v4682_v53  ;;  %1980 = vmatpush1.bf16.msra.mxu0 %v4737_v54  ;;  %v4759_v53 = vld [vmem:[%s6987_s0 + $0x190] ss:$8 sps:$4 sm:$0xff]  }
  0x5c   :  { %2642 = vmatpush1.bf16.msra.mxu1 %v4739_v55  ;;  %1981 = vmatprep.subr.bf16.mxu0 %v4949_v0  ;;  %v4762_v55 = vld [vmem:[%s6987_s0 + $0x1a4] ss:$8 sps:$4 sm:$0xff]  }
  0x5d   :  { %2643 = vmatprep.subr.bf16.mxu1 %v4949_v0 }
  0x5f   :  { %1982 = vmatpush1.bf16.msra.mxu0 %v4749_v62 }
  0x60   :  { %2644 = vmatpush1.bf16.msra.mxu1 %v4750_v63  ;;  %1983 = vmatprep.subr.bf16.mxu0 %v4949_v0 }
  0x61   :  { %808 = vmatmul.mubr.bf16.gmra.mxu0 %v4684_v56  ;;  %2645 = vmatprep.subr.bf16.mxu1 %v4949_v0 }
  0x62   :  { %1370 = vmatmul.mubr.bf16.gmra.mxu1 %v4684_v56  ;;  %815 = vmatprep.mubr.bf16.mxu0 %v4685_v57 }
  0x63   :  { %1377 = vmatprep.mubr.bf16.mxu1 %v4685_v57  ;;  %1984 = vmatpush2.bf16.msra.mxu0 %v4760_v7 }
  0x64   :  { %2646 = vmatpush2.bf16.msra.mxu1 %v4761_v8  ;;  %1985 = vmatprep.subr.bf16.mxu0 %v4949_v0 }
  0x65   :  { %2647 = vmatprep.subr.bf16.mxu1 %v4949_v0 }
  0x67   :  { %1986 = vmatpush2.bf16.msra.mxu0 %v4771_v15 }
  0x68   :  { %1987 = vmatprep.subr.bf16.mxu0 %v4949_v0  ;;  %2648 = vmatpush2.bf16.msra.mxu1 %v4772_v18  ;;  %v4768_v18 = vld [vmem:[%s6987_s0 + $0x1c4] ss:$8 sps:$4 sm:$0xff]  }
  0x69   :  { %816 = vmatmul.mubr.bf16.gmra.mxu0 %v4687_v58  ;;  %2649 = vmatprep.subr.bf16.mxu1 %v4949_v0 }
  0x6a   :  { %1378 = vmatmul.mubr.bf16.gmra.mxu1 %v4687_v58  ;;  %823 = vmatprep.mubr.bf16.mxu0 %v4688_v59 }
  0x6b   :  { %1385 = vmatprep.mubr.bf16.mxu1 %v4688_v59  ;;  %1988 = vmatpush2.bf16.msra.mxu0 %v4782_v23  ;;  %v4815_v59 = vld [vmem:[%s6986_s1 + $0x150] sm:$0xff]  }
  0x6c   :  { %1989 = vmatprep.subr.bf16.mxu0 %v4949_v0  ;;  %2650 = vmatpush2.bf16.msra.mxu1 %v4783_v26 }
  0x6d   :  { %2651 = vmatprep.subr.bf16.mxu1 %v4949_v0 }
  0x6f   :  { %1990 = vmatpush2.bf16.msra.mxu0 %v4793_v33 }
  0x70   :  { %2652 = vmatpush2.bf16.msra.mxu1 %v4794_v34  ;;  %1991 = vmatprep.subr.bf16.mxu0 %v4949_v0  ;;  %v4828_v34 = vld [vmem:[%s6986_s1 + $0x148] sm:$0xff]  }
  0x71   :  { %824 = vmatmul.mubr.bf16.gmra.mxu0 %v4690_v60  ;;  %2653 = vmatprep.subr.bf16.mxu1 %v4949_v0 }
  0x72   :  { %1386 = vmatmul.mubr.bf16.gmra.mxu1 %v4690_v60  ;;  %831 = vmatprep.mubr.bf16.mxu0 %v4693_v61 }
  0x73   :  { %1393 = vmatprep.mubr.bf16.mxu1 %v4693_v61  ;;  %1992 = vmatpush2.bf16.msra.mxu0 %v4804_v41 }
  0x74   :  { %2654 = vmatpush2.bf16.msra.mxu1 %v4807_v42  ;;  %1993 = vmatprep.subr.bf16.mxu0 %v4949_v0  ;;  %v4775_v42 = vld [vmem:[%s6987_s0 + $0x1d0] ss:$8 sps:$4 sm:$0xff]  }
  0x75   :  { %2655 = vmatprep.subr.bf16.mxu1 %v4949_v0 }
  0x77   :  { %1994 = vmatpush2.bf16.msra.mxu0 %v4815_v59 }
  0x78   :  { %1995 = vmatprep.subr.bf16.mxu0 %v4949_v0 }
  0x79   :  { %832 = vmatmul.mubr.bf16.gmra.mxu0 %v4695_v1 }
  0x7a   :  { %1394 = vmatmul.mubr.bf16.gmra.mxu1 %v4695_v1  ;;  %839 = vmatprep.mubr.bf16.mxu0 %v4696_v2  ;;  %v4819_v1 = vld [vmem:[%s6986_s1 + $0x1d0] sm:$0xff]  }
  0x7b   :  { %1401 = vmatprep.mubr.bf16.mxu1 %v4696_v2  ;;  %2656 = vmatpush2.bf16.msra.mxu1 %v4819_v1  ;;  %v4779_v1 = vld [vmem:[%s6987_s0 + $0x1f4] ss:$8 sps:$4 sm:$0xff]  }
  0x7c   :  { %2657 = vmatprep.subr.bf16.mxu1 %v4949_v0  ;;  %1996 = vmatpush2.bf16.msra.mxu0 %v4828_v34 }
  0x7d   :  { %1997 = vmatprep.subr.bf16.mxu0 %v4949_v0 }
  0x81   :  { %840 = vmatmul.mubr.bf16.gmra.mxu0 %v4698_v3 }
  0x82   :  { %1402 = vmatmul.mubr.bf16.gmra.mxu1 %v4698_v3  ;;  %847 = vmatprep.mubr.bf16.mxu0 %v4699_v4 }
  0x83   :  { %1409 = vmatprep.mubr.bf16.mxu1 %v4699_v4  ;;  %v4764_v4 = vld [vmem:[%s6987_s0 + $0x1a0] ss:$8 sps:$4 sm:$0xff]  }
  0x89   :  { %848 = vmatmul.mubr.bf16.gmra.mxu0 %v4701_v5 }
  0x8a   :  { %1410 = vmatmul.mubr.bf16.gmra.mxu1 %v4701_v5  ;;  %855 = vmatprep.mubr.bf16.mxu0 %v4704_v6 }
  0x8b   :  { %1417 = vmatprep.mubr.bf16.mxu1 %v4704_v6  ;;  %v4765_v6 = vld [vmem:[%s6987_s0 + $0x1b4] ss:$8 sps:$4 sm:$0xff]  }
  0x91   :  { %856 = vmatmul.mubr.bf16.gmra.mxu0 %v4706_v9 }
  0x92   :  { %1418 = vmatmul.mubr.bf16.gmra.mxu1 %v4706_v9  ;;  %863 = vmatprep.mubr.bf16.mxu0 %v4707_v10 }
  0x93   :  { %1425 = vmatprep.mubr.bf16.mxu1 %v4707_v10 }
  0x99   :  { %864 = vmatmul.mubr.bf16.gmra.mxu0 %v4709_v11 }
  0x9a   :  { %1426 = vmatmul.mubr.bf16.gmra.mxu1 %v4709_v11  ;;  %871 = vmatprep.mubr.bf16.mxu0 %v4710_v12 }
  0x9b   :  { %1433 = vmatprep.mubr.bf16.mxu1 %v4710_v12 }
  0xa1   :  { %872 = vmatmul.mubr.bf16.gmra.mxu0 %v4712_v13 }
  0xa2   :  { %1434 = vmatmul.mubr.bf16.gmra.mxu1 %v4712_v13  ;;  %879 = vmatprep.mubr.bf16.mxu0 %v4714_v14 }
  0xa3   :  { %1441 = vmatprep.mubr.bf16.mxu1 %v4714_v14 }
  0xa9   :  { %880 = vmatmul.mubr.bf16.gmra.mxu0 %v4717_v16 }
  0xaa   :  { %1442 = vmatmul.mubr.bf16.gmra.mxu1 %v4717_v16  ;;  %887 = vmatprep.mubr.bf16.mxu0 %v4718_v17  ;;  %v4767_v16 = vld [vmem:[%s6987_s0 + $0x1b0] ss:$8 sps:$4 sm:$0xff]  }
  0xab   :  { %1449 = vmatprep.mubr.bf16.mxu1 %v4718_v17 }
  0xb1   :  { %888 = vmatmul.mubr.bf16.gmra.mxu0 %v4720_v19 }
  0xb2   :  { %1450 = vmatmul.mubr.bf16.gmra.mxu1 %v4720_v19  ;;  %895 = vmatprep.mubr.bf16.mxu0 %v4721_v20 }
  0xb3   :  { %1457 = vmatprep.mubr.bf16.mxu1 %v4721_v20 }
  0xb9   :  { %896 = vmatmul.mubr.bf16.gmra.mxu0 %v4723_v21 }
  0xba   :  { %1458 = vmatmul.mubr.bf16.gmra.mxu1 %v4723_v21  ;;  %903 = vmatprep.mubr.bf16.mxu0 %v4725_v22 }
  0xbb   :  { %1465 = vmatprep.mubr.bf16.mxu1 %v4725_v22 }
  0xc1   :  { %904 = vmatmul.mubr.bf16.gmra.mxu0 %v4727_v24 }
  0xc2   :  { %1466 = vmatmul.mubr.bf16.gmra.mxu1 %v4727_v24  ;;  %911 = vmatprep.mubr.bf16.mxu0 %v4729_v25 }
  0xc3   :  { %1473 = vmatprep.mubr.bf16.mxu1 %v4729_v25 }
  0xc9   :  { %912 = vmatmul.mubr.bf16.gmra.mxu0 %v4731_v27 }
  0xca   :  { %1474 = vmatmul.mubr.bf16.gmra.mxu1 %v4731_v27  ;;  %919 = vmatprep.mubr.bf16.mxu0 %v4732_v28 }
  0xcb   :  { %1481 = vmatprep.mubr.bf16.mxu1 %v4732_v28  ;;  %v4770_v28 = vld [vmem:[%s6987_s0 + $0x1c0] ss:$8 sps:$4 sm:$0xff]  }
  0xd1   :  { %920 = vmatmul.mubr.bf16.gmra.mxu0 %v4734_v29 }
  0xd2   :  { %1482 = vmatmul.mubr.bf16.gmra.mxu1 %v4734_v29  ;;  %927 = vmatprep.mubr.bf16.mxu0 %v4735_v30 }
  0xd3   :  { %1489 = vmatprep.mubr.bf16.mxu1 %v4735_v30  ;;  %v4773_v30 = vld [vmem:[%s6987_s0 + $0x1d4] ss:$8 sps:$4 sm:$0xff]  }
  0xd9   :  { %928 = vmatmul.mubr.bf16.gmra.mxu0 %v4738_v31 }
  0xda   :  { %1490 = vmatmul.mubr.bf16.gmra.mxu1 %v4738_v31  ;;  %935 = vmatprep.mubr.bf16.mxu0 %v4740_v32 }
  0xdb   :  { %1497 = vmatprep.mubr.bf16.mxu1 %v4740_v32 }
  0xe1   :  { %936 = vmatmul.mubr.bf16.gmra.mxu0 %v4742_v35 }
  0xe2   :  { %1498 = vmatmul.mubr.bf16.gmra.mxu1 %v4742_v35  ;;  %943 = vmatprep.mubr.bf16.mxu0 %v4743_v36 }
  0xe3   :  { %1505 = vmatprep.mubr.bf16.mxu1 %v4743_v36 }
  0xe9   :  { %944 = vmatmul.mubr.bf16.gmra.mxu0 %v4745_v37 }
  0xea   :  { %1506 = vmatmul.mubr.bf16.gmra.mxu1 %v4745_v37  ;;  %951 = vmatprep.mubr.bf16.mxu0 %v4746_v38 }
  0xeb   :  { %1513 = vmatprep.mubr.bf16.mxu1 %v4746_v38 }
  0xf1   :  { %952 = vmatmul.mubr.bf16.gmra.mxu0 %v4748_v39 }
  0xf2   :  { %1514 = vmatmul.mubr.bf16.gmra.mxu1 %v4748_v39  ;;  %959 = vmatprep.mubr.bf16.mxu0 %v4751_v40  ;;  %v4830_v39 = vld [vmem:[%s6986_s1 + $0x1c8] sm:$0xff]  }
  0xf3   :  { %1521 = vmatprep.mubr.bf16.mxu1 %v4751_v40  ;;  %2658 = vmatpush2.bf16.msra.mxu1 %v4830_v39  ;;  %v4840_v39 = vld [vmem:[%s6986_s1 + $0x140] sm:$0xff]  }
  0xf4   :  { %2659 = vmatprep.subr.bf16.mxu1 %v4949_v0  ;;  %v4778_v0 = vld [vmem:[%s6987_s0 + $0x1e0] ss:$8 sps:$4 sm:$0xff]   ;;  %1998 = vmatpush2.bf16.msra.mxu0 %v4840_v39  ;;  %v4795_v39 = vld [vmem:[%s6987_s0 + $0x234] ss:$8 sps:$4 sm:$0xff]  }
  0xf9   :  { %960 = vmatmul.mubr.bf16.gmra.mxu0 %v4753_v43 }
  0xfa   :  { %1522 = vmatmul.mubr.bf16.gmra.mxu1 %v4753_v43  ;;  %967 = vmatprep.mubr.bf16.mxu0 %v4754_v44 }
  0xfb   :  { %1529 = vmatprep.mubr.bf16.mxu1 %v4754_v44  ;;  %v4776_v44 = vld [vmem:[%s6987_s0 + $0x1e4] ss:$8 sps:$4 sm:$0xff]  }
 0x101   :  { %v5357_v47 = vpop.f32.mrf.mxu0  ;;  %968 = vmatmul.mubr.bf16.gmra.mxu0 %v4756_v45 }
 0x102   :  { %v5359_v48 = vpop.f32.mrf.mxu1  ;;  %1530 = vmatmul.mubr.bf16.gmra.mxu1 %v4756_v45  ;;  %975 = vmatprep.mubr.bf16.mxu0 %v4757_v46 }
 0x103   :  { %v779_v50 = vpop.f32.mrf.mxu0  ;;  %1537 = vmatprep.mubr.bf16.mxu1 %v4757_v46 }
 0x104   :  { %v1341_v51 = vpop.f32.mrf.mxu1 }
 0x105   :  { %v5363_v52 = vpop.f32.mrf.mxu0 }
 0x106   :  { %v5368_v54 = vpop.f32.mrf.mxu1 }
 0x107   :  { %v782_v57 = vpop.f32.mrf.mxu0 }
 0x108   :  { %v1344_v58 = vpop.f32.mrf.mxu1 }
 0x109   :  { %v5378_v60 = vpop.f32.mrf.mxu0  ;;  %976 = vmatmul.mubr.bf16.gmra.mxu0 %v4759_v53 }
 0x10a   :  { %v5380_v61 = vpop.f32.mrf.mxu1  ;;  %1538 = vmatmul.mubr.bf16.gmra.mxu1 %v4759_v53  ;;  %983 = vmatprep.mubr.bf16.mxu0 %v4762_v55 }
 0x10b   :  { %v787_v63 = vpop.f32.mrf.mxu0  ;;  %1545 = vmatprep.mubr.bf16.mxu1 %v4762_v55 }
 0x10c   :  { %v1349_v2 = vpop.f32.mrf.mxu1 }
 0x10d   :  { %v5388_v3 = vpop.f32.mrf.mxu0 }
 0x10e   :  { %v5393_v5 = vpop.f32.mrf.mxu1 }
 0x10f   :  { %v790_v8 = vpop.f32.mrf.mxu0 }
 0x110   :  { %v1352_v9 = vpop.f32.mrf.mxu1 }
 0x111   :  { %v5401_v10 = vpop.f32.mrf.mxu0  ;;  %984 = vmatmul.mubr.bf16.gmra.mxu0 %v4764_v4 }
 0x112   :  { %v5403_v11 = vpop.f32.mrf.mxu1  ;;  %1546 = vmatmul.mubr.bf16.gmra.mxu1 %v4764_v4  ;;  %991 = vmatprep.mubr.bf16.mxu0 %v4765_v6 }
 0x113   :  { %v795_v13 = vpop.f32.mrf.mxu0  ;;  %1553 = vmatprep.mubr.bf16.mxu1 %v4765_v6 }
 0x114   :  { %v1357_v14 = vpop.f32.mrf.mxu1 }
 0x115   :  { %v5407_v15 = vpop.f32.mrf.mxu0 }
 0x116   :  { %v5412_v17 = vpop.f32.mrf.mxu1 }
 0x117   :  { %v798_v20 = vpop.f32.mrf.mxu0 }
 0x118   :  { %v1360_v21 = vpop.f32.mrf.mxu1  ;;  %v4781_v20 = vld [vmem:[%s6987_s0 + $0x1f0] ss:$8 sps:$4 sm:$0xff]  }
 0x119   :  { %v5419_v22 = vpop.f32.mrf.mxu0  ;;  %992 = vmatmul.mubr.bf16.gmra.mxu0 %v4767_v16 }
 0x11a   :  { %v5421_v23 = vpop.f32.mrf.mxu1  ;;  %1554 = vmatmul.mubr.bf16.gmra.mxu1 %v4767_v16  ;;  %999 = vmatprep.mubr.bf16.mxu0 %v4768_v18 }
 0x11b   :  { %v803_v25 = vpop.f32.mrf.mxu0  ;;  %1561 = vmatprep.mubr.bf16.mxu1 %v4768_v18 }
 0x11c   :  { %v1365_v26 = vpop.f32.mrf.mxu1  ;;  %v4784_v25 = vld [vmem:[%s6987_s0 + $0x204] ss:$8 sps:$4 sm:$0xff]  }
 0x11d   :  { %v5425_v27 = vpop.f32.mrf.mxu0 }
 0x11e   :  { %v5430_v29 = vpop.f32.mrf.mxu1 }
 0x11f   :  { %v806_v32 = vpop.f32.mrf.mxu0 }
 0x120   :  { %v1368_v33 = vpop.f32.mrf.mxu1 }
 0x121   :  { %v5440_v35 = vpop.f32.mrf.mxu0  ;;  %1000 = vmatmul.mubr.bf16.gmra.mxu0 %v4770_v28 }
 0x122   :  { %v5442_v36 = vpop.f32.mrf.mxu1  ;;  %1562 = vmatmul.mubr.bf16.gmra.mxu1 %v4770_v28  ;;  %1007 = vmatprep.mubr.bf16.mxu0 %v4773_v30 }
 0x123   :  { %v811_v38 = vpop.f32.mrf.mxu0  ;;  %1569 = vmatprep.mubr.bf16.mxu1 %v4773_v30 }
 0x124   :  { %v1373_v40 = vpop.f32.mrf.mxu1 }
 0x125   :  { %v5450_v41 = vpop.f32.mrf.mxu0 }
 0x126   :  { %v5455_v43 = vpop.f32.mrf.mxu1 }
 0x127   :  { %v814_v46 = vpop.f32.mrf.mxu0 }
 0x128   :  { %v1376_v50 = vpop.f32.mrf.mxu1  ;;  %v4786_v46 = vld [vmem:[%s6987_s0 + $0x200] ss:$8 sps:$4 sm:$0xff]  }
 0x129   :  { %v5463_v51 = vpop.f32.mrf.mxu0  ;;  %1008 = vmatmul.mubr.bf16.gmra.mxu0 %v4775_v42 }
 0x12a   :  { %v5465_v53 = vpop.f32.mrf.mxu1  ;;  %1570 = vmatmul.mubr.bf16.gmra.mxu1 %v4775_v42  ;;  %1015 = vmatprep.mubr.bf16.mxu0 %v4776_v44  ;;  %v4841_v42 = vld [vmem:[%s6986_s1 + $0x1c0] sm:$0xff]  }
 0x12b   :  { %v819_v57 = vpop.f32.mrf.mxu0  ;;  %1577 = vmatprep.mubr.bf16.mxu1 %v4776_v44  ;;  %2660 = vmatpush2.bf16.msra.mxu1 %v4841_v42 }
 0x12c   :  { %v1381_v58 = vpop.f32.mrf.mxu1  ;;  %v4787_v57 = vld [vmem:[%s6987_s0 + $0x214] ss:$8 sps:$4 sm:$0xff]  }
 0x12d   :  { %v5469_v59 = vpop.f32.mrf.mxu0 }
 0x12e   :  { %v5474_v63 = vpop.f32.mrf.mxu1 }
 0x12f   :  { %v822_v4 = vpop.f32.mrf.mxu0 }
 0x130   :  { %v1384_v6 = vpop.f32.mrf.mxu1 }
 0x131   :  { %v5481_v8 = vpop.f32.mrf.mxu0  ;;  %1016 = vmatmul.mubr.bf16.gmra.mxu0 %v4778_v0 }
 0x132   :  { %v5483_v9 = vpop.f32.mrf.mxu1  ;;  %1578 = vmatmul.mubr.bf16.gmra.mxu1 %v4778_v0  ;;  %1023 = vmatprep.mubr.bf16.mxu0 %v4779_v1 }
 0x133   :  { %v827_v14 = vpop.f32.mrf.mxu0  ;;  %1585 = vmatprep.mubr.bf16.mxu1 %v4779_v1 }
 0x134   :  { %v1389_v16 = vpop.f32.mrf.mxu1 }
 0x135   :  { %v5487_v18 = vpop.f32.mrf.mxu0 }
 0x136   :  { %v5492_v21 = vpop.f32.mrf.mxu1 }
 0x137   :  { %v830_v28 = vpop.f32.mrf.mxu0 }
 0x138   :  { %v1392_v30 = vpop.f32.mrf.mxu1  ;;  %v4789_v28 = vld [vmem:[%s6987_s0 + $0x210] ss:$8 sps:$4 sm:$0xff]  }
 0x139   :  { %v5499_v32 = vpop.f32.mrf.mxu0  ;;  %1024 = vmatmul.mubr.bf16.gmra.mxu0 %v4781_v20 }
 0x13a   :  { %v5501_v33 = vpop.f32.mrf.mxu1  ;;  %1586 = vmatmul.mubr.bf16.gmra.mxu1 %v4781_v20  ;;  %1031 = vmatprep.mubr.bf16.mxu0 %v4784_v25 }
 0x13b   :  { %v835_v38 = vpop.f32.mrf.mxu0  ;;  %1593 = vmatprep.mubr.bf16.mxu1 %v4784_v25 }
 0x13c   :  { %v1397_v40 = vpop.f32.mrf.mxu1  ;;  %v4790_v38 = vld [vmem:[%s6987_s0 + $0x224] ss:$8 sps:$4 sm:$0xff]  }
 0x13d   :  { %v5511_v44 = vpop.f32.mrf.mxu0 }
 0x13e   :  { %v5516_v50 = vpop.f32.mrf.mxu1 }
 0x13f   :  { %v838_v0 = vpop.f32.mrf.mxu0 }
 0x140   :  { %v1400_v1 = vpop.f32.mrf.mxu1 }
 0x141   :  { %v5523_v4 = vpop.f32.mrf.mxu0  ;;  %1032 = vmatmul.mubr.bf16.gmra.mxu0 %v4786_v46 }
 0x142   :  { %v5525_v6 = vpop.f32.mrf.mxu1  ;;  %1594 = vmatmul.mubr.bf16.gmra.mxu1 %v4786_v46  ;;  %1039 = vmatprep.mubr.bf16.mxu0 %v4787_v57 }
 0x143   :  { %v843_v16 = vpop.f32.mrf.mxu0  ;;  %1601 = vmatprep.mubr.bf16.mxu1 %v4787_v57 }
 0x144   :  { %v1405_v20 = vpop.f32.mrf.mxu1 }
 0x145   :  { %v5529_v25 = vpop.f32.mrf.mxu0 }
 0x146   :  { %v5534_v30 = vpop.f32.mrf.mxu1 }
 0x147   :  { %v846_v40 = vpop.f32.mrf.mxu0 }
 0x148   :  { %v1408_v42 = vpop.f32.mrf.mxu1  ;;  %v4792_v40 = vld [vmem:[%s6987_s0 + $0x220] ss:$8 sps:$4 sm:$0xff]  }
 0x149   :  { %v5541_v46 = vpop.f32.mrf.mxu0  ;;  %1040 = vmatmul.mubr.bf16.gmra.mxu0 %v4789_v28 }
 0x14a   :  { %v5543_v57 = vpop.f32.mrf.mxu1  ;;  %1602 = vmatmul.mubr.bf16.gmra.mxu1 %v4789_v28  ;;  %1047 = vmatprep.mubr.bf16.mxu0 %v4790_v38  ;;  %v4798_v28 = vld [vmem:[%s6987_s0 + $0x244] ss:$8 sps:$4 sm:$0xff]  }
 0x14b   :  { %v851_v1 = vpop.f32.mrf.mxu0  ;;  %1609 = vmatprep.mubr.bf16.mxu1 %v4790_v38 }
 0x14c   :  { %v1413_v16 = vpop.f32.mrf.mxu1 }
 0x14d   :  { %v5547_v20 = vpop.f32.mrf.mxu0 }
 0x14e   :  { %v5552_v42 = vpop.f32.mrf.mxu1 }
 0x14f   :  { %v854_v14 = vpop.f32.mrf.mxu0 }
 0x150   :  { %v1416_v0 = vpop.f32.mrf.mxu1  ;;  %v4797_v14 = vld [vmem:[%s6987_s0 + $0x230] ss:$8 sps:$4 sm:$0xff]  }
 0x151   :  { %v5559_v1 = vpop.f32.mrf.mxu0  ;;  %1048 = vmatmul.mubr.bf16.gmra.mxu0 %v4792_v40 }
 0x152   :  { %v5561_v38 = vpop.f32.mrf.mxu1  ;;  %1610 = vmatmul.mubr.bf16.gmra.mxu1 %v4792_v40  ;;  %1055 = vmatprep.mubr.bf16.mxu0 %v4795_v39  ;;  %v4801_v40 = vld [vmem:[%s6987_s0 + $0x254] ss:$8 sps:$4 sm:$0xff]  }
 0x153   :  { %v859_v58 = vpop.f32.mrf.mxu0  ;;  %1617 = vmatprep.mubr.bf16.mxu1 %v4795_v39 }
 0x154   :  { %v1421_v34 = vpop.f32.mrf.mxu1 }
 0x155   :  { %v5565_v26 = vpop.f32.mrf.mxu0 }
 0x156   :  { %v5570_v0 = vpop.f32.mrf.mxu1 }
 0x157   :  { %v862_v13 = vpop.f32.mrf.mxu0 }
 0x158   :  { %v1424_v16 = vpop.f32.mrf.mxu1  ;;  %v4800_v13 = vld [vmem:[%s6987_s0 + $0x240] ss:$8 sps:$4 sm:$0xff]  }
 0x159   :  { %v5577_v58 = vpop.f32.mrf.mxu0  ;;  %1056 = vmatmul.mubr.bf16.gmra.mxu0 %v4797_v14 }
 0x15a   :  { %v5579_v34 = vpop.f32.mrf.mxu1  ;;  %1618 = vmatmul.mubr.bf16.gmra.mxu1 %v4797_v14  ;;  %1063 = vmatprep.mubr.bf16.mxu0 %v4798_v28  ;;  %v4805_v14 = vld [vmem:[%s6987_s0 + $0x264] ss:$8 sps:$4 sm:$0xff]  }
 0x15b   :  { %v867_v2 = vpop.f32.mrf.mxu0  ;;  %1625 = vmatprep.mubr.bf16.mxu1 %v4798_v28 }
 0x15c   :  { %v1429_v55 = vpop.f32.mrf.mxu1 }
 0x15d   :  { %v5583_v45 = vpop.f32.mrf.mxu0 }
 0x15e   :  { %v5588_v16 = vpop.f32.mrf.mxu1 }
 0x15f   :  { %v870_v37 = vpop.f32.mrf.mxu0 }
 0x160   :  { %v1432_v39 = vpop.f32.mrf.mxu1  ;;  %v4803_v37 = vld [vmem:[%s6987_s0 + $0x250] ss:$8 sps:$4 sm:$0xff]  }
 0x161   :  { %v5595_v2 = vpop.f32.mrf.mxu0  ;;  %1064 = vmatmul.mubr.bf16.gmra.mxu0 %v4800_v13 }
 0x162   :  { %v5597_v55 = vpop.f32.mrf.mxu1  ;;  %1626 = vmatmul.mubr.bf16.gmra.mxu1 %v4800_v13  ;;  %1071 = vmatprep.mubr.bf16.mxu0 %v4801_v40  ;;  %v4809_v13 = vld [vmem:[%s6987_s0 + $0x274] ss:$8 sps:$4 sm:$0xff]  }
 0x163   :  { %v875_v31 = vpop.f32.mrf.mxu0  ;;  %1633 = vmatprep.mubr.bf16.mxu1 %v4801_v40 }
 0x164   :  { %v1437_v24 = vpop.f32.mrf.mxu1 }
 0x165   :  { %v5601_v19 = vpop.f32.mrf.mxu0 }
 0x166   :  { %v5606_v39 = vpop.f32.mrf.mxu1 }
 0x167   :  { %7139 = vst [vmem:[#allocation2_spill] sm:$0xff] %v5606_v39  ;;  %v878_v12 = vpop.f32.mrf.mxu0 }
 0x168   :  { %v1440_v28 = vpop.f32.mrf.mxu1  ;;  %v4808_v12 = vld [vmem:[%s6987_s0 + $0x260] ss:$8 sps:$4 sm:$0xff]  }
 0x169   :  { %v5613_v31 = vpop.f32.mrf.mxu0  ;;  %1072 = vmatmul.mubr.bf16.gmra.mxu0 %v4803_v37 }
 0x16a   :  { %7140 = vst [vmem:[#allocation3_spill] sm:$0xff] %v5613_v31  ;;  %v5615_v24 = vpop.f32.mrf.mxu1  ;;  %1634 = vmatmul.mubr.bf16.gmra.mxu1 %v4803_v37  ;;  %1079 = vmatprep.mubr.bf16.mxu0 %v4805_v14  ;;  %v4812_v37 = vld [vmem:[%s6987_s0 + $0x284] ss:$8 sps:$4 sm:$0xff]  }
 0x16b   :  { %7141 = vst [vmem:[#allocation4_spill] sm:$0xff] %v5615_v24  ;;  %v883_v7 = vpop.f32.mrf.mxu0  ;;  %1641 = vmatprep.mubr.bf16.mxu1 %v4805_v14 }
 0x16c   :  { %v1445_v62 = vpop.f32.mrf.mxu1 }
 0x16d   :  { %v5619_v56 = vpop.f32.mrf.mxu0 }
 0x16e   :  { %7142 = vst [vmem:[#allocation5_spill] sm:$0xff] %v5619_v56  ;;  %v5624_v28 = vpop.f32.mrf.mxu1 }
 0x16f   :  { %7143 = vst [vmem:[#allocation6_spill] sm:$0xff] %v5624_v28  ;;  %v886_v49 = vpop.f32.mrf.mxu0 }
 0x170   :  { %v1448_v40 = vpop.f32.mrf.mxu1  ;;  %v4811_v49 = vld [vmem:[%s6987_s0 + $0x270] ss:$8 sps:$4 sm:$0xff]  }
 0x171   :  { %v5631_v7 = vpop.f32.mrf.mxu0  ;;  %1080 = vmatmul.mubr.bf16.gmra.mxu0 %v4808_v12 }
 0x172   :  { %7144 = vst [vmem:[#allocation7_spill] sm:$0xff] %v5631_v7  ;;  %v5633_v62 = vpop.f32.mrf.mxu1  ;;  %1642 = vmatmul.mubr.bf16.gmra.mxu1 %v4808_v12  ;;  %1087 = vmatprep.mubr.bf16.mxu0 %v4809_v13  ;;  %v4816_v12 = vld [vmem:[%s6987_s0 + $0x294] ss:$8 sps:$4 sm:$0xff]  }
 0x173   :  { %7145 = vst [vmem:[#allocation8_spill] sm:$0xff] %v5633_v62  ;;  %v891_v24 = vpop.f32.mrf.mxu0  ;;  %1649 = vmatprep.mubr.bf16.mxu1 %v4809_v13 }
 0x174   :  { %v1453_v31 = vpop.f32.mrf.mxu1 }
 0x175   :  { %v5637_v39 = vpop.f32.mrf.mxu0 }
 0x176   :  { %7146 = vst [vmem:[#allocation9_spill] sm:$0xff] %v5637_v39  ;;  %v5642_v40 = vpop.f32.mrf.mxu1 }
 0x177   :  { %7147 = vst [vmem:[#allocation10_spill] sm:$0xff] %v5642_v40  ;;  %v894_v28 = vpop.f32.mrf.mxu0 }
 0x178   :  { %v1456_v14 = vpop.f32.mrf.mxu1  ;;  %v4814_v28 = vld [vmem:[%s6987_s0 + $0x280] ss:$8 sps:$4 sm:$0xff]  }
 0x179   :  { %v5649_v24 = vpop.f32.mrf.mxu0  ;;  %1088 = vmatmul.mubr.bf16.gmra.mxu0 %v4811_v49 }
 0x17a   :  { %7148 = vst [vmem:[#allocation11_spill] sm:$0xff] %v5649_v24  ;;  %v5651_v13 = vpop.f32.mrf.mxu1  ;;  %1650 = vmatmul.mubr.bf16.gmra.mxu1 %v4811_v49  ;;  %1095 = vmatprep.mubr.bf16.mxu0 %v4812_v37  ;;  %v4820_v49 = vld [vmem:[%s6987_s0 + $0x2a4] ss:$8 sps:$4 sm:$0xff]  }
 0x17b   :  { %7149 = vst [vmem:[#allocation12_spill] sm:$0xff] %v5651_v13  ;;  %v899_v62 = vpop.f32.mrf.mxu0  ;;  %1657 = vmatprep.mubr.bf16.mxu1 %v4812_v37 }
 0x17c   :  { %v1461_v7 = vpop.f32.mrf.mxu1 }
 0x17d   :  { %v5655_v56 = vpop.f32.mrf.mxu0 }
 0x17e   :  { %7150 = vst [vmem:[#allocation13_spill] sm:$0xff] %v5655_v56  ;;  %v5660_v14 = vpop.f32.mrf.mxu1 }
 0x17f   :  { %7151 = vst [vmem:[#allocation14_spill] sm:$0xff] %v5660_v14  ;;  %v902_v40 = vpop.f32.mrf.mxu0 }
 0x180   :  { %v1464_v31 = vpop.f32.mrf.mxu1  ;;  %v4818_v40 = vld [vmem:[%s6987_s0 + $0x290] ss:$8 sps:$4 sm:$0xff]  }
 0x181   :  { %v5667_v62 = vpop.f32.mrf.mxu0  ;;  %1096 = vmatmul.mubr.bf16.gmra.mxu0 %v4814_v28 }
 0x182   :  { %7152 = vst [vmem:[#allocation15_spill] sm:$0xff] %v5667_v62  ;;  %v5669_v37 = vpop.f32.mrf.mxu1  ;;  %1658 = vmatmul.mubr.bf16.gmra.mxu1 %v4814_v28  ;;  %1103 = vmatprep.mubr.bf16.mxu0 %v4816_v12  ;;  %v4823_v28 = vld [vmem:[%s6987_s0 + $0x2b4] ss:$8 sps:$4 sm:$0xff]  }
 0x183   :  { %7153 = vst [vmem:[#allocation16_spill] sm:$0xff] %v5669_v37  ;;  %v907_v13 = vpop.f32.mrf.mxu0  ;;  %1665 = vmatprep.mubr.bf16.mxu1 %v4816_v12 }
 0x184   :  { %v1469_v24 = vpop.f32.mrf.mxu1 }
 0x185   :  { %v5673_v39 = vpop.f32.mrf.mxu0 }
 0x186   :  { %7154 = vst [vmem:[#allocation17_spill] sm:$0xff] %v5673_v39  ;;  %v5678_v31 = vpop.f32.mrf.mxu1 }
 0x187   :  { %7155 = vst [vmem:[#allocation18_spill] sm:$0xff] %v5678_v31  ;;  %v910_v14 = vpop.f32.mrf.mxu0 }
 0x188   :  { %v1472_v7 = vpop.f32.mrf.mxu1  ;;  %v4822_v14 = vld [vmem:[%s6987_s0 + $0x2a0] ss:$8 sps:$4 sm:$0xff]  }
 0x189   :  { %v5685_v13 = vpop.f32.mrf.mxu0  ;;  %1104 = vmatmul.mubr.bf16.gmra.mxu0 %v4818_v40 }
 0x18a   :  { %7156 = vst [vmem:[#allocation19_spill] sm:$0xff] %v5685_v13  ;;  %v5687_v12 = vpop.f32.mrf.mxu1  ;;  %1666 = vmatmul.mubr.bf16.gmra.mxu1 %v4818_v40  ;;  %1111 = vmatprep.mubr.bf16.mxu0 %v4820_v49  ;;  %v4826_v40 = vld [vmem:[%s6987_s0 + $0x2c4] ss:$8 sps:$4 sm:$0xff]  }
 0x18b   :  { %7157 = vst [vmem:[#allocation20_spill] sm:$0xff] %v5687_v12  ;;  %v915_v37 = vpop.f32.mrf.mxu0  ;;  %1673 = vmatprep.mubr.bf16.mxu1 %v4820_v49 }
 0x18c   :  { %v1477_v62 = vpop.f32.mrf.mxu1 }
 0x18d   :  { %v5691_v56 = vpop.f32.mrf.mxu0 }
 0x18e   :  { %7158 = vst [vmem:[#allocation21_spill] sm:$0xff] %v5691_v56  ;;  %v5696_v7 = vpop.f32.mrf.mxu1 }
 0x18f   :  { %7159 = vst [vmem:[#allocation22_spill] sm:$0xff] %v5696_v7  ;;  %v918_v31 = vpop.f32.mrf.mxu0 }
 0x190   :  { %v1480_v24 = vpop.f32.mrf.mxu1  ;;  %v4825_v31 = vld [vmem:[%s6987_s0 + $0x2b0] ss:$8 sps:$4 sm:$0xff]  }
 0x191   :  { %v5703_v37 = vpop.f32.mrf.mxu0  ;;  %1112 = vmatmul.mubr.bf16.gmra.mxu0 %v4822_v14 }
 0x192   :  { %7160 = vst [vmem:[#allocation23_spill] sm:$0xff] %v5703_v37  ;;  %v5705_v49 = vpop.f32.mrf.mxu1  ;;  %1674 = vmatmul.mubr.bf16.gmra.mxu1 %v4822_v14  ;;  %1119 = vmatprep.mubr.bf16.mxu0 %v4823_v28  ;;  %v4831_v14 = vld [vmem:[%s6987_s0 + $0x2d4] ss:$8 sps:$4 sm:$0xff]  }
 0x193   :  { %7161 = vst [vmem:[#allocation24_spill] sm:$0xff] %v5705_v49  ;;  %v923_v12 = vpop.f32.mrf.mxu0  ;;  %1681 = vmatprep.mubr.bf16.mxu1 %v4823_v28 }
 0x194   :  { %v1485_v13 = vpop.f32.mrf.mxu1 }
 0x195   :  { %v5709_v39 = vpop.f32.mrf.mxu0 }
 0x196   :  { %7162 = vst [vmem:[#allocation25_spill] sm:$0xff] %v5709_v39  ;;  %v5714_v24 = vpop.f32.mrf.mxu1 }
 0x197   :  { %7163 = vst [vmem:[#allocation26_spill] sm:$0xff] %v5714_v24  ;;  %v926_v7 = vpop.f32.mrf.mxu0 }
 0x198   :  { %v1488_v62 = vpop.f32.mrf.mxu1  ;;  %v4829_v7 = vld [vmem:[%s6987_s0 + $0x2c0] ss:$8 sps:$4 sm:$0xff]  }
 0x199   :  { %v5721_v12 = vpop.f32.mrf.mxu0  ;;  %1120 = vmatmul.mubr.bf16.gmra.mxu0 %v4825_v31 }
 0x19a   :  { %7164 = vst [vmem:[#allocation27_spill] sm:$0xff] %v5721_v12  ;;  %v5723_v28 = vpop.f32.mrf.mxu1  ;;  %1682 = vmatmul.mubr.bf16.gmra.mxu1 %v4825_v31  ;;  %1127 = vmatprep.mubr.bf16.mxu0 %v4826_v40  ;;  %v4834_v31 = vld [vmem:[%s6987_s0 + $0x2e4] ss:$8 sps:$4 sm:$0xff]  }
 0x19b   :  { %7165 = vst [vmem:[#allocation28_spill] sm:$0xff] %v5723_v28  ;;  %v931_v49 = vpop.f32.mrf.mxu0  ;;  %1689 = vmatprep.mubr.bf16.mxu1 %v4826_v40 }
 0x19c   :  { %v1493_v37 = vpop.f32.mrf.mxu1 }
 0x19d   :  { %v5727_v56 = vpop.f32.mrf.mxu0 }
 0x19e   :  { %7166 = vst [vmem:[#allocation29_spill] sm:$0xff] %v5727_v56  ;;  %v5732_v62 = vpop.f32.mrf.mxu1 }
 0x19f   :  { %7167 = vst [vmem:[#allocation30_spill] sm:$0xff] %v5732_v62  ;;  %v934_v24 = vpop.f32.mrf.mxu0 }
 0x1a0   :  { %v1496_v13 = vpop.f32.mrf.mxu1  ;;  %v4833_v24 = vld [vmem:[%s6987_s0 + $0x2d0] ss:$8 sps:$4 sm:$0xff]  }
 0x1a1   :  { %v5739_v49 = vpop.f32.mrf.mxu0  ;;  %1128 = vmatmul.mubr.bf16.gmra.mxu0 %v4829_v7 }
 0x1a2   :  { %7168 = vst [vmem:[#allocation31_spill] sm:$0xff] %v5739_v49  ;;  %v5741_v40 = vpop.f32.mrf.mxu1  ;;  %1690 = vmatmul.mubr.bf16.gmra.mxu1 %v4829_v7  ;;  %1135 = vmatprep.mubr.bf16.mxu0 %v4831_v14  ;;  %v4837_v7 = vld [vmem:[%s6987_s0 + $0x2f4] ss:$8 sps:$4 sm:$0xff]  }
 0x1a3   :  { %7169 = vst [vmem:[#allocation32_spill] sm:$0xff] %v5741_v40  ;;  %v939_v28 = vpop.f32.mrf.mxu0  ;;  %1697 = vmatprep.mubr.bf16.mxu1 %v4831_v14 }
 0x1a4   :  { %v1501_v12 = vpop.f32.mrf.mxu1 }
 0x1a5   :  { %v5745_v39 = vpop.f32.mrf.mxu0 }
 0x1a6   :  { %7170 = vst [vmem:[#allocation33_spill] sm:$0xff] %v5745_v39  ;;  %v5750_v13 = vpop.f32.mrf.mxu1 }
 0x1a7   :  { %7171 = vst [vmem:[#allocation34_spill] sm:$0xff] %v5750_v13  ;;  %v942_v62 = vpop.f32.mrf.mxu0 }
 0x1a8   :  { %v1504_v37 = vpop.f32.mrf.mxu1  ;;  %v4836_v62 = vld [vmem:[%s6987_s0 + $0x2e0] ss:$8 sps:$4 sm:$0xff]  }
 0x1a9   :  { %v5757_v28 = vpop.f32.mrf.mxu0  ;;  %1136 = vmatmul.mubr.bf16.gmra.mxu0 %v4833_v24 }
 0x1aa   :  { %7172 = vst [vmem:[#allocation35_spill] sm:$0xff] %v5757_v28  ;;  %v5759_v14 = vpop.f32.mrf.mxu1  ;;  %1698 = vmatmul.mubr.bf16.gmra.mxu1 %v4833_v24  ;;  %1143 = vmatprep.mubr.bf16.mxu0 %v4834_v31  ;;  %v4842_v24 = vld [vmem:[%s6987_s0 + $0x304] ss:$8 sps:$4 sm:$0xff]  }
 0x1ab   :  { %7173 = vst [vmem:[#allocation36_spill] sm:$0xff] %v5759_v14  ;;  %v947_v40 = vpop.f32.mrf.mxu0  ;;  %1705 = vmatprep.mubr.bf16.mxu1 %v4834_v31 }
 0x1ac   :  { %v1509_v49 = vpop.f32.mrf.mxu1 }
 0x1ad   :  { %v5763_v56 = vpop.f32.mrf.mxu0 }
 0x1ae   :  { %7174 = vst [vmem:[#allocation37_spill] sm:$0xff] %v5763_v56  ;;  %v5768_v37 = vpop.f32.mrf.mxu1 }
 0x1af   :  { %7175 = vst [vmem:[#allocation38_spill] sm:$0xff] %v5768_v37  ;;  %v950_v13 = vpop.f32.mrf.mxu0 }
 0x1b0   :  { %v1512_v12 = vpop.f32.mrf.mxu1  ;;  %v4839_v13 = vld [vmem:[%s6987_s0 + $0x2f0] ss:$8 sps:$4 sm:$0xff]  }
 0x1b1   :  { %v5775_v40 = vpop.f32.mrf.mxu0  ;;  %1144 = vmatmul.mubr.bf16.gmra.mxu0 %v4836_v62 }
 0x1b2   :  { %7176 = vst [vmem:[#allocation39_spill] sm:$0xff] %v5775_v40  ;;  %v5777_v31 = vpop.f32.mrf.mxu1  ;;  %1706 = vmatmul.mubr.bf16.gmra.mxu1 %v4836_v62  ;;  %1151 = vmatprep.mubr.bf16.mxu0 %v4837_v7  ;;  %v4845_v62 = vld [vmem:[%s6987_s0 + $0x314] ss:$8 sps:$4 sm:$0xff]  }
 0x1b3   :  { %7177 = vst [vmem:[#allocation40_spill] sm:$0xff] %v5777_v31  ;;  %v955_v14 = vpop.f32.mrf.mxu0  ;;  %1713 = vmatprep.mubr.bf16.mxu1 %v4837_v7 }
 0x1b4   :  { %v1517_v28 = vpop.f32.mrf.mxu1 }
 0x1b5   :  { %v5781_v39 = vpop.f32.mrf.mxu0 }
 0x1b6   :  { %7178 = vst [vmem:[#allocation41_spill] sm:$0xff] %v5781_v39  ;;  %v5786_v12 = vpop.f32.mrf.mxu1 }
 0x1b7   :  { %7179 = vst [vmem:[#allocation42_spill] sm:$0xff] %v5786_v12  ;;  %v958_v37 = vpop.f32.mrf.mxu0 }
 0x1b8   :  { %v1520_v49 = vpop.f32.mrf.mxu1  ;;  %v4844_v37 = vld [vmem:[%s6987_s0 + $0x300] ss:$8 sps:$4 sm:$0xff]  }
 0x1b9   :  { %v5793_v14 = vpop.f32.mrf.mxu0  ;;  %1152 = vmatmul.mubr.bf16.gmra.mxu0 %v4839_v13 }
 0x1ba   :  { %7180 = vst [vmem:[#allocation43_spill] sm:$0xff] %v5793_v14  ;;  %v5795_v7 = vpop.f32.mrf.mxu1  ;;  %1714 = vmatmul.mubr.bf16.gmra.mxu1 %v4839_v13  ;;  %1159 = vmatprep.mubr.bf16.mxu0 %v4842_v24 }
 0x1bb   :  { %7181 = vst [vmem:[#allocation44_spill] sm:$0xff] %v5795_v7  ;;  %v963_v31 = vpop.f32.mrf.mxu0  ;;  %1721 = vmatprep.mubr.bf16.mxu1 %v4842_v24 }
 0x1bc   :  { %v1525_v40 = vpop.f32.mrf.mxu1 }
 0x1bd   :  { %v5799_v56 = vpop.f32.mrf.mxu0 }
 0x1be   :  { %7182 = vst [vmem:[#allocation45_spill] sm:$0xff] %v5799_v56  ;;  %v5804_v49 = vpop.f32.mrf.mxu1 }
 0x1bf   :  { %7183 = vst [vmem:[#allocation46_spill] sm:$0xff] %v5804_v49  ;;  %v966_v12 = vpop.f32.mrf.mxu0 }
 0x1c0   :  { %v1528_v28 = vpop.f32.mrf.mxu1  ;;  %v4847_v12 = vld [vmem:[%s6987_s0 + $0x310] ss:$8 sps:$4 sm:$0xff]  }
 0x1c1   :  { %v5811_v31 = vpop.f32.mrf.mxu0  ;;  %1160 = vmatmul.mubr.bf16.gmra.mxu0 %v4844_v37 }
 0x1c2   :  { %7184 = vst [vmem:[#allocation47_spill] sm:$0xff] %v5811_v31  ;;  %v5813_v24 = vpop.f32.mrf.mxu1  ;;  %1722 = vmatmul.mubr.bf16.gmra.mxu1 %v4844_v37  ;;  %1167 = vmatprep.mubr.bf16.mxu0 %v4845_v62  ;;  %v4849_v31 = vld [vmem:[%s6987_s0] ss:$8 sps:$4 sm:$0xff]  }
 0x1c3   :  { %7185 = vst [vmem:[#allocation48_spill] sm:$0xff] %v5813_v24  ;;  %v971_v7 = vpop.f32.mrf.mxu0  ;;  %1729 = vmatprep.mubr.bf16.mxu1 %v4845_v62  ;;  %v4848_v62 = vld [vmem:[%s6987_s0 + $0x4] ss:$8 sps:$4 sm:$0xff]  }
 0x1c4   :  { %v1533_v14 = vpop.f32.mrf.mxu1 }
 0x1c5   :  { %v5817_v39 = vpop.f32.mrf.mxu0 }
 0x1c6   :  { %7186 = vst [vmem:[#allocation49_spill] sm:$0xff] %v5817_v39  ;;  %v5822_v28 = vpop.f32.mrf.mxu1 }
 0x1c7   :  { %7187 = vst [vmem:[#allocation50_spill] sm:$0xff] %v5822_v28  ;;  %v974_v49 = vpop.f32.mrf.mxu0 }
 0x1c8   :  { %v1536_v37 = vpop.f32.mrf.mxu1 }
 0x1c9   :  { %v5826_v56 = vpop.f32.mrf.mxu0  ;;  %1168 = vmatmul.mubr.bf16.gmra.mxu0 %v4847_v12 }
 0x1ca   :  { %7188 = vst [vmem:[#allocation51_spill] sm:$0xff] %v5826_v56  ;;  %v5828_v40 = vpop.f32.mrf.mxu1  ;;  %1730 = vmatmul.mubr.bf16.gmra.mxu1 %v4847_v12  ;;  %1999 = vmatprep.mubr.bf16.mxu0 %v4848_v62  ;;  %v4851_v56 = vld [vmem:[%s6987_s0 + $0x10] ss:$8 sps:$4 sm:$0xff]  }
 0x1cb   :  { %7189 = vst [vmem:[#allocation52_spill] sm:$0xff] %v5828_v40  ;;  %v979_v7 = vpop.f32.mrf.mxu0  ;;  %2661 = vmatprep.mubr.bf16.mxu1 %v4848_v62 }
 0x1cc   :  { %v1541_v24 = vpop.f32.mrf.mxu1 }
 0x1cd   :  { %v5835_v13 = vpop.f32.mrf.mxu0  ;;  %v4850_v24 = vld [vmem:[%s6987_s0 + $0x14] ss:$8 sps:$4 sm:$0xff]  }
 0x1ce   :  { %7190 = vst [vmem:[#allocation53_spill] sm:$0xff] %v5835_v13  ;;  %v5837_v49 = vpop.f32.mrf.mxu1 }
 0x1cf   :  { %7191 = vst [vmem:[#allocation54_spill] sm:$0xff] %v5837_v49  ;;  %v982_v28 = vpop.f32.mrf.mxu0 }
 0x1d0   :  { %v1544_v12 = vpop.f32.mrf.mxu1 }
 0x1d1   :  { %v5841_v39 = vpop.f32.mrf.mxu0  ;;  %2000 = vmatmul.mubr.bf16.vlgmr.msra.gmra.mxu0 %v4849_v31 }
 0x1d2   :  { %7192 = vst [vmem:[#allocation55_spill] sm:$0xff] %v5841_v39  ;;  %v5846_v14 = vpop.f32.mrf.mxu1  ;;  %2662 = vmatmul.mubr.bf16.vlgmr.msra.gmra.mxu1 %v4849_v31  ;;  %2007 = vmatprep.mubr.bf16.mxu0 %v4850_v24  ;;  %v4853_v39 = vld [vmem:[%s6987_s0 + $0x20] ss:$8 sps:$4 sm:$0xff]  }
 0x1d3   :  { %7193 = vst [vmem:[#allocation56_spill] sm:$0xff] %v5846_v14  ;;  %v987_v28 = vpop.f32.mrf.mxu0  ;;  %2669 = vmatprep.mubr.bf16.mxu1 %v4850_v24  ;;  %v4852_v24 = vld [vmem:[%s6987_s0 + $0x24] ss:$8 sps:$4 sm:$0xff]  }
 0x1d4   :  { %v1549_v7 = vpop.f32.mrf.mxu1 }
 0x1d5   :  { %v5853_v12 = vpop.f32.mrf.mxu0 }
 0x1d6   :  { %7194 = vst [vmem:[#allocation57_spill] sm:$0xff] %v5853_v12  ;;  %v5855_v37 = vpop.f32.mrf.mxu1 }
 0x1d7   :  { %7195 = vst [vmem:[#allocation58_spill] sm:$0xff] %v5855_v37  ;;  %v990_v13 = vpop.f32.mrf.mxu0 }
 0x1d8   :  { %v1552_v31 = vpop.f32.mrf.mxu1 }
 0x1d9   :  { %v5859_v40 = vpop.f32.mrf.mxu0  ;;  %2008 = vmatmul.mubr.bf16.gmra.mxu0 %v4851_v56 }
 0x1da   :  { %7196 = vst [vmem:[#allocation59_spill] sm:$0xff] %v5859_v40  ;;  %v5864_v62 = vpop.f32.mrf.mxu1  ;;  %2670 = vmatmul.mubr.bf16.gmra.mxu1 %v4851_v56  ;;  %2015 = vmatprep.mubr.bf16.mxu0 %v4852_v24  ;;  %v4855_v40 = vld [vmem:[%s6987_s0 + $0x30] ss:$8 sps:$4 sm:$0xff]  }
 0x1db   :  { %7197 = vst [vmem:[#allocation60_spill] sm:$0xff] %v5864_v62  ;;  %v995_v13 = vpop.f32.mrf.mxu0  ;;  %2677 = vmatprep.mubr.bf16.mxu1 %v4852_v24  ;;  %v4854_v24 = vld [vmem:[%s6987_s0 + $0x34] ss:$8 sps:$4 sm:$0xff]  }
 0x1dc   :  { %v1557_v7 = vpop.f32.mrf.mxu1 }
 0x1dd   :  { %v5871_v31 = vpop.f32.mrf.mxu0 }
 0x1de   :  { %7198 = vst [vmem:[#allocation61_spill] sm:$0xff] %v5871_v31  ;;  %v5873_v49 = vpop.f32.mrf.mxu1 }
 0x1df   :  { %7199 = vst [vmem:[#allocation62_spill] sm:$0xff] %v5873_v49  ;;  %v998_v12 = vpop.f32.mrf.mxu0 }
 0x1e0   :  { %v1560_v56 = vpop.f32.mrf.mxu1 }
 0x1e1   :  { %v5877_v14 = vpop.f32.mrf.mxu0  ;;  %2016 = vmatmul.mubr.bf16.gmra.mxu0 %v4853_v39 }
 0x1e2   :  { %7200 = vst [vmem:[#allocation63_spill] sm:$0xff] %v5877_v14  ;;  %v5882_v28 = vpop.f32.mrf.mxu1  ;;  %2678 = vmatmul.mubr.bf16.gmra.mxu1 %v4853_v39  ;;  %2023 = vmatprep.mubr.bf16.mxu0 %v4854_v24  ;;  %v4857_v14 = vld [vmem:[%s6987_s0 + $0x40] ss:$8 sps:$4 sm:$0xff]  }
 0x1e3   :  { %7201 = vst [vmem:[#allocation64_spill] sm:$0xff] %v5882_v28  ;;  %v1003_v12 = vpop.f32.mrf.mxu0  ;;  %2685 = vmatprep.mubr.bf16.mxu1 %v4854_v24  ;;  %v4856_v24 = vld [vmem:[%s6987_s0 + $0x44] ss:$8 sps:$4 sm:$0xff]  }
 0x1e4   :  { %v1565_v7 = vpop.f32.mrf.mxu1 }
 0x1e5   :  { %v5889_v56 = vpop.f32.mrf.mxu0 }
 0x1e6   :  { %7202 = vst [vmem:[#allocation65_spill] sm:$0xff] %v5889_v56  ;;  %v5891_v37 = vpop.f32.mrf.mxu1 }
 0x1e7   :  { %7203 = vst [vmem:[#allocation66_spill] sm:$0xff] %v5891_v37  ;;  %v1006_v31 = vpop.f32.mrf.mxu0 }
 0x1e8   :  { %v1568_v39 = vpop.f32.mrf.mxu1 }
 0x1e9   :  { %v5895_v62 = vpop.f32.mrf.mxu0  ;;  %2024 = vmatmul.mubr.bf16.gmra.mxu0 %v4855_v40 }
 0x1ea   :  { %7204 = vst [vmem:[#allocation67_spill] sm:$0xff] %v5895_v62  ;;  %v5900_v13 = vpop.f32.mrf.mxu1  ;;  %2686 = vmatmul.mubr.bf16.gmra.mxu1 %v4855_v40  ;;  %2031 = vmatprep.mubr.bf16.mxu0 %v4856_v24  ;;  %v4859_v62 = vld [vmem:[%s6987_s0 + $0x50] ss:$8 sps:$4 sm:$0xff]  }
 0x1eb   :  { %7205 = vst [vmem:[#allocation68_spill] sm:$0xff] %v5900_v13  ;;  %v1011_v31 = vpop.f32.mrf.mxu0  ;;  %2693 = vmatprep.mubr.bf16.mxu1 %v4856_v24  ;;  %v4858_v24 = vld [vmem:[%s6987_s0 + $0x54] ss:$8 sps:$4 sm:$0xff]  }
 0x1ec   :  { %v1573_v7 = vpop.f32.mrf.mxu1 }
 0x1ed   :  { %v5907_v39 = vpop.f32.mrf.mxu0 }
 0x1ee   :  { %7206 = vst [vmem:[#allocation69_spill] sm:$0xff] %v5907_v39  ;;  %v5909_v49 = vpop.f32.mrf.mxu1 }
 0x1ef   :  { %7207 = vst [vmem:[#allocation70_spill] sm:$0xff] %v5909_v49  ;;  %v1014_v56 = vpop.f32.mrf.mxu0 }
 0x1f0   :  { %v1576_v40 = vpop.f32.mrf.mxu1 }
 0x1f1   :  { %v5913_v28 = vpop.f32.mrf.mxu0  ;;  %2032 = vmatmul.mubr.bf16.gmra.mxu0 %v4857_v14 }
 0x1f2   :  { %7208 = vst [vmem:[#allocation71_spill] sm:$0xff] %v5913_v28  ;;  %v5918_v12 = vpop.f32.mrf.mxu1  ;;  %2694 = vmatmul.mubr.bf16.gmra.mxu1 %v4857_v14  ;;  %2039 = vmatprep.mubr.bf16.mxu0 %v4858_v24  ;;  %v4861_v28 = vld [vmem:[%s6987_s0 + $0x60] ss:$8 sps:$4 sm:$0xff]  }
 0x1f3   :  { %7209 = vst [vmem:[#allocation72_spill] sm:$0xff] %v5918_v12  ;;  %v1019_v56 = vpop.f32.mrf.mxu0  ;;  %2701 = vmatprep.mubr.bf16.mxu1 %v4858_v24  ;;  %v4860_v24 = vld [vmem:[%s6987_s0 + $0x64] ss:$8 sps:$4 sm:$0xff]  }
 0x1f4   :  { %v1581_v7 = vpop.f32.mrf.mxu1 }
 0x1f5   :  { %v5925_v40 = vpop.f32.mrf.mxu0 }
 0x1f6   :  { %7210 = vst [vmem:[#allocation73_spill] sm:$0xff] %v5925_v40  ;;  %v5927_v37 = vpop.f32.mrf.mxu1 }
 0x1f7   :  { %7211 = vst [vmem:[#allocation74_spill] sm:$0xff] %v5927_v37  ;;  %v1022_v39 = vpop.f32.mrf.mxu0 }
 0x1f8   :  { %v1584_v14 = vpop.f32.mrf.mxu1 }
 0x1f9   :  { %v5931_v13 = vpop.f32.mrf.mxu0  ;;  %2040 = vmatmul.mubr.bf16.gmra.mxu0 %v4859_v62 }
 0x1fa   :  { %7212 = vst [vmem:[#allocation75_spill] sm:$0xff] %v5931_v13  ;;  %v5936_v31 = vpop.f32.mrf.mxu1  ;;  %2702 = vmatmul.mubr.bf16.gmra.mxu1 %v4859_v62  ;;  %2047 = vmatprep.mubr.bf16.mxu0 %v4860_v24  ;;  %v4863_v13 = vld [vmem:[%s6987_s0 + $0x70] ss:$8 sps:$4 sm:$0xff]  }
 0x1fb   :  { %7213 = vst [vmem:[#allocation76_spill] sm:$0xff] %v5936_v31  ;;  %v1027_v39 = vpop.f32.mrf.mxu0  ;;  %2709 = vmatprep.mubr.bf16.mxu1 %v4860_v24  ;;  %v4862_v24 = vld [vmem:[%s6987_s0 + $0x74] ss:$8 sps:$4 sm:$0xff]  }
 0x1fc   :  { %v1589_v7 = vpop.f32.mrf.mxu1 }
 0x1fd   :  { %v5943_v14 = vpop.f32.mrf.mxu0 }
 0x1fe   :  { %7214 = vst [vmem:[#allocation77_spill] sm:$0xff] %v5943_v14  ;;  %v5945_v49 = vpop.f32.mrf.mxu1 }
 0x1ff   :  { %7215 = vst [vmem:[#allocation78_spill] sm:$0xff] %v5945_v49  ;;  %v1030_v40 = vpop.f32.mrf.mxu0 }
 0x200   :  { %v1592_v62 = vpop.f32.mrf.mxu1 }
 0x201   :  { %v5949_v12 = vpop.f32.mrf.mxu0  ;;  %2048 = vmatmul.mubr.bf16.gmra.mxu0 %v4861_v28 }
 0x202   :  { %7216 = vst [vmem:[#allocation79_spill] sm:$0xff] %v5949_v12  ;;  %v5954_v56 = vpop.f32.mrf.mxu1  ;;  %2710 = vmatmul.mubr.bf16.gmra.mxu1 %v4861_v28  ;;  %2055 = vmatprep.mubr.bf16.mxu0 %v4862_v24  ;;  %v4865_v12 = vld [vmem:[%s6987_s0 + $0x80] ss:$8 sps:$4 sm:$0xff]  }
 0x203   :  { %7217 = vst [vmem:[#allocation80_spill] sm:$0xff] %v5954_v56  ;;  %v1035_v40 = vpop.f32.mrf.mxu0  ;;  %2717 = vmatprep.mubr.bf16.mxu1 %v4862_v24  ;;  %v4864_v24 = vld [vmem:[%s6987_s0 + $0x84] ss:$8 sps:$4 sm:$0xff]  }
 0x204   :  { %v1597_v7 = vpop.f32.mrf.mxu1 }
 0x205   :  { %v5961_v62 = vpop.f32.mrf.mxu0 }
 0x206   :  { %7218 = vst [vmem:[#allocation81_spill] sm:$0xff] %v5961_v62  ;;  %v5963_v37 = vpop.f32.mrf.mxu1 }
 0x207   :  { %7219 = vst [vmem:[#allocation82_spill] sm:$0xff] %v5963_v37  ;;  %v1038_v14 = vpop.f32.mrf.mxu0 }
 0x208   :  { %v1600_v28 = vpop.f32.mrf.mxu1 }
 0x209   :  { %v5967_v31 = vpop.f32.mrf.mxu0  ;;  %2056 = vmatmul.mubr.bf16.gmra.mxu0 %v4863_v13 }
 0x20a   :  { %7220 = vst [vmem:[#allocation83_spill] sm:$0xff] %v5967_v31  ;;  %v5972_v39 = vpop.f32.mrf.mxu1  ;;  %2718 = vmatmul.mubr.bf16.gmra.mxu1 %v4863_v13  ;;  %2063 = vmatprep.mubr.bf16.mxu0 %v4864_v24  ;;  %v4867_v31 = vld [vmem:[%s6987_s0 + $0x90] ss:$8 sps:$4 sm:$0xff]  }
 0x20b   :  { %7221 = vst [vmem:[#allocation84_spill] sm:$0xff] %v5972_v39  ;;  %v1043_v14 = vpop.f32.mrf.mxu0  ;;  %2725 = vmatprep.mubr.bf16.mxu1 %v4864_v24  ;;  %v4866_v24 = vld [vmem:[%s6987_s0 + $0x94] ss:$8 sps:$4 sm:$0xff]  }
 0x20c   :  { %v1605_v7 = vpop.f32.mrf.mxu1 }
 0x20d   :  { %v5979_v28 = vpop.f32.mrf.mxu0 }
 0x20e   :  { %7222 = vst [vmem:[#allocation85_spill] sm:$0xff] %v5979_v28  ;;  %v5981_v49 = vpop.f32.mrf.mxu1 }
 0x20f   :  { %7223 = vst [vmem:[#allocation86_spill] sm:$0xff] %v5981_v49  ;;  %v1046_v62 = vpop.f32.mrf.mxu0 }
 0x210   :  { %v1608_v13 = vpop.f32.mrf.mxu1 }
 0x211   :  { %v5985_v56 = vpop.f32.mrf.mxu0  ;;  %2064 = vmatmul.mubr.bf16.gmra.mxu0 %v4865_v12 }
 0x212   :  { %7224 = vst [vmem:[#allocation87_spill] sm:$0xff] %v5985_v56  ;;  %v5990_v40 = vpop.f32.mrf.mxu1  ;;  %2726 = vmatmul.mubr.bf16.gmra.mxu1 %v4865_v12  ;;  %2071 = vmatprep.mubr.bf16.mxu0 %v4866_v24  ;;  %v4869_v56 = vld [vmem:[%s6987_s0 + $0xa0] ss:$8 sps:$4 sm:$0xff]  }
 0x213   :  { %7225 = vst [vmem:[#allocation88_spill] sm:$0xff] %v5990_v40  ;;  %v1051_v62 = vpop.f32.mrf.mxu0  ;;  %2733 = vmatprep.mubr.bf16.mxu1 %v4866_v24  ;;  %v4868_v24 = vld [vmem:[%s6987_s0 + $0xa4] ss:$8 sps:$4 sm:$0xff]  }
 0x214   :  { %v1613_v7 = vpop.f32.mrf.mxu1 }
 0x215   :  { %v5997_v13 = vpop.f32.mrf.mxu0 }
 0x216   :  { %7226 = vst [vmem:[#allocation89_spill] sm:$0xff] %v5997_v13  ;;  %v5999_v37 = vpop.f32.mrf.mxu1 }
 0x217   :  { %7227 = vst [vmem:[#allocation90_spill] sm:$0xff] %v5999_v37  ;;  %v1054_v28 = vpop.f32.mrf.mxu0 }
 0x218   :  { %v1616_v12 = vpop.f32.mrf.mxu1 }
 0x219   :  { %v6003_v39 = vpop.f32.mrf.mxu0  ;;  %2072 = vmatmul.mubr.bf16.gmra.mxu0 %v4867_v31 }
 0x21a   :  { %7228 = vst [vmem:[#allocation91_spill] sm:$0xff] %v6003_v39  ;;  %v6008_v14 = vpop.f32.mrf.mxu1  ;;  %2734 = vmatmul.mubr.bf16.gmra.mxu1 %v4867_v31  ;;  %2079 = vmatprep.mubr.bf16.mxu0 %v4868_v24  ;;  %v4871_v39 = vld [vmem:[%s6987_s0 + $0xb0] ss:$8 sps:$4 sm:$0xff]  }
 0x21b   :  { %7229 = vst [vmem:[#allocation92_spill] sm:$0xff] %v6008_v14  ;;  %v1059_v28 = vpop.f32.mrf.mxu0  ;;  %2741 = vmatprep.mubr.bf16.mxu1 %v4868_v24  ;;  %v4870_v24 = vld [vmem:[%s6987_s0 + $0xb4] ss:$8 sps:$4 sm:$0xff]  }
 0x21c   :  { %v1621_v7 = vpop.f32.mrf.mxu1 }
 0x21d   :  { %v6015_v12 = vpop.f32.mrf.mxu0 }
 0x21e   :  { %7230 = vst [vmem:[#allocation93_spill] sm:$0xff] %v6015_v12  ;;  %v6017_v49 = vpop.f32.mrf.mxu1 }
 0x21f   :  { %7231 = vst [vmem:[#allocation94_spill] sm:$0xff] %v6017_v49  ;;  %v1062_v13 = vpop.f32.mrf.mxu0 }
 0x220   :  { %v1624_v31 = vpop.f32.mrf.mxu1 }
 0x221   :  { %v6021_v40 = vpop.f32.mrf.mxu0  ;;  %2080 = vmatmul.mubr.bf16.gmra.mxu0 %v4869_v56 }
 0x222   :  { %7232 = vst [vmem:[#allocation95_spill] sm:$0xff] %v6021_v40  ;;  %v6026_v62 = vpop.f32.mrf.mxu1  ;;  %2742 = vmatmul.mubr.bf16.gmra.mxu1 %v4869_v56  ;;  %2087 = vmatprep.mubr.bf16.mxu0 %v4870_v24  ;;  %v4873_v40 = vld [vmem:[%s6987_s0 + $0xc0] ss:$8 sps:$4 sm:$0xff]  }
 0x223   :  { %7233 = vst [vmem:[#allocation96_spill] sm:$0xff] %v6026_v62  ;;  %v1067_v13 = vpop.f32.mrf.mxu0  ;;  %2749 = vmatprep.mubr.bf16.mxu1 %v4870_v24  ;;  %v4872_v24 = vld [vmem:[%s6987_s0 + $0xc4] ss:$8 sps:$4 sm:$0xff]  }
 0x224   :  { %v1629_v7 = vpop.f32.mrf.mxu1 }
 0x225   :  { %v6033_v31 = vpop.f32.mrf.mxu0 }
 0x226   :  { %7234 = vst [vmem:[#allocation97_spill] sm:$0xff] %v6033_v31  ;;  %v6035_v37 = vpop.f32.mrf.mxu1 }
 0x227   :  { %7235 = vst [vmem:[#allocation98_spill] sm:$0xff] %v6035_v37  ;;  %v1070_v12 = vpop.f32.mrf.mxu0 }
 0x228   :  { %v1632_v56 = vpop.f32.mrf.mxu1 }
 0x229   :  { %v6039_v14 = vpop.f32.mrf.mxu0  ;;  %2088 = vmatmul.mubr.bf16.gmra.mxu0 %v4871_v39 }
 0x22a   :  { %7236 = vst [vmem:[#allocation99_spill] sm:$0xff] %v6039_v14  ;;  %v6044_v28 = vpop.f32.mrf.mxu1  ;;  %2750 = vmatmul.mubr.bf16.gmra.mxu1 %v4871_v39  ;;  %2095 = vmatprep.mubr.bf16.mxu0 %v4872_v24  ;;  %v4875_v14 = vld [vmem:[%s6987_s0 + $0xd0] ss:$8 sps:$4 sm:$0xff]  }
 0x22b   :  { %7237 = vst [vmem:[#allocation100_spill] sm:$0xff] %v6044_v28  ;;  %v1075_v12 = vpop.f32.mrf.mxu0  ;;  %2757 = vmatprep.mubr.bf16.mxu1 %v4872_v24  ;;  %v4874_v24 = vld [vmem:[%s6987_s0 + $0xd4] ss:$8 sps:$4 sm:$0xff]  }
 0x22c   :  { %v1637_v7 = vpop.f32.mrf.mxu1 }
 0x22d   :  { %v6051_v56 = vpop.f32.mrf.mxu0 }
 0x22e   :  { %7238 = vst [vmem:[#allocation101_spill] sm:$0xff] %v6051_v56  ;;  %v6053_v49 = vpop.f32.mrf.mxu1 }
 0x22f   :  { %7239 = vst [vmem:[#allocation102_spill] sm:$0xff] %v6053_v49  ;;  %v1078_v31 = vpop.f32.mrf.mxu0 }
 0x230   :  { %v1640_v39 = vpop.f32.mrf.mxu1 }
 0x231   :  { %v6057_v62 = vpop.f32.mrf.mxu0  ;;  %2096 = vmatmul.mubr.bf16.gmra.mxu0 %v4873_v40 }
 0x232   :  { %7240 = vst [vmem:[#allocation103_spill] sm:$0xff] %v6057_v62  ;;  %v6062_v13 = vpop.f32.mrf.mxu1  ;;  %2758 = vmatmul.mubr.bf16.gmra.mxu1 %v4873_v40  ;;  %2103 = vmatprep.mubr.bf16.mxu0 %v4874_v24  ;;  %v4877_v62 = vld [vmem:[%s6987_s0 + $0xe0] ss:$8 sps:$4 sm:$0xff]  }
 0x233   :  { %7241 = vst [vmem:[#allocation104_spill] sm:$0xff] %v6062_v13  ;;  %v1083_v31 = vpop.f32.mrf.mxu0  ;;  %2765 = vmatprep.mubr.bf16.mxu1 %v4874_v24  ;;  %v4876_v24 = vld [vmem:[%s6987_s0 + $0xe4] ss:$8 sps:$4 sm:$0xff]  }
 0x234   :  { %v1645_v7 = vpop.f32.mrf.mxu1 }
 0x235   :  { %v6069_v39 = vpop.f32.mrf.mxu0 }
 0x236   :  { %7242 = vst [vmem:[#allocation105_spill] sm:$0xff] %v6069_v39  ;;  %v6071_v37 = vpop.f32.mrf.mxu1 }
 0x237   :  { %7243 = vst [vmem:[#allocation106_spill] sm:$0xff] %v6071_v37  ;;  %v1086_v56 = vpop.f32.mrf.mxu0 }
 0x238   :  { %v1648_v40 = vpop.f32.mrf.mxu1 }
 0x239   :  { %v6075_v28 = vpop.f32.mrf.mxu0  ;;  %2104 = vmatmul.mubr.bf16.gmra.mxu0 %v4875_v14 }
 0x23a   :  { %7244 = vst [vmem:[#allocation107_spill] sm:$0xff] %v6075_v28  ;;  %v6080_v12 = vpop.f32.mrf.mxu1  ;;  %2766 = vmatmul.mubr.bf16.gmra.mxu1 %v4875_v14  ;;  %2111 = vmatprep.mubr.bf16.mxu0 %v4876_v24  ;;  %v4879_v28 = vld [vmem:[%s6987_s0 + $0xf0] ss:$8 sps:$4 sm:$0xff]  }
 0x23b   :  { %7245 = vst [vmem:[#allocation108_spill] sm:$0xff] %v6080_v12  ;;  %v1091_v56 = vpop.f32.mrf.mxu0  ;;  %2773 = vmatprep.mubr.bf16.mxu1 %v4876_v24  ;;  %v4878_v24 = vld [vmem:[%s6987_s0 + $0xf4] ss:$8 sps:$4 sm:$0xff]  }
 0x23c   :  { %v1653_v7 = vpop.f32.mrf.mxu1 }
 0x23d   :  { %v6087_v40 = vpop.f32.mrf.mxu0 }
 0x23e   :  { %7246 = vst [vmem:[#allocation109_spill] sm:$0xff] %v6087_v40  ;;  %v6089_v49 = vpop.f32.mrf.mxu1 }
 0x23f   :  { %7247 = vst [vmem:[#allocation110_spill] sm:$0xff] %v6089_v49  ;;  %v1094_v39 = vpop.f32.mrf.mxu0 }
 0x240   :  { %v1656_v14 = vpop.f32.mrf.mxu1 }
 0x241   :  { %v6093_v13 = vpop.f32.mrf.mxu0  ;;  %2112 = vmatmul.mubr.bf16.gmra.mxu0 %v4877_v62 }
 0x242   :  { %7248 = vst [vmem:[#allocation111_spill] sm:$0xff] %v6093_v13  ;;  %v6098_v31 = vpop.f32.mrf.mxu1  ;;  %2774 = vmatmul.mubr.bf16.gmra.mxu1 %v4877_v62  ;;  %2119 = vmatprep.mubr.bf16.mxu0 %v4878_v24  ;;  %v4881_v13 = vld [vmem:[%s6987_s0 + $0x100] ss:$8 sps:$4 sm:$0xff]  }
 0x243   :  { %7249 = vst [vmem:[#allocation112_spill] sm:$0xff] %v6098_v31  ;;  %v1099_v39 = vpop.f32.mrf.mxu0  ;;  %2781 = vmatprep.mubr.bf16.mxu1 %v4878_v24  ;;  %v4880_v24 = vld [vmem:[%s6987_s0 + $0x104] ss:$8 sps:$4 sm:$0xff]  }
 0x244   :  { %v1661_v7 = vpop.f32.mrf.mxu1 }
 0x245   :  { %v6105_v14 = vpop.f32.mrf.mxu0 }
 0x246   :  { %7250 = vst [vmem:[#allocation113_spill] sm:$0xff] %v6105_v14  ;;  %v6107_v37 = vpop.f32.mrf.mxu1 }
 0x247   :  { %7251 = vst [vmem:[#allocation114_spill] sm:$0xff] %v6107_v37  ;;  %v1102_v40 = vpop.f32.mrf.mxu0 }
 0x248   :  { %v1664_v62 = vpop.f32.mrf.mxu1 }
 0x249   :  { %v6111_v12 = vpop.f32.mrf.mxu0  ;;  %2120 = vmatmul.mubr.bf16.gmra.mxu0 %v4879_v28 }
 0x24a   :  { %7252 = vst [vmem:[#allocation115_spill] sm:$0xff] %v6111_v12  ;;  %v6116_v56 = vpop.f32.mrf.mxu1  ;;  %2782 = vmatmul.mubr.bf16.gmra.mxu1 %v4879_v28  ;;  %2127 = vmatprep.mubr.bf16.mxu0 %v4880_v24  ;;  %v4883_v12 = vld [vmem:[%s6987_s0 + $0x110] ss:$8 sps:$4 sm:$0xff]  }
 0x24b   :  { %7253 = vst [vmem:[#allocation116_spill] sm:$0xff] %v6116_v56  ;;  %v1107_v40 = vpop.f32.mrf.mxu0  ;;  %2789 = vmatprep.mubr.bf16.mxu1 %v4880_v24  ;;  %v4882_v24 = vld [vmem:[%s6987_s0 + $0x114] ss:$8 sps:$4 sm:$0xff]  }
 0x24c   :  { %v1669_v7 = vpop.f32.mrf.mxu1 }
 0x24d   :  { %v6123_v62 = vpop.f32.mrf.mxu0 }
 0x24e   :  { %7254 = vst [vmem:[#allocation117_spill] sm:$0xff] %v6123_v62  ;;  %v6125_v49 = vpop.f32.mrf.mxu1 }
 0x24f   :  { %7255 = vst [vmem:[#allocation118_spill] sm:$0xff] %v6125_v49  ;;  %v1110_v14 = vpop.f32.mrf.mxu0 }
 0x250   :  { %v1672_v28 = vpop.f32.mrf.mxu1 }
 0x251   :  { %v6129_v31 = vpop.f32.mrf.mxu0  ;;  %2128 = vmatmul.mubr.bf16.gmra.mxu0 %v4881_v13 }
 0x252   :  { %7256 = vst [vmem:[#allocation119_spill] sm:$0xff] %v6129_v31  ;;  %v6134_v39 = vpop.f32.mrf.mxu1  ;;  %2790 = vmatmul.mubr.bf16.gmra.mxu1 %v4881_v13  ;;  %2135 = vmatprep.mubr.bf16.mxu0 %v4882_v24  ;;  %v4885_v31 = vld [vmem:[%s6987_s0 + $0x120] ss:$8 sps:$4 sm:$0xff]  }
 0x253   :  { %7257 = vst [vmem:[#allocation120_spill] sm:$0xff] %v6134_v39  ;;  %v1115_v14 = vpop.f32.mrf.mxu0  ;;  %2797 = vmatprep.mubr.bf16.mxu1 %v4882_v24  ;;  %v4884_v24 = vld [vmem:[%s6987_s0 + $0x124] ss:$8 sps:$4 sm:$0xff]  }
 0x254   :  { %v1677_v7 = vpop.f32.mrf.mxu1 }
 0x255   :  { %v6141_v28 = vpop.f32.mrf.mxu0 }
 0x256   :  { %7258 = vst [vmem:[#allocation121_spill] sm:$0xff] %v6141_v28  ;;  %v6143_v37 = vpop.f32.mrf.mxu1 }
 0x257   :  { %7259 = vst [vmem:[#allocation122_spill] sm:$0xff] %v6143_v37  ;;  %v1118_v62 = vpop.f32.mrf.mxu0 }
 0x258   :  { %v1680_v13 = vpop.f32.mrf.mxu1 }
 0x259   :  { %v6147_v56 = vpop.f32.mrf.mxu0  ;;  %2136 = vmatmul.mubr.bf16.gmra.mxu0 %v4883_v12 }
 0x25a   :  { %7260 = vst [vmem:[#allocation123_spill] sm:$0xff] %v6147_v56  ;;  %v6152_v40 = vpop.f32.mrf.mxu1  ;;  %2798 = vmatmul.mubr.bf16.gmra.mxu1 %v4883_v12  ;;  %2143 = vmatprep.mubr.bf16.mxu0 %v4884_v24  ;;  %v4887_v56 = vld [vmem:[%s6987_s0 + $0x130] ss:$8 sps:$4 sm:$0xff]  }
 0x25b   :  { %7261 = vst [vmem:[#allocation124_spill] sm:$0xff] %v6152_v40  ;;  %v1123_v62 = vpop.f32.mrf.mxu0  ;;  %2805 = vmatprep.mubr.bf16.mxu1 %v4884_v24  ;;  %v4886_v24 = vld [vmem:[%s6987_s0 + $0x134] ss:$8 sps:$4 sm:$0xff]  }
 0x25c   :  { %v1685_v7 = vpop.f32.mrf.mxu1 }
 0x25d   :  { %v6159_v13 = vpop.f32.mrf.mxu0 }
 0x25e   :  { %7262 = vst [vmem:[#allocation125_spill] sm:$0xff] %v6159_v13  ;;  %v6161_v49 = vpop.f32.mrf.mxu1 }
 0x25f   :  { %7263 = vst [vmem:[#allocation126_spill] sm:$0xff] %v6161_v49  ;;  %v1126_v28 = vpop.f32.mrf.mxu0 }
 0x260   :  { %v1688_v12 = vpop.f32.mrf.mxu1 }
 0x261   :  { %v6165_v39 = vpop.f32.mrf.mxu0  ;;  %2144 = vmatmul.mubr.bf16.gmra.mxu0 %v4885_v31 }
 0x262   :  { %7264 = vst [vmem:[#allocation127_spill] sm:$0xff] %v6165_v39  ;;  %v6170_v14 = vpop.f32.mrf.mxu1  ;;  %2806 = vmatmul.mubr.bf16.gmra.mxu1 %v4885_v31  ;;  %2151 = vmatprep.mubr.bf16.mxu0 %v4886_v24  ;;  %v4889_v39 = vld [vmem:[%s6987_s0 + $0x140] ss:$8 sps:$4 sm:$0xff]  }
 0x263   :  { %7265 = vst [vmem:[#allocation128_spill] sm:$0xff] %v6170_v14  ;;  %v1131_v28 = vpop.f32.mrf.mxu0  ;;  %2813 = vmatprep.mubr.bf16.mxu1 %v4886_v24  ;;  %v4888_v24 = vld [vmem:[%s6987_s0 + $0x144] ss:$8 sps:$4 sm:$0xff]  }
 0x264   :  { %v1693_v7 = vpop.f32.mrf.mxu1 }
 0x265   :  { %v6177_v12 = vpop.f32.mrf.mxu0 }
 0x266   :  { %7266 = vst [vmem:[#allocation129_spill] sm:$0xff] %v6177_v12  ;;  %v6179_v37 = vpop.f32.mrf.mxu1 }
 0x267   :  { %7267 = vst [vmem:[#allocation130_spill] sm:$0xff] %v6179_v37  ;;  %v1134_v13 = vpop.f32.mrf.mxu0 }
 0x268   :  { %v1696_v31 = vpop.f32.mrf.mxu1 }
 0x269   :  { %v6183_v40 = vpop.f32.mrf.mxu0  ;;  %2152 = vmatmul.mubr.bf16.gmra.mxu0 %v4887_v56 }
 0x26a   :  { %7268 = vst [vmem:[#allocation131_spill] sm:$0xff] %v6183_v40  ;;  %v6188_v62 = vpop.f32.mrf.mxu1  ;;  %2814 = vmatmul.mubr.bf16.gmra.mxu1 %v4887_v56  ;;  %2159 = vmatprep.mubr.bf16.mxu0 %v4888_v24  ;;  %v4891_v40 = vld [vmem:[%s6987_s0 + $0x150] ss:$8 sps:$4 sm:$0xff]  }
 0x26b   :  { %7269 = vst [vmem:[#allocation132_spill] sm:$0xff] %v6188_v62  ;;  %v1139_v13 = vpop.f32.mrf.mxu0  ;;  %2821 = vmatprep.mubr.bf16.mxu1 %v4888_v24  ;;  %v4890_v24 = vld [vmem:[%s6987_s0 + $0x154] ss:$8 sps:$4 sm:$0xff]  }
 0x26c   :  { %v1701_v7 = vpop.f32.mrf.mxu1 }
 0x26d   :  { %v6195_v31 = vpop.f32.mrf.mxu0 }
 0x26e   :  { %7270 = vst [vmem:[#allocation133_spill] sm:$0xff] %v6195_v31  ;;  %v6197_v49 = vpop.f32.mrf.mxu1 }
 0x26f   :  { %7271 = vst [vmem:[#allocation134_spill] sm:$0xff] %v6197_v49  ;;  %v1142_v12 = vpop.f32.mrf.mxu0 }
 0x270   :  { %v1704_v56 = vpop.f32.mrf.mxu1 }
 0x271   :  { %v6201_v14 = vpop.f32.mrf.mxu0  ;;  %2160 = vmatmul.mubr.bf16.gmra.mxu0 %v4889_v39 }
 0x272   :  { %7272 = vst [vmem:[#allocation135_spill] sm:$0xff] %v6201_v14  ;;  %v6206_v28 = vpop.f32.mrf.mxu1  ;;  %2822 = vmatmul.mubr.bf16.gmra.mxu1 %v4889_v39  ;;  %2167 = vmatprep.mubr.bf16.mxu0 %v4890_v24  ;;  %v4893_v14 = vld [vmem:[%s6987_s0 + $0x160] ss:$8 sps:$4 sm:$0xff]  }
 0x273   :  { %7273 = vst [vmem:[#allocation136_spill] sm:$0xff] %v6206_v28  ;;  %v1147_v12 = vpop.f32.mrf.mxu0  ;;  %2829 = vmatprep.mubr.bf16.mxu1 %v4890_v24  ;;  %v4892_v24 = vld [vmem:[%s6987_s0 + $0x164] ss:$8 sps:$4 sm:$0xff]  }
 0x274   :  { %v1709_v7 = vpop.f32.mrf.mxu1 }
 0x275   :  { %v6213_v56 = vpop.f32.mrf.mxu0 }
 0x276   :  { %7274 = vst [vmem:[#allocation137_spill] sm:$0xff] %v6213_v56  ;;  %v6215_v37 = vpop.f32.mrf.mxu1 }
 0x277   :  { %7275 = vst [vmem:[#allocation138_spill] sm:$0xff] %v6215_v37  ;;  %v1150_v31 = vpop.f32.mrf.mxu0 }
 0x278   :  { %v1712_v39 = vpop.f32.mrf.mxu1 }
 0x279   :  { %v6219_v62 = vpop.f32.mrf.mxu0  ;;  %2168 = vmatmul.mubr.bf16.gmra.mxu0 %v4891_v40 }
 0x27a   :  { %7276 = vst [vmem:[#allocation139_spill] sm:$0xff] %v6219_v62  ;;  %v6224_v13 = vpop.f32.mrf.mxu1  ;;  %2830 = vmatmul.mubr.bf16.gmra.mxu1 %v4891_v40  ;;  %2175 = vmatprep.mubr.bf16.mxu0 %v4892_v24  ;;  %v4895_v62 = vld [vmem:[%s6987_s0 + $0x170] ss:$8 sps:$4 sm:$0xff]  }
 0x27b   :  { %7277 = vst [vmem:[#allocation140_spill] sm:$0xff] %v6224_v13  ;;  %v1155_v31 = vpop.f32.mrf.mxu0  ;;  %2837 = vmatprep.mubr.bf16.mxu1 %v4892_v24  ;;  %v4894_v24 = vld [vmem:[%s6987_s0 + $0x174] ss:$8 sps:$4 sm:$0xff]  }
 0x27c   :  { %v1717_v7 = vpop.f32.mrf.mxu1 }
 0x27d   :  { %v6231_v39 = vpop.f32.mrf.mxu0 }
 0x27e   :  { %7278 = vst [vmem:[#allocation141_spill] sm:$0xff] %v6231_v39  ;;  %v6233_v49 = vpop.f32.mrf.mxu1 }
 0x27f   :  { %7279 = vst [vmem:[#allocation142_spill] sm:$0xff] %v6233_v49  ;;  %v1158_v56 = vpop.f32.mrf.mxu0 }
 0x280   :  { %v1720_v40 = vpop.f32.mrf.mxu1 }
 0x281   :  { %v6237_v28 = vpop.f32.mrf.mxu0  ;;  %2176 = vmatmul.mubr.bf16.gmra.mxu0 %v4893_v14 }
 0x282   :  { %7280 = vst [vmem:[#allocation143_spill] sm:$0xff] %v6237_v28  ;;  %v6242_v12 = vpop.f32.mrf.mxu1  ;;  %2838 = vmatmul.mubr.bf16.gmra.mxu1 %v4893_v14  ;;  %2183 = vmatprep.mubr.bf16.mxu0 %v4894_v24  ;;  %v4897_v28 = vld [vmem:[%s6987_s0 + $0x180] ss:$8 sps:$4 sm:$0xff]  }
 0x283   :  { %7281 = vst [vmem:[#allocation144_spill] sm:$0xff] %v6242_v12  ;;  %v1163_v56 = vpop.f32.mrf.mxu0  ;;  %2845 = vmatprep.mubr.bf16.mxu1 %v4894_v24  ;;  %v4896_v24 = vld [vmem:[%s6987_s0 + $0x184] ss:$8 sps:$4 sm:$0xff]  }
 0x284   :  { %v1725_v7 = vpop.f32.mrf.mxu1  ;;  %v4898_v56 = vld [vmem:[%s6987_s0 + $0x194] ss:$8 sps:$4 sm:$0xff]  }
 0x285   :  { %v6249_v40 = vpop.f32.mrf.mxu0 }
 0x286   :  { %7282 = vst [vmem:[#allocation145_spill] sm:$0xff] %v6249_v40  ;;  %v6251_v37 = vpop.f32.mrf.mxu1 }
 0x287   :  { %7283 = vst [vmem:[#allocation146_spill] sm:$0xff] %v6251_v37  ;;  %v1166_v39 = vpop.f32.mrf.mxu0 }
 0x288   :  { %v1728_v14 = vpop.f32.mrf.mxu1 }
 0x289   :  { %v6255_v13 = vpop.f32.mrf.mxu0  ;;  %2184 = vmatmul.mubr.bf16.gmra.mxu0 %v4895_v62 }
 0x28a   :  { %7284 = vst [vmem:[#allocation147_spill] sm:$0xff] %v6255_v13  ;;  %v6260_v31 = vpop.f32.mrf.mxu1  ;;  %2846 = vmatmul.mubr.bf16.gmra.mxu1 %v4895_v62  ;;  %2191 = vmatprep.mubr.bf16.mxu0 %v4896_v24 }
 0x28b   :  { %7285 = vst [vmem:[#allocation148_spill] sm:$0xff] %v6260_v31  ;;  %v1171_v39 = vpop.f32.mrf.mxu0  ;;  %2853 = vmatprep.mubr.bf16.mxu1 %v4896_v24 }
 0x28c   :  { %v1733_v7 = vpop.f32.mrf.mxu1  ;;  %v7288_v39 = vmax.f32 %v5357_v47, %v5359_v48  ;;  %v7289_v47 = vmax.f32 %v5363_v52, %v5368_v54  ;;  %v4900_v54 = vld [vmem:[%s6987_s0 + $0x1a4] ss:$8 sps:$4 sm:$0xff]  }
 0x28d   :  { %v6267_v14 = vpop.f32.mrf.mxu0 }
 0x28e   :  { %7286 = vst [vmem:[#allocation149_spill] sm:$0xff] %v6267_v14  ;;  %v6269_v49 = vpop.f32.mrf.mxu1 }
 0x28f   :  { %7287 = vst [vmem:[#allocation150_spill] sm:$0xff] %v6269_v49  ;;  %v1174_v40 = vpop.f32.mrf.mxu0  ;;  %v6285_v49 = vld [vmem:[%s6988_s2] ss:$0 sm:$0xff] }
 0x290   :  { %v1736_v62 = vpop.f32.mrf.mxu1 }
 0x291   :  { %v2001_v12 = vpop.f32.mrf.mxu0  ;;  %2192 = vmatmul.mubr.bf16.gmra.mxu0 %v4897_v28 }
 0x292   :  { %v2400_v24 = vmax.f32 %v7288_v39, %v2001_v12  ;;  %v2663_v7 = vpop.f32.mrf.mxu1  ;;  %2854 = vmatmul.mubr.bf16.gmra.mxu1 %v4897_v28  ;;  %2199 = vmatprep.mubr.bf16.mxu0 %v4898_v56 }
 0x293   :  { %v2003_v37 = vpop.f32.mrf.mxu0  ;;  %2861 = vmatprep.mubr.bf16.mxu1 %v4898_v56  ;;  %v4899_v56 = vld [vmem:[%s6987_s0 + $0x190] ss:$8 sps:$4 sm:$0xff]  }
 0x294   :  { %v3062_v40 = vmax.f32 %v2400_v24, %v2663_v7  ;;  %v2665_v62 = vpop.f32.mrf.mxu1  ;;  %v7290_v7 = vmax.f32 %v5378_v60, %v5380_v61 }
 0x295   :  { %v2004_v14 = vpop.f32.mrf.mxu0 }
 0x296   :  { %v2401_v48 = vmax.f32 %v7289_v47, %v2004_v14  ;;  %v2666_v28 = vpop.f32.mrf.mxu1  ;;  %v3169_v39 = vadd.f32 %v6285_v49, %v3062_v40 }
 0x297   :  { %v2006_v12 = vpop.f32.mrf.mxu0 }
 0x298   :  { %v3063_v31 = vmax.f32 %v2401_v48, %v2666_v28  ;;  %v2668_v13 = vpop.f32.mrf.mxu1  ;;  %v3269_v14 = vmax.f32 %v3169_v39, 0.0 }
 0x299   :  { %v2009_v37 = vpop.f32.mrf.mxu0  ;;  %2200 = vmatmul.mubr.bf16.gmra.mxu0 %v4899_v56 }
 0x29a   :  { %v3170_v24 = vadd.f32 %v6285_v49, %v3063_v31  ;;  %v2402_v62 = vmax.f32 %v7290_v7, %v2009_v37  ;;  %v2671_v52 = vpop.f32.mrf.mxu1  ;;  %2862 = vmatmul.mubr.bf16.gmra.mxu1 %v4899_v56  ;;  %2207 = vmatprep.mubr.bf16.mxu0 %v4900_v54  ;;  %v7291_v31 = vmax.f32 %v5388_v3, %v5393_v5 }
 0x29b   :  { %v2011_v13 = vpop.f32.mrf.mxu0  ;;  %2869 = vmatprep.mubr.bf16.mxu1 %v4900_v54  ;;  %v7292_v3 = vmax.f32 %v5401_v10, %v5403_v11 }
 0x29c   :  { %v3270_v40 = vmax.f32 %v3170_v24, 0.0  ;;  %v3064_v47 = vmax.f32 %v2402_v62, %v2671_v52  ;;  %v2673_v48 = vpop.f32.mrf.mxu1  ;;  %v4901_v24 = vld [vmem:[%s6987_s0 + $0x1a0] ss:$8 sps:$4 sm:$0xff]   ;;  %v4902_v13 = vld [vmem:[%s6987_s0 + $0x1b4] ss:$8 sps:$4 sm:$0xff]  }
 0x29d   :  { %v2012_v28 = vpop.f32.mrf.mxu0 }
 0x29e   :  { %v4337_v12 = vpack.c.bf16 %v3270_v40, %v3269_v14  ;;  %v2403_v60 = vmax.f32 %v7291_v31, %v2012_v28  ;;  %v2674_v61 = vpop.f32.mrf.mxu1  ;;  %v3171_v56 = vadd.f32 %v6285_v49, %v3064_v47 }
 0x29f   :  { %v2014_v37 = vpop.f32.mrf.mxu0 }
 0x2a0   :  { %4338 = vst [vmem:[%s6989_s3] sm:$0xff] %v4337_v12   ;;  %v3065_v7 = vmax.f32 %v2403_v60, %v2674_v61  ;;  %v2676_v54 = vpop.f32.mrf.mxu1  ;;  %v3271_v40 = vmax.f32 %v3171_v56, 0.0  ;;  %v7293_v60 = vmax.f32 %v5407_v15, %v5412_v17  ;;  %v7294_v15 = vmax.f32 %v5419_v22, %v5421_v23 }
 0x2a1   :  { %v2017_v39 = vpop.f32.mrf.mxu0  ;;  %2208 = vmatmul.mubr.bf16.gmra.mxu0 %v4901_v24 }
 0x2a2   :  { %v3172_v62 = vadd.f32 %v6285_v49, %v3065_v7  ;;  %v2404_v5 = vmax.f32 %v7292_v3, %v2017_v39  ;;  %v2679_v52 = vpop.f32.mrf.mxu1  ;;  %2870 = vmatmul.mubr.bf16.gmra.mxu1 %v4901_v24  ;;  %2215 = vmatprep.mubr.bf16.mxu0 %v4902_v13  ;;  %v4903_v39 = vld [vmem:[%s6987_s0 + $0x1b0] ss:$8 sps:$4 sm:$0xff]   ;;  %v4904_v3 = vld [vmem:[%s6987_s0 + $0x1c4] ss:$8 sps:$4 sm:$0xff]  }
 0x2a3   :  { %v2019_v14 = vpop.f32.mrf.mxu0  ;;  %2877 = vmatprep.mubr.bf16.mxu1 %v4902_v13 }
 0x2a4   :  { %v3272_v47 = vmax.f32 %v3172_v62, 0.0  ;;  %v3066_v48 = vmax.f32 %v2404_v5, %v2679_v52  ;;  %v2681_v28 = vpop.f32.mrf.mxu1 }
 0x2a5   :  { %v2020_v12 = vpop.f32.mrf.mxu0  ;;  %v7295_v28 = vmax.f32 %v5425_v27, %v5430_v29  ;;  %v7296_v27 = vmax.f32 %v5440_v35, %v5442_v36 }
 0x2a6   :  { %v4342_v31 = vpack.c.bf16 %v3272_v47, %v3271_v40  ;;  %v2405_v10 = vmax.f32 %v7293_v60, %v2020_v12  ;;  %v2682_v11 = vpop.f32.mrf.mxu1  ;;  %v3173_v37 = vadd.f32 %v6285_v49, %v3066_v48 }
 0x2a7   :  { %v2022_v61 = vpop.f32.mrf.mxu0 }
 0x2a8   :  { %4584 = vst [vmem:[%s6989_s3 + $0x8] sm:$0xff] %v4342_v31   ;;  %v3067_v7 = vmax.f32 %v2405_v10, %v2682_v11  ;;  %v2684_v54 = vpop.f32.mrf.mxu1  ;;  %v3273_v52 = vmax.f32 %v3173_v37, 0.0  ;;  %v4905_v61 = vld [vmem:[%s6987_s0 + $0x1c0] ss:$8 sps:$4 sm:$0xff]  }
 0x2a9   :  { %v2025_v56 = vpop.f32.mrf.mxu0  ;;  %2216 = vmatmul.mubr.bf16.gmra.mxu0 %v4903_v39  ;;  %v4906_v54 = vld [vmem:[%s6987_s0 + $0x1d4] ss:$8 sps:$4 sm:$0xff]  }
 0x2aa   :  { %v3174_v24 = vadd.f32 %v6285_v49, %v3067_v7  ;;  %v2406_v17 = vmax.f32 %v7294_v15, %v2025_v56  ;;  %v2687_v62 = vpop.f32.mrf.mxu1  ;;  %2878 = vmatmul.mubr.bf16.gmra.mxu1 %v4903_v39  ;;  %2223 = vmatprep.mubr.bf16.mxu0 %v4904_v3 }
 0x2ab   :  { %v2027_v5 = vpop.f32.mrf.mxu0  ;;  %2885 = vmatprep.mubr.bf16.mxu1 %v4904_v3 }
 0x2ac   :  { %v3274_v13 = vmax.f32 %v3174_v24, 0.0  ;;  %v3068_v14 = vmax.f32 %v2406_v17, %v2687_v62  ;;  %v2689_v40 = vpop.f32.mrf.mxu1  ;;  %v7297_v5 = vmax.f32 %v5450_v41, %v5455_v43  ;;  %v7298_v41 = vmax.f32 %v5463_v51, %v5465_v53 }
 0x2ad   :  { %v2028_v47 = vpop.f32.mrf.mxu0 }
 0x2ae   :  { %v4347_v48 = vpack.c.bf16 %v3274_v13, %v3273_v52  ;;  %v2407_v22 = vmax.f32 %v7295_v28, %v2028_v47  ;;  %v2690_v23 = vpop.f32.mrf.mxu1  ;;  %v3175_v31 = vadd.f32 %v6285_v49, %v3068_v14 }
 0x2af   :  { %v2030_v12 = vpop.f32.mrf.mxu0 }
 0x2b0   :  { %4585 = vst [vmem:[%s6989_s3 + $0x10] sm:$0xff] %v4347_v48   ;;  %v3069_v60 = vmax.f32 %v2407_v22, %v2690_v23  ;;  %v2692_v10 = vpop.f32.mrf.mxu1  ;;  %v3275_v39 = vmax.f32 %v3175_v31, 0.0  ;;  %v4907_v48 = vld [vmem:[%s6987_s0 + $0x1d0] ss:$8 sps:$4 sm:$0xff]   ;;  %v4908_v23 = vld [vmem:[%s6987_s0 + $0x1e4] ss:$8 sps:$4 sm:$0xff]  }
 0x2b1   :  { %v2033_v11 = vpop.f32.mrf.mxu0  ;;  %2224 = vmatmul.mubr.bf16.gmra.mxu0 %v4905_v61 }
 0x2b2   :  { %v3176_v37 = vadd.f32 %v6285_v49, %v3069_v60  ;;  %v2408_v29 = vmax.f32 %v7296_v27, %v2033_v11  ;;  %v2695_v7 = vpop.f32.mrf.mxu1  ;;  %2886 = vmatmul.mubr.bf16.gmra.mxu1 %v4905_v61  ;;  %2231 = vmatprep.mubr.bf16.mxu0 %v4906_v54  ;;  %v7299_v27 = vmax.f32 %v5469_v59, %v5474_v63 }
 0x2b3   :  { %v2035_v56 = vpop.f32.mrf.mxu0  ;;  %2893 = vmatprep.mubr.bf16.mxu1 %v4906_v54  ;;  %v7300_v59 = vmax.f32 %v5481_v8, %v5483_v9 }
 0x2b4   :  { %v3276_v24 = vmax.f32 %v3176_v37, 0.0  ;;  %v3070_v15 = vmax.f32 %v2408_v29, %v2695_v7  ;;  %v2697_v17 = vpop.f32.mrf.mxu1 }
 0x2b5   :  { %v2036_v62 = vpop.f32.mrf.mxu0 }
 0x2b6   :  { %v4352_v3 = vpack.c.bf16 %v3276_v24, %v3275_v39  ;;  %v2409_v35 = vmax.f32 %v7297_v5, %v2036_v62  ;;  %v2698_v36 = vpop.f32.mrf.mxu1  ;;  %v3177_v13 = vadd.f32 %v6285_v49, %v3070_v15  ;;  %v4909_v24 = vld [vmem:[%s6987_s0 + $0x1e0] ss:$8 sps:$4 sm:$0xff]   ;;  %v4910_v62 = vld [vmem:[%s6987_s0 + $0x1f4] ss:$8 sps:$4 sm:$0xff]  }
 0x2b7   :  { %v2038_v52 = vpop.f32.mrf.mxu0 }
 0x2b8   :  { %4586 = vst [vmem:[%s6989_s3 + $0x18] sm:$0xff] %v4352_v3   ;;  %v3071_v14 = vmax.f32 %v2409_v35, %v2698_v36  ;;  %v2700_v40 = vpop.f32.mrf.mxu1  ;;  %v3277_v31 = vmax.f32 %v3177_v13, 0.0 }
 0x2b9   :  { %v2041_v47 = vpop.f32.mrf.mxu0  ;;  %2232 = vmatmul.mubr.bf16.gmra.mxu0 %v4907_v48  ;;  %v7301_v40 = vmax.f32 %v5487_v18, %v5492_v21  ;;  %v7302_v18 = vmax.f32 %v5499_v32, %v5501_v33 }
 0x2ba   :  { %v3178_v28 = vadd.f32 %v6285_v49, %v3071_v14  ;;  %v2410_v43 = vmax.f32 %v7298_v41, %v2041_v47  ;;  %v2703_v22 = vpop.f32.mrf.mxu1  ;;  %2894 = vmatmul.mubr.bf16.gmra.mxu1 %v4907_v48  ;;  %2239 = vmatprep.mubr.bf16.mxu0 %v4908_v23 }
 0x2bb   :  { %v2043_v12 = vpop.f32.mrf.mxu0  ;;  %2901 = vmatprep.mubr.bf16.mxu1 %v4908_v23 }
 0x2bc   :  { %v3278_v60 = vmax.f32 %v3178_v28, 0.0  ;;  %v3072_v10 = vmax.f32 %v2410_v43, %v2703_v22  ;;  %v2705_v11 = vpop.f32.mrf.mxu1  ;;  %v4911_v22 = vld [vmem:[%s6987_s0 + $0x1f0] ss:$8 sps:$4 sm:$0xff]  }
 0x2bd   :  { %v2044_v61 = vpop.f32.mrf.mxu0 }
 0x2be   :  { %v4357_v37 = vpack.c.bf16 %v3278_v60, %v3277_v31  ;;  %v2411_v51 = vmax.f32 %v7299_v27, %v2044_v61  ;;  %v2706_v53 = vpop.f32.mrf.mxu1  ;;  %v3179_v7 = vadd.f32 %v6285_v49, %v3072_v10  ;;  %v4912_v31 = vld [vmem:[%s6987_s0 + $0x204] ss:$8 sps:$4 sm:$0xff]  }
 0x2bf   :  { %v2046_v29 = vpop.f32.mrf.mxu0 }
 0x2c0   :  { %4587 = vst [vmem:[%s6989_s3 + $0x20] sm:$0xff] %v4357_v37   ;;  %v3073_v54 = vmax.f32 %v2411_v51, %v2706_v53  ;;  %v2708_v56 = vpop.f32.mrf.mxu1  ;;  %v3279_v5 = vmax.f32 %v3179_v7, 0.0  ;;  %v7303_v53 = vmax.f32 %v5511_v44, %v5516_v50  ;;  %v7304_v44 = vmax.f32 %v5523_v4, %v5525_v6 }
 0x2c1   :  { %v2049_v39 = vpop.f32.mrf.mxu0  ;;  %2240 = vmatmul.mubr.bf16.gmra.mxu0 %v4909_v24 }
 0x2c2   :  { %v3180_v15 = vadd.f32 %v6285_v49, %v3073_v54  ;;  %v2412_v63 = vmax.f32 %v7300_v59, %v2049_v39  ;;  %v2711_v17 = vpop.f32.mrf.mxu1  ;;  %2902 = vmatmul.mubr.bf16.gmra.mxu1 %v4909_v24  ;;  %2247 = vmatprep.mubr.bf16.mxu0 %v4910_v62  ;;  %v4913_v24 = vld [vmem:[%s6987_s0 + $0x200] ss:$8 sps:$4 sm:$0xff]  }
 0x2c3   :  { %v2051_v3 = vpop.f32.mrf.mxu0  ;;  %2909 = vmatprep.mubr.bf16.mxu1 %v4910_v62 }
 0x2c4   :  { %v3280_v35 = vmax.f32 %v3180_v15, 0.0  ;;  %v3074_v36 = vmax.f32 %v2412_v63, %v2711_v17  ;;  %v2713_v52 = vpop.f32.mrf.mxu1  ;;  %v4914_v63 = vld [vmem:[%s6987_s0 + $0x214] ss:$8 sps:$4 sm:$0xff]  }
 0x2c5   :  { %v2052_v13 = vpop.f32.mrf.mxu0 }
 0x2c6   :  { %v4362_v14 = vpack.c.bf16 %v3280_v35, %v3279_v5  ;;  %v2413_v8 = vmax.f32 %v7301_v40, %v2052_v13  ;;  %v2714_v9 = vpop.f32.mrf.mxu1  ;;  %v3181_v48 = vadd.f32 %v6285_v49, %v3074_v36  ;;  %v7305_v13 = vmax.f32 %v5529_v25, %v5534_v30 }
 0x2c7   :  { %v2054_v47 = vpop.f32.mrf.mxu0  ;;  %v7306_v25 = vmax.f32 %v5541_v46, %v5543_v57 }
 0x2c8   :  { %4588 = vst [vmem:[%s6989_s3 + $0x28] sm:$0xff] %v4362_v14   ;;  %v3075_v28 = vmax.f32 %v2413_v8, %v2714_v9  ;;  %v2716_v41 = vpop.f32.mrf.mxu1  ;;  %v3281_v10 = vmax.f32 %v3181_v48, 0.0  ;;  %v4915_v48 = vld [vmem:[%s6987_s0 + $0x210] ss:$8 sps:$4 sm:$0xff]  }
 0x2c9   :  { %v2057_v43 = vpop.f32.mrf.mxu0  ;;  %2248 = vmatmul.mubr.bf16.gmra.mxu0 %v4911_v22 }
 0x2ca   :  { %v3182_v23 = vadd.f32 %v6285_v49, %v3075_v28  ;;  %v2414_v21 = vmax.f32 %v7302_v18, %v2057_v43  ;;  %v2719_v12 = vpop.f32.mrf.mxu1  ;;  %2910 = vmatmul.mubr.bf16.gmra.mxu1 %v4911_v22  ;;  %2255 = vmatprep.mubr.bf16.mxu0 %v4912_v31  ;;  %v4916_v43 = vld [vmem:[%s6987_s0 + $0x224] ss:$8 sps:$4 sm:$0xff]  }
 0x2cb   :  { %v2059_v60 = vpop.f32.mrf.mxu0  ;;  %2917 = vmatprep.mubr.bf16.mxu1 %v4912_v31 }
 0x2cc   :  { %v3282_v11 = vmax.f32 %v3182_v23, 0.0  ;;  %v3076_v61 = vmax.f32 %v2414_v21, %v2719_v12  ;;  %v2721_v37 = vpop.f32.mrf.mxu1 }
 0x2cd   :  { %v2060_v27 = vpop.f32.mrf.mxu0 }
 0x2ce   :  { %v4367_v51 = vpack.c.bf16 %v3282_v11, %v3281_v10  ;;  %v2415_v32 = vmax.f32 %v7303_v53, %v2060_v27  ;;  %v2722_v33 = vpop.f32.mrf.mxu1  ;;  %v3183_v7 = vadd.f32 %v6285_v49, %v3076_v61  ;;  %v7307_v10 = vmax.f32 %v5547_v20, %v5552_v42  ;;  %v4917_v53 = vld [vmem:[%s6987_s0 + $0x220] ss:$8 sps:$4 sm:$0xff]  }
 0x2cf   :  { %v2062_v29 = vpop.f32.mrf.mxu0  ;;  %v7308_v20 = vmax.f32 %v5559_v1, %v5561_v38 }
 0x2d0   :  { %4589 = vst [vmem:[%s6989_s3 + $0x30] sm:$0xff] %v4367_v51   ;;  %v3077_v54 = vmax.f32 %v2415_v32, %v2722_v33  ;;  %v2724_v56 = vpop.f32.mrf.mxu1  ;;  %v3283_v62 = vmax.f32 %v3183_v7, 0.0  ;;  %v4918_v29 = vld [vmem:[%s6987_s0 + $0x234] ss:$8 sps:$4 sm:$0xff]  }
 0x2d1   :  { %v2065_v39 = vpop.f32.mrf.mxu0  ;;  %2256 = vmatmul.mubr.bf16.gmra.mxu0 %v4913_v24 }
 0x2d2   :  { %v3184_v15 = vadd.f32 %v6285_v49, %v3077_v54  ;;  %v2416_v50 = vmax.f32 %v7304_v44, %v2065_v39  ;;  %v2727_v59 = vpop.f32.mrf.mxu1  ;;  %2918 = vmatmul.mubr.bf16.gmra.mxu1 %v4913_v24  ;;  %2263 = vmatprep.mubr.bf16.mxu0 %v4914_v63 }
 0x2d3   :  { %v2067_v17 = vpop.f32.mrf.mxu0  ;;  %2925 = vmatprep.mubr.bf16.mxu1 %v4914_v63 }
 0x2d4   :  { %v3284_v3 = vmax.f32 %v3184_v15, 0.0  ;;  %v3078_v5 = vmax.f32 %v2416_v50, %v2727_v59  ;;  %v2729_v35 = vpop.f32.mrf.mxu1  ;;  %v7309_v50 = vmax.f32 %v5565_v26, %v5570_v0  ;;  %v7310_v26 = vmax.f32 %v5577_v58, %v5579_v34 }
 0x2d5   :  { %v2068_v36 = vpop.f32.mrf.mxu0 }
 0x2d6   :  { %v4372_v52 = vpack.c.bf16 %v3284_v3, %v3283_v62  ;;  %v2417_v4 = vmax.f32 %v7305_v13, %v2068_v36  ;;  %v2730_v6 = vpop.f32.mrf.mxu1  ;;  %v3185_v40 = vadd.f32 %v6285_v49, %v3078_v5  ;;  %v4919_v5 = vld [vmem:[%s6987_s0 + $0x230] ss:$8 sps:$4 sm:$0xff]  }
 0x2d7   :  { %v2070_v14 = vpop.f32.mrf.mxu0 }
 0x2d8   :  { %4590 = vst [vmem:[%s6989_s3 + $0x38] sm:$0xff] %v4372_v52   ;;  %v3079_v8 = vmax.f32 %v2417_v4, %v2730_v6  ;;  %v2732_v9 = vpop.f32.mrf.mxu1  ;;  %v3285_v23 = vmax.f32 %v3185_v40, 0.0  ;;  %v4920_v52 = vld [vmem:[%s6987_s0 + $0x244] ss:$8 sps:$4 sm:$0xff]  }
 0x2d9   :  { %v2073_v47 = vpop.f32.mrf.mxu0  ;;  %2264 = vmatmul.mubr.bf16.gmra.mxu0 %v4915_v48 }
 0x2da   :  { %v3186_v28 = vadd.f32 %v6285_v49, %v3079_v8  ;;  %v2418_v30 = vmax.f32 %v7306_v25, %v2073_v47  ;;  %v2735_v41 = vpop.f32.mrf.mxu1  ;;  %2926 = vmatmul.mubr.bf16.gmra.mxu1 %v4915_v48  ;;  %2271 = vmatprep.mubr.bf16.mxu0 %v4916_v43  ;;  %v7311_v47 = vmax.f32 %v5583_v45, %v5588_v16 }
 0x2db   :  { %v2075_v22 = vpop.f32.mrf.mxu0  ;;  %2933 = vmatprep.mubr.bf16.mxu1 %v4916_v43  ;;  %v4921_v43 = vld [vmem:[%s6987_s0 + $0x240] ss:$8 sps:$4 sm:$0xff]   ;;  %v7312_v45 = vmax.f32 %v5595_v2, %v5597_v55 }
 0x2dc   :  { %v3286_v18 = vmax.f32 %v3186_v28, 0.0  ;;  %v3080_v21 = vmax.f32 %v2418_v30, %v2735_v41  ;;  %v2737_v12 = vpop.f32.mrf.mxu1 }
 0x2dd   :  { %v2076_v31 = vpop.f32.mrf.mxu0 }
 0x2de   :  { %v4377_v60 = vpack.c.bf16 %v3286_v18, %v3285_v23  ;;  %v2419_v46 = vmax.f32 %v7307_v10, %v2076_v31  ;;  %v2738_v57 = vpop.f32.mrf.mxu1  ;;  %v3187_v61 = vadd.f32 %v6285_v49, %v3080_v21  ;;  %v4922_v18 = vld [vmem:[%s6987_s0 + $0x254] ss:$8 sps:$4 sm:$0xff]  }
 0x2df   :  { %v2078_v11 = vpop.f32.mrf.mxu0 }
 0x2e0   :  { %4591 = vst [vmem:[%s6989_s3 + $0x40] sm:$0xff] %v4377_v60   ;;  %v3081_v37 = vmax.f32 %v2419_v46, %v2738_v57  ;;  %v2740_v27 = vpop.f32.mrf.mxu1  ;;  %v3287_v54 = vmax.f32 %v3187_v61, 0.0  ;;  %v7313_v11 = vld [vmem:[#allocation2_spill] sm:$0xff] }
 0x2e1   :  { %v2081_v51 = vpop.f32.mrf.mxu0  ;;  %2272 = vmatmul.mubr.bf16.gmra.mxu0 %v4917_v53  ;;  %v7314_v61 = vmax.f32 %v5601_v19, %v7313_v11  ;;  %v7315_v19 = vld [vmem:[#allocation3_spill] sm:$0xff] }
 0x2e2   :  { %v3188_v32 = vadd.f32 %v6285_v49, %v3081_v37  ;;  %v2420_v42 = vmax.f32 %v7308_v20, %v2081_v51  ;;  %v2743_v33 = vpop.f32.mrf.mxu1  ;;  %2934 = vmatmul.mubr.bf16.gmra.mxu1 %v4917_v53  ;;  %2279 = vmatprep.mubr.bf16.mxu0 %v4918_v29  ;;  %v4923_v20 = vld [vmem:[%s6987_s0 + $0x250] ss:$8 sps:$4 sm:$0xff]  }
 0x2e3   :  { %v2083_v7 = vpop.f32.mrf.mxu0  ;;  %2941 = vmatprep.mubr.bf16.mxu1 %v4918_v29 }
 0x2e4   :  { %v3288_v56 = vmax.f32 %v3188_v32, 0.0  ;;  %v3082_v39 = vmax.f32 %v2420_v42, %v2743_v33  ;;  %v2745_v24 = vpop.f32.mrf.mxu1  ;;  %v7316_v33 = vld [vmem:[#allocation4_spill] sm:$0xff] }
 0x2e5   :  { %v2084_v15 = vpop.f32.mrf.mxu0  ;;  %v7317_v29 = vmax.f32 %v7315_v19, %v7316_v33  ;;  %v7330_v19 = vld [vmem:[#allocation13_spill] sm:$0xff]  ;;  %v7331_v33 = vld [vmem:[#allocation14_spill] sm:$0xff] }
 0x2e6   :  { %v4382_v44 = vpack.c.bf16 %v3288_v56, %v3287_v54  ;;  %v2421_v1 = vmax.f32 %v7309_v50, %v2084_v15  ;;  %v2746_v38 = vpop.f32.mrf.mxu1  ;;  %v3189_v63 = vadd.f32 %v6285_v49, %v3082_v39  ;;  %v4924_v56 = vld [vmem:[%s6987_s0 + $0x264] ss:$8 sps:$4 sm:$0xff]  }
 0x2e7   :  { %v2086_v59 = vpop.f32.mrf.mxu0 }
 0x2e8   :  { %4592 = vst [vmem:[%s6989_s3 + $0x48] sm:$0xff] %v4382_v44   ;;  %v3083_v17 = vmax.f32 %v2421_v1, %v2746_v38  ;;  %v2748_v62 = vpop.f32.mrf.mxu1  ;;  %v3289_v4 = vmax.f32 %v3189_v63, 0.0  ;;  %v7318_v59 = vld [vmem:[#allocation5_spill] sm:$0xff]  ;;  %v7319_v63 = vld [vmem:[#allocation6_spill] sm:$0xff] }
 0x2e9   :  { %v2089_v3 = vpop.f32.mrf.mxu0  ;;  %2280 = vmatmul.mubr.bf16.gmra.mxu0 %v4919_v5 }
 0x2ea   :  { %v3190_v35 = vadd.f32 %v6285_v49, %v3083_v17  ;;  %v2422_v0 = vmax.f32 %v7310_v26, %v2089_v3  ;;  %v2751_v36 = vpop.f32.mrf.mxu1  ;;  %2942 = vmatmul.mubr.bf16.gmra.mxu1 %v4919_v5  ;;  %2287 = vmatprep.mubr.bf16.mxu0 %v4920_v52  ;;  %v7320_v17 = vmax.f32 %v7318_v59, %v7319_v63  ;;  %v7334_v59 = vld [vmem:[#allocation16_spill] sm:$0xff] }
 0x2eb   :  { %v2091_v13 = vpop.f32.mrf.mxu0  ;;  %2949 = vmatprep.mubr.bf16.mxu1 %v4920_v52  ;;  %v4925_v52 = vld [vmem:[%s6987_s0 + $0x260] ss:$8 sps:$4 sm:$0xff]  }
 0x2ec   :  { %v3290_v6 = vmax.f32 %v3190_v35, 0.0  ;;  %v3084_v14 = vmax.f32 %v2422_v0, %v2751_v36  ;;  %v2753_v40 = vpop.f32.mrf.mxu1 }
 0x2ed   :  { %v2092_v8 = vpop.f32.mrf.mxu0 }
 0x2ee   :  { %v4387_v9 = vpack.c.bf16 %v3290_v6, %v3289_v4  ;;  %v2423_v58 = vmax.f32 %v7311_v47, %v2092_v8  ;;  %v2754_v34 = vpop.f32.mrf.mxu1  ;;  %v3191_v28 = vadd.f32 %v6285_v49, %v3084_v14  ;;  %v7321_v4 = vld [vmem:[#allocation7_spill] sm:$0xff]  ;;  %v7322_v6 = vld [vmem:[#allocation8_spill] sm:$0xff] }
 0x2ef   :  { %v2094_v48 = vpop.f32.mrf.mxu0  ;;  %v7323_v14 = vmax.f32 %v7321_v4, %v7322_v6  ;;  %v7336_v4 = vld [vmem:[#allocation17_spill] sm:$0xff]  ;;  %v7337_v6 = vld [vmem:[#allocation18_spill] sm:$0xff] }
 0x2f0   :  { %4593 = vst [vmem:[%s6989_s3 + $0x50] sm:$0xff] %v4387_v9   ;;  %v3085_v25 = vmax.f32 %v2423_v58, %v2754_v34  ;;  %v2756_v30 = vpop.f32.mrf.mxu1  ;;  %v3291_v12 = vmax.f32 %v3191_v28, 0.0  ;;  %v4926_v9 = vld [vmem:[%s6987_s0 + $0x274] ss:$8 sps:$4 sm:$0xff]  }
 0x2f1   :  { %v2097_v41 = vpop.f32.mrf.mxu0  ;;  %2288 = vmatmul.mubr.bf16.gmra.mxu0 %v4921_v43 }
 0x2f2   :  { %v3192_v22 = vadd.f32 %v6285_v49, %v3085_v25  ;;  %v2424_v16 = vmax.f32 %v7312_v45, %v2097_v41  ;;  %v2759_v23 = vpop.f32.mrf.mxu1  ;;  %2950 = vmatmul.mubr.bf16.gmra.mxu1 %v4921_v43  ;;  %2295 = vmatprep.mubr.bf16.mxu0 %v4922_v18  ;;  %v7324_v41 = vld [vmem:[#allocation9_spill] sm:$0xff]  ;;  %v7325_v43 = vld [vmem:[#allocation10_spill] sm:$0xff] }
 0x2f3   :  { %v2099_v21 = vpop.f32.mrf.mxu0  ;;  %2957 = vmatprep.mubr.bf16.mxu1 %v4922_v18 }
 0x2f4   :  { %v3292_v31 = vmax.f32 %v3192_v22, 0.0  ;;  %v3086_v60 = vmax.f32 %v2424_v16, %v2759_v23  ;;  %v2761_v10 = vpop.f32.mrf.mxu1  ;;  %v7326_v22 = vmax.f32 %v7324_v41, %v7325_v43  ;;  %v7340_v41 = vld [vmem:[#allocation20_spill] sm:$0xff] }
 0x2f5   :  { %v2100_v46 = vpop.f32.mrf.mxu0 }
 0x2f6   :  { %v4392_v57 = vpack.c.bf16 %v3292_v31, %v3291_v12  ;;  %v2425_v2 = vmax.f32 %v7314_v61, %v2100_v46  ;;  %v2762_v55 = vpop.f32.mrf.mxu1  ;;  %v3193_v27 = vadd.f32 %v6285_v49, %v3086_v60  ;;  %v4927_v60 = vld [vmem:[%s6987_s0 + $0x270] ss:$8 sps:$4 sm:$0xff]   ;;  %v7327_v46 = vld [vmem:[#allocation11_spill] sm:$0xff] }
 0x2f7   :  { %v2102_v37 = vpop.f32.mrf.mxu0 }
 0x2f8   :  { %4594 = vst [vmem:[%s6989_s3 + $0x58] sm:$0xff] %v4392_v57   ;;  %v3087_v51 = vmax.f32 %v2425_v2, %v2762_v55  ;;  %v2764_v53 = vpop.f32.mrf.mxu1  ;;  %v3293_v24 = vmax.f32 %v3193_v27, 0.0  ;;  %v7328_v57 = vld [vmem:[#allocation12_spill] sm:$0xff]  ;;  %v4928_v55 = vld [vmem:[%s6987_s0 + $0x284] ss:$8 sps:$4 sm:$0xff]  }
 0x2f9   :  { %v2105_v32 = vpop.f32.mrf.mxu0  ;;  %2296 = vmatmul.mubr.bf16.gmra.mxu0 %v4923_v20  ;;  %v7329_v11 = vmax.f32 %v7327_v46, %v7328_v57  ;;  %v7342_v46 = vld [vmem:[#allocation21_spill] sm:$0xff]  ;;  %v7343_v57 = vld [vmem:[#allocation22_spill] sm:$0xff] }
 0x2fa   :  { %v3194_v42 = vadd.f32 %v6285_v49, %v3087_v51  ;;  %v2426_v7 = vmax.f32 %v7317_v29, %v2105_v32  ;;  %v2767_v54 = vpop.f32.mrf.mxu1  ;;  %2958 = vmatmul.mubr.bf16.gmra.mxu1 %v4923_v20  ;;  %2303 = vmatprep.mubr.bf16.mxu0 %v4924_v56  ;;  %v7332_v29 = vmax.f32 %v7330_v19, %v7331_v33  ;;  %v7346_v19 = vld [vmem:[#allocation24_spill] sm:$0xff] }
 0x2fb   :  { %v2107_v39 = vpop.f32.mrf.mxu0  ;;  %2965 = vmatprep.mubr.bf16.mxu1 %v4924_v56 }
 0x2fc   :  { %v3294_v15 = vmax.f32 %v3194_v42, 0.0  ;;  %v3088_v44 = vmax.f32 %v2426_v7, %v2767_v54  ;;  %v2769_v50 = vpop.f32.mrf.mxu1 }
 0x2fd   :  { %v2108_v1 = vpop.f32.mrf.mxu0  ;;  %v4929_v50 = vld [vmem:[%s6987_s0 + $0x280] ss:$8 sps:$4 sm:$0xff]  }
 0x2fe   :  { %v4397_v38 = vpack.c.bf16 %v3294_v15, %v3293_v24  ;;  %v2427_v62 = vmax.f32 %v7320_v17, %v2108_v1  ;;  %v2770_v3 = vpop.f32.mrf.mxu1  ;;  %v3195_v35 = vadd.f32 %v6285_v49, %v3088_v44 }
 0x2ff   :  { %v2110_v5 = vpop.f32.mrf.mxu0 }
 0x300   :  { %4595 = vst [vmem:[%s6989_s3 + $0x60] sm:$0xff] %v4397_v38   ;;  %v3089_v26 = vmax.f32 %v2427_v62, %v2770_v3  ;;  %v2772_v0 = vpop.f32.mrf.mxu1  ;;  %v3295_v58 = vmax.f32 %v3195_v35, 0.0  ;;  %v7333_v38 = vld [vmem:[#allocation15_spill] sm:$0xff]  ;;  %v4930_v3 = vld [vmem:[%s6987_s0 + $0x294] ss:$8 sps:$4 sm:$0xff]  }
 0x301   :  { %v2113_v36 = vpop.f32.mrf.mxu0  ;;  %2304 = vmatmul.mubr.bf16.gmra.mxu0 %v4925_v52  ;;  %v7335_v63 = vmax.f32 %v7333_v38, %v7334_v59  ;;  %v7348_v38 = vld [vmem:[#allocation25_spill] sm:$0xff]  ;;  %v7349_v59 = vld [vmem:[#allocation26_spill] sm:$0xff] }
 0x302   :  { %v3196_v13 = vadd.f32 %v6285_v49, %v3089_v26  ;;  %v2428_v40 = vmax.f32 %v7323_v14, %v2113_v36  ;;  %v2775_v8 = vpop.f32.mrf.mxu1  ;;  %2966 = vmatmul.mubr.bf16.gmra.mxu1 %v4925_v52  ;;  %2311 = vmatprep.mubr.bf16.mxu0 %v4926_v9  ;;  %v7338_v14 = vmax.f32 %v7336_v4, %v7337_v6  ;;  %v7352_v4 = vld [vmem:[#allocation28_spill] sm:$0xff] }
 0x303   :  { %v2115_v47 = vpop.f32.mrf.mxu0  ;;  %2973 = vmatprep.mubr.bf16.mxu1 %v4926_v9 }
 0x304   :  { %v3296_v34 = vmax.f32 %v3196_v13, 0.0  ;;  %v3090_v48 = vmax.f32 %v2428_v40, %v2775_v8  ;;  %v2777_v28 = vpop.f32.mrf.mxu1 }
 0x305   :  { %v2116_v25 = vpop.f32.mrf.mxu0  ;;  %v4931_v28 = vld [vmem:[%s6987_s0 + $0x290] ss:$8 sps:$4 sm:$0xff]  }
 0x306   :  { %v4402_v30 = vpack.c.bf16 %v3296_v34, %v3295_v58  ;;  %v2429_v45 = vmax.f32 %v7326_v22, %v2116_v25  ;;  %v2778_v16 = vpop.f32.mrf.mxu1  ;;  %v3197_v18 = vadd.f32 %v6285_v49, %v3090_v48 }
 0x307   :  { %v2118_v23 = vpop.f32.mrf.mxu0 }
 0x308   :  { %4596 = vst [vmem:[%s6989_s3 + $0x68] sm:$0xff] %v4402_v30   ;;  %v3091_v21 = vmax.f32 %v2429_v45, %v2778_v16  ;;  %v2780_v12 = vpop.f32.mrf.mxu1  ;;  %v3297_v27 = vmax.f32 %v3197_v18, 0.0  ;;  %v7339_v30 = vld [vmem:[#allocation19_spill] sm:$0xff] }
 0x309   :  { %v2121_v31 = vpop.f32.mrf.mxu0  ;;  %2312 = vmatmul.mubr.bf16.gmra.mxu0 %v4927_v60  ;;  %v7341_v43 = vmax.f32 %v7339_v30, %v7340_v41  ;;  %v4932_v16 = vld [vmem:[%s6987_s0 + $0x2a4] ss:$8 sps:$4 sm:$0xff]   ;;  %v7354_v30 = vld [vmem:[#allocation29_spill] sm:$0xff] }
 0x30a   :  { %v3198_v10 = vadd.f32 %v6285_v49, %v3091_v21  ;;  %v2430_v61 = vmax.f32 %v7329_v11, %v2121_v31  ;;  %v2783_v2 = vpop.f32.mrf.mxu1  ;;  %2974 = vmatmul.mubr.bf16.gmra.mxu1 %v4927_v60  ;;  %2319 = vmatprep.mubr.bf16.mxu0 %v4928_v55  ;;  %v7344_v11 = vmax.f32 %v7342_v46, %v7343_v57  ;;  %v7355_v41 = vld [vmem:[#allocation30_spill] sm:$0xff]  ;;  %v7358_v46 = vld [vmem:[#allocation32_spill] sm:$0xff] }
 0x30b   :  { %v2123_v37 = vpop.f32.mrf.mxu0  ;;  %2981 = vmatprep.mubr.bf16.mxu1 %v4928_v55 }
 0x30c   :  { %v3298_v51 = vmax.f32 %v3198_v10, 0.0  ;;  %v3092_v53 = vmax.f32 %v2430_v61, %v2783_v2  ;;  %v2785_v32 = vpop.f32.mrf.mxu1 }
 0x30d   :  { %v2124_v20 = vpop.f32.mrf.mxu0  ;;  %v4933_v32 = vld [vmem:[%s6987_s0 + $0x2a0] ss:$8 sps:$4 sm:$0xff]  }
 0x30e   :  { %v4407_v42 = vpack.c.bf16 %v3298_v51, %v3297_v27  ;;  %v2431_v7 = vmax.f32 %v7332_v29, %v2124_v20  ;;  %v2786_v54 = vpop.f32.mrf.mxu1  ;;  %v3199_v39 = vadd.f32 %v6285_v49, %v3092_v53 }
 0x30f   :  { %v2126_v56 = vpop.f32.mrf.mxu0 }
 0x310   :  { %4597 = vst [vmem:[%s6989_s3 + $0x70] sm:$0xff] %v4407_v42   ;;  %v3093_v24 = vmax.f32 %v2431_v7, %v2786_v54  ;;  %v2788_v15 = vpop.f32.mrf.mxu1  ;;  %v3299_v35 = vmax.f32 %v3199_v39, 0.0  ;;  %v7345_v42 = vld [vmem:[#allocation23_spill] sm:$0xff]  ;;  %v4934_v54 = vld [vmem:[%s6987_s0 + $0x2b4] ss:$8 sps:$4 sm:$0xff]  }
 0x311   :  { %v2129_v44 = vpop.f32.mrf.mxu0  ;;  %2320 = vmatmul.mubr.bf16.gmra.mxu0 %v4929_v50  ;;  %v7347_v33 = vmax.f32 %v7345_v42, %v7346_v19  ;;  %v7360_v42 = vld [vmem:[#allocation33_spill] sm:$0xff]  ;;  %v7361_v19 = vld [vmem:[#allocation34_spill] sm:$0xff] }
 0x312   :  { %v3200_v1 = vadd.f32 %v6285_v49, %v3093_v24  ;;  %v2432_v17 = vmax.f32 %v7335_v63, %v2129_v44  ;;  %v2791_v62 = vpop.f32.mrf.mxu1  ;;  %2982 = vmatmul.mubr.bf16.gmra.mxu1 %v4929_v50  ;;  %2327 = vmatprep.mubr.bf16.mxu0 %v4930_v3  ;;  %v7350_v63 = vmax.f32 %v7348_v38, %v7349_v59  ;;  %v7364_v38 = vld [vmem:[#allocation36_spill] sm:$0xff] }
 0x313   :  { %v2131_v5 = vpop.f32.mrf.mxu0  ;;  %2989 = vmatprep.mubr.bf16.mxu1 %v4930_v3 }
 0x314   :  { %v3300_v26 = vmax.f32 %v3200_v1, 0.0  ;;  %v3094_v0 = vmax.f32 %v2432_v17, %v2791_v62  ;;  %v2793_v36 = vpop.f32.mrf.mxu1 }
 0x315   :  { %v2132_v52 = vpop.f32.mrf.mxu0  ;;  %v4935_v36 = vld [vmem:[%s6987_s0 + $0x2b0] ss:$8 sps:$4 sm:$0xff]  }
 0x316   :  { %v4412_v13 = vpack.c.bf16 %v3300_v26, %v3299_v35  ;;  %v2433_v40 = vmax.f32 %v7338_v14, %v2132_v52  ;;  %v2794_v8 = vpop.f32.mrf.mxu1  ;;  %v3201_v47 = vadd.f32 %v6285_v49, %v3094_v0 }
 0x317   :  { %v2134_v9 = vpop.f32.mrf.mxu0 }
 0x318   :  { %4598 = vst [vmem:[%s6989_s3 + $0x78] sm:$0xff] %v4412_v13   ;;  %v3095_v58 = vmax.f32 %v2433_v40, %v2794_v8  ;;  %v2796_v34 = vpop.f32.mrf.mxu1  ;;  %v3301_v18 = vmax.f32 %v3201_v47, 0.0  ;;  %v7351_v13 = vld [vmem:[#allocation27_spill] sm:$0xff] }
 0x319   :  { %v2137_v48 = vpop.f32.mrf.mxu0  ;;  %2328 = vmatmul.mubr.bf16.gmra.mxu0 %v4931_v28  ;;  %v7353_v6 = vmax.f32 %v7351_v13, %v7352_v4  ;;  %v4936_v8 = vld [vmem:[%s6987_s0 + $0x2c4] ss:$8 sps:$4 sm:$0xff]   ;;  %v7366_v13 = vld [vmem:[#allocation37_spill] sm:$0xff] }
 0x31a   :  { %v3202_v25 = vadd.f32 %v6285_v49, %v3095_v58  ;;  %v2434_v22 = vmax.f32 %v7341_v43, %v2137_v48  ;;  %v2799_v45 = vpop.f32.mrf.mxu1  ;;  %2990 = vmatmul.mubr.bf16.gmra.mxu1 %v4931_v28  ;;  %2335 = vmatprep.mubr.bf16.mxu0 %v4932_v16  ;;  %v7356_v43 = vmax.f32 %v7354_v30, %v7355_v41  ;;  %v7367_v4 = vld [vmem:[#allocation38_spill] sm:$0xff]  ;;  %v7370_v30 = vld [vmem:[#allocation40_spill] sm:$0xff] }
 0x31b   :  { %v2139_v23 = vpop.f32.mrf.mxu0  ;;  %2997 = vmatprep.mubr.bf16.mxu1 %v4932_v16 }
 0x31c   :  { %v3302_v21 = vmax.f32 %v3202_v25, 0.0  ;;  %v3096_v12 = vmax.f32 %v2434_v22, %v2799_v45  ;;  %v2801_v31 = vpop.f32.mrf.mxu1 }
 0x31d   :  { %v2140_v60 = vpop.f32.mrf.mxu0  ;;  %v4937_v31 = vld [vmem:[%s6987_s0 + $0x2c0] ss:$8 sps:$4 sm:$0xff]  }
 0x31e   :  { %v4417_v10 = vpack.c.bf16 %v3302_v21, %v3301_v18  ;;  %v2435_v61 = vmax.f32 %v7344_v11, %v2140_v60  ;;  %v2802_v2 = vpop.f32.mrf.mxu1  ;;  %v3203_v37 = vadd.f32 %v6285_v49, %v3096_v12 }
 0x31f   :  { %v2142_v55 = vpop.f32.mrf.mxu0 }
 0x320   :  { %4599 = vst [vmem:[%s6989_s3 + $0x80] sm:$0xff] %v4417_v10   ;;  %v3097_v27 = vmax.f32 %v2435_v61, %v2802_v2  ;;  %v2804_v51 = vpop.f32.mrf.mxu1  ;;  %v3303_v39 = vmax.f32 %v3203_v37, 0.0  ;;  %v7357_v10 = vld [vmem:[#allocation31_spill] sm:$0xff]  ;;  %v4938_v2 = vld [vmem:[%s6987_s0 + $0x2d4] ss:$8 sps:$4 sm:$0xff]  }
 0x321   :  { %v2145_v53 = vpop.f32.mrf.mxu0  ;;  %2336 = vmatmul.mubr.bf16.gmra.mxu0 %v4933_v32  ;;  %v7359_v57 = vmax.f32 %v7357_v10, %v7358_v46  ;;  %v7372_v10 = vld [vmem:[#allocation41_spill] sm:$0xff]  ;;  %v7373_v46 = vld [vmem:[#allocation42_spill] sm:$0xff] }
 0x322   :  { %v3204_v20 = vadd.f32 %v6285_v49, %v3097_v27  ;;  %v2436_v29 = vmax.f32 %v7347_v33, %v2145_v53  ;;  %v2807_v7 = vpop.f32.mrf.mxu1  ;;  %2998 = vmatmul.mubr.bf16.gmra.mxu1 %v4933_v32  ;;  %2343 = vmatprep.mubr.bf16.mxu0 %v4934_v54  ;;  %v7362_v33 = vmax.f32 %v7360_v42, %v7361_v19  ;;  %v7376_v42 = vld [vmem:[#allocation44_spill] sm:$0xff] }
 0x323   :  { %v2147_v56 = vpop.f32.mrf.mxu0  ;;  %3005 = vmatprep.mubr.bf16.mxu1 %v4934_v54 }
 0x324   :  { %v3304_v24 = vmax.f32 %v3204_v20, 0.0  ;;  %v3098_v15 = vmax.f32 %v2436_v29, %v2807_v7  ;;  %v2809_v44 = vpop.f32.mrf.mxu1 }
 0x325   :  { %v2148_v50 = vpop.f32.mrf.mxu0  ;;  %v4939_v44 = vld [vmem:[%s6987_s0 + $0x2d0] ss:$8 sps:$4 sm:$0xff]  }
 0x326   :  { %v4422_v1 = vpack.c.bf16 %v3304_v24, %v3303_v39  ;;  %v2437_v17 = vmax.f32 %v7350_v63, %v2148_v50  ;;  %v2810_v62 = vpop.f32.mrf.mxu1  ;;  %v3205_v5 = vadd.f32 %v6285_v49, %v3098_v15 }
 0x327   :  { %v2150_v3 = vpop.f32.mrf.mxu0 }
 0x328   :  { %4600 = vst [vmem:[%s6989_s3 + $0x88] sm:$0xff] %v4422_v1   ;;  %v3099_v35 = vmax.f32 %v2437_v17, %v2810_v62  ;;  %v2812_v26 = vpop.f32.mrf.mxu1  ;;  %v3305_v47 = vmax.f32 %v3205_v5, 0.0  ;;  %v7363_v1 = vld [vmem:[#allocation35_spill] sm:$0xff] }
 0x329   :  { %v2153_v0 = vpop.f32.mrf.mxu0  ;;  %2344 = vmatmul.mubr.bf16.gmra.mxu0 %v4935_v36  ;;  %v7365_v59 = vmax.f32 %v7363_v1, %v7364_v38  ;;  %v4940_v62 = vld [vmem:[%s6987_s0 + $0x2e4] ss:$8 sps:$4 sm:$0xff]  }
 0x32a   :  { %v3206_v52 = vadd.f32 %v6285_v49, %v3099_v35  ;;  %v2438_v14 = vmax.f32 %v7353_v6, %v2153_v0  ;;  %v2815_v40 = vpop.f32.mrf.mxu1  ;;  %3006 = vmatmul.mubr.bf16.gmra.mxu1 %v4935_v36  ;;  %2351 = vmatprep.mubr.bf16.mxu0 %v4936_v8  ;;  %v7368_v6 = vmax.f32 %v7366_v13, %v7367_v4  ;;  %v7379_v1 = vld [vmem:[#allocation46_spill] sm:$0xff]  ;;  %v7382_v13 = vld [vmem:[#allocation48_spill] sm:$0xff] }
 0x32b   :  { %v2155_v9 = vpop.f32.mrf.mxu0  ;;  %3013 = vmatprep.mubr.bf16.mxu1 %v4936_v8 }
 0x32c   :  { %v3306_v58 = vmax.f32 %v3206_v52, 0.0  ;;  %v3100_v34 = vmax.f32 %v2438_v14, %v2815_v40  ;;  %v2817_v48 = vpop.f32.mrf.mxu1 }
 0x32d   :  { %v2156_v28 = vpop.f32.mrf.mxu0  ;;  %v4941_v48 = vld [vmem:[%s6987_s0 + $0x2e0] ss:$8 sps:$4 sm:$0xff]  }
 0x32e   :  { %v4427_v25 = vpack.c.bf16 %v3306_v58, %v3305_v47  ;;  %v2439_v22 = vmax.f32 %v7356_v43, %v2156_v28  ;;  %v2818_v45 = vpop.f32.mrf.mxu1  ;;  %v3207_v23 = vadd.f32 %v6285_v49, %v3100_v34 }
 0x32f   :  { %v2158_v16 = vpop.f32.mrf.mxu0 }
 0x330   :  { %4601 = vst [vmem:[%s6989_s3 + $0x90] sm:$0xff] %v4427_v25   ;;  %v3101_v18 = vmax.f32 %v2439_v22, %v2818_v45  ;;  %v2820_v21 = vpop.f32.mrf.mxu1  ;;  %v3307_v37 = vmax.f32 %v3207_v23, 0.0  ;;  %v7369_v25 = vld [vmem:[#allocation39_spill] sm:$0xff]  ;;  %v4942_v45 = vld [vmem:[%s6987_s0 + $0x2f4] ss:$8 sps:$4 sm:$0xff]  }
 0x331   :  { %v2161_v12 = vpop.f32.mrf.mxu0  ;;  %2352 = vmatmul.mubr.bf16.gmra.mxu0 %v4937_v31  ;;  %v7371_v41 = vmax.f32 %v7369_v25, %v7370_v30  ;;  %v7384_v25 = vld [vmem:[#allocation49_spill] sm:$0xff]  ;;  %v7385_v30 = vld [vmem:[#allocation50_spill] sm:$0xff] }
 0x332   :  { %v3208_v60 = vadd.f32 %v6285_v49, %v3101_v18  ;;  %v2440_v11 = vmax.f32 %v7359_v57, %v2161_v12  ;;  %v2823_v61 = vpop.f32.mrf.mxu1  ;;  %3014 = vmatmul.mubr.bf16.gmra.mxu1 %v4937_v31  ;;  %2359 = vmatprep.mubr.bf16.mxu0 %v4938_v2  ;;  %v7374_v57 = vmax.f32 %v7372_v10, %v7373_v46  ;;  %v7388_v10 = vld [vmem:[#allocation52_spill] sm:$0xff] }
 0x333   :  { %v2163_v55 = vpop.f32.mrf.mxu0  ;;  %3021 = vmatprep.mubr.bf16.mxu1 %v4938_v2 }
 0x334   :  { %v3308_v27 = vmax.f32 %v3208_v60, 0.0  ;;  %v3102_v51 = vmax.f32 %v2440_v11, %v2823_v61  ;;  %v2825_v53 = vpop.f32.mrf.mxu1 }
 0x335   :  { %v2164_v32 = vpop.f32.mrf.mxu0  ;;  %v4943_v53 = vld [vmem:[%s6987_s0 + $0x2f0] ss:$8 sps:$4 sm:$0xff]  }
 0x336   :  { %v4432_v20 = vpack.c.bf16 %v3308_v27, %v3307_v37  ;;  %v2441_v29 = vmax.f32 %v7362_v33, %v2164_v32  ;;  %v2826_v7 = vpop.f32.mrf.mxu1  ;;  %v3209_v56 = vadd.f32 %v6285_v49, %v3102_v51 }
 0x337   :  { %v2166_v54 = vpop.f32.mrf.mxu0 }
 0x338   :  { %4602 = vst [vmem:[%s6989_s3 + $0x98] sm:$0xff] %v4432_v20   ;;  %v3103_v39 = vmax.f32 %v2441_v29, %v2826_v7  ;;  %v2828_v24 = vpop.f32.mrf.mxu1  ;;  %v3309_v5 = vmax.f32 %v3209_v56, 0.0  ;;  %v7375_v20 = vld [vmem:[#allocation43_spill] sm:$0xff] }
 0x339   :  { %v2169_v15 = vpop.f32.mrf.mxu0  ;;  %2360 = vmatmul.mubr.bf16.gmra.mxu0 %v4939_v44  ;;  %v7377_v19 = vmax.f32 %v7375_v20, %v7376_v42  ;;  %v4944_v7 = vld [vmem:[%s6987_s0 + $0x304] ss:$8 sps:$4 sm:$0xff]  }
 0x33a   :  { %v3210_v50 = vadd.f32 %v6285_v49, %v3103_v39  ;;  %v2442_v63 = vmax.f32 %v7365_v59, %v2169_v15  ;;  %v2831_v17 = vpop.f32.mrf.mxu1  ;;  %3022 = vmatmul.mubr.bf16.gmra.mxu1 %v4939_v44  ;;  %2367 = vmatprep.mubr.bf16.mxu0 %v4940_v62  ;;  %v7391_v20 = vld [vmem:[#allocation54_spill] sm:$0xff] }
 0x33b   :  { %v2171_v3 = vpop.f32.mrf.mxu0  ;;  %3029 = vmatprep.mubr.bf16.mxu1 %v4940_v62  ;;  %v6684_v62 = vld [vmem:[%s6988_s2] ss:$0 sm:$0xff] }
 0x33c   :  { %v3310_v35 = vmax.f32 %v3210_v50, 0.0  ;;  %v3104_v26 = vmax.f32 %v2442_v63, %v2831_v17  ;;  %v2833_v0 = vpop.f32.mrf.mxu1 }
 0x33d   :  { %v2172_v36 = vpop.f32.mrf.mxu0  ;;  %v4946_v0 = vld [vmem:[%s6987_s0 + $0x300] ss:$8 sps:$4 sm:$0xff]  }
 0x33e   :  { %v4437_v52 = vpack.c.bf16 %v3310_v35, %v3309_v5  ;;  %v2443_v14 = vmax.f32 %v7368_v6, %v2172_v36  ;;  %v2834_v40 = vpop.f32.mrf.mxu1  ;;  %v3211_v9 = vadd.f32 %v6285_v49, %v3104_v26 }
 0x33f   :  { %v2174_v8 = vpop.f32.mrf.mxu0 }
 0x340   :  { %4603 = vst [vmem:[%s6989_s3 + $0xa0] sm:$0xff] %v4437_v52   ;;  %v3105_v47 = vmax.f32 %v2443_v14, %v2834_v40  ;;  %v2836_v58 = vpop.f32.mrf.mxu1  ;;  %v3311_v23 = vmax.f32 %v3211_v9, 0.0  ;;  %v7381_v52 = vld [vmem:[#allocation47_spill] sm:$0xff]  ;;  %v4947_v40 = vld [vmem:[%s6987_s0 + $0x314] ss:$8 sps:$4 sm:$0xff]  }
 0x341   :  { %v2177_v34 = vpop.f32.mrf.mxu0  ;;  %2368 = vmatmul.mubr.bf16.gmra.mxu0 %v4941_v48  ;;  %v7383_v4 = vmax.f32 %v7381_v52, %v7382_v13 }
 0x342   :  { %v3212_v28 = vadd.f32 %v6285_v49, %v3105_v47  ;;  %v2444_v43 = vmax.f32 %v7371_v41, %v2177_v34  ;;  %v2839_v22 = vpop.f32.mrf.mxu1  ;;  %3030 = vmatmul.mubr.bf16.gmra.mxu1 %v4941_v48  ;;  %2375 = vmatprep.mubr.bf16.mxu0 %v4942_v45  ;;  %v7386_v41 = vmax.f32 %v7384_v25, %v7385_v30 }
 0x343   :  { %v2179_v16 = vpop.f32.mrf.mxu0  ;;  %3037 = vmatprep.mubr.bf16.mxu1 %v4942_v45 }
 0x344   :  { %v3312_v18 = vmax.f32 %v3212_v28, 0.0  ;;  %v3106_v21 = vmax.f32 %v2444_v43, %v2839_v22  ;;  %v2841_v12 = vpop.f32.mrf.mxu1 }
 0x345   :  { %v2180_v31 = vpop.f32.mrf.mxu0  ;;  %v4948_v12 = vld [vmem:[%s6987_s0 + $0x310] ss:$8 sps:$4 sm:$0xff]  }
 0x346   :  { %v4442_v60 = vpack.c.bf16 %v3312_v18, %v3311_v23  ;;  %v2445_v11 = vmax.f32 %v7374_v57, %v2180_v31  ;;  %v2842_v61 = vpop.f32.mrf.mxu1  ;;  %v3213_v55 = vadd.f32 %v6285_v49, %v3106_v21 }
 0x347   :  { %v2182_v2 = vpop.f32.mrf.mxu0 }
 0x348   :  { %4604 = vst [vmem:[%s6989_s3 + $0xa8] sm:$0xff] %v4442_v60   ;;  %v3107_v37 = vmax.f32 %v2445_v11, %v2842_v61  ;;  %v2844_v27 = vpop.f32.mrf.mxu1  ;;  %v3313_v56 = vmax.f32 %v3213_v55, 0.0  ;;  %v7387_v60 = vld [vmem:[#allocation51_spill] sm:$0xff] }
 0x349   :  { %v2185_v51 = vpop.f32.mrf.mxu0  ;;  %2376 = vmatmul.mubr.bf16.gmra.mxu0 %v4943_v53  ;;  %v7389_v46 = vmax.f32 %v7387_v60, %v7388_v10 }
 0x34a   :  { %v3214_v32 = vadd.f32 %v6285_v49, %v3107_v37  ;;  %v2446_v33 = vmax.f32 %v7377_v19, %v2185_v51  ;;  %v2847_v29 = vpop.f32.mrf.mxu1  ;;  %3038 = vmatmul.mubr.bf16.gmra.mxu1 %v4943_v53  ;;  %2383 = vmatprep.mubr.bf16.mxu0 %v4944_v7  ;;  %v7378_v49 = vld [vmem:[#allocation45_spill] sm:$0xff] }
 0x34b   :  { %v2187_v54 = vpop.f32.mrf.mxu0  ;;  %3045 = vmatprep.mubr.bf16.mxu1 %v4944_v7  ;;  %v7380_v38 = vmax.f32 %v7378_v49, %v7379_v1 }
 0x34c   :  { %v3314_v39 = vmax.f32 %v3214_v32, 0.0  ;;  %v3108_v24 = vmax.f32 %v2446_v33, %v2847_v29  ;;  %v2849_v15 = vpop.f32.mrf.mxu1  ;;  %v7390_v32 = vld [vmem:[#allocation53_spill] sm:$0xff] }
 0x34d   :  { %v2188_v44 = vpop.f32.mrf.mxu0  ;;  %v7392_v42 = vmax.f32 %v7390_v32, %v7391_v20  ;;  %v7393_v15 = vld [vmem:[#allocation55_spill] sm:$0xff] }
 0x34e   :  { %v4447_v50 = vpack.c.bf16 %v3314_v39, %v3313_v56  ;;  %v2447_v59 = vmax.f32 %v7380_v38, %v2188_v44  ;;  %v2850_v63 = vpop.f32.mrf.mxu1  ;;  %v3215_v3 = vadd.f32 %v6684_v62, %v3108_v24  ;;  %v7394_v44 = vld [vmem:[#allocation56_spill] sm:$0xff] }
 0x34f   :  { %v2190_v17 = vpop.f32.mrf.mxu0 }
 0x350   :  { %4605 = vst [vmem:[%s6989_s3 + $0xb0] sm:$0xff] %v4447_v50   ;;  %v3109_v5 = vmax.f32 %v2447_v59, %v2850_v63  ;;  %v2852_v35 = vpop.f32.mrf.mxu1  ;;  %v3315_v9 = vmax.f32 %v3215_v3, 0.0  ;;  %v7395_v50 = vmax.f32 %v7393_v15, %v7394_v44 }
 0x351   :  { %v2193_v26 = vpop.f32.mrf.mxu0  ;;  %2384 = vmatmul.mubr.bf16.gmra.mxu0 %v4946_v0 }
 0x352   :  { %v3216_v36 = vadd.f32 %v6684_v62, %v3109_v5  ;;  %v2448_v6 = vmax.f32 %v7383_v4, %v2193_v26  ;;  %v2855_v14 = vpop.f32.mrf.mxu1  ;;  %3046 = vmatmul.mubr.bf16.gmra.mxu1 %v4946_v0  ;;  %2391 = vmatprep.mubr.bf16.mxu0 %v4947_v40  ;;  %v7396_v26 = vld [vmem:[#allocation57_spill] sm:$0xff]  ;;  %v7397_v0 = vld [vmem:[#allocation58_spill] sm:$0xff] }
 0x353   :  { %v2195_v8 = vpop.f32.mrf.mxu0  ;;  %3053 = vmatprep.mubr.bf16.mxu1 %v4947_v40 }
 0x354   :  { %v3316_v47 = vmax.f32 %v3216_v36, 0.0  ;;  %v3110_v58 = vmax.f32 %v2448_v6, %v2855_v14  ;;  %v2857_v34 = vpop.f32.mrf.mxu1  ;;  %v7398_v36 = vmax.f32 %v7396_v26, %v7397_v0 }
 0x355   :  { %v2196_v48 = vpop.f32.mrf.mxu0 }
 0x356   :  { %v4452_v28 = vpack.c.bf16 %v3316_v47, %v3315_v9  ;;  %v2449_v43 = vmax.f32 %v7386_v41, %v2196_v48  ;;  %v2858_v22 = vpop.f32.mrf.mxu1  ;;  %v3217_v16 = vadd.f32 %v6684_v62, %v3110_v58  ;;  %v7399_v47 = vld [vmem:[#allocation59_spill] sm:$0xff]  ;;  %v7400_v58 = vld [vmem:[#allocation60_spill] sm:$0xff] }
 0x357   :  { %v2198_v45 = vpop.f32.mrf.mxu0  ;;  %v7401_v34 = vmax.f32 %v7399_v47, %v7400_v58 }
 0x358   :  { %4606 = vst [vmem:[%s6989_s3 + $0xb8] sm:$0xff] %v4452_v28   ;;  %v3111_v23 = vmax.f32 %v2449_v43, %v2858_v22  ;;  %v2860_v18 = vpop.f32.mrf.mxu1  ;;  %v3317_v2 = vmax.f32 %v3217_v16, 0.0 }
 0x359   :  { %v2201_v21 = vpop.f32.mrf.mxu0  ;;  %2392 = vmatmul.mubr.bf16.gmra.mxu0 %v4948_v12  ;;  %v7403_v18 = vld [vmem:[#allocation62_spill] sm:$0xff] }
 0x35a   :  { %v3218_v31 = vadd.f32 %v6684_v62, %v3111_v23  ;;  %v2450_v57 = vmax.f32 %v7389_v46, %v2201_v21  ;;  %v2863_v11 = vpop.f32.mrf.mxu1  ;;  %3054 = vmatmul.mubr.bf16.gmra.mxu1 %v4948_v12  ;;  %v7402_v23 = vld [vmem:[#allocation61_spill] sm:$0xff] }
 0x35b   :  { %v2203_v61 = vpop.f32.mrf.mxu0  ;;  %v7404_v21 = vmax.f32 %v7402_v23, %v7403_v18 }
 0x35c   :  { %v3318_v55 = vmax.f32 %v3218_v31, 0.0  ;;  %v3112_v37 = vmax.f32 %v2450_v57, %v2863_v11  ;;  %v2865_v27 = vpop.f32.mrf.mxu1 }
 0x35d   :  { %v2204_v51 = vpop.f32.mrf.mxu0 }
 0x35e   :  { %v4457_v53 = vpack.c.bf16 %v3318_v55, %v3317_v2  ;;  %v2451_v19 = vmax.f32 %v7392_v42, %v2204_v51  ;;  %v2866_v33 = vpop.f32.mrf.mxu1  ;;  %v3219_v7 = vadd.f32 %v6684_v62, %v3112_v37  ;;  %v7405_v2 = vld [vmem:[#allocation63_spill] sm:$0xff]  ;;  %v7406_v55 = vld [vmem:[#allocation64_spill] sm:$0xff] }
 0x35f   :  { %v2206_v29 = vpop.f32.mrf.mxu0  ;;  %v7407_v37 = vmax.f32 %v7405_v2, %v7406_v55 }
 0x360   :  { %4607 = vst [vmem:[%s6989_s3 + $0xc0] sm:$0xff] %v4457_v53   ;;  %v3113_v54 = vmax.f32 %v2451_v19, %v2866_v33  ;;  %v2868_v56 = vpop.f32.mrf.mxu1  ;;  %v3319_v59 = vmax.f32 %v3219_v7, 0.0  ;;  %v7408_v7 = vld [vmem:[#allocation65_spill] sm:$0xff] }
 0x361   :  { %v2209_v39 = vpop.f32.mrf.mxu0 }
 0x362   :  { %v3220_v24 = vadd.f32 %v6684_v62, %v3113_v54  ;;  %v2452_v49 = vmax.f32 %v7395_v50, %v2209_v39  ;;  %v2871_v1 = vpop.f32.mrf.mxu1  ;;  %v7409_v54 = vld [vmem:[#allocation66_spill] sm:$0xff] }
 0x363   :  { %v2211_v38 = vpop.f32.mrf.mxu0  ;;  %v7410_v56 = vmax.f32 %v7408_v7, %v7409_v54 }
 0x364   :  { %v3320_v63 = vmax.f32 %v3220_v24, 0.0  ;;  %v3114_v17 = vmax.f32 %v2452_v49, %v2871_v1  ;;  %v2873_v3 = vpop.f32.mrf.mxu1 }
 0x365   :  { %v2212_v5 = vpop.f32.mrf.mxu0 }
 0x366   :  { %v4462_v35 = vpack.c.bf16 %v3320_v63, %v3319_v59  ;;  %v2453_v52 = vmax.f32 %v7398_v36, %v2212_v5  ;;  %v2874_v13 = vpop.f32.mrf.mxu1  ;;  %v3221_v6 = vadd.f32 %v6684_v62, %v3114_v17  ;;  %v7411_v59 = vld [vmem:[#allocation67_spill] sm:$0xff]  ;;  %v7412_v63 = vld [vmem:[#allocation68_spill] sm:$0xff] }
 0x367   :  { %v2214_v4 = vpop.f32.mrf.mxu0  ;;  %v7413_v17 = vmax.f32 %v7411_v59, %v7412_v63 }
 0x368   :  { %4608 = vst [vmem:[%s6989_s3 + $0xc8] sm:$0xff] %v4462_v35   ;;  %v3115_v14 = vmax.f32 %v2453_v52, %v2874_v13  ;;  %v2876_v40 = vpop.f32.mrf.mxu1  ;;  %v3321_v30 = vmax.f32 %v3221_v6, 0.0  ;;  %v7414_v6 = vld [vmem:[#allocation69_spill] sm:$0xff] }
 0x369   :  { %v2217_v8 = vpop.f32.mrf.mxu0 }
 0x36a   :  { %v3222_v9 = vadd.f32 %v6684_v62, %v3115_v14  ;;  %v2454_v48 = vmax.f32 %v7401_v34, %v2217_v8  ;;  %v2879_v28 = vpop.f32.mrf.mxu1  ;;  %v7415_v14 = vld [vmem:[#allocation70_spill] sm:$0xff] }
 0x36b   :  { %v2219_v25 = vpop.f32.mrf.mxu0  ;;  %v7416_v40 = vmax.f32 %v7414_v6, %v7415_v14 }
 0x36c   :  { %v3322_v41 = vmax.f32 %v3222_v9, 0.0  ;;  %v3116_v43 = vmax.f32 %v2454_v48, %v2879_v28  ;;  %v2881_v22 = vpop.f32.mrf.mxu1 }
 0x36d   :  { %v2220_v45 = vpop.f32.mrf.mxu0 }
 0x36e   :  { %v4467_v16 = vpack.c.bf16 %v3322_v41, %v3321_v30  ;;  %v2455_v12 = vmax.f32 %v7404_v21, %v2220_v45  ;;  %v2882_v31 = vpop.f32.mrf.mxu1  ;;  %v3223_v10 = vadd.f32 %v6684_v62, %v3116_v43  ;;  %v7417_v30 = vld [vmem:[#allocation71_spill] sm:$0xff]  ;;  %v7418_v41 = vld [vmem:[#allocation72_spill] sm:$0xff] }
 0x36f   :  { %v2222_v60 = vpop.f32.mrf.mxu0  ;;  %v7419_v43 = vmax.f32 %v7417_v30, %v7418_v41 }
 0x370   :  { %4609 = vst [vmem:[%s6989_s3 + $0xd0] sm:$0xff] %v4467_v16   ;;  %v3117_v46 = vmax.f32 %v2455_v12, %v2882_v31  ;;  %v2884_v57 = vpop.f32.mrf.mxu1  ;;  %v3323_v32 = vmax.f32 %v3223_v10, 0.0  ;;  %v7420_v10 = vld [vmem:[#allocation73_spill] sm:$0xff] }
 0x371   :  { %v2225_v11 = vpop.f32.mrf.mxu0 }
 0x372   :  { %v3224_v61 = vadd.f32 %v6684_v62, %v3117_v46  ;;  %v2456_v27 = vmax.f32 %v7407_v37, %v2225_v11  ;;  %v2887_v51 = vpop.f32.mrf.mxu1  ;;  %v7421_v46 = vld [vmem:[#allocation74_spill] sm:$0xff] }
 0x373   :  { %v2227_v53 = vpop.f32.mrf.mxu0  ;;  %v7422_v57 = vmax.f32 %v7420_v10, %v7421_v46 }
 0x374   :  { %v3324_v20 = vmax.f32 %v3224_v61, 0.0  ;;  %v3118_v42 = vmax.f32 %v2456_v27, %v2887_v51  ;;  %v2889_v19 = vpop.f32.mrf.mxu1 }
 0x375   :  { %v2228_v33 = vpop.f32.mrf.mxu0 }
 0x376   :  { %v4472_v29 = vpack.c.bf16 %v3324_v20, %v3323_v32  ;;  %v2457_v39 = vmax.f32 %v7410_v56, %v2228_v33  ;;  %v2890_v24 = vpop.f32.mrf.mxu1  ;;  %v3225_v44 = vadd.f32 %v6684_v62, %v3118_v42  ;;  %v7423_v32 = vld [vmem:[#allocation75_spill] sm:$0xff]  ;;  %v7424_v20 = vld [vmem:[#allocation76_spill] sm:$0xff] }
 0x377   :  { %v2230_v15 = vpop.f32.mrf.mxu0  ;;  %v7425_v42 = vmax.f32 %v7423_v32, %v7424_v20 }
 0x378   :  { %4610 = vst [vmem:[%s6989_s3 + $0xd8] sm:$0xff] %v4472_v29   ;;  %v3119_v50 = vmax.f32 %v2457_v39, %v2890_v24  ;;  %v2892_v49 = vpop.f32.mrf.mxu1  ;;  %v3325_v26 = vmax.f32 %v3225_v44, 0.0  ;;  %v7426_v44 = vld [vmem:[#allocation77_spill] sm:$0xff] }
 0x379   :  { %v2233_v1 = vpop.f32.mrf.mxu0 }
 0x37a   :  { %v3226_v38 = vadd.f32 %v6684_v62, %v3119_v50  ;;  %v2458_v3 = vmax.f32 %v7413_v17, %v2233_v1  ;;  %v2895_v5 = vpop.f32.mrf.mxu1  ;;  %v7427_v50 = vld [vmem:[#allocation78_spill] sm:$0xff] }
 0x37b   :  { %v2235_v35 = vpop.f32.mrf.mxu0  ;;  %v7428_v49 = vmax.f32 %v7426_v44, %v7427_v50 }
 0x37c   :  { %v3326_v0 = vmax.f32 %v3226_v38, 0.0  ;;  %v3120_v36 = vmax.f32 %v2458_v3, %v2895_v5  ;;  %v2897_v52 = vpop.f32.mrf.mxu1 }
 0x37d   :  { %v2236_v13 = vpop.f32.mrf.mxu0 }
 0x37e   :  { %v4477_v4 = vpack.c.bf16 %v3326_v0, %v3325_v26  ;;  %v2459_v8 = vmax.f32 %v7416_v40, %v2236_v13  ;;  %v2898_v9 = vpop.f32.mrf.mxu1  ;;  %v3227_v58 = vadd.f32 %v6684_v62, %v3120_v36  ;;  %v7429_v26 = vld [vmem:[#allocation79_spill] sm:$0xff]  ;;  %v7430_v0 = vld [vmem:[#allocation80_spill] sm:$0xff] }
 0x37f   :  { %v2238_v47 = vpop.f32.mrf.mxu0  ;;  %v7431_v36 = vmax.f32 %v7429_v26, %v7430_v0 }
 0x380   :  { %4611 = vst [vmem:[%s6989_s3 + $0xe0] sm:$0xff] %v4477_v4   ;;  %v3121_v34 = vmax.f32 %v2459_v8, %v2898_v9  ;;  %v2900_v48 = vpop.f32.mrf.mxu1  ;;  %v3327_v23 = vmax.f32 %v3227_v58, 0.0  ;;  %v7432_v58 = vld [vmem:[#allocation81_spill] sm:$0xff] }
 0x381   :  { %v2241_v28 = vpop.f32.mrf.mxu0 }
 0x382   :  { %v3228_v25 = vadd.f32 %v6684_v62, %v3121_v34  ;;  %v2460_v22 = vmax.f32 %v7419_v43, %v2241_v28  ;;  %v2903_v45 = vpop.f32.mrf.mxu1  ;;  %v7433_v34 = vld [vmem:[#allocation82_spill] sm:$0xff] }
 0x383   :  { %v2243_v16 = vpop.f32.mrf.mxu0  ;;  %v7434_v48 = vmax.f32 %v7432_v58, %v7433_v34 }
 0x384   :  { %v3328_v18 = vmax.f32 %v3228_v25, 0.0  ;;  %v3122_v21 = vmax.f32 %v2460_v22, %v2903_v45  ;;  %v2905_v12 = vpop.f32.mrf.mxu1 }
 0x385   :  { %v2244_v31 = vpop.f32.mrf.mxu0 }
 0x386   :  { %v4482_v60 = vpack.c.bf16 %v3328_v18, %v3327_v23  ;;  %v2461_v11 = vmax.f32 %v7422_v57, %v2244_v31  ;;  %v2906_v61 = vpop.f32.mrf.mxu1  ;;  %v3229_v55 = vadd.f32 %v6684_v62, %v3122_v21  ;;  %v7435_v23 = vld [vmem:[#allocation83_spill] sm:$0xff]  ;;  %v7436_v18 = vld [vmem:[#allocation84_spill] sm:$0xff] }
 0x387   :  { %v2246_v2 = vpop.f32.mrf.mxu0  ;;  %v7437_v21 = vmax.f32 %v7435_v23, %v7436_v18 }
 0x388   :  { %4612 = vst [vmem:[%s6989_s3 + $0xe8] sm:$0xff] %v4482_v60   ;;  %v3123_v37 = vmax.f32 %v2461_v11, %v2906_v61  ;;  %v2908_v27 = vpop.f32.mrf.mxu1  ;;  %v3329_v7 = vmax.f32 %v3229_v55, 0.0  ;;  %v7438_v55 = vld [vmem:[#allocation85_spill] sm:$0xff] }
 0x389   :  { %v2249_v51 = vpop.f32.mrf.mxu0 }
 0x38a   :  { %v3230_v53 = vadd.f32 %v6684_v62, %v3123_v37  ;;  %v2462_v19 = vmax.f32 %v7425_v42, %v2249_v51  ;;  %v2911_v33 = vpop.f32.mrf.mxu1  ;;  %v7439_v37 = vld [vmem:[#allocation86_spill] sm:$0xff] }
 0x38b   :  { %v2251_v29 = vpop.f32.mrf.mxu0  ;;  %v7440_v27 = vmax.f32 %v7438_v55, %v7439_v37 }
 0x38c   :  { %v3330_v54 = vmax.f32 %v3230_v53, 0.0  ;;  %v3124_v56 = vmax.f32 %v2462_v19, %v2911_v33  ;;  %v2913_v39 = vpop.f32.mrf.mxu1 }
 0x38d   :  { %v2252_v24 = vpop.f32.mrf.mxu0 }
 0x38e   :  { %v4487_v15 = vpack.c.bf16 %v3330_v54, %v3329_v7  ;;  %v2463_v1 = vmax.f32 %v7428_v49, %v2252_v24  ;;  %v2914_v38 = vpop.f32.mrf.mxu1  ;;  %v3231_v63 = vadd.f32 %v6684_v62, %v3124_v56  ;;  %v7441_v7 = vld [vmem:[#allocation87_spill] sm:$0xff]  ;;  %v7442_v54 = vld [vmem:[#allocation88_spill] sm:$0xff] }
 0x38f   :  { %v2254_v59 = vpop.f32.mrf.mxu0  ;;  %v7443_v56 = vmax.f32 %v7441_v7, %v7442_v54 }
 0x390   :  { %4613 = vst [vmem:[%s6989_s3 + $0xf0] sm:$0xff] %v4487_v15   ;;  %v3125_v17 = vmax.f32 %v2463_v1, %v2914_v38  ;;  %v2916_v3 = vpop.f32.mrf.mxu1  ;;  %v3331_v6 = vmax.f32 %v3231_v63, 0.0  ;;  %v7444_v63 = vld [vmem:[#allocation89_spill] sm:$0xff] }
 0x391   :  { %v2257_v5 = vpop.f32.mrf.mxu0 }
 0x392   :  { %v3232_v35 = vadd.f32 %v6684_v62, %v3125_v17  ;;  %v2464_v52 = vmax.f32 %v7431_v36, %v2257_v5  ;;  %v2919_v13 = vpop.f32.mrf.mxu1  ;;  %v7445_v17 = vld [vmem:[#allocation90_spill] sm:$0xff] }
 0x393   :  { %v2259_v4 = vpop.f32.mrf.mxu0  ;;  %v7446_v3 = vmax.f32 %v7444_v63, %v7445_v17 }
 0x394   :  { %v3332_v14 = vmax.f32 %v3232_v35, 0.0  ;;  %v3126_v40 = vmax.f32 %v2464_v52, %v2919_v13  ;;  %v2921_v8 = vpop.f32.mrf.mxu1 }
 0x395   :  { %v2260_v9 = vpop.f32.mrf.mxu0 }
 0x396   :  { %v4492_v47 = vpack.c.bf16 %v3332_v14, %v3331_v6  ;;  %v2465_v28 = vmax.f32 %v7434_v48, %v2260_v9  ;;  %v2922_v25 = vpop.f32.mrf.mxu1  ;;  %v3233_v41 = vadd.f32 %v6684_v62, %v3126_v40  ;;  %v7447_v6 = vld [vmem:[#allocation91_spill] sm:$0xff]  ;;  %v7448_v14 = vld [vmem:[#allocation92_spill] sm:$0xff] }
 0x397   :  { %v2262_v30 = vpop.f32.mrf.mxu0  ;;  %v7449_v40 = vmax.f32 %v7447_v6, %v7448_v14 }
 0x398   :  { %4614 = vst [vmem:[%s6989_s3 + $0xf8] sm:$0xff] %v4492_v47   ;;  %v3127_v43 = vmax.f32 %v2465_v28, %v2922_v25  ;;  %v2924_v22 = vpop.f32.mrf.mxu1  ;;  %v3333_v10 = vmax.f32 %v3233_v41, 0.0  ;;  %v7450_v41 = vld [vmem:[#allocation93_spill] sm:$0xff] }
 0x399   :  { %v2265_v45 = vpop.f32.mrf.mxu0 }
 0x39a   :  { %v3234_v16 = vadd.f32 %v6684_v62, %v3127_v43  ;;  %v2466_v12 = vmax.f32 %v7437_v21, %v2265_v45  ;;  %v2927_v31 = vpop.f32.mrf.mxu1  ;;  %v7451_v43 = vld [vmem:[#allocation94_spill] sm:$0xff] }
 0x39b   :  { %v2267_v60 = vpop.f32.mrf.mxu0  ;;  %v7452_v22 = vmax.f32 %v7450_v41, %v7451_v43 }
 0x39c   :  { %v3334_v46 = vmax.f32 %v3234_v16, 0.0  ;;  %v3128_v57 = vmax.f32 %v2466_v12, %v2927_v31  ;;  %v2929_v11 = vpop.f32.mrf.mxu1 }
 0x39d   :  { %v2268_v61 = vpop.f32.mrf.mxu0 }
 0x39e   :  { %v4497_v2 = vpack.c.bf16 %v3334_v46, %v3333_v10  ;;  %v2467_v51 = vmax.f32 %v7440_v27, %v2268_v61  ;;  %v2930_v53 = vpop.f32.mrf.mxu1  ;;  %v3235_v20 = vadd.f32 %v6684_v62, %v3128_v57  ;;  %v7453_v10 = vld [vmem:[#allocation95_spill] sm:$0xff]  ;;  %v7454_v46 = vld [vmem:[#allocation96_spill] sm:$0xff] }
 0x39f   :  { %v2270_v32 = vpop.f32.mrf.mxu0  ;;  %v7455_v57 = vmax.f32 %v7453_v10, %v7454_v46 }
 0x3a0   :  { %4615 = vst [vmem:[%s6989_s3 + $0x100] sm:$0xff] %v4497_v2   ;;  %v3129_v42 = vmax.f32 %v2467_v51, %v2930_v53  ;;  %v2932_v19 = vpop.f32.mrf.mxu1  ;;  %v3335_v44 = vmax.f32 %v3235_v20, 0.0  ;;  %v7456_v20 = vld [vmem:[#allocation97_spill] sm:$0xff] }
 0x3a1   :  { %v2273_v33 = vpop.f32.mrf.mxu0 }
 0x3a2   :  { %v3236_v29 = vadd.f32 %v6684_v62, %v3129_v42  ;;  %v2468_v39 = vmax.f32 %v7443_v56, %v2273_v33  ;;  %v2935_v24 = vpop.f32.mrf.mxu1  ;;  %v7457_v42 = vld [vmem:[#allocation98_spill] sm:$0xff] }
 0x3a3   :  { %v2275_v15 = vpop.f32.mrf.mxu0  ;;  %v7458_v19 = vmax.f32 %v7456_v20, %v7457_v42 }
 0x3a4   :  { %v3336_v50 = vmax.f32 %v3236_v29, 0.0  ;;  %v3130_v49 = vmax.f32 %v2468_v39, %v2935_v24  ;;  %v2937_v1 = vpop.f32.mrf.mxu1 }
 0x3a5   :  { %v2276_v38 = vpop.f32.mrf.mxu0 }
 0x3a6   :  { %v4502_v59 = vpack.c.bf16 %v3336_v50, %v3335_v44  ;;  %v2469_v5 = vmax.f32 %v7446_v3, %v2276_v38  ;;  %v2938_v35 = vpop.f32.mrf.mxu1  ;;  %v3237_v0 = vadd.f32 %v6684_v62, %v3130_v49  ;;  %v7459_v44 = vld [vmem:[#allocation99_spill] sm:$0xff]  ;;  %v7460_v50 = vld [vmem:[#allocation100_spill] sm:$0xff] }
 0x3a7   :  { %v2278_v26 = vpop.f32.mrf.mxu0  ;;  %v7461_v49 = vmax.f32 %v7459_v44, %v7460_v50 }
 0x3a8   :  { %4616 = vst [vmem:[%s6989_s3 + $0x108] sm:$0xff] %v4502_v59   ;;  %v3131_v36 = vmax.f32 %v2469_v5, %v2938_v35  ;;  %v2940_v52 = vpop.f32.mrf.mxu1  ;;  %v3337_v58 = vmax.f32 %v3237_v0, 0.0  ;;  %v7462_v0 = vld [vmem:[#allocation101_spill] sm:$0xff] }
 0x3a9   :  { %v2281_v13 = vpop.f32.mrf.mxu0 }
 0x3aa   :  { %v3238_v4 = vadd.f32 %v6684_v62, %v3131_v36  ;;  %v2470_v8 = vmax.f32 %v7449_v40, %v2281_v13  ;;  %v2943_v9 = vpop.f32.mrf.mxu1  ;;  %v7463_v36 = vld [vmem:[#allocation102_spill] sm:$0xff] }
 0x3ab   :  { %v2283_v47 = vpop.f32.mrf.mxu0  ;;  %v7464_v52 = vmax.f32 %v7462_v0, %v7463_v36 }
 0x3ac   :  { %v3338_v34 = vmax.f32 %v3238_v4, 0.0  ;;  %v3132_v48 = vmax.f32 %v2470_v8, %v2943_v9  ;;  %v2945_v28 = vpop.f32.mrf.mxu1 }
 0x3ad   :  { %v2284_v25 = vpop.f32.mrf.mxu0 }
 0x3ae   :  { %v4507_v30 = vpack.c.bf16 %v3338_v34, %v3337_v58  ;;  %v2471_v45 = vmax.f32 %v7452_v22, %v2284_v25  ;;  %v2946_v16 = vpop.f32.mrf.mxu1  ;;  %v3239_v18 = vadd.f32 %v6684_v62, %v3132_v48  ;;  %v7465_v58 = vld [vmem:[#allocation103_spill] sm:$0xff]  ;;  %v7466_v34 = vld [vmem:[#allocation104_spill] sm:$0xff] }
 0x3af   :  { %v2286_v23 = vpop.f32.mrf.mxu0  ;;  %v7467_v48 = vmax.f32 %v7465_v58, %v7466_v34 }
 0x3b0   :  { %4617 = vst [vmem:[%s6989_s3 + $0x110] sm:$0xff] %v4507_v30   ;;  %v3133_v21 = vmax.f32 %v2471_v45, %v2946_v16  ;;  %v2948_v12 = vpop.f32.mrf.mxu1  ;;  %v3339_v55 = vmax.f32 %v3239_v18, 0.0  ;;  %v7468_v18 = vld [vmem:[#allocation105_spill] sm:$0xff] }
 0x3b1   :  { %v2289_v31 = vpop.f32.mrf.mxu0 }
 0x3b2   :  { %v3240_v60 = vadd.f32 %v6684_v62, %v3133_v21  ;;  %v2472_v11 = vmax.f32 %v7455_v57, %v2289_v31  ;;  %v2951_v61 = vpop.f32.mrf.mxu1  ;;  %v7469_v21 = vld [vmem:[#allocation106_spill] sm:$0xff] }
 0x3b3   :  { %v2291_v2 = vpop.f32.mrf.mxu0  ;;  %v7470_v12 = vmax.f32 %v7468_v18, %v7469_v21 }
 0x3b4   :  { %v3340_v37 = vmax.f32 %v3240_v60, 0.0  ;;  %v3134_v27 = vmax.f32 %v2472_v11, %v2951_v61  ;;  %v2953_v51 = vpop.f32.mrf.mxu1 }
 0x3b5   :  { %v2292_v53 = vpop.f32.mrf.mxu0 }
 0x3b6   :  { %v4512_v32 = vpack.c.bf16 %v3340_v37, %v3339_v55  ;;  %v2473_v33 = vmax.f32 %v7458_v19, %v2292_v53  ;;  %v2954_v29 = vpop.f32.mrf.mxu1  ;;  %v3241_v54 = vadd.f32 %v6684_v62, %v3134_v27  ;;  %v7471_v55 = vld [vmem:[#allocation107_spill] sm:$0xff]  ;;  %v7472_v37 = vld [vmem:[#allocation108_spill] sm:$0xff] }
 0x3b7   :  { %v2294_v7 = vpop.f32.mrf.mxu0  ;;  %v7473_v27 = vmax.f32 %v7471_v55, %v7472_v37 }
 0x3b8   :  { %4618 = vst [vmem:[%s6989_s3 + $0x118] sm:$0xff] %v4512_v32   ;;  %v3135_v56 = vmax.f32 %v2473_v33, %v2954_v29  ;;  %v2956_v39 = vpop.f32.mrf.mxu1  ;;  %v3341_v63 = vmax.f32 %v3241_v54, 0.0  ;;  %v7474_v54 = vld [vmem:[#allocation109_spill] sm:$0xff] }
 0x3b9   :  { %v2297_v24 = vpop.f32.mrf.mxu0 }
 0x3ba   :  { %v3242_v15 = vadd.f32 %v6684_v62, %v3135_v56  ;;  %v2474_v1 = vmax.f32 %v7461_v49, %v2297_v24  ;;  %v2959_v38 = vpop.f32.mrf.mxu1  ;;  %v7475_v56 = vld [vmem:[#allocation110_spill] sm:$0xff] }
 0x3bb   :  { %v2299_v59 = vpop.f32.mrf.mxu0  ;;  %v7476_v39 = vmax.f32 %v7474_v54, %v7475_v56 }
 0x3bc   :  { %v3342_v17 = vmax.f32 %v3242_v15, 0.0  ;;  %v3136_v3 = vmax.f32 %v2474_v1, %v2959_v38  ;;  %v2961_v5 = vpop.f32.mrf.mxu1 }
 0x3bd   :  { %v2300_v35 = vpop.f32.mrf.mxu0 }
 0x3be   :  { %v4517_v26 = vpack.c.bf16 %v3342_v17, %v3341_v63  ;;  %v2475_v13 = vmax.f32 %v7464_v52, %v2300_v35  ;;  %v2962_v4 = vpop.f32.mrf.mxu1  ;;  %v3243_v14 = vadd.f32 %v6684_v62, %v3136_v3  ;;  %v7477_v63 = vld [vmem:[#allocation111_spill] sm:$0xff]  ;;  %v7478_v17 = vld [vmem:[#allocation112_spill] sm:$0xff] }
 0x3bf   :  { %v2302_v6 = vpop.f32.mrf.mxu0  ;;  %v7479_v3 = vmax.f32 %v7477_v63, %v7478_v17 }
 0x3c0   :  { %4619 = vst [vmem:[%s6989_s3 + $0x120] sm:$0xff] %v4517_v26   ;;  %v3137_v40 = vmax.f32 %v2475_v13, %v2962_v4  ;;  %v2964_v8 = vpop.f32.mrf.mxu1  ;;  %v3343_v41 = vmax.f32 %v3243_v14, 0.0  ;;  %v7480_v14 = vld [vmem:[#allocation113_spill] sm:$0xff] }
 0x3c1   :  { %v2305_v9 = vpop.f32.mrf.mxu0 }
 0x3c2   :  { %v3244_v47 = vadd.f32 %v6684_v62, %v3137_v40  ;;  %v2476_v28 = vmax.f32 %v7467_v48, %v2305_v9  ;;  %v2967_v25 = vpop.f32.mrf.mxu1  ;;  %v7481_v40 = vld [vmem:[#allocation114_spill] sm:$0xff] }
 0x3c3   :  { %v2307_v30 = vpop.f32.mrf.mxu0  ;;  %v7482_v8 = vmax.f32 %v7480_v14, %v7481_v40 }
 0x3c4   :  { %v3344_v43 = vmax.f32 %v3244_v47, 0.0  ;;  %v3138_v22 = vmax.f32 %v2476_v28, %v2967_v25  ;;  %v2969_v45 = vpop.f32.mrf.mxu1 }
 0x3c5   :  { %v2308_v16 = vpop.f32.mrf.mxu0 }
 0x3c6   :  { %v4522_v23 = vpack.c.bf16 %v3344_v43, %v3343_v41  ;;  %v2477_v31 = vmax.f32 %v7470_v12, %v2308_v16  ;;  %v2970_v60 = vpop.f32.mrf.mxu1  ;;  %v3245_v46 = vadd.f32 %v6684_v62, %v3138_v22  ;;  %v7483_v41 = vld [vmem:[#allocation115_spill] sm:$0xff]  ;;  %v7484_v43 = vld [vmem:[#allocation116_spill] sm:$0xff] }
 0x3c7   :  { %v2310_v10 = vpop.f32.mrf.mxu0  ;;  %v7485_v22 = vmax.f32 %v7483_v41, %v7484_v43 }
 0x3c8   :  { %4620 = vst [vmem:[%s6989_s3 + $0x128] sm:$0xff] %v4522_v23   ;;  %v3139_v57 = vmax.f32 %v2477_v31, %v2970_v60  ;;  %v2972_v11 = vpop.f32.mrf.mxu1  ;;  %v3345_v20 = vmax.f32 %v3245_v46, 0.0  ;;  %v7486_v46 = vld [vmem:[#allocation117_spill] sm:$0xff] }
 0x3c9   :  { %v2313_v61 = vpop.f32.mrf.mxu0 }
 0x3ca   :  { %v3246_v2 = vadd.f32 %v6684_v62, %v3139_v57  ;;  %v2478_v51 = vmax.f32 %v7473_v27, %v2313_v61  ;;  %v2975_v53 = vpop.f32.mrf.mxu1  ;;  %v7487_v57 = vld [vmem:[#allocation118_spill] sm:$0xff] }
 0x3cb   :  { %v2315_v32 = vpop.f32.mrf.mxu0  ;;  %v7488_v11 = vmax.f32 %v7486_v46, %v7487_v57 }
 0x3cc   :  { %v3346_v42 = vmax.f32 %v3246_v2, 0.0  ;;  %v3140_v19 = vmax.f32 %v2478_v51, %v2975_v53  ;;  %v2977_v33 = vpop.f32.mrf.mxu1 }
 0x3cd   :  { %v2316_v29 = vpop.f32.mrf.mxu0 }
 0x3ce   :  { %v4527_v7 = vpack.c.bf16 %v3346_v42, %v3345_v20  ;;  %v2479_v24 = vmax.f32 %v7476_v39, %v2316_v29  ;;  %v2978_v15 = vpop.f32.mrf.mxu1  ;;  %v3247_v50 = vadd.f32 %v6684_v62, %v3140_v19  ;;  %v7489_v20 = vld [vmem:[#allocation119_spill] sm:$0xff]  ;;  %v7490_v42 = vld [vmem:[#allocation120_spill] sm:$0xff] }
 0x3cf   :  { %v2318_v44 = vpop.f32.mrf.mxu0  ;;  %v7491_v19 = vmax.f32 %v7489_v20, %v7490_v42 }
 0x3d0   :  { %4621 = vst [vmem:[%s6989_s3 + $0x130] sm:$0xff] %v4527_v7   ;;  %v3141_v49 = vmax.f32 %v2479_v24, %v2978_v15  ;;  %v2980_v1 = vpop.f32.mrf.mxu1  ;;  %v3347_v0 = vmax.f32 %v3247_v50, 0.0  ;;  %v7492_v50 = vld [vmem:[#allocation121_spill] sm:$0xff] }
 0x3d1   :  { %v2321_v38 = vpop.f32.mrf.mxu0 }
 0x3d2   :  { %v3248_v59 = vadd.f32 %v6684_v62, %v3141_v49  ;;  %v2480_v5 = vmax.f32 %v7479_v3, %v2321_v38  ;;  %v2983_v35 = vpop.f32.mrf.mxu1  ;;  %v7493_v49 = vld [vmem:[#allocation122_spill] sm:$0xff] }
 0x3d3   :  { %v2323_v26 = vpop.f32.mrf.mxu0  ;;  %v7494_v1 = vmax.f32 %v7492_v50, %v7493_v49 }
 0x3d4   :  { %v3348_v36 = vmax.f32 %v3248_v59, 0.0  ;;  %v3142_v52 = vmax.f32 %v2480_v5, %v2983_v35  ;;  %v2985_v13 = vpop.f32.mrf.mxu1 }
 0x3d5   :  { %v2324_v4 = vpop.f32.mrf.mxu0 }
 0x3d6   :  { %v4532_v6 = vpack.c.bf16 %v3348_v36, %v3347_v0  ;;  %v2481_v9 = vmax.f32 %v7482_v8, %v2324_v4  ;;  %v2986_v47 = vpop.f32.mrf.mxu1  ;;  %v3249_v34 = vadd.f32 %v6684_v62, %v3142_v52  ;;  %v7495_v0 = vld [vmem:[#allocation123_spill] sm:$0xff]  ;;  %v7496_v36 = vld [vmem:[#allocation124_spill] sm:$0xff] }
 0x3d7   :  { %v2326_v58 = vpop.f32.mrf.mxu0  ;;  %v7497_v52 = vmax.f32 %v7495_v0, %v7496_v36 }
 0x3d8   :  { %4622 = vst [vmem:[%s6989_s3 + $0x138] sm:$0xff] %v4532_v6   ;;  %v3143_v48 = vmax.f32 %v2481_v9, %v2986_v47  ;;  %v2988_v28 = vpop.f32.mrf.mxu1  ;;  %v3349_v18 = vmax.f32 %v3249_v34, 0.0  ;;  %v7498_v34 = vld [vmem:[#allocation125_spill] sm:$0xff] }
 0x3d9   :  { %v2329_v25 = vpop.f32.mrf.mxu0 }
 0x3da   :  { %v3250_v30 = vadd.f32 %v6684_v62, %v3143_v48  ;;  %v2482_v45 = vmax.f32 %v7485_v22, %v2329_v25  ;;  %v2991_v16 = vpop.f32.mrf.mxu1  ;;  %v7499_v48 = vld [vmem:[#allocation126_spill] sm:$0xff] }
 0x3db   :  { %v2331_v23 = vpop.f32.mrf.mxu0  ;;  %v7500_v28 = vmax.f32 %v7498_v34, %v7499_v48 }
 0x3dc   :  { %v3350_v21 = vmax.f32 %v3250_v30, 0.0  ;;  %v3144_v12 = vmax.f32 %v2482_v45, %v2991_v16  ;;  %v2993_v31 = vpop.f32.mrf.mxu1 }
 0x3dd   :  { %v2332_v60 = vpop.f32.mrf.mxu0 }
 0x3de   :  { %v4537_v10 = vpack.c.bf16 %v3350_v21, %v3349_v18  ;;  %v2483_v61 = vmax.f32 %v7488_v11, %v2332_v60  ;;  %v2994_v2 = vpop.f32.mrf.mxu1  ;;  %v3251_v37 = vadd.f32 %v6684_v62, %v3144_v12  ;;  %v7501_v18 = vld [vmem:[#allocation127_spill] sm:$0xff]  ;;  %v7502_v21 = vld [vmem:[#allocation128_spill] sm:$0xff] }
 0x3df   :  { %v2334_v55 = vpop.f32.mrf.mxu0  ;;  %v7503_v12 = vmax.f32 %v7501_v18, %v7502_v21 }
 0x3e0   :  { %4623 = vst [vmem:[%s6989_s3 + $0x140] sm:$0xff] %v4537_v10   ;;  %v3145_v27 = vmax.f32 %v2483_v61, %v2994_v2  ;;  %v2996_v51 = vpop.f32.mrf.mxu1  ;;  %v3351_v54 = vmax.f32 %v3251_v37, 0.0  ;;  %v7504_v37 = vld [vmem:[#allocation129_spill] sm:$0xff] }
 0x3e1   :  { %v2337_v53 = vpop.f32.mrf.mxu0 }
 0x3e2   :  { %v3252_v32 = vadd.f32 %v6684_v62, %v3145_v27  ;;  %v2484_v33 = vmax.f32 %v7491_v19, %v2337_v53  ;;  %v2999_v29 = vpop.f32.mrf.mxu1  ;;  %v7505_v27 = vld [vmem:[#allocation130_spill] sm:$0xff] }
 0x3e3   :  { %v2339_v7 = vpop.f32.mrf.mxu0  ;;  %v7506_v51 = vmax.f32 %v7504_v37, %v7505_v27 }
 0x3e4   :  { %v3352_v56 = vmax.f32 %v3252_v32, 0.0  ;;  %v3146_v39 = vmax.f32 %v2484_v33, %v2999_v29  ;;  %v3001_v24 = vpop.f32.mrf.mxu1 }
 0x3e5   :  { %v2340_v15 = vpop.f32.mrf.mxu0 }
 0x3e6   :  { %v4542_v44 = vpack.c.bf16 %v3352_v56, %v3351_v54  ;;  %v2485_v38 = vmax.f32 %v7494_v1, %v2340_v15  ;;  %v3002_v59 = vpop.f32.mrf.mxu1  ;;  %v3253_v17 = vadd.f32 %v6684_v62, %v3146_v39  ;;  %v7507_v54 = vld [vmem:[#allocation131_spill] sm:$0xff]  ;;  %v7508_v56 = vld [vmem:[#allocation132_spill] sm:$0xff] }
 0x3e7   :  { %v2342_v63 = vpop.f32.mrf.mxu0  ;;  %v7509_v39 = vmax.f32 %v7507_v54, %v7508_v56 }
 0x3e8   :  { %4624 = vst [vmem:[%s6989_s3 + $0x148] sm:$0xff] %v4542_v44   ;;  %v3147_v3 = vmax.f32 %v2485_v38, %v3002_v59  ;;  %v3004_v5 = vpop.f32.mrf.mxu1  ;;  %v3353_v14 = vmax.f32 %v3253_v17, 0.0  ;;  %v7510_v17 = vld [vmem:[#allocation133_spill] sm:$0xff] }
 0x3e9   :  { %v2345_v35 = vpop.f32.mrf.mxu0 }
 0x3ea   :  { %v3254_v26 = vadd.f32 %v6684_v62, %v3147_v3  ;;  %v2486_v13 = vmax.f32 %v7497_v52, %v2345_v35  ;;  %v3007_v4 = vpop.f32.mrf.mxu1  ;;  %v7511_v3 = vld [vmem:[#allocation134_spill] sm:$0xff] }
 0x3eb   :  { %v2347_v6 = vpop.f32.mrf.mxu0  ;;  %v7512_v5 = vmax.f32 %v7510_v17, %v7511_v3 }
 0x3ec   :  { %v3354_v40 = vmax.f32 %v3254_v26, 0.0  ;;  %v3148_v8 = vmax.f32 %v2486_v13, %v3007_v4  ;;  %v3009_v9 = vpop.f32.mrf.mxu1 }
 0x3ed   :  { %v2348_v47 = vpop.f32.mrf.mxu0 }
 0x3ee   :  { %v4547_v58 = vpack.c.bf16 %v3354_v40, %v3353_v14  ;;  %v2487_v25 = vmax.f32 %v7500_v28, %v2348_v47  ;;  %v3010_v30 = vpop.f32.mrf.mxu1  ;;  %v3255_v43 = vadd.f32 %v6684_v62, %v3148_v8  ;;  %v7513_v14 = vld [vmem:[#allocation135_spill] sm:$0xff]  ;;  %v7514_v40 = vld [vmem:[#allocation136_spill] sm:$0xff] }
 0x3ef   :  { %v2350_v41 = vpop.f32.mrf.mxu0  ;;  %v7515_v8 = vmax.f32 %v7513_v14, %v7514_v40 }
 0x3f0   :  { %4625 = vst [vmem:[%s6989_s3 + $0x150] sm:$0xff] %v4547_v58   ;;  %v3149_v22 = vmax.f32 %v2487_v25, %v3010_v30  ;;  %v3012_v45 = vpop.f32.mrf.mxu1  ;;  %v3355_v46 = vmax.f32 %v3255_v43, 0.0  ;;  %v7516_v43 = vld [vmem:[#allocation137_spill] sm:$0xff] }
 0x3f1   :  { %v2353_v16 = vpop.f32.mrf.mxu0 }
 0x3f2   :  { %v3256_v23 = vadd.f32 %v6684_v62, %v3149_v22  ;;  %v2488_v31 = vmax.f32 %v7503_v12, %v2353_v16  ;;  %v3015_v60 = vpop.f32.mrf.mxu1  ;;  %v7517_v22 = vld [vmem:[#allocation138_spill] sm:$0xff] }
 0x3f3   :  { %v2355_v10 = vpop.f32.mrf.mxu0  ;;  %v7518_v45 = vmax.f32 %v7516_v43, %v7517_v22 }
 0x3f4   :  { %v3356_v57 = vmax.f32 %v3256_v23, 0.0  ;;  %v3150_v11 = vmax.f32 %v2488_v31, %v3015_v60  ;;  %v3017_v61 = vpop.f32.mrf.mxu1 }
 0x3f5   :  { %v2356_v2 = vpop.f32.mrf.mxu0 }
 0x3f6   :  { %v4552_v55 = vpack.c.bf16 %v3356_v57, %v3355_v46  ;;  %v2489_v53 = vmax.f32 %v7506_v51, %v2356_v2  ;;  %v3018_v32 = vpop.f32.mrf.mxu1  ;;  %v3257_v42 = vadd.f32 %v6684_v62, %v3150_v11  ;;  %v7519_v46 = vld [vmem:[#allocation139_spill] sm:$0xff]  ;;  %v7520_v57 = vld [vmem:[#allocation140_spill] sm:$0xff] }
 0x3f7   :  { %v2358_v20 = vpop.f32.mrf.mxu0  ;;  %v7521_v11 = vmax.f32 %v7519_v46, %v7520_v57 }
 0x3f8   :  { %4626 = vst [vmem:[%s6989_s3 + $0x158] sm:$0xff] %v4552_v55   ;;  %v3151_v19 = vmax.f32 %v2489_v53, %v3018_v32  ;;  %v3020_v33 = vpop.f32.mrf.mxu1  ;;  %v3357_v50 = vmax.f32 %v3257_v42, 0.0  ;;  %v7522_v42 = vld [vmem:[#allocation141_spill] sm:$0xff] }
 0x3f9   :  { %v2361_v29 = vpop.f32.mrf.mxu0 }
 0x3fa   :  { %v3258_v7 = vadd.f32 %v6684_v62, %v3151_v19  ;;  %v2490_v24 = vmax.f32 %v7509_v39, %v2361_v29  ;;  %v3023_v15 = vpop.f32.mrf.mxu1  ;;  %v7523_v19 = vld [vmem:[#allocation142_spill] sm:$0xff] }
 0x3fb   :  { %v2363_v44 = vpop.f32.mrf.mxu0  ;;  %v7524_v33 = vmax.f32 %v7522_v42, %v7523_v19 }
 0x3fc   :  { %v3358_v49 = vmax.f32 %v3258_v7, 0.0  ;;  %v3152_v1 = vmax.f32 %v2490_v24, %v3023_v15  ;;  %v3025_v38 = vpop.f32.mrf.mxu1 }
 0x3fd   :  { %v2364_v59 = vpop.f32.mrf.mxu0 }
 0x3fe   :  { %v4557_v63 = vpack.c.bf16 %v3358_v49, %v3357_v50  ;;  %v2491_v35 = vmax.f32 %v7512_v5, %v2364_v59  ;;  %v3026_v26 = vpop.f32.mrf.mxu1  ;;  %v3259_v36 = vadd.f32 %v6684_v62, %v3152_v1  ;;  %v7525_v50 = vld [vmem:[#allocation143_spill] sm:$0xff]  ;;  %v7526_v49 = vld [vmem:[#allocation144_spill] sm:$0xff] }
 0x3ff   :  { %v2366_v0 = vpop.f32.mrf.mxu0  ;;  %v7527_v1 = vmax.f32 %v7525_v50, %v7526_v49 }
 0x400   :  { %4627 = vst [vmem:[%s6989_s3 + $0x160] sm:$0xff] %v4557_v63   ;;  %v3153_v52 = vmax.f32 %v2491_v35, %v3026_v26  ;;  %v3028_v13 = vpop.f32.mrf.mxu1  ;;  %v3359_v34 = vmax.f32 %v3259_v36, 0.0  ;;  %v7528_v36 = vld [vmem:[#allocation145_spill] sm:$0xff] }
 0x401   :  { %v2369_v4 = vpop.f32.mrf.mxu0 }
 0x402   :  { %v3260_v6 = vadd.f32 %v6684_v62, %v3153_v52  ;;  %v2492_v9 = vmax.f32 %v7515_v8, %v2369_v4  ;;  %v3031_v47 = vpop.f32.mrf.mxu1  ;;  %v7529_v52 = vld [vmem:[#allocation146_spill] sm:$0xff] }
 0x403   :  { %v2371_v58 = vpop.f32.mrf.mxu0  ;;  %v7530_v13 = vmax.f32 %v7528_v36, %v7529_v52 }
 0x404   :  { %v3360_v48 = vmax.f32 %v3260_v6, 0.0  ;;  %v3154_v28 = vmax.f32 %v2492_v9, %v3031_v47  ;;  %v3033_v25 = vpop.f32.mrf.mxu1 }
 0x405   :  { %v2372_v30 = vpop.f32.mrf.mxu0 }
 0x406   :  { %v4562_v41 = vpack.c.bf16 %v3360_v48, %v3359_v34  ;;  %v2493_v16 = vmax.f32 %v7518_v45, %v2372_v30  ;;  %v3034_v23 = vpop.f32.mrf.mxu1  ;;  %v3261_v21 = vadd.f32 %v6684_v62, %v3154_v28  ;;  %v7531_v34 = vld [vmem:[#allocation147_spill] sm:$0xff]  ;;  %v7532_v48 = vld [vmem:[#allocation148_spill] sm:$0xff] }
 0x407   :  { %v2374_v18 = vpop.f32.mrf.mxu0  ;;  %v7533_v28 = vmax.f32 %v7531_v34, %v7532_v48 }
 0x408   :  { %4628 = vst [vmem:[%s6989_s3 + $0x168] sm:$0xff] %v4562_v41   ;;  %v3155_v12 = vmax.f32 %v2493_v16, %v3034_v23  ;;  %v3036_v31 = vpop.f32.mrf.mxu1  ;;  %v3361_v37 = vmax.f32 %v3261_v21, 0.0  ;;  %v7534_v21 = vld [vmem:[#allocation149_spill] sm:$0xff] }
 0x409   :  { %v2377_v60 = vpop.f32.mrf.mxu0 }
 0x40a   :  { %v3262_v10 = vadd.f32 %v6684_v62, %v3155_v12  ;;  %v2494_v61 = vmax.f32 %v7521_v11, %v2377_v60  ;;  %v3039_v2 = vpop.f32.mrf.mxu1  ;;  %v7535_v12 = vld [vmem:[#allocation150_spill] sm:$0xff] }
 0x40b   :  { %v2379_v55 = vpop.f32.mrf.mxu0  ;;  %v7536_v31 = vmax.f32 %v7534_v21, %v7535_v12 }
 0x40c   :  { %v3362_v27 = vmax.f32 %v3262_v10, 0.0  ;;  %v3156_v51 = vmax.f32 %v2494_v61, %v3039_v2  ;;  %v3041_v53 = vpop.f32.mrf.mxu1 }
 0x40d   :  { %v2380_v32 = vpop.f32.mrf.mxu0 }
 0x40e   :  { %v4567_v20 = vpack.c.bf16 %v3362_v27, %v3361_v37  ;;  %v2495_v29 = vmax.f32 %v7524_v33, %v2380_v32  ;;  %v3042_v7 = vpop.f32.mrf.mxu1  ;;  %v3263_v56 = vadd.f32 %v6684_v62, %v3156_v51 }
 0x40f   :  { %v2382_v54 = vpop.f32.mrf.mxu0 }
 0x410   :  { %4629 = vst [vmem:[%s6989_s3 + $0x170] sm:$0xff] %v4567_v20   ;;  %v3157_v39 = vmax.f32 %v2495_v29, %v3042_v7  ;;  %v3044_v24 = vpop.f32.mrf.mxu1  ;;  %v3363_v17 = vmax.f32 %v3263_v56, 0.0 }
 0x411   :  { %v2385_v15 = vpop.f32.mrf.mxu0 }
 0x412   :  { %v3264_v44 = vadd.f32 %v6684_v62, %v3157_v39  ;;  %v2496_v38 = vmax.f32 %v7527_v1, %v2385_v15  ;;  %v3047_v59 = vpop.f32.mrf.mxu1 }
 0x413   :  { %v2387_v63 = vpop.f32.mrf.mxu0 }
 0x414   :  { %v3364_v3 = vmax.f32 %v3264_v44, 0.0  ;;  %v3158_v5 = vmax.f32 %v2496_v38, %v3047_v59  ;;  %v3049_v35 = vpop.f32.mrf.mxu1 }
 0x415   :  { %v2388_v26 = vpop.f32.mrf.mxu0 }
 0x416   :  { %v4572_v0 = vpack.c.bf16 %v3364_v3, %v3363_v17  ;;  %v2497_v4 = vmax.f32 %v7530_v13, %v2388_v26  ;;  %v3050_v6 = vpop.f32.mrf.mxu1  ;;  %v3265_v40 = vadd.f32 %v6684_v62, %v3158_v5 }
 0x417   :  { %v2390_v14 = vpop.f32.mrf.mxu0 }
 0x418   :  { %4630 = vst [vmem:[%s6989_s3 + $0x178] sm:$0xff] %v4572_v0   ;;  %v3159_v8 = vmax.f32 %v2497_v4, %v3050_v6  ;;  %v3052_v9 = vpop.f32.mrf.mxu1  ;;  %v3365_v43 = vmax.f32 %v3265_v40, 0.0 }
 0x419   :  { %v2393_v47 = vpop.f32.mrf.mxu0 }
 0x41a   :  { %v3266_v58 = vadd.f32 %v6684_v62, %v3159_v8  ;;  %v2498_v25 = vmax.f32 %v7533_v28, %v2393_v47  ;;  %v3055_v30 = vpop.f32.mrf.mxu1 }
 0x41b   :  { %v2395_v41 = vpop.f32.mrf.mxu0 }
 0x41c   :  { %v3366_v22 = vmax.f32 %v3266_v58, 0.0  ;;  %v3160_v45 = vmax.f32 %v2498_v25, %v3055_v30  ;;  %v3057_v16 = vpop.f32.mrf.mxu1 }
 0x41d   :  { %v2396_v23 = vpop.f32.mrf.mxu0 }
 0x41e   :  { %v4577_v18 = vpack.c.bf16 %v3366_v22, %v3365_v43  ;;  %v2499_v60 = vmax.f32 %v7536_v31, %v2396_v23  ;;  %v3058_v10 = vpop.f32.mrf.mxu1  ;;  %v3267_v57 = vadd.f32 %v6684_v62, %v3160_v45 }
 0x41f   :  { %v2398_v46 = vpop.f32.mrf.mxu0 }
 0x420   :  { %4631 = vst [vmem:[%s6989_s3 + $0x180] sm:$0xff] %v4577_v18   ;;  %v3161_v11 = vmax.f32 %v2499_v60, %v3058_v10  ;;  %v3060_v61 = vpop.f32.mrf.mxu1  ;;  %v3367_v55 = vmax.f32 %v3267_v57, 0.0 }
 0x422   :  { %v3268_v2 = vadd.f32 %v6684_v62, %v3161_v11 }
 0x424   :  { %v3368_v37 = vmax.f32 %v3268_v2, 0.0 }
 0x426   :  { %v4582_v27 = vpack.c.bf16 %v3368_v37, %v3367_v55 }
 0x428   :  { %4632 = vst [vmem:[%s6989_s3 + $0x188] sm:$0xff] %v4582_v27  }

// kernel: cnn_pool_forward.5
= control target key start
LH: loop header
LB: loop body
LE: loop exit
PB: predicated region body
PF: predicated region fallthrough
CT: control target
= control target key end

     0   :  { %s1644_s1 = inlined_call_operand.vmem [shape: bf16[512,128], index: 1, kind: input, shape index: {}]   ;;  %s1645_s0 = inlined_call_operand.vmem [shape: bf16[168,512], index: 0, kind: input, shape index: {}]   ;;  %s1646_s2 = inlined_call_operand.vmem [shape: f32[1,128], index: 2, kind: input, shape index: {}]   ;;  %s1647_s3 = inlined_call_operand.vmem [shape: bf16[168,128], index: 3, kind: output, shape index: {}]  }
   0x1   :  { %v1247_v0 = vld [vmem:[%s1644_s1 + $0x78] sm:$0xff]   ;;  %v1251_v4 = vld [vmem:[%s1644_s1 + $0x70] sm:$0xff]   ;;  %v1255_v8 = vld [vmem:[%s1644_s1 + $0x68] sm:$0xff]  }
   0x2   :  { %v1248_v1 = vld [vmem:[%s1644_s1 + $0xf8] sm:$0xff]   ;;  %1083 = vmatprep.subr.bf16.mxu0 %v1247_v0  ;;  %v1252_v5 = vld [vmem:[%s1644_s1 + $0xf0] sm:$0xff]   ;;  %v1256_v9 = vld [vmem:[%s1644_s1 + $0xe8] sm:$0xff]  }
   0x3   :  { %v1249_v2 = vld [vmem:[%s1644_s1 + $0x38] sm:$0xff]   ;;  %1165 = vmatprep.subr.bf16.mxu1 %v1248_v1  ;;  %v1253_v6 = vld [vmem:[%s1644_s1 + $0x30] sm:$0xff]   ;;  %v1257_v10 = vld [vmem:[%s1644_s1 + $0x28] sm:$0xff]  }
   0x4   :  { %v1250_v3 = vld [vmem:[%s1644_s1 + $0xb8] sm:$0xff]   ;;  %1084 = vmatpush3.bf16.msra.mxu0 %v1249_v2  ;;  %v1254_v7 = vld [vmem:[%s1644_s1 + $0xb0] sm:$0xff]   ;;  %v1258_v11 = vld [vmem:[%s1644_s1 + $0xa8] sm:$0xff]  }
   0x5   :  { %1166 = vmatpush3.bf16.msra.mxu1 %v1250_v3  ;;  %1085 = vmatprep.subr.bf16.mxu0 %v1251_v4  ;;  %v1259_v12 = vld [vmem:[%s1644_s1 + $0x60] sm:$0xff]   ;;  %v1263_v16 = vld [vmem:[%s1644_s1 + $0x58] sm:$0xff]   ;;  %v1267_v20 = vld [vmem:[%s1644_s1 + $0x50] sm:$0xff]  }
   0x6   :  { %1167 = vmatprep.subr.bf16.mxu1 %v1252_v5  ;;  %v1260_v13 = vld [vmem:[%s1644_s1 + $0xe0] sm:$0xff]   ;;  %v1264_v17 = vld [vmem:[%s1644_s1 + $0xd8] sm:$0xff]   ;;  %v1268_v21 = vld [vmem:[%s1644_s1 + $0xd0] sm:$0xff]  }
   0x7   :  { %v1261_v14 = vld [vmem:[%s1644_s1 + $0x20] sm:$0xff]   ;;  %v1265_v18 = vld [vmem:[%s1644_s1 + $0x18] sm:$0xff]   ;;  %v1269_v22 = vld [vmem:[%s1644_s1 + $0x10] sm:$0xff]  }
   0x8   :  { %1086 = vmatpush3.bf16.msra.mxu0 %v1253_v6  ;;  %v1262_v15 = vld [vmem:[%s1644_s1 + $0xa0] sm:$0xff]   ;;  %v1266_v19 = vld [vmem:[%s1644_s1 + $0x98] sm:$0xff]   ;;  %v1270_v23 = vld [vmem:[%s1644_s1 + $0x90] sm:$0xff]  }
   0x9   :  { %1168 = vmatpush3.bf16.msra.mxu1 %v1254_v7  ;;  %1087 = vmatprep.subr.bf16.mxu0 %v1255_v8  ;;  %v1271_v24 = vld [vmem:[%s1644_s1 + $0x48] sm:$0xff]   ;;  %v1275_v28 = vld [vmem:[%s1644_s1 + $0x40] sm:$0xff]  }
   0xa   :  { %1169 = vmatprep.subr.bf16.mxu1 %v1256_v9  ;;  %v1272_v25 = vld [vmem:[%s1644_s1 + $0xc8] sm:$0xff]   ;;  %v1276_v29 = vld [vmem:[%s1644_s1 + $0xc0] sm:$0xff]  }
   0xb   :  { %v1273_v26 = vld [vmem:[%s1644_s1 + $0x8] sm:$0xff]   ;;  %v1277_v30 = vld [vmem:[%s1644_s1] sm:$0xff]  }
   0xc   :  { %1088 = vmatpush3.bf16.msra.mxu0 %v1257_v10  ;;  %v1274_v27 = vld [vmem:[%s1644_s1 + $0x88] sm:$0xff]   ;;  %v1278_v31 = vld [vmem:[%s1644_s1 + $0x80] sm:$0xff]  }
   0xd   :  { %1170 = vmatpush3.bf16.msra.mxu1 %v1258_v11  ;;  %1089 = vmatprep.subr.bf16.mxu0 %v1259_v12  ;;  %v1279_v32 = vld [vmem:[%s1645_s0] ss:$16 sps:$4 sm:$0xff]   ;;  %v1281_v33 = vld [vmem:[%s1645_s0 + $0x4] ss:$16 sps:$4 sm:$0xff]   ;;  %v1282_v34 = vld [vmem:[%s1645_s0 + $0x8] ss:$16 sps:$4 sm:$0xff]  }
   0xe   :  { %1171 = vmatprep.subr.bf16.mxu1 %v1260_v13  ;;  %v1284_v35 = vld [vmem:[%s1645_s0 + $0xc] ss:$16 sps:$4 sm:$0xff]   ;;  %566 = vmatprep.mubr.bf16.mxu0 %v1281_v33  ;;  %v1285_v36 = vld [vmem:[%s1645_s0 + $0x24] ss:$16 sps:$4 sm:$0xff]   ;;  %v1289_v38 = vld [vmem:[%s1645_s0 + $0x20] ss:$16 sps:$4 sm:$0xff]  }
   0xf   :  { %686 = vmatprep.mubr.bf16.mxu1 %v1284_v35  ;;  %v1287_v37 = vld [vmem:[%s1645_s0 + $0x2c] ss:$16 sps:$4 sm:$0xff]   ;;  %v1290_v39 = vld [vmem:[%s1645_s0 + $0x28] ss:$16 sps:$4 sm:$0xff]   ;;  %v1291_v40 = vld [vmem:[%s1645_s0 + $0x44] ss:$16 sps:$4 sm:$0xff]  }
  0x10   :  { %1090 = vmatpush3.bf16.msra.mxu0 %v1261_v14  ;;  %v1293_v41 = vld [vmem:[%s1645_s0 + $0x4c] ss:$16 sps:$4 sm:$0xff]   ;;  %v1295_v42 = vld [vmem:[%s1645_s0 + $0x40] ss:$16 sps:$4 sm:$0xff]   ;;  %v1296_v43 = vld [vmem:[%s1645_s0 + $0x48] ss:$16 sps:$4 sm:$0xff]  }
  0x11   :  { %1172 = vmatpush3.bf16.msra.mxu1 %v1262_v15  ;;  %1091 = vmatprep.subr.bf16.mxu0 %v1263_v16  ;;  %v1297_v44 = vld [vmem:[%s1645_s0 + $0x64] ss:$16 sps:$4 sm:$0xff]   ;;  %v1299_v45 = vld [vmem:[%s1645_s0 + $0x6c] ss:$16 sps:$4 sm:$0xff]   ;;  %v1301_v46 = vld [vmem:[%s1645_s0 + $0x60] ss:$16 sps:$4 sm:$0xff]  }
  0x12   :  { %1173 = vmatprep.subr.bf16.mxu1 %v1264_v17  ;;  %v1302_v47 = vld [vmem:[%s1645_s0 + $0x68] ss:$16 sps:$4 sm:$0xff]   ;;  %v1303_v48 = vld [vmem:[%s1645_s0 + $0x84] ss:$16 sps:$4 sm:$0xff]   ;;  %v1305_v49 = vld [vmem:[%s1645_s0 + $0x8c] ss:$16 sps:$4 sm:$0xff]  }
  0x13   :  { %v1307_v50 = vld [vmem:[%s1645_s0 + $0x80] ss:$16 sps:$4 sm:$0xff]   ;;  %v1308_v51 = vld [vmem:[%s1645_s0 + $0x88] ss:$16 sps:$4 sm:$0xff]   ;;  %v1309_v52 = vld [vmem:[%s1645_s0 + $0xa4] ss:$16 sps:$4 sm:$0xff]  }
  0x14   :  { %1092 = vmatpush3.bf16.msra.mxu0 %v1265_v18  ;;  %v1311_v53 = vld [vmem:[%s1645_s0 + $0xac] ss:$16 sps:$4 sm:$0xff]   ;;  %v1313_v54 = vld [vmem:[%s1645_s0 + $0xa0] ss:$16 sps:$4 sm:$0xff]   ;;  %v1314_v55 = vld [vmem:[%s1645_s0 + $0xa8] ss:$16 sps:$4 sm:$0xff]  }
  0x15   :  { %1174 = vmatpush3.bf16.msra.mxu1 %v1266_v19  ;;  %1093 = vmatprep.subr.bf16.mxu0 %v1267_v20  ;;  %v1315_v56 = vld [vmem:[%s1645_s0 + $0xc4] ss:$16 sps:$4 sm:$0xff]   ;;  %v1317_v57 = vld [vmem:[%s1645_s0 + $0xcc] ss:$16 sps:$4 sm:$0xff]   ;;  %v1319_v58 = vld [vmem:[%s1645_s0 + $0xc0] ss:$16 sps:$4 sm:$0xff]  }
  0x16   :  { %1175 = vmatprep.subr.bf16.mxu1 %v1268_v21  ;;  %v1320_v59 = vld [vmem:[%s1645_s0 + $0xc8] ss:$16 sps:$4 sm:$0xff]   ;;  %v1321_v60 = vld [vmem:[%s1645_s0 + $0xe4] ss:$16 sps:$4 sm:$0xff]   ;;  %v1323_v61 = vld [vmem:[%s1645_s0 + $0xec] ss:$16 sps:$4 sm:$0xff]  }
  0x17   :  { %v1325_v62 = vld [vmem:[%s1645_s0 + $0xe0] ss:$16 sps:$4 sm:$0xff]   ;;  %v1326_v63 = vld [vmem:[%s1645_s0 + $0xe8] ss:$16 sps:$4 sm:$0xff]   ;;  %v1327_v0 = vld [vmem:[%s1645_s0 + $0x104] ss:$16 sps:$4 sm:$0xff]  }
  0x18   :  { %1094 = vmatpush3.bf16.msra.mxu0 %v1269_v22  ;;  %v1329_v1 = vld [vmem:[%s1645_s0 + $0x10c] ss:$16 sps:$4 sm:$0xff]   ;;  %v1331_v2 = vld [vmem:[%s1645_s0 + $0x100] ss:$16 sps:$4 sm:$0xff]   ;;  %v1332_v3 = vld [vmem:[%s1645_s0 + $0x108] ss:$16 sps:$4 sm:$0xff]  }
  0x19   :  { %1176 = vmatpush3.bf16.msra.mxu1 %v1270_v23  ;;  %1095 = vmatprep.subr.bf16.mxu0 %v1271_v24  ;;  %v1333_v4 = vld [vmem:[%s1645_s0 + $0x124] ss:$16 sps:$4 sm:$0xff]   ;;  %v1335_v5 = vld [vmem:[%s1645_s0 + $0x12c] ss:$16 sps:$4 sm:$0xff]   ;;  %v1337_v8 = vld [vmem:[%s1645_s0 + $0x120] ss:$16 sps:$4 sm:$0xff]  }
  0x1a   :  { %1177 = vmatprep.subr.bf16.mxu1 %v1272_v25  ;;  %v55_v6 = vld [vmem:[%s1645_s0 + $0x140] sm:$0xff]  ;;  %v56_v7 = vld [vmem:[%s1645_s0 + $0x148] sm:$0xff] }
  0x1b   :  { %v1338_v9 = vld [vmem:[%s1645_s0 + $0x128] ss:$16 sps:$4 sm:$0xff]   ;;  %v947_v10 = vcombine.high %v55_v6, %v55_v6  ;;  %v949_v11 = vcombine.high %v56_v7, %v56_v7  ;;  %v946_v12 = vcombine.low %v55_v6, %v55_v6  ;;  %v948_v13 = vcombine.low %v56_v7, %v56_v7  ;;  %v1588_v16 = vld [vmem:[%s1646_s2] ss:$0 sm:$0xff] }
  0x1c   :  { %1096 = vmatpush3.bf16.msra.mxu0 %v1273_v26 }
  0x1d   :  { %1178 = vmatpush3.bf16.msra.mxu1 %v1274_v27  ;;  %1097 = vmatprep.subr.bf16.mxu0 %v1275_v28 }
  0x1e   :  { %1179 = vmatprep.subr.bf16.mxu1 %v1276_v29 }
  0x20   :  { %1098 = vmatpush3.bf16.msra.mxu0 %v1277_v30 }
  0x21   :  { %1180 = vmatpush3.bf16.msra.mxu1 %v1278_v31 }
  0x23   :  { %567 = vmatmul.mubr.bf16.vlgmr.msra.gmra.mxu0 %v1279_v32 }
  0x24   :  { %687 = vmatmul.mubr.bf16.vlgmr.msra.gmra.mxu1 %v1282_v34  ;;  %574 = vmatprep.mubr.bf16.mxu0 %v1285_v36 }
  0x25   :  { %694 = vmatprep.mubr.bf16.mxu1 %v1287_v37 }
  0x2b   :  { %575 = vmatmul.mubr.bf16.gmra.mxu0 %v1289_v38 }
  0x2c   :  { %695 = vmatmul.mubr.bf16.gmra.mxu1 %v1290_v39  ;;  %582 = vmatprep.mubr.bf16.mxu0 %v1291_v40 }
  0x2d   :  { %702 = vmatprep.mubr.bf16.mxu1 %v1293_v41 }
  0x33   :  { %583 = vmatmul.mubr.bf16.gmra.mxu0 %v1295_v42 }
  0x34   :  { %703 = vmatmul.mubr.bf16.gmra.mxu1 %v1296_v43  ;;  %590 = vmatprep.mubr.bf16.mxu0 %v1297_v44 }
  0x35   :  { %710 = vmatprep.mubr.bf16.mxu1 %v1299_v45 }
  0x3b   :  { %591 = vmatmul.mubr.bf16.gmra.mxu0 %v1301_v46 }
  0x3c   :  { %711 = vmatmul.mubr.bf16.gmra.mxu1 %v1302_v47  ;;  %598 = vmatprep.mubr.bf16.mxu0 %v1303_v48 }
  0x3d   :  { %718 = vmatprep.mubr.bf16.mxu1 %v1305_v49 }
  0x43   :  { %599 = vmatmul.mubr.bf16.gmra.mxu0 %v1307_v50 }
  0x44   :  { %719 = vmatmul.mubr.bf16.gmra.mxu1 %v1308_v51  ;;  %606 = vmatprep.mubr.bf16.mxu0 %v1309_v52 }
  0x45   :  { %726 = vmatprep.mubr.bf16.mxu1 %v1311_v53 }
  0x4b   :  { %607 = vmatmul.mubr.bf16.gmra.mxu0 %v1313_v54 }
  0x4c   :  { %727 = vmatmul.mubr.bf16.gmra.mxu1 %v1314_v55  ;;  %614 = vmatprep.mubr.bf16.mxu0 %v1315_v56 }
  0x4d   :  { %734 = vmatprep.mubr.bf16.mxu1 %v1317_v57 }
  0x53   :  { %615 = vmatmul.mubr.bf16.gmra.mxu0 %v1319_v58 }
  0x54   :  { %735 = vmatmul.mubr.bf16.gmra.mxu1 %v1320_v59  ;;  %622 = vmatprep.mubr.bf16.mxu0 %v1321_v60 }
  0x55   :  { %742 = vmatprep.mubr.bf16.mxu1 %v1323_v61 }
  0x5b   :  { %623 = vmatmul.mubr.bf16.gmra.mxu0 %v1325_v62 }
  0x5c   :  { %743 = vmatmul.mubr.bf16.gmra.mxu1 %v1326_v63  ;;  %630 = vmatprep.mubr.bf16.mxu0 %v1327_v0 }
  0x5d   :  { %750 = vmatprep.mubr.bf16.mxu1 %v1329_v1 }
  0x63   :  { %631 = vmatmul.mubr.bf16.gmra.mxu0 %v1331_v2 }
  0x64   :  { %751 = vmatmul.mubr.bf16.gmra.mxu1 %v1332_v3  ;;  %638 = vmatprep.mubr.bf16.mxu0 %v1333_v4 }
  0x65   :  { %758 = vmatprep.mubr.bf16.mxu1 %v1335_v5 }
  0x6b   :  { %639 = vmatmul.mubr.bf16.gmra.mxu0 %v1337_v8 }
  0x6c   :  { %759 = vmatmul.mubr.bf16.gmra.mxu1 %v1338_v9  ;;  %646 = vmatprep.mubr.bf16.mxu0 %v947_v10 }
  0x6d   :  { %766 = vmatprep.mubr.bf16.mxu1 %v949_v11 }
  0x73   :  { %647 = vmatmul.mubr.bf16.gmra.mxu0 %v946_v12 }
  0x74   :  { %767 = vmatmul.mubr.bf16.gmra.mxu1 %v948_v13 }
  0xe3   :  { %v1099_v14 = vpop.f32.mrf.mxu0 }
  0xe4   :  { %v1181_v15 = vpop.f32.mrf.mxu1 }
  0xe5   :  { %v1100_v17 = vpop.f32.mrf.mxu0 }
  0xe6   :  { %v1101_v18 = vadd.f32 %v1100_v17, %v1099_v14  ;;  %v1182_v19 = vpop.f32.mrf.mxu1 }
  0xe7   :  { %v1102_v20 = vpop.f32.mrf.mxu0  ;;  %v1183_v24 = vadd.f32 %v1182_v19, %v1181_v15 }
  0xe8   :  { %v569_v21 = vadd.f32 %v1101_v18, %v1588_v16  ;;  %v1184_v22 = vpop.f32.mrf.mxu1 }
  0xe9   :  { %v1103_v23 = vpop.f32.mrf.mxu0 }
  0xea   :  { %v1104_v25 = vadd.f32 %v1103_v23, %v1102_v20  ;;  %v1185_v26 = vpop.f32.mrf.mxu1  ;;  %v689_v28 = vadd.f32 %v1183_v24, %v569_v21 }
  0xeb   :  { %v1105_v27 = vpop.f32.mrf.mxu0  ;;  %v1186_v30 = vadd.f32 %v1185_v26, %v1184_v22 }
  0xec   :  { %v572_v29 = vadd.f32 %v1104_v25, %v1588_v16  ;;  %v1187_v31 = vpop.f32.mrf.mxu1  ;;  %v774_v37 = vmax.f32 %v689_v28, 0.0 }
  0xed   :  { %v1106_v32 = vpop.f32.mrf.mxu0 }
  0xee   :  { %v692_v33 = vadd.f32 %v1186_v30, %v572_v29  ;;  %v1107_v34 = vadd.f32 %v1106_v32, %v1105_v27  ;;  %v1188_v35 = vpop.f32.mrf.mxu1 }
  0xef   :  { %v1108_v36 = vpop.f32.mrf.mxu0  ;;  %v1189_v43 = vadd.f32 %v1188_v35, %v1187_v31 }
  0xf0   :  { %v775_v38 = vmax.f32 %v692_v33, 0.0  ;;  %v577_v39 = vadd.f32 %v1107_v34, %v1588_v16  ;;  %v1190_v40 = vpop.f32.mrf.mxu1 }
  0xf1   :  { %v1109_v41 = vpop.f32.mrf.mxu0 }
  0xf2   :  { %v1027_v42 = vpack.c.bf16 %v775_v38, %v774_v37  ;;  %v1110_v44 = vadd.f32 %v1109_v41, %v1108_v36  ;;  %v1191_v45 = vpop.f32.mrf.mxu1  ;;  %v697_v47 = vadd.f32 %v1189_v43, %v577_v39 }
  0xf3   :  { %v1111_v46 = vpop.f32.mrf.mxu0  ;;  %v1192_v49 = vadd.f32 %v1191_v45, %v1190_v40 }
  0xf4   :  { %1028 = vst [vmem:[%s1647_s3] sm:$0xff] %v1027_v42   ;;  %v580_v48 = vadd.f32 %v1110_v44, %v1588_v16  ;;  %v1193_v50 = vpop.f32.mrf.mxu1  ;;  %v776_v56 = vmax.f32 %v697_v47, 0.0 }
  0xf5   :  { %v1112_v51 = vpop.f32.mrf.mxu0 }
  0xf6   :  { %v700_v52 = vadd.f32 %v1192_v49, %v580_v48  ;;  %v1113_v53 = vadd.f32 %v1112_v51, %v1111_v46  ;;  %v1194_v54 = vpop.f32.mrf.mxu1 }
  0xf7   :  { %v1114_v55 = vpop.f32.mrf.mxu0  ;;  %v1195_v62 = vadd.f32 %v1194_v54, %v1193_v50 }
  0xf8   :  { %v777_v57 = vmax.f32 %v700_v52, 0.0  ;;  %v585_v58 = vadd.f32 %v1113_v53, %v1588_v16  ;;  %v1196_v59 = vpop.f32.mrf.mxu1 }
  0xf9   :  { %v1115_v60 = vpop.f32.mrf.mxu0 }
  0xfa   :  { %v1032_v61 = vpack.c.bf16 %v777_v57, %v776_v56  ;;  %v1116_v63 = vadd.f32 %v1115_v60, %v1114_v55  ;;  %v1197_v0 = vpop.f32.mrf.mxu1  ;;  %v705_v2 = vadd.f32 %v1195_v62, %v585_v58 }
  0xfb   :  { %v1117_v1 = vpop.f32.mrf.mxu0  ;;  %v1198_v4 = vadd.f32 %v1197_v0, %v1196_v59 }
  0xfc   :  { %1074 = vst [vmem:[%s1647_s3 + $0x8] sm:$0xff] %v1032_v61   ;;  %v588_v3 = vadd.f32 %v1116_v63, %v1588_v16  ;;  %v1199_v5 = vpop.f32.mrf.mxu1  ;;  %v778_v11 = vmax.f32 %v705_v2, 0.0 }
  0xfd   :  { %v1118_v6 = vpop.f32.mrf.mxu0 }
  0xfe   :  { %v708_v7 = vadd.f32 %v1198_v4, %v588_v3  ;;  %v1119_v8 = vadd.f32 %v1118_v6, %v1117_v1  ;;  %v1200_v9 = vpop.f32.mrf.mxu1 }
  0xff   :  { %v1120_v10 = vpop.f32.mrf.mxu0  ;;  %v1201_v18 = vadd.f32 %v1200_v9, %v1199_v5 }
 0x100   :  { %v779_v12 = vmax.f32 %v708_v7, 0.0  ;;  %v593_v13 = vadd.f32 %v1119_v8, %v1588_v16  ;;  %v1202_v14 = vpop.f32.mrf.mxu1 }
 0x101   :  { %v1121_v15 = vpop.f32.mrf.mxu0 }
 0x102   :  { %v1037_v17 = vpack.c.bf16 %v779_v12, %v778_v11  ;;  %v1122_v19 = vadd.f32 %v1121_v15, %v1120_v10  ;;  %v1203_v20 = vpop.f32.mrf.mxu1  ;;  %v713_v22 = vadd.f32 %v1201_v18, %v593_v13 }
 0x103   :  { %v1123_v21 = vpop.f32.mrf.mxu0  ;;  %v1204_v24 = vadd.f32 %v1203_v20, %v1202_v14 }
 0x104   :  { %1075 = vst [vmem:[%s1647_s3 + $0x10] sm:$0xff] %v1037_v17   ;;  %v596_v23 = vadd.f32 %v1122_v19, %v1588_v16  ;;  %v1205_v25 = vpop.f32.mrf.mxu1  ;;  %v780_v31 = vmax.f32 %v713_v22, 0.0 }
 0x105   :  { %v1124_v26 = vpop.f32.mrf.mxu0 }
 0x106   :  { %v716_v27 = vadd.f32 %v1204_v24, %v596_v23  ;;  %v1125_v28 = vadd.f32 %v1124_v26, %v1123_v21  ;;  %v1206_v29 = vpop.f32.mrf.mxu1 }
 0x107   :  { %v1126_v30 = vpop.f32.mrf.mxu0  ;;  %v1207_v37 = vadd.f32 %v1206_v29, %v1205_v25 }
 0x108   :  { %v781_v32 = vmax.f32 %v716_v27, 0.0  ;;  %v601_v33 = vadd.f32 %v1125_v28, %v1588_v16  ;;  %v1208_v34 = vpop.f32.mrf.mxu1 }
 0x109   :  { %v1127_v35 = vpop.f32.mrf.mxu0 }
 0x10a   :  { %v1042_v36 = vpack.c.bf16 %v781_v32, %v780_v31  ;;  %v1128_v38 = vadd.f32 %v1127_v35, %v1126_v30  ;;  %v1209_v39 = vpop.f32.mrf.mxu1  ;;  %v721_v41 = vadd.f32 %v1207_v37, %v601_v33 }
 0x10b   :  { %v1129_v40 = vpop.f32.mrf.mxu0  ;;  %v1210_v43 = vadd.f32 %v1209_v39, %v1208_v34 }
 0x10c   :  { %1076 = vst [vmem:[%s1647_s3 + $0x18] sm:$0xff] %v1042_v36   ;;  %v604_v42 = vadd.f32 %v1128_v38, %v1588_v16  ;;  %v1211_v44 = vpop.f32.mrf.mxu1  ;;  %v782_v50 = vmax.f32 %v721_v41, 0.0 }
 0x10d   :  { %v1130_v45 = vpop.f32.mrf.mxu0 }
 0x10e   :  { %v724_v46 = vadd.f32 %v1210_v43, %v604_v42  ;;  %v1131_v47 = vadd.f32 %v1130_v45, %v1129_v40  ;;  %v1212_v48 = vpop.f32.mrf.mxu1 }
 0x10f   :  { %v1132_v49 = vpop.f32.mrf.mxu0  ;;  %v1213_v56 = vadd.f32 %v1212_v48, %v1211_v44 }
 0x110   :  { %v783_v51 = vmax.f32 %v724_v46, 0.0  ;;  %v609_v52 = vadd.f32 %v1131_v47, %v1588_v16  ;;  %v1214_v53 = vpop.f32.mrf.mxu1 }
 0x111   :  { %v1133_v54 = vpop.f32.mrf.mxu0 }
 0x112   :  { %v1047_v55 = vpack.c.bf16 %v783_v51, %v782_v50  ;;  %v1134_v57 = vadd.f32 %v1133_v54, %v1132_v49  ;;  %v1215_v58 = vpop.f32.mrf.mxu1  ;;  %v729_v60 = vadd.f32 %v1213_v56, %v609_v52 }
 0x113   :  { %v1135_v59 = vpop.f32.mrf.mxu0  ;;  %v1216_v62 = vadd.f32 %v1215_v58, %v1214_v53 }
 0x114   :  { %1077 = vst [vmem:[%s1647_s3 + $0x20] sm:$0xff] %v1047_v55   ;;  %v612_v61 = vadd.f32 %v1134_v57, %v1588_v16  ;;  %v1217_v63 = vpop.f32.mrf.mxu1  ;;  %v784_v5 = vmax.f32 %v729_v60, 0.0 }
 0x115   :  { %v1136_v0 = vpop.f32.mrf.mxu0 }
 0x116   :  { %v732_v1 = vadd.f32 %v1216_v62, %v612_v61  ;;  %v1137_v2 = vadd.f32 %v1136_v0, %v1135_v59  ;;  %v1218_v3 = vpop.f32.mrf.mxu1 }
 0x117   :  { %v1138_v4 = vpop.f32.mrf.mxu0  ;;  %v1219_v11 = vadd.f32 %v1218_v3, %v1217_v63 }
 0x118   :  { %v785_v6 = vmax.f32 %v732_v1, 0.0  ;;  %v617_v7 = vadd.f32 %v1137_v2, %v1588_v16  ;;  %v1220_v8 = vpop.f32.mrf.mxu1 }
 0x119   :  { %v1139_v9 = vpop.f32.mrf.mxu0 }
 0x11a   :  { %v1052_v10 = vpack.c.bf16 %v785_v6, %v784_v5  ;;  %v1140_v12 = vadd.f32 %v1139_v9, %v1138_v4  ;;  %v1221_v13 = vpop.f32.mrf.mxu1  ;;  %v737_v15 = vadd.f32 %v1219_v11, %v617_v7 }
 0x11b   :  { %v1141_v14 = vpop.f32.mrf.mxu0  ;;  %v1222_v18 = vadd.f32 %v1221_v13, %v1220_v8 }
 0x11c   :  { %1078 = vst [vmem:[%s1647_s3 + $0x28] sm:$0xff] %v1052_v10   ;;  %v620_v17 = vadd.f32 %v1140_v12, %v1588_v16  ;;  %v1223_v19 = vpop.f32.mrf.mxu1  ;;  %v786_v25 = vmax.f32 %v737_v15, 0.0 }
 0x11d   :  { %v1142_v20 = vpop.f32.mrf.mxu0 }
 0x11e   :  { %v740_v21 = vadd.f32 %v1222_v18, %v620_v17  ;;  %v1143_v22 = vadd.f32 %v1142_v20, %v1141_v14  ;;  %v1224_v23 = vpop.f32.mrf.mxu1 }
 0x11f   :  { %v1144_v24 = vpop.f32.mrf.mxu0  ;;  %v1225_v31 = vadd.f32 %v1224_v23, %v1223_v19 }
 0x120   :  { %v787_v26 = vmax.f32 %v740_v21, 0.0  ;;  %v625_v27 = vadd.f32 %v1143_v22, %v1588_v16  ;;  %v1226_v28 = vpop.f32.mrf.mxu1 }
 0x121   :  { %v1145_v29 = vpop.f32.mrf.mxu0 }
 0x122   :  { %v1057_v30 = vpack.c.bf16 %v787_v26, %v786_v25  ;;  %v1146_v32 = vadd.f32 %v1145_v29, %v1144_v24  ;;  %v1227_v33 = vpop.f32.mrf.mxu1  ;;  %v745_v35 = vadd.f32 %v1225_v31, %v625_v27 }
 0x123   :  { %v1147_v34 = vpop.f32.mrf.mxu0  ;;  %v1228_v37 = vadd.f32 %v1227_v33, %v1226_v28 }
 0x124   :  { %1079 = vst [vmem:[%s1647_s3 + $0x30] sm:$0xff] %v1057_v30   ;;  %v628_v36 = vadd.f32 %v1146_v32, %v1588_v16  ;;  %v1229_v38 = vpop.f32.mrf.mxu1  ;;  %v788_v44 = vmax.f32 %v745_v35, 0.0 }
 0x125   :  { %v1148_v39 = vpop.f32.mrf.mxu0 }
 0x126   :  { %v748_v40 = vadd.f32 %v1228_v37, %v628_v36  ;;  %v1149_v41 = vadd.f32 %v1148_v39, %v1147_v34  ;;  %v1230_v42 = vpop.f32.mrf.mxu1 }
 0x127   :  { %v1150_v43 = vpop.f32.mrf.mxu0  ;;  %v1231_v50 = vadd.f32 %v1230_v42, %v1229_v38 }
 0x128   :  { %v789_v45 = vmax.f32 %v748_v40, 0.0  ;;  %v633_v46 = vadd.f32 %v1149_v41, %v1588_v16  ;;  %v1232_v47 = vpop.f32.mrf.mxu1 }
 0x129   :  { %v1151_v48 = vpop.f32.mrf.mxu0 }
 0x12a   :  { %v1062_v49 = vpack.c.bf16 %v789_v45, %v788_v44  ;;  %v1152_v51 = vadd.f32 %v1151_v48, %v1150_v43  ;;  %v1233_v52 = vpop.f32.mrf.mxu1  ;;  %v753_v54 = vadd.f32 %v1231_v50, %v633_v46 }
 0x12b   :  { %v1153_v53 = vpop.f32.mrf.mxu0  ;;  %v1234_v56 = vadd.f32 %v1233_v52, %v1232_v47 }
 0x12c   :  { %1080 = vst [vmem:[%s1647_s3 + $0x38] sm:$0xff] %v1062_v49   ;;  %v636_v55 = vadd.f32 %v1152_v51, %v1588_v16  ;;  %v1235_v57 = vpop.f32.mrf.mxu1  ;;  %v790_v63 = vmax.f32 %v753_v54, 0.0 }
 0x12d   :  { %v1154_v58 = vpop.f32.mrf.mxu0 }
 0x12e   :  { %v756_v59 = vadd.f32 %v1234_v56, %v636_v55  ;;  %v1155_v60 = vadd.f32 %v1154_v58, %v1153_v53  ;;  %v1236_v61 = vpop.f32.mrf.mxu1 }
 0x12f   :  { %v1156_v62 = vpop.f32.mrf.mxu0  ;;  %v1237_v5 = vadd.f32 %v1236_v61, %v1235_v57 }
 0x130   :  { %v791_v0 = vmax.f32 %v756_v59, 0.0  ;;  %v641_v1 = vadd.f32 %v1155_v60, %v1588_v16  ;;  %v1238_v2 = vpop.f32.mrf.mxu1 }
 0x131   :  { %v1157_v3 = vpop.f32.mrf.mxu0 }
 0x132   :  { %v1067_v4 = vpack.c.bf16 %v791_v0, %v790_v63  ;;  %v1158_v6 = vadd.f32 %v1157_v3, %v1156_v62  ;;  %v1239_v7 = vpop.f32.mrf.mxu1  ;;  %v761_v9 = vadd.f32 %v1237_v5, %v641_v1 }
 0x133   :  { %v1159_v8 = vpop.f32.mrf.mxu0  ;;  %v1240_v11 = vadd.f32 %v1239_v7, %v1238_v2 }
 0x134   :  { %1081 = vst [vmem:[%s1647_s3 + $0x40] sm:$0xff] %v1067_v4   ;;  %v644_v10 = vadd.f32 %v1158_v6, %v1588_v16  ;;  %v1241_v12 = vpop.f32.mrf.mxu1  ;;  %v792_v19 = vmax.f32 %v761_v9, 0.0 }
 0x135   :  { %v1160_v13 = vpop.f32.mrf.mxu0 }
 0x136   :  { %v764_v14 = vadd.f32 %v1240_v11, %v644_v10  ;;  %v1161_v15 = vadd.f32 %v1160_v13, %v1159_v8  ;;  %v1242_v17 = vpop.f32.mrf.mxu1 }
 0x137   :  { %v1162_v18 = vpop.f32.mrf.mxu0  ;;  %v1243_v22 = vadd.f32 %v1242_v17, %v1241_v12 }
 0x138   :  { %v793_v20 = vmax.f32 %v764_v14, 0.0  ;;  %v649_v21 = vadd.f32 %v1161_v15, %v1588_v16  ;;  %v1244_v23 = vpop.f32.mrf.mxu1 }
 0x139   :  { %v1163_v24 = vpop.f32.mrf.mxu0 }
 0x13a   :  { %v1072_v25 = vpack.c.bf16 %v793_v20, %v792_v19  ;;  %v769_v26 = vadd.f32 %v1243_v22, %v649_v21  ;;  %v1245_v27 = vpop.f32.mrf.mxu1 }
 0x13c   :  { %1082 = vst [vmem:[%s1647_s3 + $0x48] sm:$0xff] %v1072_v25   ;;  %v794_v28 = vmax.f32 %v769_v26, 0.0 }
 0x13e   :  { %v1023_v29 = vpack.c.bf16 %v794_v28, %v794_v28 }
 0x140   :  { %900 = vst [vmem:[%s1647_s3 + $0x50] sm:$0xf] %v1023_v29 }

// kernel: cnn_pool_forward.6
= control target key start
LH: loop header
LB: loop body
LE: loop exit
PB: predicated region body
PF: predicated region fallthrough
CT: control target
= control target key end

     0   :  { %v1281_v34 = vmov 0.0   ;;  %vm1282_vm0 = vmmov 0   ;;  %vm516_vm1 = vcmask 523264   ;;  %s1650_s1 = inlined_call_operand.vmem [shape: bf16[576,128], index: 1, kind: input, shape index: {}]   ;;  %s1651_s0 = inlined_call_operand.vmem [shape: bf16[104,576], index: 0, kind: input, shape index: {}]   ;;  %s1652_s2 = inlined_call_operand.vmem [shape: f32[1,128], index: 2, kind: input, shape index: {}]   ;;  %s1653_s3 = inlined_call_operand.vmem [shape: bf16[104,128], index: 3, kind: output, shape index: {}]  }
   0x1   :  { %v1198_v0 = vld [vmem:[%s1650_s1 + $0x78] sm:$0xff]   ;;  %v1202_v4 = vld [vmem:[%s1650_s1 + $0x70] sm:$0xff]   ;;  %v1206_v8 = vld [vmem:[%s1650_s1 + $0x68] sm:$0xff]  }
   0x2   :  { %v1199_v1 = vld [vmem:[%s1650_s1 + $0xf8] sm:$0xff]   ;;  %1025 = vmatprep.subr.bf16.mxu0 %v1198_v0  ;;  %v1203_v5 = vld [vmem:[%s1650_s1 + $0xf0] sm:$0xff]   ;;  %v1207_v9 = vld [vmem:[%s1650_s1 + $0xe8] sm:$0xff]  }
   0x3   :  { %v1200_v2 = vld [vmem:[%s1650_s1 + $0x38] sm:$0xff]   ;;  %1083 = vmatprep.subr.bf16.mxu1 %v1199_v1  ;;  %v1204_v6 = vld [vmem:[%s1650_s1 + $0x30] sm:$0xff]   ;;  %v1208_v10 = vld [vmem:[%s1650_s1 + $0x28] sm:$0xff]  }
   0x4   :  { %v1201_v3 = vld [vmem:[%s1650_s1 + $0xb8] sm:$0xff]   ;;  %1026 = vmatpush3.bf16.msra.mxu0 %v1200_v2  ;;  %v1205_v7 = vld [vmem:[%s1650_s1 + $0xb0] sm:$0xff]   ;;  %v1209_v11 = vld [vmem:[%s1650_s1 + $0xa8] sm:$0xff]  }
   0x5   :  { %1084 = vmatpush3.bf16.msra.mxu1 %v1201_v3  ;;  %1027 = vmatprep.subr.bf16.mxu0 %v1202_v4  ;;  %v1210_v12 = vld [vmem:[%s1650_s1 + $0x60] sm:$0xff]   ;;  %v1214_v16 = vld [vmem:[%s1650_s1 + $0x58] sm:$0xff]   ;;  %v1218_v20 = vld [vmem:[%s1650_s1 + $0x50] sm:$0xff]  }
   0x6   :  { %1085 = vmatprep.subr.bf16.mxu1 %v1203_v5  ;;  %v1211_v13 = vld [vmem:[%s1650_s1 + $0xe0] sm:$0xff]   ;;  %v1215_v17 = vld [vmem:[%s1650_s1 + $0xd8] sm:$0xff]   ;;  %v1219_v21 = vld [vmem:[%s1650_s1 + $0xd0] sm:$0xff]  }
   0x7   :  { %v1212_v14 = vld [vmem:[%s1650_s1 + $0x20] sm:$0xff]   ;;  %v1216_v18 = vld [vmem:[%s1650_s1 + $0x18] sm:$0xff]   ;;  %v1220_v22 = vld [vmem:[%s1650_s1 + $0x10] sm:$0xff]  }
   0x8   :  { %1028 = vmatpush3.bf16.msra.mxu0 %v1204_v6  ;;  %v1213_v15 = vld [vmem:[%s1650_s1 + $0xa0] sm:$0xff]   ;;  %v1217_v19 = vld [vmem:[%s1650_s1 + $0x98] sm:$0xff]   ;;  %v1221_v23 = vld [vmem:[%s1650_s1 + $0x90] sm:$0xff]  }
   0x9   :  { %1086 = vmatpush3.bf16.msra.mxu1 %v1205_v7  ;;  %1029 = vmatprep.subr.bf16.mxu0 %v1206_v8  ;;  %v1222_v24 = vld [vmem:[%s1650_s1 + $0x48] sm:$0xff]   ;;  %v1226_v28 = vld [vmem:[%s1650_s1 + $0x40] sm:$0xff]   ;;  %v1236_v37 = vld [vmem:[%s1650_s1 + $0x118] sm:$0xff]  }
   0xa   :  { %1087 = vmatprep.subr.bf16.mxu1 %v1207_v9  ;;  %v1223_v25 = vld [vmem:[%s1650_s1 + $0xc8] sm:$0xff]   ;;  %v1227_v29 = vld [vmem:[%s1650_s1 + $0xc0] sm:$0xff]   ;;  %v1247_v43 = vld [vmem:[%s1650_s1 + $0x110] sm:$0xff]  }
   0xb   :  { %v1224_v26 = vld [vmem:[%s1650_s1 + $0x8] sm:$0xff]   ;;  %v1228_v30 = vld [vmem:[%s1650_s1] sm:$0xff]   ;;  %v1245_v44 = vld [vmem:[%s1651_s0 + $0x5c] ss:$20 sps:$4 sm:$0xff]  }
   0xc   :  { %1030 = vmatpush3.bf16.msra.mxu0 %v1208_v10  ;;  %v1225_v27 = vld [vmem:[%s1650_s1 + $0x88] sm:$0xff]   ;;  %v1229_v31 = vld [vmem:[%s1650_s1 + $0x80] sm:$0xff]   ;;  %v1250_v48 = vld [vmem:[%s1651_s0 + $0x7c] ss:$20 sps:$4 sm:$0xff]  }
   0xd   :  { %1088 = vmatpush3.bf16.msra.mxu1 %v1209_v11  ;;  %1031 = vmatprep.subr.bf16.mxu0 %v1210_v12  ;;  %v1230_v32 = vld [vmem:[%s1651_s0] ss:$20 sps:$4 sm:$0xff]   ;;  %v1232_v33 = vld [vmem:[%s1651_s0 + $0x4] ss:$20 sps:$4 sm:$0xff]   ;;  %v1233_v35 = vld [vmem:[%s1651_s0 + $0x8] ss:$20 sps:$4 sm:$0xff]  }
   0xe   :  { %1089 = vmatprep.subr.bf16.mxu1 %v1211_v13  ;;  %v1235_v36 = vld [vmem:[%s1651_s0 + $0xc] ss:$20 sps:$4 sm:$0xff]   ;;  %570 = vmatprep.mubr.bf16.mxu0 %v1232_v33  ;;  %v1239_v39 = vld [vmem:[%s1651_s0 + $0x34] ss:$20 sps:$4 sm:$0xff]   ;;  %v1242_v41 = vld [vmem:[%s1651_s0 + $0x30] ss:$20 sps:$4 sm:$0xff]  }
   0xf   :  { %658 = vmatprep.mubr.bf16.mxu1 %v1235_v36  ;;  %v1237_v38 = vld [vmem:[%s1651_s0 + $0x2c] ss:$20 sps:$4 sm:$0xff]   ;;  %v1241_v40 = vld [vmem:[%s1651_s0 + $0x28] ss:$20 sps:$4 sm:$0xff]   ;;  %v1248_v46 = vld [vmem:[%s1651_s0 + $0x50] ss:$20 sps:$4 sm:$0xff]  }
  0x10   :  { %1032 = vmatpush3.bf16.msra.mxu0 %v1212_v14  ;;  %v1243_v42 = vld [vmem:[%s1651_s0 + $0x54] ss:$20 sps:$4 sm:$0xff]   ;;  %v1249_v47 = vld [vmem:[%s1651_s0 + $0x58] ss:$20 sps:$4 sm:$0xff]   ;;  %v1269_v50 = vld [vmem:[%s1650_s1 + $0x100] sm:$0xff]  }
  0x11   :  { %1090 = vmatpush3.bf16.msra.mxu1 %v1213_v15  ;;  %1033 = vmatprep.subr.bf16.mxu0 %v1214_v16  ;;  %v1256_v45 = vld [vmem:[%s1650_s1 + $0x108] sm:$0xff]   ;;  %v1252_v49 = vld [vmem:[%s1651_s0 + $0x84] ss:$20 sps:$4 sm:$0xff]   ;;  %v1255_v52 = vld [vmem:[%s1651_s0 + $0x80] ss:$20 sps:$4 sm:$0xff]  }
  0x12   :  { %1091 = vmatprep.subr.bf16.mxu1 %v1215_v17  ;;  %v1254_v51 = vld [vmem:[%s1651_s0 + $0x78] ss:$20 sps:$4 sm:$0xff]   ;;  %v1261_v55 = vld [vmem:[%s1651_s0 + $0xa0] ss:$20 sps:$4 sm:$0xff]   ;;  %v1262_v56 = vld [vmem:[%s1651_s0 + $0xa8] ss:$20 sps:$4 sm:$0xff]  }
  0x13   :  { %v1257_v53 = vld [vmem:[%s1651_s0 + $0xa4] ss:$20 sps:$4 sm:$0xff]   ;;  %v1259_v54 = vld [vmem:[%s1651_s0 + $0xac] ss:$20 sps:$4 sm:$0xff]   ;;  %v1265_v58 = vld [vmem:[%s1651_s0 + $0xd4] ss:$20 sps:$4 sm:$0xff]  }
  0x14   :  { %1034 = vmatpush3.bf16.msra.mxu0 %v1216_v18  ;;  %v1263_v57 = vld [vmem:[%s1651_s0 + $0xcc] ss:$20 sps:$4 sm:$0xff]   ;;  %v51_v59 = vld [vmem:[%s1651_s0 + $0xf0] sm:$0xff]  ;;  %v52_v60 = vld [vmem:[%s1651_s0 + $0xf8] sm:$0xff] }
  0x15   :  { %1092 = vmatpush3.bf16.msra.mxu1 %v1217_v19  ;;  %1035 = vmatprep.subr.bf16.mxu0 %v1218_v20  ;;  %v1267_v61 = vld [vmem:[%s1651_s0 + $0xc8] ss:$20 sps:$4 sm:$0xff]   ;;  %v1268_v62 = vld [vmem:[%s1651_s0 + $0xd0] ss:$20 sps:$4 sm:$0xff]   ;;  %v917_v63 = vcombine.high %v51_v59, %v51_v59  ;;  %v919_v0 = vcombine.high %v52_v60, %v52_v60  ;;  %v916_v1 = vcombine.low %v51_v59, %v51_v59  ;;  %v1276_v5 = vld [vmem:[%s1651_s0 + $0x38] ss:$20 sps:$4 sm:$0xff]  }
  0x16   :  { %1093 = vmatprep.subr.bf16.mxu1 %v1219_v21  ;;  %v918_v2 = vcombine.low %v52_v60, %v52_v60  ;;  %v1274_v3 = vld [vmem:[%s1651_s0 + $0x10] ss:$20 sps:$4 sm:$0xff]   ;;  %v1277_v6 = vld [vmem:[%s1651_s0 + $0xd8] ss:$20 sps:$4 sm:$0xff]   ;;  %v1278_v7 = vld [vmem:[%s1651_s0 + $0x60] ss:$20 sps:$4 sm:$0xff]  }
  0x17   :  { %v1275_v4 = vld [vmem:[%s1651_s0 + $0xb0] ss:$20 sps:$4 sm:$0xff]   ;;  %v1279_v8 = vld [vmem:[%s1651_s0 + $0x100] ss:$0 sps:$4 sm:$0xff]   ;;  %v1280_v9 = vld [vmem:[%s1651_s0 + $0x88] ss:$20 sps:$4 sm:$0xff]  }
  0x18   :  { %1036 = vmatpush3.bf16.msra.mxu0 %v1220_v22 }
  0x19   :  { %1094 = vmatpush3.bf16.msra.mxu1 %v1221_v23  ;;  %1037 = vmatprep.subr.bf16.mxu0 %v1222_v24 }
  0x1a   :  { %1095 = vmatprep.subr.bf16.mxu1 %v1223_v25 }
  0x1c   :  { %1038 = vmatpush3.bf16.msra.mxu0 %v1224_v26 }
  0x1d   :  { %1096 = vmatpush3.bf16.msra.mxu1 %v1225_v27  ;;  %1039 = vmatprep.subr.bf16.mxu0 %v1226_v28 }
  0x1e   :  { %1097 = vmatprep.subr.bf16.mxu1 %v1227_v29 }
  0x20   :  { %1040 = vmatpush3.bf16.msra.mxu0 %v1228_v30 }
  0x21   :  { %1098 = vmatpush3.bf16.msra.mxu1 %v1229_v31  ;;  %1152 = vmatprep.subr.bf16.mxu0 %v1281_v34 }
  0x22   :  { %1188 = vmatprep.subr.bf16.mxu1 %v1281_v34 }
  0x23   :  { %571 = vmatmul.mubr.bf16.vlgmr.msra.gmra.mxu0 %v1230_v32 }
  0x24   :  { %659 = vmatmul.mubr.bf16.vlgmr.msra.gmra.mxu1 %v1233_v35  ;;  %1153 = vmatpush3.bf16.msra.mxu0 %v1236_v37 }
  0x25   :  { %578 = vmatprep.mubr.bf16.mxu0 %v1237_v38  ;;  %1192 = vmatpush3.bf16.msra.mxu1 %v1236_v37 }
  0x26   :  { %666 = vmatprep.mubr.bf16.mxu1 %v1239_v39  ;;  %1154 = vmatprep.subr.bf16.mxu0 %v1281_v34 }
  0x27   :  { %1189 = vmatprep.subr.bf16.mxu1 %v1281_v34 }
  0x28   :  { %1155 = vmatpush3.bf16.msra.mxu0 %v1247_v43 }
  0x29   :  { %1193 = vmatpush3.bf16.msra.mxu1 %v1247_v43  ;;  %1156 = vmatprep.subr.bf16.mxu0 %v1281_v34 }
  0x2a   :  { %1190 = vmatprep.subr.bf16.mxu1 %v1281_v34 }
  0x2b   :  { %579 = vmatmul.mubr.bf16.gmra.mxu0 %v1241_v40 }
  0x2c   :  { %667 = vmatmul.mubr.bf16.gmra.mxu1 %v1242_v41  ;;  %586 = vmatprep.mubr.bf16.mxu0 %v1243_v42 }
  0x2d   :  { %674 = vmatprep.mubr.bf16.mxu1 %v1245_v44  ;;  %1157 = vmatpush3.bf16.msra.mxu0 %v1256_v45 }
  0x2e   :  { %1194 = vmatpush3.bf16.msra.mxu1 %v1256_v45  ;;  %1158 = vmatprep.subr.bf16.mxu0 %v1281_v34 }
  0x2f   :  { %1191 = vmatprep.subr.bf16.mxu1 %v1281_v34 }
  0x31   :  { %1159 = vmatpush3.bf16.msra.mxu0 %v1269_v50 }
  0x32   :  { %1195 = vmatpush3.bf16.msra.mxu1 %v1269_v50 }
  0x33   :  { %587 = vmatmul.mubr.bf16.gmra.mxu0 %v1248_v46 }
  0x34   :  { %675 = vmatmul.mubr.bf16.gmra.mxu1 %v1249_v47  ;;  %594 = vmatprep.mubr.bf16.mxu0 %v1250_v48 }
  0x35   :  { %682 = vmatprep.mubr.bf16.mxu1 %v1252_v49 }
  0x3b   :  { %595 = vmatmul.mubr.bf16.gmra.mxu0 %v1254_v51 }
  0x3c   :  { %683 = vmatmul.mubr.bf16.gmra.mxu1 %v1255_v52  ;;  %602 = vmatprep.mubr.bf16.mxu0 %v1257_v53 }
  0x3d   :  { %690 = vmatprep.mubr.bf16.mxu1 %v1259_v54 }
  0x43   :  { %603 = vmatmul.mubr.bf16.gmra.mxu0 %v1261_v55 }
  0x44   :  { %691 = vmatmul.mubr.bf16.gmra.mxu1 %v1262_v56  ;;  %610 = vmatprep.mubr.bf16.mxu0 %v1263_v57 }
  0x45   :  { %698 = vmatprep.mubr.bf16.mxu1 %v1265_v58 }
  0x4b   :  { %611 = vmatmul.mubr.bf16.gmra.mxu0 %v1267_v61  ;;  %v1590_v61 = vld [vmem:[%s1652_s2] ss:$0 sm:$0xff] }
  0x4c   :  { %699 = vmatmul.mubr.bf16.gmra.mxu1 %v1268_v62  ;;  %618 = vmatprep.mubr.bf16.mxu0 %v917_v63 }
  0x4d   :  { %706 = vmatprep.mubr.bf16.mxu1 %v919_v0 }
  0x53   :  { %619 = vmatmul.mubr.bf16.gmra.mxu0 %v916_v1 }
  0x54   :  { %707 = vmatmul.mubr.bf16.gmra.mxu1 %v918_v2  ;;  %1160 = vmatprep.mubr.msk.bf16.mxu0 %vm1282_vm0, %v1281_v34 }
  0x55   :  { %1176 = vmatprep.mubr.msk.bf16.mxu1 %vm1282_vm0, %v1281_v34 }
  0x5b   :  { %1161 = vmatmul.mubr.msk.bf16.vlgmr.msra.gmra.mxu0 %vm516_vm1, %v1274_v3 }
  0x5c   :  { %1177 = vmatmul.mubr.msk.bf16.vlgmr.msra.gmra.mxu1 %vm516_vm1, %v1275_v4  ;;  %1164 = vmatprep.mubr.msk.bf16.mxu0 %vm1282_vm0, %v1281_v34 }
  0x5d   :  { %1180 = vmatprep.mubr.msk.bf16.mxu1 %vm1282_vm0, %v1281_v34 }
  0x63   :  { %1165 = vmatmul.mubr.msk.bf16.gmra.mxu0 %vm516_vm1, %v1276_v5 }
  0x64   :  { %1181 = vmatmul.mubr.msk.bf16.gmra.mxu1 %vm516_vm1, %v1277_v6  ;;  %1168 = vmatprep.mubr.msk.bf16.mxu0 %vm1282_vm0, %v1281_v34 }
  0x65   :  { %1184 = vmatprep.mubr.msk.bf16.mxu1 %vm1282_vm0, %v1281_v34 }
  0x6b   :  { %1169 = vmatmul.mubr.msk.bf16.gmra.mxu0 %vm516_vm1, %v1278_v7 }
  0x6c   :  { %1185 = vmatmul.mubr.msk.bf16.gmra.mxu1 %vm516_vm1, %v1279_v8  ;;  %1172 = vmatprep.mubr.msk.bf16.mxu0 %vm1282_vm0, %v1281_v34 }
  0x73   :  { %1173 = vmatmul.mubr.msk.bf16.gmra.mxu0 %vm516_vm1, %v1280_v9 }
  0xe3   :  { %v1041_v10 = vpop.f32.mrf.mxu0 }
  0xe4   :  { %v1099_v11 = vpop.f32.mrf.mxu1 }
  0xe5   :  { %v1042_v12 = vpop.f32.mrf.mxu0 }
  0xe6   :  { %v1100_v13 = vpop.f32.mrf.mxu1  ;;  %v1043_v59 = vadd.f32 %v1042_v12, %v1041_v10 }
  0xe7   :  { %v1044_v14 = vpop.f32.mrf.mxu0  ;;  %v1101_v5 = vadd.f32 %v1100_v13, %v1099_v11 }
  0xe8   :  { %v1102_v15 = vpop.f32.mrf.mxu1  ;;  %v573_v4 = vadd.f32 %v1043_v59, %v1590_v61 }
  0xe9   :  { %v1045_v16 = vpop.f32.mrf.mxu0 }
  0xea   :  { %v1103_v17 = vpop.f32.mrf.mxu1  ;;  %v1046_v0 = vadd.f32 %v1045_v16, %v1044_v14  ;;  %v661_v16 = vadd.f32 %v1101_v5, %v573_v4 }
  0xeb   :  { %v1539_v18 = vpop.f32.mrf.mxu0  ;;  %v1104_v12 = vadd.f32 %v1103_v17, %v1102_v15 }
  0xec   :  { %v1541_v19 = vpop.f32.mrf.mxu1  ;;  %v576_v10 = vadd.f32 %v1046_v0, %v1590_v61 }
  0xed   :  { %v1048_v20 = vpop.f32.mrf.mxu0 }
  0xee   :  { %v1543_v21 = vpop.f32.mrf.mxu1  ;;  %v1049_v14 = vadd.f32 %v1048_v20, %v1539_v18 }
  0xef   :  { %v1545_v22 = vpop.f32.mrf.mxu0  ;;  %v1107_v18 = vadd.f32 %v1543_v21, %v1541_v19 }
  0xf0   :  { %v1547_v23 = vpop.f32.mrf.mxu1 }
  0xf1   :  { %v1549_v24 = vpop.f32.mrf.mxu0 }
  0xf2   :  { %v1551_v25 = vpop.f32.mrf.mxu1  ;;  %v1052_v13 = vadd.f32 %v1549_v24, %v1545_v22 }
  0xf3   :  { %v1553_v26 = vpop.f32.mrf.mxu0 }
  0xf4   :  { %v1555_v27 = vpop.f32.mrf.mxu1 }
  0xf5   :  { %v1557_v28 = vpop.f32.mrf.mxu0 }
  0xf6   :  { %v1559_v29 = vpop.f32.mrf.mxu1 }
  0xf7   :  { %v1561_v30 = vpop.f32.mrf.mxu0 }
  0xf8   :  { %v1563_v31 = vpop.f32.mrf.mxu1 }
  0xf9   :  { %v1565_v32 = vpop.f32.mrf.mxu0 }
  0xfa   :  { %v1567_v33 = vpop.f32.mrf.mxu1 }
  0xfb   :  { %v1569_v34 = vpop.f32.mrf.mxu0 }
  0xfc   :  { %v1571_v35 = vpop.f32.mrf.mxu1 }
  0xfd   :  { %v1573_v36 = vpop.f32.mrf.mxu0 }
  0xfe   :  { %v1575_v37 = vpop.f32.mrf.mxu1 }
  0xff   :  { %v1577_v38 = vpop.f32.mrf.mxu0 }
 0x100   :  { %v1579_v39 = vpop.f32.mrf.mxu1 }
 0x101   :  { %1654 = vst [vmem:[#allocation2_spill] sm:$0xff] %v1579_v39  ;;  %v1581_v40 = vpop.f32.mrf.mxu0 }
 0x102   :  { %v1583_v41 = vpop.f32.mrf.mxu1 }
 0x103   :  { %1655 = vst [vmem:[#allocation3_spill] sm:$0xff] %v1583_v41  ;;  %v1065_v42 = vpop.f32.mrf.mxu0 }
 0x104   :  { %v1123_v43 = vpop.f32.mrf.mxu1 }
 0x105   :  { %v1066_v44 = vpop.f32.mrf.mxu0 }
 0x106   :  { %v1124_v45 = vpop.f32.mrf.mxu1  ;;  %v1067_v62 = vadd.f32 %v1066_v44, %v1065_v42 }
 0x107   :  { %v1068_v46 = vpop.f32.mrf.mxu0  ;;  %v1125_v8 = vadd.f32 %v1124_v45, %v1123_v43 }
 0x108   :  { %v1126_v47 = vpop.f32.mrf.mxu1  ;;  %v605_v7 = vadd.f32 %v1067_v62, %v1590_v61  ;;  %v664_v62 = vadd.f32 %v1104_v12, %v576_v10 }
 0x109   :  { %v1069_v48 = vpop.f32.mrf.mxu0 }
 0x10a   :  { %v1127_v49 = vpop.f32.mrf.mxu1  ;;  %v1070_v2 = vadd.f32 %v1069_v48, %v1068_v46  ;;  %v693_v59 = vadd.f32 %v1125_v8, %v605_v7 }
 0x10b   :  { %v1071_v50 = vpop.f32.mrf.mxu0  ;;  %v1128_v42 = vadd.f32 %v1127_v49, %v1126_v47  ;;  %v581_v47 = vadd.f32 %v1049_v14, %v1590_v61 }
 0x10c   :  { %v1129_v51 = vpop.f32.mrf.mxu1  ;;  %v608_v39 = vadd.f32 %v1070_v2, %v1590_v61 }
 0x10d   :  { %v1072_v52 = vpop.f32.mrf.mxu0  ;;  %v669_v8 = vadd.f32 %v1107_v18, %v581_v47 }
 0x10e   :  { %v1130_v53 = vpop.f32.mrf.mxu1  ;;  %v1073_v48 = vadd.f32 %v1072_v52, %v1071_v50  ;;  %v1110_v50 = vadd.f32 %v1551_v25, %v1547_v23  ;;  %v1055_v23 = vadd.f32 %v1557_v28, %v1553_v26 }
 0x10f   :  { %v1074_v54 = vpop.f32.mrf.mxu0  ;;  %v1131_v22 = vadd.f32 %v1130_v53, %v1129_v51 }
 0x110   :  { %v1132_v55 = vpop.f32.mrf.mxu1  ;;  %v613_v52 = vadd.f32 %v1073_v48, %v1590_v61 }
 0x111   :  { %v1075_v56 = vpop.f32.mrf.mxu0 }
 0x112   :  { %v1133_v57 = vpop.f32.mrf.mxu1  ;;  %v1076_v0 = vadd.f32 %v1075_v56, %v1074_v54  ;;  %v584_v54 = vadd.f32 %v1052_v13, %v1590_v61 }
 0x113   :  { %v1077_v58 = vpop.f32.mrf.mxu0  ;;  %v1134_v56 = vadd.f32 %v1133_v57, %v1132_v55  ;;  %v1058_v55 = vadd.f32 %v1565_v32, %v1561_v30  ;;  %v589_v30 = vadd.f32 %v1055_v23, %v1590_v61  ;;  %v1113_v32 = vadd.f32 %v1559_v29, %v1555_v27 }
 0x114   :  { %v1585_v60 = vpop.f32.mrf.mxu1  ;;  %v616_v5 = vadd.f32 %v1076_v0, %v1590_v61 }
 0x115   :  { %v1078_v63 = vpop.f32.mrf.mxu0  ;;  %v677_v29 = vadd.f32 %v1113_v32, %v589_v30 }
 0x116   :  { %v1136_v1 = vpop.f32.mrf.mxu1 }
 0x117   :  { %v1080_v3 = vpop.f32.mrf.mxu0  ;;  %v1137_v26 = vadd.f32 %v1136_v1, %v1585_v60  ;;  %v1116_v60 = vadd.f32 %v1567_v33, %v1563_v31 }
 0x118   :  { %v1138_v6 = vpop.f32.mrf.mxu1 }
 0x119   :  { %v1081_v9 = vpop.f32.mrf.mxu0  ;;  %v1079_v6 = vadd.f32 %v1078_v63, %v1077_v58  ;;  %v672_v63 = vadd.f32 %v1110_v50, %v584_v54  ;;  %v1656_v54 = vld [vmem:[#allocation2_spill] sm:$0xff] }
 0x11a   :  { %v1139_v41 = vpop.f32.mrf.mxu1  ;;  %v701_v9 = vadd.f32 %v1131_v22, %v613_v52  ;;  %v1119_v52 = vadd.f32 %v1575_v37, %v1571_v35 }
 0x11b   :  { %v748_v44 = vpop.f32.mrf.mxu0  ;;  %v696_v41 = vadd.f32 %v1128_v42, %v608_v39  ;;  %v621_v12 = vadd.f32 %v1079_v6, %v1590_v61 }
 0x11c   :  { %v780_v46 = vpop.f32.mrf.mxu1  ;;  %v749_v43 = vadd.f32 %v748_v44, %v661_v16  ;;  %v704_v44 = vadd.f32 %v1134_v56, %v616_v5  ;;  %v1657_v56 = vld [vmem:[#allocation3_spill] sm:$0xff] }
 0x11d   :  { %v1162_v11 = vpop.f32.mrf.mxu0  ;;  %v781_v15 = vadd.f32 %v780_v46, %v693_v59  ;;  %v592_v59 = vadd.f32 %v1058_v55, %v1590_v61  ;;  %v709_v0 = vadd.f32 %v1137_v26, %v621_v12 }
 0x11e   :  { %v1178_v45 = vpop.f32.mrf.mxu1  ;;  %v802_v3 = vmax.f32 %v749_v43, 0.0 }
 0x11f   :  { %v751_v17 = vpop.f32.mrf.mxu0  ;;  %v810_v19 = vmax.f32 %v781_v15, 0.0  ;;  %v1061_v15 = vadd.f32 %v1573_v36, %v1569_v34  ;;  %v680_v33 = vadd.f32 %v1116_v60, %v592_v59 }
 0x120   :  { %v752_v20 = vadd.f32 %v751_v17, %v664_v62  ;;  %v783_v49 = vpop.f32.mrf.mxu1 }
 0x121   :  { %v784_v24 = vadd.f32 %v783_v49, %v696_v41  ;;  %v1163_v2 = vpop.f32.mrf.mxu0  ;;  %v597_v50 = vadd.f32 %v1061_v15, %v1590_v61 }
 0x122   :  { %v803_v39 = vmax.f32 %v752_v20, 0.0  ;;  %v1179_v4 = vpop.f32.mrf.mxu1  ;;  %v1064_v20 = vadd.f32 %v1581_v40, %v1577_v38 }
 0x123   :  { %v811_v21 = vmax.f32 %v784_v24, 0.0  ;;  %v756_v7 = vpop.f32.mrf.mxu0 }
 0x124   :  { %v993_v25 = vpack.c.bf16 %v803_v39, %v802_v3  ;;  %v788_v51 = vpop.f32.mrf.mxu1  ;;  %v757_v57 = vadd.f32 %v756_v7, %v669_v8  ;;  %v600_v2 = vadd.f32 %v1064_v20, %v1590_v61  ;;  %v1122_v3 = vadd.f32 %v1657_v56, %v1656_v54 }
 0x125   :  { %v1013_v53 = vpack.c.bf16 %v811_v21, %v810_v19  ;;  %v1166_v10 = vpop.f32.mrf.mxu0  ;;  %v789_v28 = vadd.f32 %v788_v51, %v701_v9  ;;  %v685_v21 = vadd.f32 %v1119_v52, %v597_v50 }
 0x126   :  { %994 = vst [vmem:[%s1653_s3] sm:$0xff] %v993_v25   ;;  %v1182_v58 = vpop.f32.mrf.mxu1  ;;  %v804_v1 = vmax.f32 %v757_v57, 0.0  ;;  %v688_v61 = vadd.f32 %v1122_v3, %v600_v2 }
 0x127   :  { %1023 = vst [vmem:[%s1653_s3 + $0x20] sm:$0xff] %v1013_v53   ;;  %v759_v42 = vpop.f32.mrf.mxu0  ;;  %v812_v43 = vmax.f32 %v789_v28, 0.0 }
 0x128   :  { %v760_v14 = vadd.f32 %v759_v42, %v672_v63  ;;  %v791_v16 = vpop.f32.mrf.mxu1 }
 0x129   :  { %v792_v46 = vadd.f32 %v791_v16, %v704_v44  ;;  %v1167_v48 = vpop.f32.mrf.mxu0 }
 0x12a   :  { %v805_v11 = vmax.f32 %v760_v14, 0.0  ;;  %v1183_v13 = vpop.f32.mrf.mxu1 }
 0x12b   :  { %v813_v45 = vmax.f32 %v792_v46, 0.0  ;;  %v764_v62 = vpop.f32.mrf.mxu0 }
 0x12c   :  { %v998_v27 = vpack.c.bf16 %v805_v11, %v804_v1  ;;  %v796_v17 = vpop.f32.mrf.mxu1  ;;  %v765_v31 = vadd.f32 %v764_v62, %v677_v29 }
 0x12d   :  { %v1018_v41 = vpack.c.bf16 %v813_v45, %v812_v43  ;;  %v797_v47 = vadd.f32 %v796_v17, %v709_v0  ;;  %v1170_v18 = vpop.f32.mrf.mxu0 }
 0x12e   :  { %1020 = vst [vmem:[%s1653_s3 + $0x8] sm:$0xff] %v998_v27   ;;  %v1186_v49 = vpop.f32.mrf.mxu1  ;;  %v806_v39 = vmax.f32 %v765_v31, 0.0 }
 0x12f   :  { %1024 = vst [vmem:[%s1653_s3 + $0x28] sm:$0xff] %v1018_v41   ;;  %v814_v34 = vmax.f32 %v797_v47, 0.0  ;;  %v767_v36 = vpop.f32.mrf.mxu0 }
 0x130   :  { %v768_v22 = vadd.f32 %v767_v36, %v680_v33  ;;  %v799_v38 = vpop.f32.mrf.mxu1 }
 0x131   :  { %v989_v40 = vpack.c.bf16 %v814_v34, %v814_v34  ;;  %v1171_v24 = vpop.f32.mrf.mxu0 }
 0x132   :  { %v807_v4 = vmax.f32 %v768_v22, 0.0  ;;  %v1187_v5 = vpop.f32.mrf.mxu1 }
 0x133   :  { %880 = vst [vmem:[%s1653_s3 + $0x30] sm:$0xf] %v989_v40  ;;  %v772_v6 = vpop.f32.mrf.mxu0 }
 0x134   :  { %v1003_v19 = vpack.c.bf16 %v807_v4, %v806_v39  ;;  %v773_v37 = vadd.f32 %v772_v6, %v685_v21 }
 0x135   :  { %v1174_v35 = vpop.f32.mrf.mxu0 }
 0x136   :  { %1021 = vst [vmem:[%s1653_s3 + $0x10] sm:$0xff] %v1003_v19   ;;  %v808_v8 = vmax.f32 %v773_v37, 0.0 }
 0x137   :  { %v775_v7 = vpop.f32.mrf.mxu0 }
 0x138   :  { %v776_v23 = vadd.f32 %v775_v7, %v688_v61 }
 0x139   :  { %v1175_v25 = vpop.f32.mrf.mxu0 }
 0x13a   :  { %v809_v51 = vmax.f32 %v776_v23, 0.0 }
 0x13c   :  { %v1008_v53 = vpack.c.bf16 %v809_v51, %v808_v8 }
 0x13e   :  { %1022 = vst [vmem:[%s1653_s3 + $0x18] sm:$0xff] %v1008_v53  }

// kernel: cnn_pool_forward.7
= control target key start
LH: loop header
LB: loop body
LE: loop exit
PB: predicated region body
PF: predicated region fallthrough
CT: control target
= control target key end

     0   :  { %s6403_s18 = smov 0   ;;  %s6405_s19 = smov 0   ;;  %s7804_s0 = inlined_call_operand.vmem [shape: bf16[8,3136], index: 0, kind: input, shape index: {}]   ;;  %s7805_s1 = inlined_call_operand.vmem [shape: bf16[3136,1024], index: 1, kind: input, shape index: {}]   ;;  %s7806_s2 = inlined_call_operand.vmem [shape: f32[1,1024], index: 2, kind: input, shape index: {}]   ;;  %s7807_s3 = inlined_call_operand.vmem [shape: bf16[1024,128], index: 3, kind: input, shape index: {}]   ;;  %s7808_s4 = inlined_call_operand.vmem [shape: f32[1,128], index: 4, kind: input, shape index: {}]   ;;  %s7809_s5 = inlined_call_operand.vmem [shape: f32[8,128], index: 5, kind: output, shape index: {}]  }
   0x1   :  { %s6407_s20 = smov 0   ;;  %s6409_s21 = smov 0  }
   0x2   :  { %s6411_s22 = smov 0  }
   0x3 LB: > { %s24_s23 = sadd.s32 1, %s6366_s21  ;;  %p67_p1 = scmp.ne.s32.totalorder %s6358_s19, %s6354_s18  ;;  %s6370_s22 = sphi %s6411_s22, %s15_s22   ;;  %s6366_s21 = sphi %s6409_s21, %s7813_s21   ;;  %s6362_s20 = sphi %s6407_s20, %s7812_s20   ;;  %s6358_s19 = sphi %s6405_s19, %s7811_s19   ;;  %s6354_s18 = sphi %s6403_s18, %s7810_s18  }
   0x4   : > { %p25_p0 = scmp.ge.s32.totalorder %s24_s23, 4  ;;  %p68_p2 = scmp.eq.s32.totalorder %s6370_s22, 0 }
   0x5   : > { %s60_s25 = sadd.s32 1, %s6358_s19  ;;  %p5191_p5 = scmp.ge.s32.totalorder %s6370_s22, 4 }
   0x6   : > { %s7815_s23 = smov (%p25_p0, %s24_s23), 0  ;;  %p69_p3 = por %p68_p2, %p67_p1 }
   0x7   : > { %s57_s24 = ssub.s32 %s6366_s21, %s7815_s23  ;;  %203 = sbr.rel (%p5191_p5) target bundleno = 408 (0x198), region = 24 }
   0x8   : > { %p58_p4 = scmp.eq.s32.totalorder %s57_s24, 0 }
   0xa   : > { %s6438_s26 = scalar_select %p58_p4, %s6358_s19, %s60_s25  }
   0xc   : > { %206 = sbr.rel (!%p69_p3) target bundleno = 408 (0x198), region = 28  ;;  %s208_s27 = sand.u32 (%p69_p3), 1, %s6358_s19  }
   0xd   : > { %s5637_s28 = sshll.u32 (%p69_p3), %s6366_s21, 3  ;;  %s5660_s29 = smul.u32 (%p69_p3), 3136, %s208_s27 }
   0xe   : > { %s6446_s7 = scalar_lea.vmem (%p69_p3), %s7805_s1, %s5637_s28 }
   0xf   : > { %v1024_v0 = vld [vmem:[%s6446_s7] sm:$0xff] (%p69_p3)  ;;  %s6454_s8 = scalar_lea.vmem (%p69_p3), [#allocation2], %s5660_s29 }
  0x10   : > { %v1026_v1 = vld [vmem:[%s6446_s7 + $0x20] sm:$0xff] (%p69_p3)  ;;  %1025 = vst [vmem:[%s6454_s8] sm:$0xff] (%p69_p3), %v1024_v0 }
  0x11   : > { %v1028_v2 = vld [vmem:[%s6446_s7 + $0x40] sm:$0xff]  ;;  %1027 = vst [vmem:[%s6454_s8 + $0x8] sm:$0xff] %v1026_v1 }
  0x12   : > { %v1030_v3 = vld [vmem:[%s6446_s7 + $0x60] sm:$0xff]  ;;  %1029 = vst [vmem:[%s6454_s8 + $0x10] sm:$0xff] %v1028_v2 }
  0x13   : > { %v1032_v4 = vld [vmem:[%s6446_s7 + $0x80] sm:$0xff]  ;;  %1031 = vst [vmem:[%s6454_s8 + $0x18] sm:$0xff] %v1030_v3 }
  0x14   : > { %v1034_v5 = vld [vmem:[%s6446_s7 + $0xa0] sm:$0xff]  ;;  %1033 = vst [vmem:[%s6454_s8 + $0x20] sm:$0xff] %v1032_v4 }
  0x15   : > { %1035 = vst [vmem:[%s6454_s8 + $0x28] sm:$0xff] %v1034_v5  ;;  %v1036_v6 = vld [vmem:[%s6446_s7 + $0xc0] sm:$0xff] }
  0x16   : > { %v1038_v7 = vld [vmem:[%s6446_s7 + $0xe0] sm:$0xff]  ;;  %1037 = vst [vmem:[%s6454_s8 + $0x30] sm:$0xff] %v1036_v6 }
  0x17   : > { %v1040_v8 = vld [vmem:[%s6446_s7 + $0x100] sm:$0xff]  ;;  %1039 = vst [vmem:[%s6454_s8 + $0x38] sm:$0xff] %v1038_v7 }
  0x18   : > { %1041 = vst [vmem:[%s6454_s8 + $0x40] sm:$0xff] %v1040_v8  ;;  %v1042_v9 = vld [vmem:[%s6446_s7 + $0x120] sm:$0xff] }
  0x19   : > { %v1044_v10 = vld [vmem:[%s6446_s7 + $0x140] sm:$0xff]  ;;  %1043 = vst [vmem:[%s6454_s8 + $0x48] sm:$0xff] %v1042_v9 }
  0x1a   : > { %v1046_v11 = vld [vmem:[%s6446_s7 + $0x160] sm:$0xff]  ;;  %1045 = vst [vmem:[%s6454_s8 + $0x50] sm:$0xff] %v1044_v10 }
  0x1b   : > { %1047 = vst [vmem:[%s6454_s8 + $0x58] sm:$0xff] %v1046_v11  ;;  %v1048_v12 = vld [vmem:[%s6446_s7 + $0x180] sm:$0xff] }
  0x1c   : > { %v1050_v13 = vld [vmem:[%s6446_s7 + $0x1a0] sm:$0xff]  ;;  %1049 = vst [vmem:[%s6454_s8 + $0x60] sm:$0xff] %v1048_v12 }
  0x1d   : > { %v1052_v14 = vld [vmem:[%s6446_s7 + $0x1c0] sm:$0xff]  ;;  %1051 = vst [vmem:[%s6454_s8 + $0x68] sm:$0xff] %v1050_v13 }
  0x1e   : > { %1053 = vst [vmem:[%s6454_s8 + $0x70] sm:$0xff] %v1052_v14  ;;  %v1054_v15 = vld [vmem:[%s6446_s7 + $0x1e0] sm:$0xff] }
  0x1f   : > { %v1056_v16 = vld [vmem:[%s6446_s7 + $0x200] sm:$0xff]  ;;  %1055 = vst [vmem:[%s6454_s8 + $0x78] sm:$0xff] %v1054_v15 }
  0x20   : > { %v1058_v17 = vld [vmem:[%s6446_s7 + $0x220] sm:$0xff]  ;;  %1057 = vst [vmem:[%s6454_s8 + $0x80] sm:$0xff] %v1056_v16 }
  0x21   : > { %1059 = vst [vmem:[%s6454_s8 + $0x88] sm:$0xff] %v1058_v17  ;;  %v1060_v18 = vld [vmem:[%s6446_s7 + $0x240] sm:$0xff] }
  0x22   : > { %v1062_v19 = vld [vmem:[%s6446_s7 + $0x260] sm:$0xff]  ;;  %1061 = vst [vmem:[%s6454_s8 + $0x90] sm:$0xff] %v1060_v18 }
  0x23   : > { %v1064_v20 = vld [vmem:[%s6446_s7 + $0x280] sm:$0xff]  ;;  %1063 = vst [vmem:[%s6454_s8 + $0x98] sm:$0xff] %v1062_v19 }
  0x24   : > { %1065 = vst [vmem:[%s6454_s8 + $0xa0] sm:$0xff] %v1064_v20  ;;  %v1066_v21 = vld [vmem:[%s6446_s7 + $0x2a0] sm:$0xff] }
  0x25   : > { %v1068_v22 = vld [vmem:[%s6446_s7 + $0x2c0] sm:$0xff]  ;;  %1067 = vst [vmem:[%s6454_s8 + $0xa8] sm:$0xff] %v1066_v21 }
  0x26   : > { %v1070_v23 = vld [vmem:[%s6446_s7 + $0x2e0] sm:$0xff]  ;;  %1069 = vst [vmem:[%s6454_s8 + $0xb0] sm:$0xff] %v1068_v22 }
  0x27   : > { %1071 = vst [vmem:[%s6454_s8 + $0xb8] sm:$0xff] %v1070_v23  ;;  %v1072_v24 = vld [vmem:[%s6446_s7 + $0x300] sm:$0xff] }
  0x28   : > { %v1074_v25 = vld [vmem:[%s6446_s7 + $0x320] sm:$0xff]  ;;  %1073 = vst [vmem:[%s6454_s8 + $0xc0] sm:$0xff] %v1072_v24 }
  0x29   : > { %v1076_v26 = vld [vmem:[%s6446_s7 + $0x340] sm:$0xff]  ;;  %1075 = vst [vmem:[%s6454_s8 + $0xc8] sm:$0xff] %v1074_v25 }
  0x2a   : > { %1077 = vst [vmem:[%s6454_s8 + $0xd0] sm:$0xff] %v1076_v26  ;;  %v1078_v27 = vld [vmem:[%s6446_s7 + $0x360] sm:$0xff] }
  0x2b   : > { %v1080_v28 = vld [vmem:[%s6446_s7 + $0x380] sm:$0xff]  ;;  %1079 = vst [vmem:[%s6454_s8 + $0xd8] sm:$0xff] %v1078_v27 }
  0x2c   : > { %v1082_v29 = vld [vmem:[%s6446_s7 + $0x3a0] sm:$0xff]  ;;  %1081 = vst [vmem:[%s6454_s8 + $0xe0] sm:$0xff] %v1080_v28 }
  0x2d   : > { %1083 = vst [vmem:[%s6454_s8 + $0xe8] sm:$0xff] %v1082_v29  ;;  %v1084_v30 = vld [vmem:[%s6446_s7 + $0x3c0] sm:$0xff] }
  0x2e   : > { %v1086_v31 = vld [vmem:[%s6446_s7 + $0x3e0] sm:$0xff]  ;;  %1085 = vst [vmem:[%s6454_s8 + $0xf0] sm:$0xff] %v1084_v30 }
  0x2f   : > { %v1088_v32 = vld [vmem:[%s6446_s7 + $0x400] sm:$0xff]  ;;  %1087 = vst [vmem:[%s6454_s8 + $0xf8] sm:$0xff] %v1086_v31 }
  0x30   : > { %1089 = vst [vmem:[%s6454_s8 + $0x100] sm:$0xff] %v1088_v32  ;;  %v1090_v33 = vld [vmem:[%s6446_s7 + $0x420] sm:$0xff] }
  0x31   : > { %v1092_v34 = vld [vmem:[%s6446_s7 + $0x440] sm:$0xff]  ;;  %1091 = vst [vmem:[%s6454_s8 + $0x108] sm:$0xff] %v1090_v33 }
  0x32   : > { %v1094_v35 = vld [vmem:[%s6446_s7 + $0x460] sm:$0xff]  ;;  %1093 = vst [vmem:[%s6454_s8 + $0x110] sm:$0xff] %v1092_v34 }
  0x33   : > { %1095 = vst [vmem:[%s6454_s8 + $0x118] sm:$0xff] %v1094_v35  ;;  %v1096_v36 = vld [vmem:[%s6446_s7 + $0x480] sm:$0xff] }
  0x34   : > { %v1098_v37 = vld [vmem:[%s6446_s7 + $0x4a0] sm:$0xff]  ;;  %1097 = vst [vmem:[%s6454_s8 + $0x120] sm:$0xff] %v1096_v36 }
  0x35   : > { %v1100_v38 = vld [vmem:[%s6446_s7 + $0x4c0] sm:$0xff]  ;;  %1099 = vst [vmem:[%s6454_s8 + $0x128] sm:$0xff] %v1098_v37 }
  0x36   : > { %1101 = vst [vmem:[%s6454_s8 + $0x130] sm:$0xff] %v1100_v38  ;;  %v1102_v39 = vld [vmem:[%s6446_s7 + $0x4e0] sm:$0xff] }
  0x37   : > { %v1104_v40 = vld [vmem:[%s6446_s7 + $0x500] sm:$0xff]  ;;  %1103 = vst [vmem:[%s6454_s8 + $0x138] sm:$0xff] %v1102_v39 }
  0x38   : > { %v1106_v41 = vld [vmem:[%s6446_s7 + $0x520] sm:$0xff]  ;;  %1105 = vst [vmem:[%s6454_s8 + $0x140] sm:$0xff] %v1104_v40 }
  0x39   : > { %1107 = vst [vmem:[%s6454_s8 + $0x148] sm:$0xff] %v1106_v41  ;;  %v1108_v42 = vld [vmem:[%s6446_s7 + $0x540] sm:$0xff] }
  0x3a   : > { %v1110_v43 = vld [vmem:[%s6446_s7 + $0x560] sm:$0xff]  ;;  %1109 = vst [vmem:[%s6454_s8 + $0x150] sm:$0xff] %v1108_v42 }
  0x3b   : > { %v1112_v44 = vld [vmem:[%s6446_s7 + $0x580] sm:$0xff]  ;;  %1111 = vst [vmem:[%s6454_s8 + $0x158] sm:$0xff] %v1110_v43 }
  0x3c   : > { %1113 = vst [vmem:[%s6454_s8 + $0x160] sm:$0xff] %v1112_v44  ;;  %v1114_v45 = vld [vmem:[%s6446_s7 + $0x5a0] sm:$0xff] }
  0x3d   : > { %v1116_v46 = vld [vmem:[%s6446_s7 + $0x5c0] sm:$0xff]  ;;  %1115 = vst [vmem:[%s6454_s8 + $0x168] sm:$0xff] %v1114_v45 }
  0x3e   : > { %v1118_v47 = vld [vmem:[%s6446_s7 + $0x5e0] sm:$0xff]  ;;  %1117 = vst [vmem:[%s6454_s8 + $0x170] sm:$0xff] %v1116_v46 }
  0x3f   : > { %1119 = vst [vmem:[%s6454_s8 + $0x178] sm:$0xff] %v1118_v47  ;;  %v1120_v48 = vld [vmem:[%s6446_s7 + $0x600] sm:$0xff] }
  0x40   : > { %v1122_v49 = vld [vmem:[%s6446_s7 + $0x620] sm:$0xff]  ;;  %1121 = vst [vmem:[%s6454_s8 + $0x180] sm:$0xff] %v1120_v48 }
  0x41   : > { %v1124_v50 = vld [vmem:[%s6446_s7 + $0x640] sm:$0xff]  ;;  %1123 = vst [vmem:[%s6454_s8 + $0x188] sm:$0xff] %v1122_v49 }
  0x42   : > { %1125 = vst [vmem:[%s6454_s8 + $0x190] sm:$0xff] %v1124_v50  ;;  %v1126_v51 = vld [vmem:[%s6446_s7 + $0x660] sm:$0xff] }
  0x43   : > { %v1128_v52 = vld [vmem:[%s6446_s7 + $0x680] sm:$0xff]  ;;  %1127 = vst [vmem:[%s6454_s8 + $0x198] sm:$0xff] %v1126_v51 }
  0x44   : > { %v1130_v53 = vld [vmem:[%s6446_s7 + $0x6a0] sm:$0xff]  ;;  %1129 = vst [vmem:[%s6454_s8 + $0x1a0] sm:$0xff] %v1128_v52 }
  0x45   : > { %1131 = vst [vmem:[%s6454_s8 + $0x1a8] sm:$0xff] %v1130_v53  ;;  %v1132_v54 = vld [vmem:[%s6446_s7 + $0x6c0] sm:$0xff] }
  0x46   : > { %v1134_v55 = vld [vmem:[%s6446_s7 + $0x6e0] sm:$0xff]  ;;  %1133 = vst [vmem:[%s6454_s8 + $0x1b0] sm:$0xff] %v1132_v54 }
  0x47   : > { %v1136_v56 = vld [vmem:[%s6446_s7 + $0x700] sm:$0xff]  ;;  %1135 = vst [vmem:[%s6454_s8 + $0x1b8] sm:$0xff] %v1134_v55 }
  0x48   : > { %1137 = vst [vmem:[%s6454_s8 + $0x1c0] sm:$0xff] %v1136_v56  ;;  %v1138_v57 = vld [vmem:[%s6446_s7 + $0x720] sm:$0xff] }
  0x49   : > { %v1140_v58 = vld [vmem:[%s6446_s7 + $0x740] sm:$0xff]  ;;  %1139 = vst [vmem:[%s6454_s8 + $0x1c8] sm:$0xff] %v1138_v57 }
  0x4a   : > { %v1142_v59 = vld [vmem:[%s6446_s7 + $0x760] sm:$0xff]  ;;  %1141 = vst [vmem:[%s6454_s8 + $0x1d0] sm:$0xff] %v1140_v58 }
  0x4b   : > { %1143 = vst [vmem:[%s6454_s8 + $0x1d8] sm:$0xff] %v1142_v59  ;;  %v1144_v60 = vld [vmem:[%s6446_s7 + $0x780] sm:$0xff] }
  0x4c   : > { %v1146_v61 = vld [vmem:[%s6446_s7 + $0x7a0] sm:$0xff]  ;;  %1145 = vst [vmem:[%s6454_s8 + $0x1e0] sm:$0xff] %v1144_v60 }
  0x4d   : > { %v1148_v62 = vld [vmem:[%s6446_s7 + $0x7c0] sm:$0xff]  ;;  %1147 = vst [vmem:[%s6454_s8 + $0x1e8] sm:$0xff] %v1146_v61 }
  0x4e   : > { %1149 = vst [vmem:[%s6454_s8 + $0x1f0] sm:$0xff] %v1148_v62  ;;  %v1150_v63 = vld [vmem:[%s6446_s7 + $0x7e0] sm:$0xff] }
  0x4f   : > { %v1152_v0 = vld [vmem:[%s6446_s7 + $0x800] sm:$0xff]  ;;  %1151 = vst [vmem:[%s6454_s8 + $0x1f8] sm:$0xff] %v1150_v63 }
  0x50   : > { %v1154_v1 = vld [vmem:[%s6446_s7 + $0x820] sm:$0xff]  ;;  %1153 = vst [vmem:[%s6454_s8 + $0x200] sm:$0xff] %v1152_v0 }
  0x51   : > { %1155 = vst [vmem:[%s6454_s8 + $0x208] sm:$0xff] %v1154_v1  ;;  %v1156_v2 = vld [vmem:[%s6446_s7 + $0x840] sm:$0xff] }
  0x52   : > { %v1158_v3 = vld [vmem:[%s6446_s7 + $0x860] sm:$0xff]  ;;  %1157 = vst [vmem:[%s6454_s8 + $0x210] sm:$0xff] %v1156_v2 }
  0x53   : > { %v1160_v4 = vld [vmem:[%s6446_s7 + $0x880] sm:$0xff]  ;;  %1159 = vst [vmem:[%s6454_s8 + $0x218] sm:$0xff] %v1158_v3 }
  0x54   : > { %1161 = vst [vmem:[%s6454_s8 + $0x220] sm:$0xff] %v1160_v4  ;;  %v1162_v5 = vld [vmem:[%s6446_s7 + $0x8a0] sm:$0xff] }
  0x55   : > { %v1164_v6 = vld [vmem:[%s6446_s7 + $0x8c0] sm:$0xff]  ;;  %1163 = vst [vmem:[%s6454_s8 + $0x228] sm:$0xff] %v1162_v5 }
  0x56   : > { %v1166_v7 = vld [vmem:[%s6446_s7 + $0x8e0] sm:$0xff]  ;;  %1165 = vst [vmem:[%s6454_s8 + $0x230] sm:$0xff] %v1164_v6 }
  0x57   : > { %1167 = vst [vmem:[%s6454_s8 + $0x238] sm:$0xff] %v1166_v7  ;;  %v1168_v8 = vld [vmem:[%s6446_s7 + $0x900] sm:$0xff] }
  0x58   : > { %v1170_v9 = vld [vmem:[%s6446_s7 + $0x920] sm:$0xff]  ;;  %1169 = vst [vmem:[%s6454_s8 + $0x240] sm:$0xff] %v1168_v8 }
  0x59   : > { %v1172_v10 = vld [vmem:[%s6446_s7 + $0x940] sm:$0xff]  ;;  %1171 = vst [vmem:[%s6454_s8 + $0x248] sm:$0xff] %v1170_v9 }
  0x5a   : > { %1173 = vst [vmem:[%s6454_s8 + $0x250] sm:$0xff] %v1172_v10  ;;  %v1174_v11 = vld [vmem:[%s6446_s7 + $0x960] sm:$0xff] }
  0x5b   : > { %v1176_v12 = vld [vmem:[%s6446_s7 + $0x980] sm:$0xff]  ;;  %1175 = vst [vmem:[%s6454_s8 + $0x258] sm:$0xff] %v1174_v11 }
  0x5c   : > { %v1178_v13 = vld [vmem:[%s6446_s7 + $0x9a0] sm:$0xff]  ;;  %1177 = vst [vmem:[%s6454_s8 + $0x260] sm:$0xff] %v1176_v12 }
  0x5d   : > { %1179 = vst [vmem:[%s6454_s8 + $0x268] sm:$0xff] %v1178_v13  ;;  %v1180_v14 = vld [vmem:[%s6446_s7 + $0x9c0] sm:$0xff] }
  0x5e   : > { %v1182_v15 = vld [vmem:[%s6446_s7 + $0x9e0] sm:$0xff]  ;;  %1181 = vst [vmem:[%s6454_s8 + $0x270] sm:$0xff] %v1180_v14 }
  0x5f   : > { %v1184_v16 = vld [vmem:[%s6446_s7 + $0xa00] sm:$0xff]  ;;  %1183 = vst [vmem:[%s6454_s8 + $0x278] sm:$0xff] %v1182_v15 }
  0x60   : > { %1185 = vst [vmem:[%s6454_s8 + $0x280] sm:$0xff] %v1184_v16  ;;  %v1186_v17 = vld [vmem:[%s6446_s7 + $0xa20] sm:$0xff] }
  0x61   : > { %v1188_v18 = vld [vmem:[%s6446_s7 + $0xa40] sm:$0xff]  ;;  %1187 = vst [vmem:[%s6454_s8 + $0x288] sm:$0xff] %v1186_v17 }
  0x62   : > { %v1190_v19 = vld [vmem:[%s6446_s7 + $0xa60] sm:$0xff]  ;;  %1189 = vst [vmem:[%s6454_s8 + $0x290] sm:$0xff] %v1188_v18 }
  0x63   : > { %1191 = vst [vmem:[%s6454_s8 + $0x298] sm:$0xff] %v1190_v19  ;;  %v1192_v20 = vld [vmem:[%s6446_s7 + $0xa80] sm:$0xff] }
  0x64   : > { %v1194_v21 = vld [vmem:[%s6446_s7 + $0xaa0] sm:$0xff]  ;;  %1193 = vst [vmem:[%s6454_s8 + $0x2a0] sm:$0xff] %v1192_v20 }
  0x65   : > { %v1196_v22 = vld [vmem:[%s6446_s7 + $0xac0] sm:$0xff]  ;;  %1195 = vst [vmem:[%s6454_s8 + $0x2a8] sm:$0xff] %v1194_v21 }
  0x66   : > { %1197 = vst [vmem:[%s6454_s8 + $0x2b0] sm:$0xff] %v1196_v22  ;;  %v1198_v23 = vld [vmem:[%s6446_s7 + $0xae0] sm:$0xff] }
  0x67   : > { %v1200_v24 = vld [vmem:[%s6446_s7 + $0xb00] sm:$0xff]  ;;  %1199 = vst [vmem:[%s6454_s8 + $0x2b8] sm:$0xff] %v1198_v23 }
  0x68   : > { %v1202_v25 = vld [vmem:[%s6446_s7 + $0xb20] sm:$0xff]  ;;  %1201 = vst [vmem:[%s6454_s8 + $0x2c0] sm:$0xff] %v1200_v24 }
  0x69   : > { %1203 = vst [vmem:[%s6454_s8 + $0x2c8] sm:$0xff] %v1202_v25  ;;  %v1204_v26 = vld [vmem:[%s6446_s7 + $0xb40] sm:$0xff] }
  0x6a   : > { %v1206_v27 = vld [vmem:[%s6446_s7 + $0xb60] sm:$0xff]  ;;  %1205 = vst [vmem:[%s6454_s8 + $0x2d0] sm:$0xff] %v1204_v26 }
  0x6b   : > { %v1208_v28 = vld [vmem:[%s6446_s7 + $0xb80] sm:$0xff]  ;;  %1207 = vst [vmem:[%s6454_s8 + $0x2d8] sm:$0xff] %v1206_v27 }
  0x6c   : > { %1209 = vst [vmem:[%s6454_s8 + $0x2e0] sm:$0xff] %v1208_v28  ;;  %v1210_v29 = vld [vmem:[%s6446_s7 + $0xba0] sm:$0xff] }
  0x6d   : > { %v1212_v30 = vld [vmem:[%s6446_s7 + $0xbc0] sm:$0xff]  ;;  %1211 = vst [vmem:[%s6454_s8 + $0x2e8] sm:$0xff] %v1210_v29 }
  0x6e   : > { %v1214_v31 = vld [vmem:[%s6446_s7 + $0xbe0] sm:$0xff]  ;;  %1213 = vst [vmem:[%s6454_s8 + $0x2f0] sm:$0xff] %v1212_v30 }
  0x6f   : > { %1215 = vst [vmem:[%s6454_s8 + $0x2f8] sm:$0xff] %v1214_v31  ;;  %v1216_v32 = vld [vmem:[%s6446_s7 + $0xc00] sm:$0xff] }
  0x70   : > { %v1218_v33 = vld [vmem:[%s6446_s7 + $0xc20] sm:$0xff]  ;;  %1217 = vst [vmem:[%s6454_s8 + $0x300] sm:$0xff] %v1216_v32 }
  0x71   : > { %v1220_v34 = vld [vmem:[%s6446_s7 + $0xc40] sm:$0xff]  ;;  %1219 = vst [vmem:[%s6454_s8 + $0x308] sm:$0xff] %v1218_v33 }
  0x72   : > { %1221 = vst [vmem:[%s6454_s8 + $0x310] sm:$0xff] %v1220_v34  ;;  %v1222_v35 = vld [vmem:[%s6446_s7 + $0xc60] sm:$0xff] }
  0x73   : > { %v1224_v36 = vld [vmem:[%s6446_s7 + $0xc80] sm:$0xff]  ;;  %1223 = vst [vmem:[%s6454_s8 + $0x318] sm:$0xff] %v1222_v35 }
  0x74   : > { %v1226_v37 = vld [vmem:[%s6446_s7 + $0xca0] sm:$0xff]  ;;  %1225 = vst [vmem:[%s6454_s8 + $0x320] sm:$0xff] %v1224_v36 }
  0x75   : > { %1227 = vst [vmem:[%s6454_s8 + $0x328] sm:$0xff] %v1226_v37  ;;  %v1228_v38 = vld [vmem:[%s6446_s7 + $0xcc0] sm:$0xff] }
  0x76   : > { %v1230_v39 = vld [vmem:[%s6446_s7 + $0xce0] sm:$0xff]  ;;  %1229 = vst [vmem:[%s6454_s8 + $0x330] sm:$0xff] %v1228_v38 }
  0x77   : > { %v1232_v40 = vld [vmem:[%s6446_s7 + $0xd00] sm:$0xff]  ;;  %1231 = vst [vmem:[%s6454_s8 + $0x338] sm:$0xff] %v1230_v39 }
  0x78   : > { %1233 = vst [vmem:[%s6454_s8 + $0x340] sm:$0xff] %v1232_v40  ;;  %v1234_v41 = vld [vmem:[%s6446_s7 + $0xd20] sm:$0xff] }
  0x79   : > { %v1236_v42 = vld [vmem:[%s6446_s7 + $0xd40] sm:$0xff]  ;;  %1235 = vst [vmem:[%s6454_s8 + $0x348] sm:$0xff] %v1234_v41 }
  0x7a   : > { %v1238_v43 = vld [vmem:[%s6446_s7 + $0xd60] sm:$0xff]  ;;  %1237 = vst [vmem:[%s6454_s8 + $0x350] sm:$0xff] %v1236_v42 }
  0x7b   : > { %1239 = vst [vmem:[%s6454_s8 + $0x358] sm:$0xff] %v1238_v43  ;;  %v1240_v44 = vld [vmem:[%s6446_s7 + $0xd80] sm:$0xff] }
  0x7c   : > { %v1242_v45 = vld [vmem:[%s6446_s7 + $0xda0] sm:$0xff]  ;;  %1241 = vst [vmem:[%s6454_s8 + $0x360] sm:$0xff] %v1240_v44 }
  0x7d   : > { %v1244_v46 = vld [vmem:[%s6446_s7 + $0xdc0] sm:$0xff]  ;;  %1243 = vst [vmem:[%s6454_s8 + $0x368] sm:$0xff] %v1242_v45 }
  0x7e   : > { %1245 = vst [vmem:[%s6454_s8 + $0x370] sm:$0xff] %v1244_v46  ;;  %v1246_v47 = vld [vmem:[%s6446_s7 + $0xde0] sm:$0xff] }
  0x7f   : > { %v1248_v48 = vld [vmem:[%s6446_s7 + $0xe00] sm:$0xff]  ;;  %1247 = vst [vmem:[%s6454_s8 + $0x378] sm:$0xff] %v1246_v47 }
  0x80   : > { %v1250_v49 = vld [vmem:[%s6446_s7 + $0xe20] sm:$0xff]  ;;  %1249 = vst [vmem:[%s6454_s8 + $0x380] sm:$0xff] %v1248_v48 }
  0x81   : > { %1251 = vst [vmem:[%s6454_s8 + $0x388] sm:$0xff] %v1250_v49  ;;  %v1252_v50 = vld [vmem:[%s6446_s7 + $0xe40] sm:$0xff] }
  0x82   : > { %v1254_v51 = vld [vmem:[%s6446_s7 + $0xe60] sm:$0xff]  ;;  %1253 = vst [vmem:[%s6454_s8 + $0x390] sm:$0xff] %v1252_v50 }
  0x83   : > { %v1256_v52 = vld [vmem:[%s6446_s7 + $0xe80] sm:$0xff]  ;;  %1255 = vst [vmem:[%s6454_s8 + $0x398] sm:$0xff] %v1254_v51 }
  0x84   : > { %1257 = vst [vmem:[%s6454_s8 + $0x3a0] sm:$0xff] %v1256_v52  ;;  %v1258_v53 = vld [vmem:[%s6446_s7 + $0xea0] sm:$0xff] }
  0x85   : > { %v1260_v54 = vld [vmem:[%s6446_s7 + $0xec0] sm:$0xff]  ;;  %1259 = vst [vmem:[%s6454_s8 + $0x3a8] sm:$0xff] %v1258_v53 }
  0x86   : > { %v1262_v55 = vld [vmem:[%s6446_s7 + $0xee0] sm:$0xff]  ;;  %1261 = vst [vmem:[%s6454_s8 + $0x3b0] sm:$0xff] %v1260_v54 }
  0x87   : > { %1263 = vst [vmem:[%s6454_s8 + $0x3b8] sm:$0xff] %v1262_v55  ;;  %v1264_v56 = vld [vmem:[%s6446_s7 + $0xf00] sm:$0xff] }
  0x88   : > { %v1266_v57 = vld [vmem:[%s6446_s7 + $0xf20] sm:$0xff]  ;;  %1265 = vst [vmem:[%s6454_s8 + $0x3c0] sm:$0xff] %v1264_v56 }
  0x89   : > { %v1268_v58 = vld [vmem:[%s6446_s7 + $0xf40] sm:$0xff]  ;;  %1267 = vst [vmem:[%s6454_s8 + $0x3c8] sm:$0xff] %v1266_v57 }
  0x8a   : > { %1269 = vst [vmem:[%s6454_s8 + $0x3d0] sm:$0xff] %v1268_v58  ;;  %v1270_v59 = vld [vmem:[%s6446_s7 + $0xf60] sm:$0xff] }
  0x8b   : > { %v1272_v60 = vld [vmem:[%s6446_s7 + $0xf80] sm:$0xff]  ;;  %1271 = vst [vmem:[%s6454_s8 + $0x3d8] sm:$0xff] %v1270_v59 }
  0x8c   : > { %v1274_v61 = vld [vmem:[%s6446_s7 + $0xfa0] sm:$0xff]  ;;  %1273 = vst [vmem:[%s6454_s8 + $0x3e0] sm:$0xff] %v1272_v60 }
  0x8d   : > { %1275 = vst [vmem:[%s6454_s8 + $0x3e8] sm:$0xff] %v1274_v61  ;;  %v1276_v62 = vld [vmem:[%s6446_s7 + $0xfc0] sm:$0xff] }
  0x8e   : > { %v1278_v63 = vld [vmem:[%s6446_s7 + $0xfe0] sm:$0xff]  ;;  %1277 = vst [vmem:[%s6454_s8 + $0x3f0] sm:$0xff] %v1276_v62 }
  0x8f   : > { %v1280_v0 = vld [vmem:[%s6446_s7 + $0x1000] sm:$0xff]  ;;  %1279 = vst [vmem:[%s6454_s8 + $0x3f8] sm:$0xff] %v1278_v63 }
  0x90   : > { %1281 = vst [vmem:[%s6454_s8 + $0x400] sm:$0xff] %v1280_v0  ;;  %v1282_v1 = vld [vmem:[%s6446_s7 + $0x1020] sm:$0xff] }
  0x91   : > { %v1284_v2 = vld [vmem:[%s6446_s7 + $0x1040] sm:$0xff]  ;;  %1283 = vst [vmem:[%s6454_s8 + $0x408] sm:$0xff] %v1282_v1 }
  0x92   : > { %v1286_v3 = vld [vmem:[%s6446_s7 + $0x1060] sm:$0xff]  ;;  %1285 = vst [vmem:[%s6454_s8 + $0x410] sm:$0xff] %v1284_v2 }
  0x93   : > { %1287 = vst [vmem:[%s6454_s8 + $0x418] sm:$0xff] %v1286_v3  ;;  %v1288_v4 = vld [vmem:[%s6446_s7 + $0x1080] sm:$0xff] }
  0x94   : > { %v1290_v5 = vld [vmem:[%s6446_s7 + $0x10a0] sm:$0xff]  ;;  %1289 = vst [vmem:[%s6454_s8 + $0x420] sm:$0xff] %v1288_v4 }
  0x95   : > { %v1292_v6 = vld [vmem:[%s6446_s7 + $0x10c0] sm:$0xff]  ;;  %1291 = vst [vmem:[%s6454_s8 + $0x428] sm:$0xff] %v1290_v5 }
  0x96   : > { %1293 = vst [vmem:[%s6454_s8 + $0x430] sm:$0xff] %v1292_v6  ;;  %v1294_v7 = vld [vmem:[%s6446_s7 + $0x10e0] sm:$0xff] }
  0x97   : > { %v1296_v8 = vld [vmem:[%s6446_s7 + $0x1100] sm:$0xff]  ;;  %1295 = vst [vmem:[%s6454_s8 + $0x438] sm:$0xff] %v1294_v7 }
  0x98   : > { %v1298_v9 = vld [vmem:[%s6446_s7 + $0x1120] sm:$0xff]  ;;  %1297 = vst [vmem:[%s6454_s8 + $0x440] sm:$0xff] %v1296_v8 }
  0x99   : > { %1299 = vst [vmem:[%s6454_s8 + $0x448] sm:$0xff] %v1298_v9  ;;  %v1300_v10 = vld [vmem:[%s6446_s7 + $0x1140] sm:$0xff] }
  0x9a   : > { %v1302_v11 = vld [vmem:[%s6446_s7 + $0x1160] sm:$0xff]  ;;  %1301 = vst [vmem:[%s6454_s8 + $0x450] sm:$0xff] %v1300_v10 }
  0x9b   : > { %v1304_v12 = vld [vmem:[%s6446_s7 + $0x1180] sm:$0xff]  ;;  %1303 = vst [vmem:[%s6454_s8 + $0x458] sm:$0xff] %v1302_v11 }
  0x9c   : > { %1305 = vst [vmem:[%s6454_s8 + $0x460] sm:$0xff] %v1304_v12  ;;  %v1306_v13 = vld [vmem:[%s6446_s7 + $0x11a0] sm:$0xff] }
  0x9d   : > { %v1308_v14 = vld [vmem:[%s6446_s7 + $0x11c0] sm:$0xff]  ;;  %1307 = vst [vmem:[%s6454_s8 + $0x468] sm:$0xff] %v1306_v13 }
  0x9e   : > { %v1310_v15 = vld [vmem:[%s6446_s7 + $0x11e0] sm:$0xff]  ;;  %1309 = vst [vmem:[%s6454_s8 + $0x470] sm:$0xff] %v1308_v14 }
  0x9f   : > { %1311 = vst [vmem:[%s6454_s8 + $0x478] sm:$0xff] %v1310_v15  ;;  %v1312_v16 = vld [vmem:[%s6446_s7 + $0x1200] sm:$0xff] }
  0xa0   : > { %v1314_v17 = vld [vmem:[%s6446_s7 + $0x1220] sm:$0xff]  ;;  %1313 = vst [vmem:[%s6454_s8 + $0x480] sm:$0xff] %v1312_v16 }
  0xa1   : > { %v1316_v18 = vld [vmem:[%s6446_s7 + $0x1240] sm:$0xff]  ;;  %1315 = vst [vmem:[%s6454_s8 + $0x488] sm:$0xff] %v1314_v17 }
  0xa2   : > { %1317 = vst [vmem:[%s6454_s8 + $0x490] sm:$0xff] %v1316_v18  ;;  %v1318_v19 = vld [vmem:[%s6446_s7 + $0x1260] sm:$0xff] }
  0xa3   : > { %v1320_v20 = vld [vmem:[%s6446_s7 + $0x1280] sm:$0xff]  ;;  %1319 = vst [vmem:[%s6454_s8 + $0x498] sm:$0xff] %v1318_v19 }
  0xa4   : > { %v1322_v21 = vld [vmem:[%s6446_s7 + $0x12a0] sm:$0xff]  ;;  %1321 = vst [vmem:[%s6454_s8 + $0x4a0] sm:$0xff] %v1320_v20 }
  0xa5   : > { %1323 = vst [vmem:[%s6454_s8 + $0x4a8] sm:$0xff] %v1322_v21  ;;  %v1324_v22 = vld [vmem:[%s6446_s7 + $0x12c0] sm:$0xff] }
  0xa6   : > { %v1326_v23 = vld [vmem:[%s6446_s7 + $0x12e0] sm:$0xff]  ;;  %1325 = vst [vmem:[%s6454_s8 + $0x4b0] sm:$0xff] %v1324_v22 }
  0xa7   : > { %v1328_v24 = vld [vmem:[%s6446_s7 + $0x1300] sm:$0xff]  ;;  %1327 = vst [vmem:[%s6454_s8 + $0x4b8] sm:$0xff] %v1326_v23 }
  0xa8   : > { %1329 = vst [vmem:[%s6454_s8 + $0x4c0] sm:$0xff] %v1328_v24  ;;  %v1330_v25 = vld [vmem:[%s6446_s7 + $0x1320] sm:$0xff] }
  0xa9   : > { %v1332_v26 = vld [vmem:[%s6446_s7 + $0x1340] sm:$0xff]  ;;  %1331 = vst [vmem:[%s6454_s8 + $0x4c8] sm:$0xff] %v1330_v25 }
  0xaa   : > { %v1334_v27 = vld [vmem:[%s6446_s7 + $0x1360] sm:$0xff]  ;;  %1333 = vst [vmem:[%s6454_s8 + $0x4d0] sm:$0xff] %v1332_v26 }
  0xab   : > { %1335 = vst [vmem:[%s6454_s8 + $0x4d8] sm:$0xff] %v1334_v27  ;;  %v1336_v28 = vld [vmem:[%s6446_s7 + $0x1380] sm:$0xff] }
  0xac   : > { %v1338_v29 = vld [vmem:[%s6446_s7 + $0x13a0] sm:$0xff]  ;;  %1337 = vst [vmem:[%s6454_s8 + $0x4e0] sm:$0xff] %v1336_v28 }
  0xad   : > { %v1340_v30 = vld [vmem:[%s6446_s7 + $0x13c0] sm:$0xff]  ;;  %1339 = vst [vmem:[%s6454_s8 + $0x4e8] sm:$0xff] %v1338_v29 }
  0xae   : > { %1341 = vst [vmem:[%s6454_s8 + $0x4f0] sm:$0xff] %v1340_v30  ;;  %v1342_v31 = vld [vmem:[%s6446_s7 + $0x13e0] sm:$0xff] }
  0xaf   : > { %v1344_v32 = vld [vmem:[%s6446_s7 + $0x1400] sm:$0xff]  ;;  %1343 = vst [vmem:[%s6454_s8 + $0x4f8] sm:$0xff] %v1342_v31 }
  0xb0   : > { %v1346_v33 = vld [vmem:[%s6446_s7 + $0x1420] sm:$0xff]  ;;  %1345 = vst [vmem:[%s6454_s8 + $0x500] sm:$0xff] %v1344_v32 }
  0xb1   : > { %1347 = vst [vmem:[%s6454_s8 + $0x508] sm:$0xff] %v1346_v33  ;;  %v1348_v34 = vld [vmem:[%s6446_s7 + $0x1440] sm:$0xff] }
  0xb2   : > { %v1350_v35 = vld [vmem:[%s6446_s7 + $0x1460] sm:$0xff]  ;;  %1349 = vst [vmem:[%s6454_s8 + $0x510] sm:$0xff] %v1348_v34 }
  0xb3   : > { %v1352_v36 = vld [vmem:[%s6446_s7 + $0x1480] sm:$0xff]  ;;  %1351 = vst [vmem:[%s6454_s8 + $0x518] sm:$0xff] %v1350_v35 }
  0xb4   : > { %1353 = vst [vmem:[%s6454_s8 + $0x520] sm:$0xff] %v1352_v36  ;;  %v1354_v37 = vld [vmem:[%s6446_s7 + $0x14a0] sm:$0xff] }
  0xb5   : > { %v1356_v38 = vld [vmem:[%s6446_s7 + $0x14c0] sm:$0xff]  ;;  %1355 = vst [vmem:[%s6454_s8 + $0x528] sm:$0xff] %v1354_v37 }
  0xb6   : > { %v1358_v39 = vld [vmem:[%s6446_s7 + $0x14e0] sm:$0xff]  ;;  %1357 = vst [vmem:[%s6454_s8 + $0x530] sm:$0xff] %v1356_v38 }
  0xb7   : > { %1359 = vst [vmem:[%s6454_s8 + $0x538] sm:$0xff] %v1358_v39  ;;  %v1360_v40 = vld [vmem:[%s6446_s7 + $0x1500] sm:$0xff] }
  0xb8   : > { %v1362_v41 = vld [vmem:[%s6446_s7 + $0x1520] sm:$0xff]  ;;  %1361 = vst [vmem:[%s6454_s8 + $0x540] sm:$0xff] %v1360_v40 }
  0xb9   : > { %v1364_v42 = vld [vmem:[%s6446_s7 + $0x1540] sm:$0xff]  ;;  %1363 = vst [vmem:[%s6454_s8 + $0x548] sm:$0xff] %v1362_v41 }
  0xba   : > { %1365 = vst [vmem:[%s6454_s8 + $0x550] sm:$0xff] %v1364_v42  ;;  %v1366_v43 = vld [vmem:[%s6446_s7 + $0x1560] sm:$0xff] }
  0xbb   : > { %v1368_v44 = vld [vmem:[%s6446_s7 + $0x1580] sm:$0xff]  ;;  %1367 = vst [vmem:[%s6454_s8 + $0x558] sm:$0xff] %v1366_v43 }
  0xbc   : > { %v1370_v45 = vld [vmem:[%s6446_s7 + $0x15a0] sm:$0xff]  ;;  %1369 = vst [vmem:[%s6454_s8 + $0x560] sm:$0xff] %v1368_v44 }
  0xbd   : > { %1371 = vst [vmem:[%s6454_s8 + $0x568] sm:$0xff] %v1370_v45  ;;  %v1372_v46 = vld [vmem:[%s6446_s7 + $0x15c0] sm:$0xff] }
  0xbe   : > { %v1374_v47 = vld [vmem:[%s6446_s7 + $0x15e0] sm:$0xff]  ;;  %1373 = vst [vmem:[%s6454_s8 + $0x570] sm:$0xff] %v1372_v46 }
  0xbf   : > { %v1376_v48 = vld [vmem:[%s6446_s7 + $0x1600] sm:$0xff]  ;;  %1375 = vst [vmem:[%s6454_s8 + $0x578] sm:$0xff] %v1374_v47 }
  0xc0   : > { %1377 = vst [vmem:[%s6454_s8 + $0x580] sm:$0xff] %v1376_v48  ;;  %v1378_v49 = vld [vmem:[%s6446_s7 + $0x1620] sm:$0xff] }
  0xc1   : > { %v1380_v50 = vld [vmem:[%s6446_s7 + $0x1640] sm:$0xff]  ;;  %1379 = vst [vmem:[%s6454_s8 + $0x588] sm:$0xff] %v1378_v49 }
  0xc2   : > { %v1382_v51 = vld [vmem:[%s6446_s7 + $0x1660] sm:$0xff]  ;;  %1381 = vst [vmem:[%s6454_s8 + $0x590] sm:$0xff] %v1380_v50 }
  0xc3   : > { %1383 = vst [vmem:[%s6454_s8 + $0x598] sm:$0xff] %v1382_v51  ;;  %v1384_v52 = vld [vmem:[%s6446_s7 + $0x1680] sm:$0xff] }
  0xc4   : > { %v1386_v53 = vld [vmem:[%s6446_s7 + $0x16a0] sm:$0xff]  ;;  %1385 = vst [vmem:[%s6454_s8 + $0x5a0] sm:$0xff] %v1384_v52 }
  0xc5   : > { %v1388_v54 = vld [vmem:[%s6446_s7 + $0x16c0] sm:$0xff]  ;;  %1387 = vst [vmem:[%s6454_s8 + $0x5a8] sm:$0xff] %v1386_v53 }
  0xc6   : > { %1389 = vst [vmem:[%s6454_s8 + $0x5b0] sm:$0xff] %v1388_v54  ;;  %v1390_v55 = vld [vmem:[%s6446_s7 + $0x16e0] sm:$0xff] }
  0xc7   : > { %v1392_v56 = vld [vmem:[%s6446_s7 + $0x1700] sm:$0xff]  ;;  %1391 = vst [vmem:[%s6454_s8 + $0x5b8] sm:$0xff] %v1390_v55 }
  0xc8   : > { %v1394_v57 = vld [vmem:[%s6446_s7 + $0x1720] sm:$0xff]  ;;  %1393 = vst [vmem:[%s6454_s8 + $0x5c0] sm:$0xff] %v1392_v56 }
  0xc9   : > { %1395 = vst [vmem:[%s6454_s8 + $0x5c8] sm:$0xff] %v1394_v57  ;;  %v1396_v58 = vld [vmem:[%s6446_s7 + $0x1740] sm:$0xff] }
  0xca   : > { %v1398_v59 = vld [vmem:[%s6446_s7 + $0x1760] sm:$0xff]  ;;  %1397 = vst [vmem:[%s6454_s8 + $0x5d0] sm:$0xff] %v1396_v58 }
  0xcb   : > { %v1400_v60 = vld [vmem:[%s6446_s7 + $0x1780] sm:$0xff]  ;;  %1399 = vst [vmem:[%s6454_s8 + $0x5d8] sm:$0xff] %v1398_v59 }
  0xcc   : > { %1401 = vst [vmem:[%s6454_s8 + $0x5e0] sm:$0xff] %v1400_v60  ;;  %v1402_v61 = vld [vmem:[%s6446_s7 + $0x17a0] sm:$0xff] }
  0xcd   : > { %v1404_v62 = vld [vmem:[%s6446_s7 + $0x17c0] sm:$0xff]  ;;  %1403 = vst [vmem:[%s6454_s8 + $0x5e8] sm:$0xff] %v1402_v61 }
  0xce   : > { %v1406_v63 = vld [vmem:[%s6446_s7 + $0x17e0] sm:$0xff]  ;;  %1405 = vst [vmem:[%s6454_s8 + $0x5f0] sm:$0xff] %v1404_v62 }
  0xcf   : > { %1407 = vst [vmem:[%s6454_s8 + $0x5f8] sm:$0xff] %v1406_v63  ;;  %v1408_v0 = vld [vmem:[%s6446_s7 + $0x1800] sm:$0xff] }
  0xd0   : > { %v1410_v1 = vld [vmem:[%s6446_s7 + $0x1820] sm:$0xff]  ;;  %1409 = vst [vmem:[%s6454_s8 + $0x600] sm:$0xff] %v1408_v0 }
  0xd1   : > { %v1412_v2 = vld [vmem:[%s6446_s7 + $0x1840] sm:$0xff]  ;;  %1411 = vst [vmem:[%s6454_s8 + $0x608] sm:$0xff] %v1410_v1 }
  0xd2   : > { %1413 = vst [vmem:[%s6454_s8 + $0x610] sm:$0xff] %v1412_v2  ;;  %v1414_v3 = vld [vmem:[%s6446_s7 + $0x1860] sm:$0xff] }
  0xd3   : > { %v1416_v4 = vld [vmem:[%s6446_s7 + $0x1880] sm:$0xff]  ;;  %1415 = vst [vmem:[%s6454_s8 + $0x618] sm:$0xff] %v1414_v3 }
  0xd4   : > { %v1418_v5 = vld [vmem:[%s6446_s7 + $0x18a0] sm:$0xff]  ;;  %1417 = vst [vmem:[%s6454_s8 + $0x620] sm:$0xff] %v1416_v4 }
  0xd5   : > { %1419 = vst [vmem:[%s6454_s8 + $0x628] sm:$0xff] %v1418_v5  ;;  %v1420_v6 = vld [vmem:[%s6446_s7 + $0x18c0] sm:$0xff] }
  0xd6   : > { %v1422_v7 = vld [vmem:[%s6446_s7 + $0x18e0] sm:$0xff]  ;;  %1421 = vst [vmem:[%s6454_s8 + $0x630] sm:$0xff] %v1420_v6 }
  0xd7   : > { %v1424_v8 = vld [vmem:[%s6446_s7 + $0x1900] sm:$0xff]  ;;  %1423 = vst [vmem:[%s6454_s8 + $0x638] sm:$0xff] %v1422_v7 }
  0xd8   : > { %1425 = vst [vmem:[%s6454_s8 + $0x640] sm:$0xff] %v1424_v8  ;;  %v1426_v9 = vld [vmem:[%s6446_s7 + $0x1920] sm:$0xff] }
  0xd9   : > { %v1428_v10 = vld [vmem:[%s6446_s7 + $0x1940] sm:$0xff]  ;;  %1427 = vst [vmem:[%s6454_s8 + $0x648] sm:$0xff] %v1426_v9 }
  0xda   : > { %v1430_v11 = vld [vmem:[%s6446_s7 + $0x1960] sm:$0xff]  ;;  %1429 = vst [vmem:[%s6454_s8 + $0x650] sm:$0xff] %v1428_v10 }
  0xdb   : > { %1431 = vst [vmem:[%s6454_s8 + $0x658] sm:$0xff] %v1430_v11  ;;  %v1432_v12 = vld [vmem:[%s6446_s7 + $0x1980] sm:$0xff] }
  0xdc   : > { %v1434_v13 = vld [vmem:[%s6446_s7 + $0x19a0] sm:$0xff]  ;;  %1433 = vst [vmem:[%s6454_s8 + $0x660] sm:$0xff] %v1432_v12 }
  0xdd   : > { %v1436_v14 = vld [vmem:[%s6446_s7 + $0x19c0] sm:$0xff]  ;;  %1435 = vst [vmem:[%s6454_s8 + $0x668] sm:$0xff] %v1434_v13 }
  0xde   : > { %1437 = vst [vmem:[%s6454_s8 + $0x670] sm:$0xff] %v1436_v14  ;;  %v1438_v15 = vld [vmem:[%s6446_s7 + $0x19e0] sm:$0xff] }
  0xdf   : > { %v1440_v16 = vld [vmem:[%s6446_s7 + $0x1a00] sm:$0xff]  ;;  %1439 = vst [vmem:[%s6454_s8 + $0x678] sm:$0xff] %v1438_v15 }
  0xe0   : > { %v1442_v17 = vld [vmem:[%s6446_s7 + $0x1a20] sm:$0xff]  ;;  %1441 = vst [vmem:[%s6454_s8 + $0x680] sm:$0xff] %v1440_v16 }
  0xe1   : > { %1443 = vst [vmem:[%s6454_s8 + $0x688] sm:$0xff] %v1442_v17  ;;  %v1444_v18 = vld [vmem:[%s6446_s7 + $0x1a40] sm:$0xff] }
  0xe2   : > { %v1446_v19 = vld [vmem:[%s6446_s7 + $0x1a60] sm:$0xff]  ;;  %1445 = vst [vmem:[%s6454_s8 + $0x690] sm:$0xff] %v1444_v18 }
  0xe3   : > { %v1448_v20 = vld [vmem:[%s6446_s7 + $0x1a80] sm:$0xff]  ;;  %1447 = vst [vmem:[%s6454_s8 + $0x698] sm:$0xff] %v1446_v19 }
  0xe4   : > { %1449 = vst [vmem:[%s6454_s8 + $0x6a0] sm:$0xff] %v1448_v20  ;;  %v1450_v21 = vld [vmem:[%s6446_s7 + $0x1aa0] sm:$0xff] }
  0xe5   : > { %v1452_v22 = vld [vmem:[%s6446_s7 + $0x1ac0] sm:$0xff]  ;;  %1451 = vst [vmem:[%s6454_s8 + $0x6a8] sm:$0xff] %v1450_v21 }
  0xe6   : > { %v1454_v23 = vld [vmem:[%s6446_s7 + $0x1ae0] sm:$0xff]  ;;  %1453 = vst [vmem:[%s6454_s8 + $0x6b0] sm:$0xff] %v1452_v22 }
  0xe7   : > { %1455 = vst [vmem:[%s6454_s8 + $0x6b8] sm:$0xff] %v1454_v23  ;;  %v1456_v24 = vld [vmem:[%s6446_s7 + $0x1b00] sm:$0xff] }
  0xe8   : > { %v1458_v25 = vld [vmem:[%s6446_s7 + $0x1b20] sm:$0xff]  ;;  %1457 = vst [vmem:[%s6454_s8 + $0x6c0] sm:$0xff] %v1456_v24 }
  0xe9   : > { %v1460_v26 = vld [vmem:[%s6446_s7 + $0x1b40] sm:$0xff]  ;;  %1459 = vst [vmem:[%s6454_s8 + $0x6c8] sm:$0xff] %v1458_v25 }
  0xea   : > { %1461 = vst [vmem:[%s6454_s8 + $0x6d0] sm:$0xff] %v1460_v26  ;;  %v1462_v27 = vld [vmem:[%s6446_s7 + $0x1b60] sm:$0xff] }
  0xeb   : > { %v1464_v28 = vld [vmem:[%s6446_s7 + $0x1b80] sm:$0xff]  ;;  %1463 = vst [vmem:[%s6454_s8 + $0x6d8] sm:$0xff] %v1462_v27 }
  0xec   : > { %v1466_v29 = vld [vmem:[%s6446_s7 + $0x1ba0] sm:$0xff]  ;;  %1465 = vst [vmem:[%s6454_s8 + $0x6e0] sm:$0xff] %v1464_v28 }
  0xed   : > { %1467 = vst [vmem:[%s6454_s8 + $0x6e8] sm:$0xff] %v1466_v29  ;;  %v1468_v30 = vld [vmem:[%s6446_s7 + $0x1bc0] sm:$0xff] }
  0xee   : > { %v1470_v31 = vld [vmem:[%s6446_s7 + $0x1be0] sm:$0xff]  ;;  %1469 = vst [vmem:[%s6454_s8 + $0x6f0] sm:$0xff] %v1468_v30 }
  0xef   : > { %v1472_v32 = vld [vmem:[%s6446_s7 + $0x1c00] sm:$0xff]  ;;  %1471 = vst [vmem:[%s6454_s8 + $0x6f8] sm:$0xff] %v1470_v31 }
  0xf0   : > { %1473 = vst [vmem:[%s6454_s8 + $0x700] sm:$0xff] %v1472_v32  ;;  %v1474_v33 = vld [vmem:[%s6446_s7 + $0x1c20] sm:$0xff] }
  0xf1   : > { %v1476_v34 = vld [vmem:[%s6446_s7 + $0x1c40] sm:$0xff]  ;;  %1475 = vst [vmem:[%s6454_s8 + $0x708] sm:$0xff] %v1474_v33 }
  0xf2   : > { %v1478_v35 = vld [vmem:[%s6446_s7 + $0x1c60] sm:$0xff]  ;;  %1477 = vst [vmem:[%s6454_s8 + $0x710] sm:$0xff] %v1476_v34 }
  0xf3   : > { %1479 = vst [vmem:[%s6454_s8 + $0x718] sm:$0xff] %v1478_v35  ;;  %v1480_v36 = vld [vmem:[%s6446_s7 + $0x1c80] sm:$0xff] }
  0xf4   : > { %v1482_v37 = vld [vmem:[%s6446_s7 + $0x1ca0] sm:$0xff]  ;;  %1481 = vst [vmem:[%s6454_s8 + $0x720] sm:$0xff] %v1480_v36 }
  0xf5   : > { %v1484_v38 = vld [vmem:[%s6446_s7 + $0x1cc0] sm:$0xff]  ;;  %1483 = vst [vmem:[%s6454_s8 + $0x728] sm:$0xff] %v1482_v37 }
  0xf6   : > { %1485 = vst [vmem:[%s6454_s8 + $0x730] sm:$0xff] %v1484_v38  ;;  %v1486_v39 = vld [vmem:[%s6446_s7 + $0x1ce0] sm:$0xff] }
  0xf7   : > { %v1488_v40 = vld [vmem:[%s6446_s7 + $0x1d00] sm:$0xff]  ;;  %1487 = vst [vmem:[%s6454_s8 + $0x738] sm:$0xff] %v1486_v39 }
  0xf8   : > { %v1490_v41 = vld [vmem:[%s6446_s7 + $0x1d20] sm:$0xff]  ;;  %1489 = vst [vmem:[%s6454_s8 + $0x740] sm:$0xff] %v1488_v40 }
  0xf9   : > { %1491 = vst [vmem:[%s6454_s8 + $0x748] sm:$0xff] %v1490_v41  ;;  %v1492_v42 = vld [vmem:[%s6446_s7 + $0x1d40] sm:$0xff] }
  0xfa   : > { %v1494_v43 = vld [vmem:[%s6446_s7 + $0x1d60] sm:$0xff]  ;;  %1493 = vst [vmem:[%s6454_s8 + $0x750] sm:$0xff] %v1492_v42 }
  0xfb   : > { %v1496_v44 = vld [vmem:[%s6446_s7 + $0x1d80] sm:$0xff]  ;;  %1495 = vst [vmem:[%s6454_s8 + $0x758] sm:$0xff] %v1494_v43 }
  0xfc   : > { %1497 = vst [vmem:[%s6454_s8 + $0x760] sm:$0xff] %v1496_v44  ;;  %v1498_v45 = vld [vmem:[%s6446_s7 + $0x1da0] sm:$0xff] }
  0xfd   : > { %v1500_v46 = vld [vmem:[%s6446_s7 + $0x1dc0] sm:$0xff]  ;;  %1499 = vst [vmem:[%s6454_s8 + $0x768] sm:$0xff] %v1498_v45 }
  0xfe   : > { %v1502_v47 = vld [vmem:[%s6446_s7 + $0x1de0] sm:$0xff]  ;;  %1501 = vst [vmem:[%s6454_s8 + $0x770] sm:$0xff] %v1500_v46 }
  0xff   : > { %1503 = vst [vmem:[%s6454_s8 + $0x778] sm:$0xff] %v1502_v47  ;;  %v1504_v48 = vld [vmem:[%s6446_s7 + $0x1e00] sm:$0xff] }
 0x100   : > { %v1506_v49 = vld [vmem:[%s6446_s7 + $0x1e20] sm:$0xff]  ;;  %1505 = vst [vmem:[%s6454_s8 + $0x780] sm:$0xff] %v1504_v48 }
 0x101   : > { %v1508_v50 = vld [vmem:[%s6446_s7 + $0x1e40] sm:$0xff]  ;;  %1507 = vst [vmem:[%s6454_s8 + $0x788] sm:$0xff] %v1506_v49 }
 0x102   : > { %1509 = vst [vmem:[%s6454_s8 + $0x790] sm:$0xff] %v1508_v50  ;;  %v1510_v51 = vld [vmem:[%s6446_s7 + $0x1e60] sm:$0xff] }
 0x103   : > { %v1512_v52 = vld [vmem:[%s6446_s7 + $0x1e80] sm:$0xff]  ;;  %1511 = vst [vmem:[%s6454_s8 + $0x798] sm:$0xff] %v1510_v51 }
 0x104   : > { %v1514_v53 = vld [vmem:[%s6446_s7 + $0x1ea0] sm:$0xff]  ;;  %1513 = vst [vmem:[%s6454_s8 + $0x7a0] sm:$0xff] %v1512_v52 }
 0x105   : > { %1515 = vst [vmem:[%s6454_s8 + $0x7a8] sm:$0xff] %v1514_v53  ;;  %v1516_v54 = vld [vmem:[%s6446_s7 + $0x1ec0] sm:$0xff] }
 0x106   : > { %v1518_v55 = vld [vmem:[%s6446_s7 + $0x1ee0] sm:$0xff]  ;;  %1517 = vst [vmem:[%s6454_s8 + $0x7b0] sm:$0xff] %v1516_v54 }
 0x107   : > { %v1520_v56 = vld [vmem:[%s6446_s7 + $0x1f00] sm:$0xff]  ;;  %1519 = vst [vmem:[%s6454_s8 + $0x7b8] sm:$0xff] %v1518_v55 }
 0x108   : > { %1521 = vst [vmem:[%s6454_s8 + $0x7c0] sm:$0xff] %v1520_v56  ;;  %v1522_v57 = vld [vmem:[%s6446_s7 + $0x1f20] sm:$0xff] }
 0x109   : > { %v1524_v58 = vld [vmem:[%s6446_s7 + $0x1f40] sm:$0xff]  ;;  %1523 = vst [vmem:[%s6454_s8 + $0x7c8] sm:$0xff] %v1522_v57 }
 0x10a   : > { %v1526_v59 = vld [vmem:[%s6446_s7 + $0x1f60] sm:$0xff]  ;;  %1525 = vst [vmem:[%s6454_s8 + $0x7d0] sm:$0xff] %v1524_v58 }
 0x10b   : > { %1527 = vst [vmem:[%s6454_s8 + $0x7d8] sm:$0xff] %v1526_v59  ;;  %v1528_v60 = vld [vmem:[%s6446_s7 + $0x1f80] sm:$0xff] }
 0x10c   : > { %v1530_v61 = vld [vmem:[%s6446_s7 + $0x1fa0] sm:$0xff]  ;;  %1529 = vst [vmem:[%s6454_s8 + $0x7e0] sm:$0xff] %v1528_v60 }
 0x10d   : > { %v1532_v62 = vld [vmem:[%s6446_s7 + $0x1fc0] sm:$0xff]  ;;  %1531 = vst [vmem:[%s6454_s8 + $0x7e8] sm:$0xff] %v1530_v61 }
 0x10e   : > { %1533 = vst [vmem:[%s6454_s8 + $0x7f0] sm:$0xff] %v1532_v62  ;;  %v1534_v63 = vld [vmem:[%s6446_s7 + $0x1fe0] sm:$0xff] }
 0x10f   : > { %v1536_v0 = vld [vmem:[%s6446_s7 + $0x2000] sm:$0xff]  ;;  %1535 = vst [vmem:[%s6454_s8 + $0x7f8] sm:$0xff] %v1534_v63 }
 0x110   : > { %v1538_v1 = vld [vmem:[%s6446_s7 + $0x2020] sm:$0xff]  ;;  %1537 = vst [vmem:[%s6454_s8 + $0x800] sm:$0xff] %v1536_v0 }
 0x111   : > { %1539 = vst [vmem:[%s6454_s8 + $0x808] sm:$0xff] %v1538_v1  ;;  %v1540_v2 = vld [vmem:[%s6446_s7 + $0x2040] sm:$0xff] }
 0x112   : > { %v1542_v3 = vld [vmem:[%s6446_s7 + $0x2060] sm:$0xff]  ;;  %1541 = vst [vmem:[%s6454_s8 + $0x810] sm:$0xff] %v1540_v2 }
 0x113   : > { %v1544_v4 = vld [vmem:[%s6446_s7 + $0x2080] sm:$0xff]  ;;  %1543 = vst [vmem:[%s6454_s8 + $0x818] sm:$0xff] %v1542_v3 }
 0x114   : > { %1545 = vst [vmem:[%s6454_s8 + $0x820] sm:$0xff] %v1544_v4  ;;  %v1546_v5 = vld [vmem:[%s6446_s7 + $0x20a0] sm:$0xff] }
 0x115   : > { %v1548_v6 = vld [vmem:[%s6446_s7 + $0x20c0] sm:$0xff]  ;;  %1547 = vst [vmem:[%s6454_s8 + $0x828] sm:$0xff] %v1546_v5 }
 0x116   : > { %v1550_v7 = vld [vmem:[%s6446_s7 + $0x20e0] sm:$0xff]  ;;  %1549 = vst [vmem:[%s6454_s8 + $0x830] sm:$0xff] %v1548_v6 }
 0x117   : > { %1551 = vst [vmem:[%s6454_s8 + $0x838] sm:$0xff] %v1550_v7  ;;  %v1552_v8 = vld [vmem:[%s6446_s7 + $0x2100] sm:$0xff] }
 0x118   : > { %v1554_v9 = vld [vmem:[%s6446_s7 + $0x2120] sm:$0xff]  ;;  %1553 = vst [vmem:[%s6454_s8 + $0x840] sm:$0xff] %v1552_v8 }
 0x119   : > { %v1556_v10 = vld [vmem:[%s6446_s7 + $0x2140] sm:$0xff]  ;;  %1555 = vst [vmem:[%s6454_s8 + $0x848] sm:$0xff] %v1554_v9 }
 0x11a   : > { %1557 = vst [vmem:[%s6454_s8 + $0x850] sm:$0xff] %v1556_v10  ;;  %v1558_v11 = vld [vmem:[%s6446_s7 + $0x2160] sm:$0xff] }
 0x11b   : > { %v1560_v12 = vld [vmem:[%s6446_s7 + $0x2180] sm:$0xff]  ;;  %1559 = vst [vmem:[%s6454_s8 + $0x858] sm:$0xff] %v1558_v11 }
 0x11c   : > { %v1562_v13 = vld [vmem:[%s6446_s7 + $0x21a0] sm:$0xff]  ;;  %1561 = vst [vmem:[%s6454_s8 + $0x860] sm:$0xff] %v1560_v12 }
 0x11d   : > { %1563 = vst [vmem:[%s6454_s8 + $0x868] sm:$0xff] %v1562_v13  ;;  %v1564_v14 = vld [vmem:[%s6446_s7 + $0x21c0] sm:$0xff] }
 0x11e   : > { %v1566_v15 = vld [vmem:[%s6446_s7 + $0x21e0] sm:$0xff]  ;;  %1565 = vst [vmem:[%s6454_s8 + $0x870] sm:$0xff] %v1564_v14 }
 0x11f   : > { %v1568_v16 = vld [vmem:[%s6446_s7 + $0x2200] sm:$0xff]  ;;  %1567 = vst [vmem:[%s6454_s8 + $0x878] sm:$0xff] %v1566_v15 }
 0x120   : > { %1569 = vst [vmem:[%s6454_s8 + $0x880] sm:$0xff] %v1568_v16  ;;  %v1570_v17 = vld [vmem:[%s6446_s7 + $0x2220] sm:$0xff] }
 0x121   : > { %v1572_v18 = vld [vmem:[%s6446_s7 + $0x2240] sm:$0xff]  ;;  %1571 = vst [vmem:[%s6454_s8 + $0x888] sm:$0xff] %v1570_v17 }
 0x122   : > { %v1574_v19 = vld [vmem:[%s6446_s7 + $0x2260] sm:$0xff]  ;;  %1573 = vst [vmem:[%s6454_s8 + $0x890] sm:$0xff] %v1572_v18 }
 0x123   : > { %1575 = vst [vmem:[%s6454_s8 + $0x898] sm:$0xff] %v1574_v19  ;;  %v1576_v20 = vld [vmem:[%s6446_s7 + $0x2280] sm:$0xff] }
 0x124   : > { %v1578_v21 = vld [vmem:[%s6446_s7 + $0x22a0] sm:$0xff]  ;;  %1577 = vst [vmem:[%s6454_s8 + $0x8a0] sm:$0xff] %v1576_v20 }
 0x125   : > { %v1580_v22 = vld [vmem:[%s6446_s7 + $0x22c0] sm:$0xff]  ;;  %1579 = vst [vmem:[%s6454_s8 + $0x8a8] sm:$0xff] %v1578_v21 }
 0x126   : > { %1581 = vst [vmem:[%s6454_s8 + $0x8b0] sm:$0xff] %v1580_v22  ;;  %v1582_v23 = vld [vmem:[%s6446_s7 + $0x22e0] sm:$0xff] }
 0x127   : > { %v1584_v24 = vld [vmem:[%s6446_s7 + $0x2300] sm:$0xff]  ;;  %1583 = vst [vmem:[%s6454_s8 + $0x8b8] sm:$0xff] %v1582_v23 }
 0x128   : > { %v1586_v25 = vld [vmem:[%s6446_s7 + $0x2320] sm:$0xff]  ;;  %1585 = vst [vmem:[%s6454_s8 + $0x8c0] sm:$0xff] %v1584_v24 }
 0x129   : > { %1587 = vst [vmem:[%s6454_s8 + $0x8c8] sm:$0xff] %v1586_v25  ;;  %v1588_v26 = vld [vmem:[%s6446_s7 + $0x2340] sm:$0xff] }
 0x12a   : > { %v1590_v27 = vld [vmem:[%s6446_s7 + $0x2360] sm:$0xff]  ;;  %1589 = vst [vmem:[%s6454_s8 + $0x8d0] sm:$0xff] %v1588_v26 }
 0x12b   : > { %v1592_v28 = vld [vmem:[%s6446_s7 + $0x2380] sm:$0xff]  ;;  %1591 = vst [vmem:[%s6454_s8 + $0x8d8] sm:$0xff] %v1590_v27 }
 0x12c   : > { %1593 = vst [vmem:[%s6454_s8 + $0x8e0] sm:$0xff] %v1592_v28  ;;  %v1594_v29 = vld [vmem:[%s6446_s7 + $0x23a0] sm:$0xff] }
 0x12d   : > { %v1596_v30 = vld [vmem:[%s6446_s7 + $0x23c0] sm:$0xff]  ;;  %1595 = vst [vmem:[%s6454_s8 + $0x8e8] sm:$0xff] %v1594_v29 }
 0x12e   : > { %v1598_v31 = vld [vmem:[%s6446_s7 + $0x23e0] sm:$0xff]  ;;  %1597 = vst [vmem:[%s6454_s8 + $0x8f0] sm:$0xff] %v1596_v30 }
 0x12f   : > { %1599 = vst [vmem:[%s6454_s8 + $0x8f8] sm:$0xff] %v1598_v31  ;;  %v1600_v32 = vld [vmem:[%s6446_s7 + $0x2400] sm:$0xff] }
 0x130   : > { %v1602_v33 = vld [vmem:[%s6446_s7 + $0x2420] sm:$0xff]  ;;  %1601 = vst [vmem:[%s6454_s8 + $0x900] sm:$0xff] %v1600_v32 }
 0x131   : > { %v1604_v34 = vld [vmem:[%s6446_s7 + $0x2440] sm:$0xff]  ;;  %1603 = vst [vmem:[%s6454_s8 + $0x908] sm:$0xff] %v1602_v33 }
 0x132   : > { %1605 = vst [vmem:[%s6454_s8 + $0x910] sm:$0xff] %v1604_v34  ;;  %v1606_v35 = vld [vmem:[%s6446_s7 + $0x2460] sm:$0xff] }
 0x133   : > { %v1608_v36 = vld [vmem:[%s6446_s7 + $0x2480] sm:$0xff]  ;;  %1607 = vst [vmem:[%s6454_s8 + $0x918] sm:$0xff] %v1606_v35 }
 0x134   : > { %v1610_v37 = vld [vmem:[%s6446_s7 + $0x24a0] sm:$0xff]  ;;  %1609 = vst [vmem:[%s6454_s8 + $0x920] sm:$0xff] %v1608_v36 }
 0x135   : > { %1611 = vst [vmem:[%s6454_s8 + $0x928] sm:$0xff] %v1610_v37  ;;  %v1612_v38 = vld [vmem:[%s6446_s7 + $0x24c0] sm:$0xff] }
 0x136   : > { %v1614_v39 = vld [vmem:[%s6446_s7 + $0x24e0] sm:$0xff]  ;;  %1613 = vst [vmem:[%s6454_s8 + $0x930] sm:$0xff] %v1612_v38 }
 0x137   : > { %v1616_v40 = vld [vmem:[%s6446_s7 + $0x2500] sm:$0xff]  ;;  %1615 = vst [vmem:[%s6454_s8 + $0x938] sm:$0xff] %v1614_v39 }
 0x138   : > { %1617 = vst [vmem:[%s6454_s8 + $0x940] sm:$0xff] %v1616_v40  ;;  %v1618_v41 = vld [vmem:[%s6446_s7 + $0x2520] sm:$0xff] }
 0x139   : > { %v1620_v42 = vld [vmem:[%s6446_s7 + $0x2540] sm:$0xff]  ;;  %1619 = vst [vmem:[%s6454_s8 + $0x948] sm:$0xff] %v1618_v41 }
 0x13a   : > { %v1622_v43 = vld [vmem:[%s6446_s7 + $0x2560] sm:$0xff]  ;;  %1621 = vst [vmem:[%s6454_s8 + $0x950] sm:$0xff] %v1620_v42 }
 0x13b   : > { %1623 = vst [vmem:[%s6454_s8 + $0x958] sm:$0xff] %v1622_v43  ;;  %v1624_v44 = vld [vmem:[%s6446_s7 + $0x2580] sm:$0xff] }
 0x13c   : > { %v1626_v45 = vld [vmem:[%s6446_s7 + $0x25a0] sm:$0xff]  ;;  %1625 = vst [vmem:[%s6454_s8 + $0x960] sm:$0xff] %v1624_v44 }
 0x13d   : > { %v1628_v46 = vld [vmem:[%s6446_s7 + $0x25c0] sm:$0xff]  ;;  %1627 = vst [vmem:[%s6454_s8 + $0x968] sm:$0xff] %v1626_v45 }
 0x13e   : > { %1629 = vst [vmem:[%s6454_s8 + $0x970] sm:$0xff] %v1628_v46  ;;  %v1630_v47 = vld [vmem:[%s6446_s7 + $0x25e0] sm:$0xff] }
 0x13f   : > { %v1632_v48 = vld [vmem:[%s6446_s7 + $0x2600] sm:$0xff]  ;;  %1631 = vst [vmem:[%s6454_s8 + $0x978] sm:$0xff] %v1630_v47 }
 0x140   : > { %v1634_v49 = vld [vmem:[%s6446_s7 + $0x2620] sm:$0xff]  ;;  %1633 = vst [vmem:[%s6454_s8 + $0x980] sm:$0xff] %v1632_v48 }
 0x141   : > { %1635 = vst [vmem:[%s6454_s8 + $0x988] sm:$0xff] %v1634_v49  ;;  %v1636_v50 = vld [vmem:[%s6446_s7 + $0x2640] sm:$0xff] }
 0x142   : > { %v1638_v51 = vld [vmem:[%s6446_s7 + $0x2660] sm:$0xff]  ;;  %1637 = vst [vmem:[%s6454_s8 + $0x990] sm:$0xff] %v1636_v50 }
 0x143   : > { %v1640_v52 = vld [vmem:[%s6446_s7 + $0x2680] sm:$0xff]  ;;  %1639 = vst [vmem:[%s6454_s8 + $0x998] sm:$0xff] %v1638_v51 }
 0x144   : > { %1641 = vst [vmem:[%s6454_s8 + $0x9a0] sm:$0xff] %v1640_v52  ;;  %v1642_v53 = vld [vmem:[%s6446_s7 + $0x26a0] sm:$0xff] }
 0x145   : > { %v1644_v54 = vld [vmem:[%s6446_s7 + $0x26c0] sm:$0xff]  ;;  %1643 = vst [vmem:[%s6454_s8 + $0x9a8] sm:$0xff] %v1642_v53 }
 0x146   : > { %v1646_v55 = vld [vmem:[%s6446_s7 + $0x26e0] sm:$0xff]  ;;  %1645 = vst [vmem:[%s6454_s8 + $0x9b0] sm:$0xff] %v1644_v54 }
 0x147   : > { %1647 = vst [vmem:[%s6454_s8 + $0x9b8] sm:$0xff] %v1646_v55  ;;  %v1648_v56 = vld [vmem:[%s6446_s7 + $0x2700] sm:$0xff] }
 0x148   : > { %v1650_v57 = vld [vmem:[%s6446_s7 + $0x2720] sm:$0xff]  ;;  %1649 = vst [vmem:[%s6454_s8 + $0x9c0] sm:$0xff] %v1648_v56 }
 0x149   : > { %v1652_v58 = vld [vmem:[%s6446_s7 + $0x2740] sm:$0xff]  ;;  %1651 = vst [vmem:[%s6454_s8 + $0x9c8] sm:$0xff] %v1650_v57 }
 0x14a   : > { %1653 = vst [vmem:[%s6454_s8 + $0x9d0] sm:$0xff] %v1652_v58  ;;  %v1654_v59 = vld [vmem:[%s6446_s7 + $0x2760] sm:$0xff] }
 0x14b   : > { %v1656_v60 = vld [vmem:[%s6446_s7 + $0x2780] sm:$0xff]  ;;  %1655 = vst [vmem:[%s6454_s8 + $0x9d8] sm:$0xff] %v1654_v59 }
 0x14c   : > { %v1658_v61 = vld [vmem:[%s6446_s7 + $0x27a0] sm:$0xff]  ;;  %1657 = vst [vmem:[%s6454_s8 + $0x9e0] sm:$0xff] %v1656_v60 }
 0x14d   : > { %1659 = vst [vmem:[%s6454_s8 + $0x9e8] sm:$0xff] %v1658_v61  ;;  %v1660_v62 = vld [vmem:[%s6446_s7 + $0x27c0] sm:$0xff] }
 0x14e   : > { %v1662_v63 = vld [vmem:[%s6446_s7 + $0x27e0] sm:$0xff]  ;;  %1661 = vst [vmem:[%s6454_s8 + $0x9f0] sm:$0xff] %v1660_v62 }
 0x14f   : > { %v1664_v0 = vld [vmem:[%s6446_s7 + $0x2800] sm:$0xff]  ;;  %1663 = vst [vmem:[%s6454_s8 + $0x9f8] sm:$0xff] %v1662_v63 }
 0x150   : > { %1665 = vst [vmem:[%s6454_s8 + $0xa00] sm:$0xff] %v1664_v0  ;;  %v1666_v1 = vld [vmem:[%s6446_s7 + $0x2820] sm:$0xff] }
 0x151   : > { %v1668_v2 = vld [vmem:[%s6446_s7 + $0x2840] sm:$0xff]  ;;  %1667 = vst [vmem:[%s6454_s8 + $0xa08] sm:$0xff] %v1666_v1 }
 0x152   : > { %v1670_v3 = vld [vmem:[%s6446_s7 + $0x2860] sm:$0xff]  ;;  %1669 = vst [vmem:[%s6454_s8 + $0xa10] sm:$0xff] %v1668_v2 }
 0x153   : > { %1671 = vst [vmem:[%s6454_s8 + $0xa18] sm:$0xff] %v1670_v3  ;;  %v1672_v4 = vld [vmem:[%s6446_s7 + $0x2880] sm:$0xff] }
 0x154   : > { %v1674_v5 = vld [vmem:[%s6446_s7 + $0x28a0] sm:$0xff]  ;;  %1673 = vst [vmem:[%s6454_s8 + $0xa20] sm:$0xff] %v1672_v4 }
 0x155   : > { %v1676_v6 = vld [vmem:[%s6446_s7 + $0x28c0] sm:$0xff]  ;;  %1675 = vst [vmem:[%s6454_s8 + $0xa28] sm:$0xff] %v1674_v5 }
 0x156   : > { %1677 = vst [vmem:[%s6454_s8 + $0xa30] sm:$0xff] %v1676_v6  ;;  %v1678_v7 = vld [vmem:[%s6446_s7 + $0x28e0] sm:$0xff] }
 0x157   : > { %v1680_v8 = vld [vmem:[%s6446_s7 + $0x2900] sm:$0xff]  ;;  %1679 = vst [vmem:[%s6454_s8 + $0xa38] sm:$0xff] %v1678_v7 }
 0x158   : > { %v1682_v9 = vld [vmem:[%s6446_s7 + $0x2920] sm:$0xff]  ;;  %1681 = vst [vmem:[%s6454_s8 + $0xa40] sm:$0xff] %v1680_v8 }
 0x159   : > { %1683 = vst [vmem:[%s6454_s8 + $0xa48] sm:$0xff] %v1682_v9  ;;  %v1684_v10 = vld [vmem:[%s6446_s7 + $0x2940] sm:$0xff] }
 0x15a   : > { %v1686_v11 = vld [vmem:[%s6446_s7 + $0x2960] sm:$0xff]  ;;  %1685 = vst [vmem:[%s6454_s8 + $0xa50] sm:$0xff] %v1684_v10 }
 0x15b   : > { %v1688_v12 = vld [vmem:[%s6446_s7 + $0x2980] sm:$0xff]  ;;  %1687 = vst [vmem:[%s6454_s8 + $0xa58] sm:$0xff] %v1686_v11 }
 0x15c   : > { %1689 = vst [vmem:[%s6454_s8 + $0xa60] sm:$0xff] %v1688_v12  ;;  %v1690_v13 = vld [vmem:[%s6446_s7 + $0x29a0] sm:$0xff] }
 0x15d   : > { %v1692_v14 = vld [vmem:[%s6446_s7 + $0x29c0] sm:$0xff]  ;;  %1691 = vst [vmem:[%s6454_s8 + $0xa68] sm:$0xff] %v1690_v13 }
 0x15e   : > { %v1694_v15 = vld [vmem:[%s6446_s7 + $0x29e0] sm:$0xff]  ;;  %1693 = vst [vmem:[%s6454_s8 + $0xa70] sm:$0xff] %v1692_v14 }
 0x15f   : > { %1695 = vst [vmem:[%s6454_s8 + $0xa78] sm:$0xff] %v1694_v15  ;;  %v1696_v16 = vld [vmem:[%s6446_s7 + $0x2a00] sm:$0xff] }
 0x160   : > { %v1698_v17 = vld [vmem:[%s6446_s7 + $0x2a20] sm:$0xff]  ;;  %1697 = vst [vmem:[%s6454_s8 + $0xa80] sm:$0xff] %v1696_v16 }
 0x161   : > { %v1700_v18 = vld [vmem:[%s6446_s7 + $0x2a40] sm:$0xff]  ;;  %1699 = vst [vmem:[%s6454_s8 + $0xa88] sm:$0xff] %v1698_v17 }
 0x162   : > { %1701 = vst [vmem:[%s6454_s8 + $0xa90] sm:$0xff] %v1700_v18  ;;  %v1702_v19 = vld [vmem:[%s6446_s7 + $0x2a60] sm:$0xff] }
 0x163   : > { %v1704_v20 = vld [vmem:[%s6446_s7 + $0x2a80] sm:$0xff]  ;;  %1703 = vst [vmem:[%s6454_s8 + $0xa98] sm:$0xff] %v1702_v19 }
 0x164   : > { %v1706_v21 = vld [vmem:[%s6446_s7 + $0x2aa0] sm:$0xff]  ;;  %1705 = vst [vmem:[%s6454_s8 + $0xaa0] sm:$0xff] %v1704_v20 }
 0x165   : > { %1707 = vst [vmem:[%s6454_s8 + $0xaa8] sm:$0xff] %v1706_v21  ;;  %v1708_v22 = vld [vmem:[%s6446_s7 + $0x2ac0] sm:$0xff] }
 0x166   : > { %v1710_v23 = vld [vmem:[%s6446_s7 + $0x2ae0] sm:$0xff]  ;;  %1709 = vst [vmem:[%s6454_s8 + $0xab0] sm:$0xff] %v1708_v22 }
 0x167   : > { %v1712_v24 = vld [vmem:[%s6446_s7 + $0x2b00] sm:$0xff]  ;;  %1711 = vst [vmem:[%s6454_s8 + $0xab8] sm:$0xff] %v1710_v23 }
 0x168   : > { %1713 = vst [vmem:[%s6454_s8 + $0xac0] sm:$0xff] %v1712_v24  ;;  %v1714_v25 = vld [vmem:[%s6446_s7 + $0x2b20] sm:$0xff] }
 0x169   : > { %v1716_v26 = vld [vmem:[%s6446_s7 + $0x2b40] sm:$0xff]  ;;  %1715 = vst [vmem:[%s6454_s8 + $0xac8] sm:$0xff] %v1714_v25 }
 0x16a   : > { %v1718_v27 = vld [vmem:[%s6446_s7 + $0x2b60] sm:$0xff]  ;;  %1717 = vst [vmem:[%s6454_s8 + $0xad0] sm:$0xff] %v1716_v26 }
 0x16b   : > { %1719 = vst [vmem:[%s6454_s8 + $0xad8] sm:$0xff] %v1718_v27  ;;  %v1720_v28 = vld [vmem:[%s6446_s7 + $0x2b80] sm:$0xff] }
 0x16c   : > { %v1722_v29 = vld [vmem:[%s6446_s7 + $0x2ba0] sm:$0xff]  ;;  %1721 = vst [vmem:[%s6454_s8 + $0xae0] sm:$0xff] %v1720_v28 }
 0x16d   : > { %v1724_v30 = vld [vmem:[%s6446_s7 + $0x2bc0] sm:$0xff]  ;;  %1723 = vst [vmem:[%s6454_s8 + $0xae8] sm:$0xff] %v1722_v29 }
 0x16e   : > { %1725 = vst [vmem:[%s6454_s8 + $0xaf0] sm:$0xff] %v1724_v30  ;;  %v1726_v31 = vld [vmem:[%s6446_s7 + $0x2be0] sm:$0xff] }
 0x16f   : > { %v1728_v32 = vld [vmem:[%s6446_s7 + $0x2c00] sm:$0xff]  ;;  %1727 = vst [vmem:[%s6454_s8 + $0xaf8] sm:$0xff] %v1726_v31 }
 0x170   : > { %v1730_v33 = vld [vmem:[%s6446_s7 + $0x2c20] sm:$0xff]  ;;  %1729 = vst [vmem:[%s6454_s8 + $0xb00] sm:$0xff] %v1728_v32 }
 0x171   : > { %1731 = vst [vmem:[%s6454_s8 + $0xb08] sm:$0xff] %v1730_v33  ;;  %v1732_v34 = vld [vmem:[%s6446_s7 + $0x2c40] sm:$0xff] }
 0x172   : > { %v1734_v35 = vld [vmem:[%s6446_s7 + $0x2c60] sm:$0xff]  ;;  %1733 = vst [vmem:[%s6454_s8 + $0xb10] sm:$0xff] %v1732_v34 }
 0x173   : > { %v1736_v36 = vld [vmem:[%s6446_s7 + $0x2c80] sm:$0xff]  ;;  %1735 = vst [vmem:[%s6454_s8 + $0xb18] sm:$0xff] %v1734_v35 }
 0x174   : > { %1737 = vst [vmem:[%s6454_s8 + $0xb20] sm:$0xff] %v1736_v36  ;;  %v1738_v37 = vld [vmem:[%s6446_s7 + $0x2ca0] sm:$0xff] }
 0x175   : > { %v1740_v38 = vld [vmem:[%s6446_s7 + $0x2cc0] sm:$0xff]  ;;  %1739 = vst [vmem:[%s6454_s8 + $0xb28] sm:$0xff] %v1738_v37 }
 0x176   : > { %v1742_v39 = vld [vmem:[%s6446_s7 + $0x2ce0] sm:$0xff]  ;;  %1741 = vst [vmem:[%s6454_s8 + $0xb30] sm:$0xff] %v1740_v38 }
 0x177   : > { %1743 = vst [vmem:[%s6454_s8 + $0xb38] sm:$0xff] %v1742_v39  ;;  %v1744_v40 = vld [vmem:[%s6446_s7 + $0x2d00] sm:$0xff] }
 0x178   : > { %v1746_v41 = vld [vmem:[%s6446_s7 + $0x2d20] sm:$0xff]  ;;  %1745 = vst [vmem:[%s6454_s8 + $0xb40] sm:$0xff] %v1744_v40 }
 0x179   : > { %v1748_v42 = vld [vmem:[%s6446_s7 + $0x2d40] sm:$0xff]  ;;  %1747 = vst [vmem:[%s6454_s8 + $0xb48] sm:$0xff] %v1746_v41 }
 0x17a   : > { %1749 = vst [vmem:[%s6454_s8 + $0xb50] sm:$0xff] %v1748_v42  ;;  %v1750_v43 = vld [vmem:[%s6446_s7 + $0x2d60] sm:$0xff] }
 0x17b   : > { %v1752_v44 = vld [vmem:[%s6446_s7 + $0x2d80] sm:$0xff]  ;;  %1751 = vst [vmem:[%s6454_s8 + $0xb58] sm:$0xff] %v1750_v43 }
 0x17c   : > { %v1754_v45 = vld [vmem:[%s6446_s7 + $0x2da0] sm:$0xff]  ;;  %1753 = vst [vmem:[%s6454_s8 + $0xb60] sm:$0xff] %v1752_v44 }
 0x17d   : > { %1755 = vst [vmem:[%s6454_s8 + $0xb68] sm:$0xff] %v1754_v45  ;;  %v1756_v46 = vld [vmem:[%s6446_s7 + $0x2dc0] sm:$0xff] }
 0x17e   : > { %v1758_v47 = vld [vmem:[%s6446_s7 + $0x2de0] sm:$0xff]  ;;  %1757 = vst [vmem:[%s6454_s8 + $0xb70] sm:$0xff] %v1756_v46 }
 0x17f   : > { %v1760_v48 = vld [vmem:[%s6446_s7 + $0x2e00] sm:$0xff]  ;;  %1759 = vst [vmem:[%s6454_s8 + $0xb78] sm:$0xff] %v1758_v47 }
 0x180   : > { %1761 = vst [vmem:[%s6454_s8 + $0xb80] sm:$0xff] %v1760_v48  ;;  %v1762_v49 = vld [vmem:[%s6446_s7 + $0x2e20] sm:$0xff] }
 0x181   : > { %v1764_v50 = vld [vmem:[%s6446_s7 + $0x2e40] sm:$0xff]  ;;  %1763 = vst [vmem:[%s6454_s8 + $0xb88] sm:$0xff] %v1762_v49 }
 0x182   : > { %v1766_v51 = vld [vmem:[%s6446_s7 + $0x2e60] sm:$0xff]  ;;  %1765 = vst [vmem:[%s6454_s8 + $0xb90] sm:$0xff] %v1764_v50 }
 0x183   : > { %1767 = vst [vmem:[%s6454_s8 + $0xb98] sm:$0xff] %v1766_v51  ;;  %v1768_v52 = vld [vmem:[%s6446_s7 + $0x2e80] sm:$0xff] }
 0x184   : > { %v1770_v53 = vld [vmem:[%s6446_s7 + $0x2ea0] sm:$0xff]  ;;  %1769 = vst [vmem:[%s6454_s8 + $0xba0] sm:$0xff] %v1768_v52 }
 0x185   : > { %v1772_v54 = vld [vmem:[%s6446_s7 + $0x2ec0] sm:$0xff]  ;;  %1771 = vst [vmem:[%s6454_s8 + $0xba8] sm:$0xff] %v1770_v53 }
 0x186   : > { %1773 = vst [vmem:[%s6454_s8 + $0xbb0] sm:$0xff] %v1772_v54  ;;  %v1774_v55 = vld [vmem:[%s6446_s7 + $0x2ee0] sm:$0xff] }
 0x187   : > { %v1776_v56 = vld [vmem:[%s6446_s7 + $0x2f00] sm:$0xff]  ;;  %1775 = vst [vmem:[%s6454_s8 + $0xbb8] sm:$0xff] %v1774_v55 }
 0x188   : > { %v1778_v57 = vld [vmem:[%s6446_s7 + $0x2f20] sm:$0xff]  ;;  %1777 = vst [vmem:[%s6454_s8 + $0xbc0] sm:$0xff] %v1776_v56 }
 0x189   : > { %1779 = vst [vmem:[%s6454_s8 + $0xbc8] sm:$0xff] %v1778_v57  ;;  %v1780_v58 = vld [vmem:[%s6446_s7 + $0x2f40] sm:$0xff] }
 0x18a   : > { %v1782_v59 = vld [vmem:[%s6446_s7 + $0x2f60] sm:$0xff]  ;;  %1781 = vst [vmem:[%s6454_s8 + $0xbd0] sm:$0xff] %v1780_v58 }
 0x18b   : > { %v1784_v60 = vld [vmem:[%s6446_s7 + $0x2f80] sm:$0xff]  ;;  %1783 = vst [vmem:[%s6454_s8 + $0xbd8] sm:$0xff] %v1782_v59 }
 0x18c   : > { %1785 = vst [vmem:[%s6454_s8 + $0xbe0] sm:$0xff] %v1784_v60  ;;  %v1786_v61 = vld [vmem:[%s6446_s7 + $0x2fa0] sm:$0xff] }
 0x18d   : > { %v1788_v62 = vld [vmem:[%s6446_s7 + $0x2fc0] sm:$0xff]  ;;  %1787 = vst [vmem:[%s6454_s8 + $0xbe8] sm:$0xff] %v1786_v61 }
 0x18e   : > { %v1790_v63 = vld [vmem:[%s6446_s7 + $0x2fe0] sm:$0xff]  ;;  %1789 = vst [vmem:[%s6454_s8 + $0xbf0] sm:$0xff] %v1788_v62 }
 0x18f   : > { %1791 = vst [vmem:[%s6454_s8 + $0xbf8] sm:$0xff] %v1790_v63  ;;  %v1792_v0 = vld [vmem:[%s6446_s7 + $0x3000] sm:$0xff] }
 0x190   : > { %v1794_v1 = vld [vmem:[%s6446_s7 + $0x3020] sm:$0xff]  ;;  %1793 = vst [vmem:[%s6454_s8 + $0xc00] sm:$0xff] %v1792_v0 }
 0x191   : > { %v1796_v2 = vld [vmem:[%s6446_s7 + $0x3040] sm:$0xff]  ;;  %1795 = vst [vmem:[%s6454_s8 + $0xc08] sm:$0xff] %v1794_v1 }
 0x192   : > { %1797 = vst [vmem:[%s6454_s8 + $0xc10] sm:$0xff] %v1796_v2  ;;  %v1798_v3 = vld [vmem:[%s6446_s7 + $0x3060] sm:$0xff] }
 0x193   : > { %v1800_v4 = vld [vmem:[%s6446_s7 + $0x3080] sm:$0xff]  ;;  %1799 = vst [vmem:[%s6454_s8 + $0xc18] sm:$0xff] %v1798_v3 }
 0x194   : > { %v1802_v5 = vld [vmem:[%s6446_s7 + $0x30a0] sm:$0xff]  ;;  %1801 = vst [vmem:[%s6454_s8 + $0xc20] sm:$0xff] %v1800_v4 }
 0x195   : > { %1803 = vst [vmem:[%s6454_s8 + $0xc28] sm:$0xff] %v1802_v5  ;;  %v1804_v6 = vld [vmem:[%s6446_s7 + $0x30c0] sm:$0xff] }
 0x196   : > { %v1806_v7 = vld [vmem:[%s6446_s7 + $0x30e0] sm:$0xff]  ;;  %1805 = vst [vmem:[%s6454_s8 + $0xc30] sm:$0xff] %v1804_v6 }
 0x197   : > { %1807 = vst [vmem:[%s6454_s8 + $0xc38] sm:$0xff] %v1806_v7 }
 0x198 PF: > { %p5194_p6 = scmp.ge.s32.totalorder %s6370_s22, 1  ;;  %p1829_p7 = scmp.lt.s32.totalorder %s6370_s22, 5 }
 0x19a   : > { %p1830_p8 = pnand %p5194_p6, %p1829_p7 }
 0x19b   : > { %s1836_s9 = sand.u32 (!%p1830_p8), 1, %s6354_s18   ;;  %s5195_s10 = sshll.u32 (!%p1830_p8), %s6362_s20, 1 }
 0x19c   : > { %1833 = sbr.rel (%p1830_p8) target bundleno = 1229 (0x4cd), region = 74  ;;  %p1883_p9 = scmp.lt.s32.totalorder (!%p1830_p8), %s5195_s10, 7 }
 0x19d   : > { %s5661_s11 = smul.u32 (!%p1830_p8), 3136, %s1836_s9  ;;  %s5196_s12 = sshll.u32 (!%p1830_p8), %s6362_s20, 5 }
 0x19e   : > { %p1888_p10 = scmp.lt.s32.totalorder (!%p1830_p8), %s5196_s12, 127  ;;  %p5198_p11 = scmp.ne.s32.totalorder (!%p1830_p8), %s6362_s20, 0 }
 0x19f   : > { %s7250_s18 = scalar_lea.vmem (!%p1830_p8), [#allocation2], %s5661_s11 }
 0x1a1   : > { %s7817_s10 = smov (!%p1883_p9, %s5195_s10), 7  ;;  %s7819_s12 = smov (!%p1888_p10, %s5196_s12), 127 }
 0x1a2   : > { %s1885_s15 = scalar_lea.vmem %s7806_s2, %s7817_s10  ;;  %s5197_s16 = sshll.u32 %s7819_s12, 2 }
 0x1a3   : > { %s7248_s25 = scalar_lea.vmem %s7807_s3, %s5197_s16  ;;  %1901 = sbr.rel (%p5198_p11) target bundleno = 426 (0x1aa), region = 82 }
 0x1a8   : > { %v5199_v8 = vld [vmem:[%s7808_s4] ss:$0 sm:$0xff] }
 0x1a9   : > { %1910 = vst [vmem:[%s7809_s5] sm:$0xff] %v5199_v8 }
 0x1aa PF: > { %v5703_v9 = vld [vmem:[%s7250_s18 + $0x74] ss:$8 sps:$4 sm:$0xff]   ;;  %v5705_v10 = vld [vmem:[%s7250_s18 + $0x70] ss:$8 sps:$4 sm:$0xff]   ;;  %v5709_v13 = vld [vmem:[%s7250_s18 + $0x64] ss:$8 sps:$4 sm:$0xff]  }
 0x1ab   : > { %4379 = vmatprep.subr.bf16.mxu0 %v5703_v9  ;;  %v5706_v11 = vld [vmem:[%s7250_s18 + $0x174] ss:$8 sps:$4 sm:$0xff]   ;;  %v5708_v12 = vld [vmem:[%s7250_s18 + $0x170] ss:$8 sps:$4 sm:$0xff]   ;;  %v5711_v14 = vld [vmem:[%s7250_s18 + $0x60] ss:$8 sps:$4 sm:$0xff]  }
 0x1ac   : > { %4380 = vmatpush1.bf16.msra.mxu0 %v5705_v10  ;;  %4420 = vmatprep.subr.bf16.mxu1 %v5706_v11  ;;  %v5712_v15 = vld [vmem:[%s7250_s18 + $0x164] ss:$8 sps:$4 sm:$0xff]   ;;  %v5714_v16 = vld [vmem:[%s7250_s18 + $0x160] ss:$8 sps:$4 sm:$0xff]   ;;  %v5715_v17 = vld [vmem:[%s7250_s18 + $0x54] ss:$8 sps:$4 sm:$0xff]  }
 0x1ad   : > { %4421 = vmatpush1.bf16.msra.mxu1 %v5708_v12  ;;  %4381 = vmatprep.subr.bf16.mxu0 %v5709_v13  ;;  %v5717_v18 = vld [vmem:[%s7250_s18 + $0x50] ss:$8 sps:$4 sm:$0xff]   ;;  %v5718_v19 = vld [vmem:[%s7250_s18 + $0x154] ss:$8 sps:$4 sm:$0xff]   ;;  %v5721_v20 = vld [vmem:[%s7250_s18 + $0x44] ss:$8 sps:$4 sm:$0xff]  }
 0x1ae   : > { %4422 = vmatprep.subr.bf16.mxu1 %v5712_v15  ;;  %v5720_v21 = vld [vmem:[%s7250_s18 + $0x150] ss:$8 sps:$4 sm:$0xff]   ;;  %v5724_v22 = vld [vmem:[%s7250_s18 + $0x144] ss:$8 sps:$4 sm:$0xff]   ;;  %v5723_v23 = vld [vmem:[%s7250_s18 + $0x40] ss:$8 sps:$4 sm:$0xff]  }
 0x1af   : > { %v5727_v24 = vld [vmem:[%s7250_s18 + $0x34] ss:$8 sps:$4 sm:$0xff]   ;;  %v5726_v25 = vld [vmem:[%s7250_s18 + $0x140] ss:$8 sps:$4 sm:$0xff]   ;;  %v5729_v27 = vld [vmem:[%s7250_s18 + $0x30] ss:$8 sps:$4 sm:$0xff]  }
 0x1b0   : > { %4382 = vmatpush1.bf16.msra.mxu0 %v5711_v14  ;;  %v5730_v26 = vld [vmem:[%s7250_s18 + $0x134] ss:$8 sps:$4 sm:$0xff]   ;;  %v5733_v28 = vld [vmem:[%s7250_s18 + $0x24] ss:$8 sps:$4 sm:$0xff]   ;;  %v5732_v29 = vld [vmem:[%s7250_s18 + $0x130] ss:$8 sps:$4 sm:$0xff]  }
 0x1b1   : > { %4383 = vmatprep.subr.bf16.mxu0 %v5715_v17  ;;  %4423 = vmatpush1.bf16.msra.mxu1 %v5714_v16  ;;  %v5736_v30 = vld [vmem:[%s7250_s18 + $0x124] ss:$8 sps:$4 sm:$0xff]   ;;  %v5735_v31 = vld [vmem:[%s7250_s18 + $0x20] ss:$8 sps:$4 sm:$0xff]   ;;  %v5739_v32 = vld [vmem:[%s7250_s18 + $0x14] ss:$8 sps:$4 sm:$0xff]  }
 0x1b2   : > { %4424 = vmatprep.subr.bf16.mxu1 %v5718_v19  ;;  %v5738_v33 = vld [vmem:[%s7250_s18 + $0x120] ss:$8 sps:$4 sm:$0xff]   ;;  %v5742_v34 = vld [vmem:[%s7250_s18 + $0x114] ss:$8 sps:$4 sm:$0xff]   ;;  %v5741_v35 = vld [vmem:[%s7250_s18 + $0x10] ss:$8 sps:$4 sm:$0xff]  }
 0x1b3   : > { %v5745_v36 = vld [vmem:[%s7250_s18 + $0x4] ss:$8 sps:$4 sm:$0xff]   ;;  %v5744_v37 = vld [vmem:[%s7250_s18 + $0x110] ss:$8 sps:$4 sm:$0xff]   ;;  %v5747_v39 = vld [vmem:[%s7250_s18] ss:$8 sps:$4 sm:$0xff]  }
 0x1b4   : > { %4384 = vmatpush1.bf16.msra.mxu0 %v5717_v18  ;;  %v5748_v38 = vld [vmem:[%s7250_s18 + $0x104] ss:$8 sps:$4 sm:$0xff]   ;;  %v5751_v40 = vld [vmem:[%s7250_s18 + $0xf4] ss:$8 sps:$4 sm:$0xff]   ;;  %v5750_v41 = vld [vmem:[%s7250_s18 + $0x100] ss:$8 sps:$4 sm:$0xff]  }
 0x1b5   : > { %4385 = vmatprep.subr.bf16.mxu0 %v5721_v20  ;;  %4425 = vmatpush1.bf16.msra.mxu1 %v5720_v21  ;;  %v5754_v42 = vld [vmem:[%s7250_s18 + $0x1f4] ss:$8 sps:$4 sm:$0xff]   ;;  %v5753_v43 = vld [vmem:[%s7250_s18 + $0xf0] ss:$8 sps:$4 sm:$0xff]   ;;  %v5757_v44 = vld [vmem:[%s7250_s18 + $0xe4] ss:$8 sps:$4 sm:$0xff]  }
 0x1b6   : > { %4426 = vmatprep.subr.bf16.mxu1 %v5724_v22  ;;  %v5756_v45 = vld [vmem:[%s7250_s18 + $0x1f0] ss:$8 sps:$4 sm:$0xff]   ;;  %v5760_v46 = vld [vmem:[%s7250_s18 + $0x1e4] ss:$8 sps:$4 sm:$0xff]   ;;  %v5759_v47 = vld [vmem:[%s7250_s18 + $0xe0] ss:$8 sps:$4 sm:$0xff]  }
 0x1b7   : > { %v5763_v48 = vld [vmem:[%s7250_s18 + $0xd4] ss:$8 sps:$4 sm:$0xff]   ;;  %v5762_v49 = vld [vmem:[%s7250_s18 + $0x1e0] ss:$8 sps:$4 sm:$0xff]   ;;  %v5765_v51 = vld [vmem:[%s7250_s18 + $0xd0] ss:$8 sps:$4 sm:$0xff]  }
 0x1b8   : > { %4386 = vmatpush1.bf16.msra.mxu0 %v5723_v23  ;;  %v5766_v50 = vld [vmem:[%s7250_s18 + $0x1d4] ss:$8 sps:$4 sm:$0xff]   ;;  %v5769_v52 = vld [vmem:[%s7250_s18 + $0xc4] ss:$8 sps:$4 sm:$0xff]   ;;  %v5768_v53 = vld [vmem:[%s7250_s18 + $0x1d0] ss:$8 sps:$4 sm:$0xff]  }
 0x1b9   : > { %4387 = vmatprep.subr.bf16.mxu0 %v5727_v24  ;;  %4427 = vmatpush1.bf16.msra.mxu1 %v5726_v25  ;;  %v5772_v54 = vld [vmem:[%s7250_s18 + $0x1c4] ss:$8 sps:$4 sm:$0xff]   ;;  %v5771_v56 = vld [vmem:[%s7250_s18 + $0xc0] ss:$8 sps:$4 sm:$0xff]   ;;  %v5775_v58 = vld [vmem:[%s7250_s18 + $0xb4] ss:$8 sps:$4 sm:$0xff]  }
 0x1ba   : > { %4428 = vmatprep.subr.bf16.mxu1 %v5730_v26  ;;  %v1911_v55 = vld [vmem:[%s7804_s0] sm:$0xff]  ;;  %v1912_v59 = vld [vmem:[%s7804_s0 + $0x8] sm:$0xff]  ;;  %v5778_v62 = vld [vmem:[%s7250_s18 + $0x1b4] ss:$8 sps:$4 sm:$0xff]   ;;  %vm4375_vm0 = vcmask 523264  }
 0x1bb   : > { %v5201_v57 = vcombine.high %v1911_v55, %v1911_v55  ;;  %v5774_v60 = vld [vmem:[%s7250_s18 + $0x1c0] ss:$8 sps:$4 sm:$0xff]   ;;  %v5203_v61 = vcombine.high %v1912_v59, %v1912_v59  ;;  %v5777_v63 = vld [vmem:[%s7250_s18 + $0xb0] ss:$8 sps:$4 sm:$0xff]   ;;  %v5781_v0 = vld [vmem:[%s7250_s18 + $0xa4] ss:$8 sps:$4 sm:$0xff]   ;;  %v5200_v14 = vcombine.low %v1911_v55, %v1911_v55  ;;  %v5202_v17 = vcombine.low %v1912_v59, %v1912_v59 }
 0x1bc   : > { %4388 = vmatpush1.bf16.msra.mxu0 %v5729_v27  ;;  %v5780_v1 = vld [vmem:[%s7250_s18 + $0x1b0] ss:$8 sps:$4 sm:$0xff]   ;;  %v5784_v2 = vld [vmem:[%s7250_s18 + $0x1a4] ss:$8 sps:$4 sm:$0xff]   ;;  %v5783_v3 = vld [vmem:[%s7250_s18 + $0xa0] ss:$8 sps:$4 sm:$0xff]  }
 0x1bd   : > { %4389 = vmatprep.subr.bf16.mxu0 %v5733_v28  ;;  %4429 = vmatpush1.bf16.msra.mxu1 %v5732_v29  ;;  %v5787_v4 = vld [vmem:[%s7250_s18 + $0x94] ss:$8 sps:$4 sm:$0xff]   ;;  %v5786_v5 = vld [vmem:[%s7250_s18 + $0x1a0] ss:$8 sps:$4 sm:$0xff]   ;;  %v5789_v7 = vld [vmem:[%s7250_s18 + $0x90] ss:$8 sps:$4 sm:$0xff]  }
 0x1be   : > { %4430 = vmatprep.subr.bf16.mxu1 %v5736_v30  ;;  %4411 = vmatprep.mubr.bf16.mxu0 %v5201_v57  ;;  %v5790_v6 = vld [vmem:[%s7250_s18 + $0x194] ss:$8 sps:$4 sm:$0xff]   ;;  %v5793_v8 = vld [vmem:[%s7250_s18 + $0x84] ss:$8 sps:$4 sm:$0xff]   ;;  %v5792_v9 = vld [vmem:[%s7250_s18 + $0x190] ss:$8 sps:$4 sm:$0xff]  }
 0x1bf   : > { %4452 = vmatprep.mubr.bf16.mxu1 %v5203_v61  ;;  %v5796_v10 = vld [vmem:[%s7250_s18 + $0x184] ss:$8 sps:$4 sm:$0xff]   ;;  %v5795_v11 = vld [vmem:[%s7250_s18 + $0x80] ss:$8 sps:$4 sm:$0xff]   ;;  %v5803_v12 = vld [vmem:[%s7250_s18 + $0x274] ss:$8 sps:$4 sm:$0xff]  }
 0x1c0   : > { %4390 = vmatpush1.bf16.msra.mxu0 %v5735_v31  ;;  %v5800_v13 = vld [vmem:[%s7250_s18 + $0x180] ss:$8 sps:$4 sm:$0xff]   ;;  %v5808_v15 = vld [vmem:[%s7250_s18 + $0x374] ss:$8 sps:$4 sm:$0xff]   ;;  %v5801_v16 = vld [vmem:[%s7250_s18 + $0x270] ss:$8 sps:$4 sm:$0xff]  }
 0x1c1   : > { %4391 = vmatprep.subr.bf16.mxu0 %v5739_v32  ;;  %4431 = vmatpush1.bf16.msra.mxu1 %v5738_v33  ;;  %v5811_v18 = vld [vmem:[%s7250_s18 + $0x264] ss:$8 sps:$4 sm:$0xff]   ;;  %v5806_v19 = vld [vmem:[%s7250_s18 + $0x370] ss:$8 sps:$4 sm:$0xff]   ;;  %v5809_v21 = vld [vmem:[%s7250_s18 + $0x260] ss:$8 sps:$4 sm:$0xff]  }
 0x1c2   : > { %4432 = vmatprep.subr.bf16.mxu1 %v5742_v34  ;;  %v5814_v20 = vld [vmem:[%s7250_s18 + $0x364] ss:$8 sps:$4 sm:$0xff]   ;;  %v5817_v22 = vld [vmem:[%s7250_s18 + $0x254] ss:$8 sps:$4 sm:$0xff]   ;;  %v5812_v23 = vld [vmem:[%s7250_s18 + $0x360] ss:$8 sps:$4 sm:$0xff]  }
 0x1c3   : > { %v5820_v24 = vld [vmem:[%s7250_s18 + $0x354] ss:$8 sps:$4 sm:$0xff]   ;;  %v5815_v25 = vld [vmem:[%s7250_s18 + $0x250] ss:$8 sps:$4 sm:$0xff]   ;;  %v5823_v26 = vld [vmem:[%s7250_s18 + $0x244] ss:$8 sps:$4 sm:$0xff]  }
 0x1c4   : > { %4392 = vmatpush1.bf16.msra.mxu0 %v5741_v35  ;;  %v5818_v27 = vld [vmem:[%s7250_s18 + $0x350] ss:$8 sps:$4 sm:$0xff]   ;;  %v5826_v28 = vld [vmem:[%s7250_s18 + $0x344] ss:$8 sps:$4 sm:$0xff]   ;;  %v5821_v29 = vld [vmem:[%s7250_s18 + $0x240] ss:$8 sps:$4 sm:$0xff]  }
 0x1c5   : > { %4393 = vmatprep.subr.bf16.mxu0 %v5745_v36  ;;  %4433 = vmatpush1.bf16.msra.mxu1 %v5744_v37  ;;  %v5829_v30 = vld [vmem:[%s7250_s18 + $0x234] ss:$8 sps:$4 sm:$0xff]   ;;  %v5824_v31 = vld [vmem:[%s7250_s18 + $0x340] ss:$8 sps:$4 sm:$0xff]   ;;  %v5827_v33 = vld [vmem:[%s7250_s18 + $0x230] ss:$8 sps:$4 sm:$0xff]  }
 0x1c6   : > { %4434 = vmatprep.subr.bf16.mxu1 %v5748_v38  ;;  %v5832_v32 = vld [vmem:[%s7250_s18 + $0x334] ss:$8 sps:$4 sm:$0xff]   ;;  %v5835_v34 = vld [vmem:[%s7250_s18 + $0x224] ss:$8 sps:$4 sm:$0xff]   ;;  %v5830_v35 = vld [vmem:[%s7250_s18 + $0x330] ss:$8 sps:$4 sm:$0xff]  }
 0x1c7   : > { %v5838_v36 = vld [vmem:[%s7250_s18 + $0x324] ss:$8 sps:$4 sm:$0xff]   ;;  %v5833_v37 = vld [vmem:[%s7250_s18 + $0x220] ss:$8 sps:$4 sm:$0xff]   ;;  %v5841_v38 = vld [vmem:[%s7250_s18 + $0x214] ss:$8 sps:$4 sm:$0xff]  }
 0x1c8   : > { %4394 = vmatpush1.bf16.msra.mxu0 %v5747_v39  ;;  %v5836_v39 = vld [vmem:[%s7250_s18 + $0x320] ss:$8 sps:$4 sm:$0xff]   ;;  %v5854_v55 = vld [vmem:[%s7250_s18 + $0x3f0] ss:$8 sps:$4 sm:$0xff]  }
 0x1c9   : > { %4395 = vmatprep.subr.bf16.mxu0 %v5751_v40  ;;  %4435 = vmatpush1.bf16.msra.mxu1 %v5750_v41  ;;  %v5844_v40 = vld [vmem:[%s7250_s18 + $0x314] ss:$8 sps:$4 sm:$0xff]   ;;  %v5857_v57 = vld [vmem:[%s7250_s18 + $0x2e0] ss:$8 sps:$4 sm:$0xff]   ;;  %v5863_v61 = vld [vmem:[%s7250_s18 + $0x2d0] ss:$8 sps:$4 sm:$0xff]  }
 0x1ca   : > { %4436 = vmatprep.subr.bf16.mxu1 %v5754_v42  ;;  %v7358_v41 = vld [vmem:[%s7804_s0 + $0x10] sm:$0xff]  ;;  %v5860_v59 = vld [vmem:[%s7250_s18 + $0x3e0] ss:$8 sps:$4 sm:$0xff]  }
 0x1cb   : > { %v5839_v42 = vld [vmem:[%s7250_s18 + $0x210] ss:$8 sps:$4 sm:$0xff]  }
 0x1cc   : > { %4396 = vmatpush2.bf16.msra.mxu0 %v5753_v43  ;;  %v5205_v43 = vcombine.high %v7358_v41, %v7358_v41 }
 0x1cd   : > { %4397 = vmatprep.subr.bf16.mxu0 %v5757_v44  ;;  %4437 = vmatpush2.bf16.msra.mxu1 %v5756_v45  ;;  %v7366_v44 = vld [vmem:[%s7804_s0 + $0x18] sm:$0xff]  ;;  %v5847_v45 = vld [vmem:[%s7250_s18 + $0x204] ss:$8 sps:$4 sm:$0xff]  }
 0x1ce   : > { %4438 = vmatprep.subr.bf16.mxu1 %v5760_v46  ;;  %v5207_v46 = vcombine.high %v7366_v44, %v7366_v44 }
 0x1d0   : > { %4398 = vmatpush2.bf16.msra.mxu0 %v5759_v47  ;;  %v5842_v47 = vld [vmem:[%s7250_s18 + $0x310] ss:$8 sps:$4 sm:$0xff]  }
 0x1d1   : > { %4399 = vmatprep.subr.bf16.mxu0 %v5763_v48  ;;  %4439 = vmatpush2.bf16.msra.mxu1 %v5762_v49  ;;  %v5850_v48 = vld [vmem:[%s7250_s18 + $0x304] ss:$8 sps:$4 sm:$0xff]   ;;  %v5845_v49 = vld [vmem:[%s7250_s18 + $0x200] ss:$8 sps:$4 sm:$0xff]  }
 0x1d2   : > { %4440 = vmatprep.subr.bf16.mxu1 %v5766_v50  ;;  %v5853_v50 = vld [vmem:[%s7250_s18 + $0x2f4] ss:$8 sps:$4 sm:$0xff]  }
 0x1d4   : > { %4400 = vmatpush2.bf16.msra.mxu0 %v5765_v51  ;;  %v5848_v51 = vld [vmem:[%s7250_s18 + $0x300] ss:$8 sps:$4 sm:$0xff]  }
 0x1d5   : > { %4401 = vmatprep.subr.bf16.mxu0 %v5769_v52  ;;  %4441 = vmatpush2.bf16.msra.mxu1 %v5768_v53  ;;  %v5856_v52 = vld [vmem:[%s7250_s18 + $0x3f4] ss:$8 sps:$4 sm:$0xff]   ;;  %v5851_v53 = vld [vmem:[%s7250_s18 + $0x2f0] ss:$8 sps:$4 sm:$0xff]  }
 0x1d6   : > { %4442 = vmatprep.subr.bf16.mxu1 %v5772_v54  ;;  %v5859_v54 = vld [vmem:[%s7250_s18 + $0x2e4] ss:$8 sps:$4 sm:$0xff]  }
 0x1d8   : > { %4402 = vmatpush2.bf16.msra.mxu0 %v5771_v56  ;;  %v5862_v56 = vld [vmem:[%s7250_s18 + $0x3e4] ss:$8 sps:$4 sm:$0xff]  }
 0x1d9   : > { %4403 = vmatprep.subr.bf16.mxu0 %v5775_v58  ;;  %4443 = vmatpush2.bf16.msra.mxu1 %v5774_v60  ;;  %v5865_v58 = vld [vmem:[%s7250_s18 + $0x2d4] ss:$8 sps:$4 sm:$0xff]  }
 0x1da   : > { %4444 = vmatprep.subr.bf16.mxu1 %v5778_v62  ;;  %v5868_v60 = vld [vmem:[%s7250_s18 + $0x3d4] ss:$8 sps:$4 sm:$0xff]   ;;  %v5871_v62 = vld [vmem:[%s7250_s18 + $0x2c4] ss:$8 sps:$4 sm:$0xff]  }
 0x1dc   : > { %4404 = vmatpush2.bf16.msra.mxu0 %v5777_v63  ;;  %v5866_v63 = vld [vmem:[%s7250_s18 + $0x3d0] ss:$8 sps:$4 sm:$0xff]  }
 0x1dd   : > { %4405 = vmatprep.subr.bf16.mxu0 %v5781_v0  ;;  %4445 = vmatpush2.bf16.msra.mxu1 %v5780_v1  ;;  %v5874_v0 = vld [vmem:[%s7250_s18 + $0x3c4] ss:$8 sps:$4 sm:$0xff]   ;;  %v5869_v1 = vld [vmem:[%s7250_s18 + $0x2c0] ss:$8 sps:$4 sm:$0xff]  }
 0x1de   : > { %4446 = vmatprep.subr.bf16.mxu1 %v5784_v2  ;;  %v5877_v2 = vld [vmem:[%s7250_s18 + $0x2b4] ss:$8 sps:$4 sm:$0xff]  }
 0x1e0   : > { %4406 = vmatpush2.bf16.msra.mxu0 %v5783_v3  ;;  %v5872_v3 = vld [vmem:[%s7250_s18 + $0x3c0] ss:$8 sps:$4 sm:$0xff]  }
 0x1e1   : > { %4407 = vmatprep.subr.bf16.mxu0 %v5787_v4  ;;  %4447 = vmatpush2.bf16.msra.mxu1 %v5786_v5  ;;  %v5880_v4 = vld [vmem:[%s7250_s18 + $0x3b4] ss:$8 sps:$4 sm:$0xff]   ;;  %v5875_v5 = vld [vmem:[%s7250_s18 + $0x2b0] ss:$8 sps:$4 sm:$0xff]  }
 0x1e2   : > { %4448 = vmatprep.subr.bf16.mxu1 %v5790_v6  ;;  %v5883_v6 = vld [vmem:[%s7250_s18 + $0x2a4] ss:$8 sps:$4 sm:$0xff]  }
 0x1e4   : > { %4408 = vmatpush2.bf16.msra.mxu0 %v5789_v7  ;;  %v5878_v7 = vld [vmem:[%s7250_s18 + $0x3b0] ss:$8 sps:$4 sm:$0xff]  }
 0x1e5   : > { %4409 = vmatprep.subr.bf16.mxu0 %v5793_v8  ;;  %4449 = vmatpush2.bf16.msra.mxu1 %v5792_v9  ;;  %v5886_v8 = vld [vmem:[%s7250_s18 + $0x3a4] ss:$8 sps:$4 sm:$0xff]   ;;  %v5881_v9 = vld [vmem:[%s7250_s18 + $0x2a0] ss:$8 sps:$4 sm:$0xff]  }
 0x1e6   : > { %4450 = vmatprep.subr.bf16.mxu1 %v5796_v10  ;;  %v5889_v10 = vld [vmem:[%s7250_s18 + $0x294] ss:$8 sps:$4 sm:$0xff]  }
 0x1e8   : > { %4410 = vmatpush2.bf16.msra.mxu0 %v5795_v11  ;;  %v5884_v11 = vld [vmem:[%s7250_s18 + $0x3a0] ss:$8 sps:$4 sm:$0xff]  }
 0x1e9   : > { %4461 = vmatprep.subr.bf16.mxu0 %v5803_v12  ;;  %4451 = vmatpush2.bf16.msra.mxu1 %v5800_v13  ;;  %v5892_v12 = vld [vmem:[%s7250_s18 + $0x394] ss:$8 sps:$4 sm:$0xff]   ;;  %v5887_v13 = vld [vmem:[%s7250_s18 + $0x290] ss:$8 sps:$4 sm:$0xff]  }
 0x1ea   : > { %4502 = vmatprep.subr.bf16.mxu1 %v5808_v15  ;;  %v5890_v15 = vld [vmem:[%s7250_s18 + $0x390] ss:$8 sps:$4 sm:$0xff]  }
 0x1eb   : > { %4412 = vmatmul.mubr.bf16.vlgmr.msra.gmra.mxu0 %v5200_v14  ;;  %v5895_v14 = vld [vmem:[%s7250_s18 + $0x284] ss:$8 sps:$4 sm:$0xff]  }
 0x1ec   : > { %4462 = vmatpush1.bf16.msra.mxu0 %v5801_v16  ;;  %4453 = vmatmul.mubr.bf16.vlgmr.msra.gmra.mxu1 %v5202_v17  ;;  %v5898_v16 = vld [vmem:[%s7250_s18 + $0x384] ss:$8 sps:$4 sm:$0xff]   ;;  %v5893_v17 = vld [vmem:[%s7250_s18 + $0x280] ss:$8 sps:$4 sm:$0xff]  }
 0x1ed   : > { %4463 = vmatprep.subr.bf16.mxu0 %v5811_v18  ;;  %4503 = vmatpush1.bf16.msra.mxu1 %v5806_v19  ;;  %v5903_v18 = vld [vmem:[%s7250_s18 + $0x474] ss:$8 sps:$4 sm:$0xff]   ;;  %v5896_v19 = vld [vmem:[%s7250_s18 + $0x380] ss:$8 sps:$4 sm:$0xff]  }
 0x1ee   : > { %4504 = vmatprep.subr.bf16.mxu1 %v5814_v20  ;;  %4493 = vmatprep.mubr.bf16.mxu0 %v5205_v43  ;;  %v5204_v20 = vcombine.low %v7358_v41, %v7358_v41  ;;  %v5924_v41 = vld [vmem:[%s7250_s18 + $0x540] ss:$8 sps:$4 sm:$0xff]   ;;  %v5927_v43 = vld [vmem:[%s7250_s18 + $0x430] ss:$8 sps:$4 sm:$0xff]  }
 0x1ef   : > { %4534 = vmatprep.mubr.bf16.mxu1 %v5207_v46  ;;  %v5938_v46 = vld [vmem:[%s7250_s18 + $0x524] ss:$8 sps:$4 sm:$0xff]  }
 0x1f0   : > { %4464 = vmatpush1.bf16.msra.mxu0 %v5809_v21  ;;  %v5908_v21 = vld [vmem:[%s7250_s18 + $0x574] ss:$8 sps:$4 sm:$0xff]  }
 0x1f1   : > { %4465 = vmatprep.subr.bf16.mxu0 %v5817_v22  ;;  %4505 = vmatpush1.bf16.msra.mxu1 %v5812_v23  ;;  %v5901_v22 = vld [vmem:[%s7250_s18 + $0x470] ss:$8 sps:$4 sm:$0xff]   ;;  %v5206_v23 = vcombine.low %v7366_v44, %v7366_v44  ;;  %v5935_v44 = vld [vmem:[%s7250_s18 + $0x424] ss:$8 sps:$4 sm:$0xff]  }
 0x1f2   : > { %4506 = vmatprep.subr.bf16.mxu1 %v5820_v24  ;;  %v5911_v24 = vld [vmem:[%s7250_s18 + $0x464] ss:$8 sps:$4 sm:$0xff]  }
 0x1f4   : > { %4466 = vmatpush1.bf16.msra.mxu0 %v5815_v25  ;;  %v5906_v25 = vld [vmem:[%s7250_s18 + $0x570] ss:$8 sps:$4 sm:$0xff]  }
 0x1f5   : > { %4467 = vmatprep.subr.bf16.mxu0 %v5823_v26  ;;  %4507 = vmatpush1.bf16.msra.mxu1 %v5818_v27  ;;  %v7419_v26 = vld [vmem:[%s7804_s0 + $0x20] sm:$0xff] }
 0x1f6   : > { %4508 = vmatprep.subr.bf16.mxu1 %v5826_v28  ;;  %v5909_v27 = vld [vmem:[%s7250_s18 + $0x460] ss:$8 sps:$4 sm:$0xff]   ;;  %v5914_v28 = vld [vmem:[%s7250_s18 + $0x564] ss:$8 sps:$4 sm:$0xff]  }
 0x1f8   : > { %4468 = vmatpush1.bf16.msra.mxu0 %v5821_v29  ;;  %v5209_v29 = vcombine.high %v7419_v26, %v7419_v26 }
 0x1f9   : > { %4469 = vmatprep.subr.bf16.mxu0 %v5829_v30  ;;  %4509 = vmatpush1.bf16.msra.mxu1 %v5824_v31  ;;  %v7428_v30 = vld [vmem:[%s7804_s0 + $0x28] sm:$0xff]  ;;  %v5917_v31 = vld [vmem:[%s7250_s18 + $0x454] ss:$8 sps:$4 sm:$0xff]  }
 0x1fa   : > { %4510 = vmatprep.subr.bf16.mxu1 %v5832_v32  ;;  %v5211_v32 = vcombine.high %v7428_v30, %v7428_v30 }
 0x1fc   : > { %4470 = vmatpush1.bf16.msra.mxu0 %v5827_v33  ;;  %v5912_v33 = vld [vmem:[%s7250_s18 + $0x560] ss:$8 sps:$4 sm:$0xff]  }
 0x1fd   : > { %4471 = vmatprep.subr.bf16.mxu0 %v5835_v34  ;;  %4511 = vmatpush1.bf16.msra.mxu1 %v5830_v35  ;;  %v5920_v34 = vld [vmem:[%s7250_s18 + $0x554] ss:$8 sps:$4 sm:$0xff]   ;;  %v5915_v35 = vld [vmem:[%s7250_s18 + $0x450] ss:$8 sps:$4 sm:$0xff]  }
 0x1fe   : > { %4512 = vmatprep.subr.bf16.mxu1 %v5838_v36  ;;  %v5923_v36 = vld [vmem:[%s7250_s18 + $0x444] ss:$8 sps:$4 sm:$0xff]  }
 0x200   : > { %4472 = vmatpush1.bf16.msra.mxu0 %v5833_v37  ;;  %v5918_v37 = vld [vmem:[%s7250_s18 + $0x550] ss:$8 sps:$4 sm:$0xff]  }
 0x201   : > { %4473 = vmatprep.subr.bf16.mxu0 %v5841_v38  ;;  %4513 = vmatpush1.bf16.msra.mxu1 %v5836_v39  ;;  %v5926_v38 = vld [vmem:[%s7250_s18 + $0x544] ss:$8 sps:$4 sm:$0xff]   ;;  %v5921_v39 = vld [vmem:[%s7250_s18 + $0x440] ss:$8 sps:$4 sm:$0xff]  }
 0x202   : > { %4514 = vmatprep.subr.bf16.mxu1 %v5844_v40  ;;  %v5929_v40 = vld [vmem:[%s7250_s18 + $0x434] ss:$8 sps:$4 sm:$0xff]  }
 0x204   : > { %4474 = vmatpush1.bf16.msra.mxu0 %v5839_v42  ;;  %v5932_v42 = vld [vmem:[%s7250_s18 + $0x534] ss:$8 sps:$4 sm:$0xff]  }
 0x205   : > { %4475 = vmatprep.subr.bf16.mxu0 %v5847_v45  ;;  %4515 = vmatpush1.bf16.msra.mxu1 %v5842_v47  ;;  %v5930_v45 = vld [vmem:[%s7250_s18 + $0x530] ss:$8 sps:$4 sm:$0xff]   ;;  %v5933_v47 = vld [vmem:[%s7250_s18 + $0x420] ss:$8 sps:$4 sm:$0xff]  }
 0x206   : > { %4516 = vmatprep.subr.bf16.mxu1 %v5850_v48  ;;  %v5941_v48 = vld [vmem:[%s7250_s18 + $0x414] ss:$8 sps:$4 sm:$0xff]  }
 0x208   : > { %4476 = vmatpush1.bf16.msra.mxu0 %v5845_v49  ;;  %v5936_v49 = vld [vmem:[%s7250_s18 + $0x520] ss:$8 sps:$4 sm:$0xff]  }
 0x209   : > { %4477 = vmatprep.subr.bf16.mxu0 %v5853_v50  ;;  %4517 = vmatpush1.bf16.msra.mxu1 %v5848_v51  ;;  %v5944_v50 = vld [vmem:[%s7250_s18 + $0x514] ss:$8 sps:$4 sm:$0xff]   ;;  %v5939_v51 = vld [vmem:[%s7250_s18 + $0x410] ss:$8 sps:$4 sm:$0xff]  }
 0x20a   : > { %4518 = vmatprep.subr.bf16.mxu1 %v5856_v52  ;;  %v5947_v52 = vld [vmem:[%s7250_s18 + $0x404] ss:$8 sps:$4 sm:$0xff]  }
 0x20c   : > { %4478 = vmatpush2.bf16.msra.mxu0 %v5851_v53  ;;  %v5942_v53 = vld [vmem:[%s7250_s18 + $0x510] ss:$8 sps:$4 sm:$0xff]  }
 0x20d   : > { %4479 = vmatprep.subr.bf16.mxu0 %v5859_v54  ;;  %4519 = vmatpush2.bf16.msra.mxu1 %v5854_v55  ;;  %v5950_v54 = vld [vmem:[%s7250_s18 + $0x504] ss:$8 sps:$4 sm:$0xff]   ;;  %v5945_v55 = vld [vmem:[%s7250_s18 + $0x400] ss:$8 sps:$4 sm:$0xff]  }
 0x20e   : > { %4520 = vmatprep.subr.bf16.mxu1 %v5862_v56  ;;  %v5953_v56 = vld [vmem:[%s7250_s18 + $0x4f4] ss:$8 sps:$4 sm:$0xff]  }
 0x210   : > { %4480 = vmatpush2.bf16.msra.mxu0 %v5857_v57  ;;  %v5948_v57 = vld [vmem:[%s7250_s18 + $0x500] ss:$8 sps:$4 sm:$0xff]  }
 0x211   : > { %4481 = vmatprep.subr.bf16.mxu0 %v5865_v58  ;;  %4521 = vmatpush2.bf16.msra.mxu1 %v5860_v59  ;;  %v5956_v58 = vld [vmem:[%s7250_s18 + $0x5f4] ss:$8 sps:$4 sm:$0xff]   ;;  %v5951_v59 = vld [vmem:[%s7250_s18 + $0x4f0] ss:$8 sps:$4 sm:$0xff]  }
 0x212   : > { %4522 = vmatprep.subr.bf16.mxu1 %v5868_v60  ;;  %v5959_v60 = vld [vmem:[%s7250_s18 + $0x4e4] ss:$8 sps:$4 sm:$0xff]  }
 0x214   : > { %4482 = vmatpush2.bf16.msra.mxu0 %v5863_v61  ;;  %v5954_v61 = vld [vmem:[%s7250_s18 + $0x5f0] ss:$8 sps:$4 sm:$0xff]  }
 0x215   : > { %4483 = vmatprep.subr.bf16.mxu0 %v5871_v62  ;;  %4523 = vmatpush2.bf16.msra.mxu1 %v5866_v63  ;;  %v5962_v62 = vld [vmem:[%s7250_s18 + $0x5e4] ss:$8 sps:$4 sm:$0xff]   ;;  %v5957_v63 = vld [vmem:[%s7250_s18 + $0x4e0] ss:$8 sps:$4 sm:$0xff]  }
 0x216   : > { %4524 = vmatprep.subr.bf16.mxu1 %v5874_v0  ;;  %v5965_v0 = vld [vmem:[%s7250_s18 + $0x4d4] ss:$8 sps:$4 sm:$0xff]  }
 0x218   : > { %4484 = vmatpush2.bf16.msra.mxu0 %v5869_v1  ;;  %v5960_v1 = vld [vmem:[%s7250_s18 + $0x5e0] ss:$8 sps:$4 sm:$0xff]  }
 0x219   : > { %4485 = vmatprep.subr.bf16.mxu0 %v5877_v2  ;;  %4525 = vmatpush2.bf16.msra.mxu1 %v5872_v3  ;;  %v5968_v2 = vld [vmem:[%s7250_s18 + $0x5d4] ss:$8 sps:$4 sm:$0xff]   ;;  %v5963_v3 = vld [vmem:[%s7250_s18 + $0x4d0] ss:$8 sps:$4 sm:$0xff]  }
 0x21a   : > { %4526 = vmatprep.subr.bf16.mxu1 %v5880_v4  ;;  %v5971_v4 = vld [vmem:[%s7250_s18 + $0x4c4] ss:$8 sps:$4 sm:$0xff]  }
 0x21c   : > { %4486 = vmatpush2.bf16.msra.mxu0 %v5875_v5  ;;  %v5966_v5 = vld [vmem:[%s7250_s18 + $0x5d0] ss:$8 sps:$4 sm:$0xff]  }
 0x21d   : > { %4487 = vmatprep.subr.bf16.mxu0 %v5883_v6  ;;  %4527 = vmatpush2.bf16.msra.mxu1 %v5878_v7  ;;  %v5974_v6 = vld [vmem:[%s7250_s18 + $0x5c4] ss:$8 sps:$4 sm:$0xff]   ;;  %v5969_v7 = vld [vmem:[%s7250_s18 + $0x4c0] ss:$8 sps:$4 sm:$0xff]  }
 0x21e   : > { %4528 = vmatprep.subr.bf16.mxu1 %v5886_v8  ;;  %v5977_v8 = vld [vmem:[%s7250_s18 + $0x4b4] ss:$8 sps:$4 sm:$0xff]  }
 0x220   : > { %4488 = vmatpush2.bf16.msra.mxu0 %v5881_v9  ;;  %v5972_v9 = vld [vmem:[%s7250_s18 + $0x5c0] ss:$8 sps:$4 sm:$0xff]  }
 0x221   : > { %4489 = vmatprep.subr.bf16.mxu0 %v5889_v10  ;;  %4529 = vmatpush2.bf16.msra.mxu1 %v5884_v11  ;;  %v5980_v10 = vld [vmem:[%s7250_s18 + $0x5b4] ss:$8 sps:$4 sm:$0xff]   ;;  %v5975_v11 = vld [vmem:[%s7250_s18 + $0x4b0] ss:$8 sps:$4 sm:$0xff]  }
 0x222   : > { %4530 = vmatprep.subr.bf16.mxu1 %v5892_v12  ;;  %v5983_v12 = vld [vmem:[%s7250_s18 + $0x4a4] ss:$8 sps:$4 sm:$0xff]  }
 0x224   : > { %4490 = vmatpush2.bf16.msra.mxu0 %v5887_v13  ;;  %v5978_v13 = vld [vmem:[%s7250_s18 + $0x5b0] ss:$8 sps:$4 sm:$0xff]  }
 0x225   : > { %4491 = vmatprep.subr.bf16.mxu0 %v5895_v14  ;;  %4531 = vmatpush2.bf16.msra.mxu1 %v5890_v15  ;;  %v5986_v14 = vld [vmem:[%s7250_s18 + $0x5a4] ss:$8 sps:$4 sm:$0xff]   ;;  %v5981_v15 = vld [vmem:[%s7250_s18 + $0x4a0] ss:$8 sps:$4 sm:$0xff]  }
 0x226   : > { %4532 = vmatprep.subr.bf16.mxu1 %v5898_v16  ;;  %v5989_v16 = vld [vmem:[%s7250_s18 + $0x494] ss:$8 sps:$4 sm:$0xff]  }
 0x228   : > { %4492 = vmatpush2.bf16.msra.mxu0 %v5893_v17  ;;  %v5984_v17 = vld [vmem:[%s7250_s18 + $0x5a0] ss:$8 sps:$4 sm:$0xff]  }
 0x229   : > { %4543 = vmatprep.subr.bf16.mxu0 %v5903_v18  ;;  %4533 = vmatpush2.bf16.msra.mxu1 %v5896_v19  ;;  %v5992_v18 = vld [vmem:[%s7250_s18 + $0x594] ss:$8 sps:$4 sm:$0xff]   ;;  %v5987_v19 = vld [vmem:[%s7250_s18 + $0x490] ss:$8 sps:$4 sm:$0xff]  }
 0x22a   : > { %4584 = vmatprep.subr.bf16.mxu1 %v5908_v21  ;;  %v5990_v21 = vld [vmem:[%s7250_s18 + $0x590] ss:$8 sps:$4 sm:$0xff]  }
 0x22b   : > { %4494 = vmatmul.mubr.bf16.vlgmr.msra.gmra.mxu0 %v5204_v20  ;;  %v5995_v20 = vld [vmem:[%s7250_s18 + $0x484] ss:$8 sps:$4 sm:$0xff]  }
 0x22c   : > { %4544 = vmatpush1.bf16.msra.mxu0 %v5901_v22  ;;  %4535 = vmatmul.mubr.bf16.vlgmr.msra.gmra.mxu1 %v5206_v23  ;;  %v5993_v22 = vld [vmem:[%s7250_s18 + $0x480] ss:$8 sps:$4 sm:$0xff]   ;;  %v5998_v23 = vld [vmem:[%s7250_s18 + $0x584] ss:$8 sps:$4 sm:$0xff]  }
 0x22d   : > { %4545 = vmatprep.subr.bf16.mxu0 %v5911_v24  ;;  %4585 = vmatpush1.bf16.msra.mxu1 %v5906_v25  ;;  %v6003_v24 = vld [vmem:[%s7250_s18 + $0x674] ss:$8 sps:$4 sm:$0xff]  }
 0x22e   : > { %4575 = vmatprep.mubr.bf16.mxu0 %v5209_v29  ;;  %4586 = vmatprep.subr.bf16.mxu1 %v5914_v28  ;;  %v7492_v25 = vld [vmem:[%s7804_s0 + $0x30] sm:$0xff]  ;;  %v5208_v28 = vcombine.low %v7419_v26, %v7419_v26 }
 0x22f   : > { %4616 = vmatprep.mubr.bf16.mxu1 %v5211_v32  ;;  %v6008_v29 = vld [vmem:[%s7250_s18 + $0x774] ss:$8 sps:$4 sm:$0xff]   ;;  %v6001_v32 = vld [vmem:[%s7250_s18 + $0x670] ss:$8 sps:$4 sm:$0xff]  }
 0x230   : > { %4546 = vmatpush1.bf16.msra.mxu0 %v5909_v27  ;;  %v5996_v27 = vld [vmem:[%s7250_s18 + $0x580] ss:$8 sps:$4 sm:$0xff]   ;;  %v6006_v26 = vld [vmem:[%s7250_s18 + $0x770] ss:$8 sps:$4 sm:$0xff]  }
 0x231   : > { %4547 = vmatprep.subr.bf16.mxu0 %v5917_v31  ;;  %4587 = vmatpush1.bf16.msra.mxu1 %v5912_v33  ;;  %v7501_v31 = vld [vmem:[%s7804_s0 + $0x38] sm:$0xff]  ;;  %v5213_v33 = vcombine.high %v7492_v25, %v7492_v25 }
 0x232   : > { %4588 = vmatprep.subr.bf16.mxu1 %v5920_v34  ;;  %v5210_v34 = vcombine.low %v7428_v30, %v7428_v30  ;;  %v6017_v30 = vld [vmem:[%s7250_s18 + $0x654] ss:$8 sps:$4 sm:$0xff]  }
 0x234   : > { %4548 = vmatpush1.bf16.msra.mxu0 %v5915_v35  ;;  %v6011_v35 = vld [vmem:[%s7250_s18 + $0x664] ss:$8 sps:$4 sm:$0xff]  }
 0x235   : > { %4549 = vmatprep.subr.bf16.mxu0 %v5923_v36  ;;  %4589 = vmatpush1.bf16.msra.mxu1 %v5918_v37  ;;  %v5215_v36 = vcombine.high %v7501_v31, %v7501_v31  ;;  %v6014_v37 = vld [vmem:[%s7250_s18 + $0x764] ss:$8 sps:$4 sm:$0xff]  }
 0x236   : > { %4590 = vmatprep.subr.bf16.mxu1 %v5926_v38  ;;  %v6009_v38 = vld [vmem:[%s7250_s18 + $0x660] ss:$8 sps:$4 sm:$0xff]  }
 0x238   : > { %4550 = vmatpush1.bf16.msra.mxu0 %v5921_v39  ;;  %v6012_v39 = vld [vmem:[%s7250_s18 + $0x760] ss:$8 sps:$4 sm:$0xff]  }
 0x239   : > { %4551 = vmatprep.subr.bf16.mxu0 %v5929_v40  ;;  %4591 = vmatpush1.bf16.msra.mxu1 %v5924_v41  ;;  %v6020_v40 = vld [vmem:[%s7250_s18 + $0x754] ss:$8 sps:$4 sm:$0xff]   ;;  %v6015_v41 = vld [vmem:[%s7250_s18 + $0x650] ss:$8 sps:$4 sm:$0xff]  }
 0x23a   : > { %4592 = vmatprep.subr.bf16.mxu1 %v5932_v42  ;;  %v6023_v42 = vld [vmem:[%s7250_s18 + $0x644] ss:$8 sps:$4 sm:$0xff]  }
 0x23c   : > { %4552 = vmatpush1.bf16.msra.mxu0 %v5927_v43  ;;  %v6018_v43 = vld [vmem:[%s7250_s18 + $0x750] ss:$8 sps:$4 sm:$0xff]  }
 0x23d   : > { %4553 = vmatprep.subr.bf16.mxu0 %v5935_v44  ;;  %4593 = vmatpush1.bf16.msra.mxu1 %v5930_v45  ;;  %v6026_v44 = vld [vmem:[%s7250_s18 + $0x744] ss:$8 sps:$4 sm:$0xff]   ;;  %v6021_v45 = vld [vmem:[%s7250_s18 + $0x640] ss:$8 sps:$4 sm:$0xff]  }
 0x23e   : > { %4594 = vmatprep.subr.bf16.mxu1 %v5938_v46  ;;  %v6029_v46 = vld [vmem:[%s7250_s18 + $0x634] ss:$8 sps:$4 sm:$0xff]  }
 0x240   : > { %4554 = vmatpush1.bf16.msra.mxu0 %v5933_v47  ;;  %v6024_v47 = vld [vmem:[%s7250_s18 + $0x740] ss:$8 sps:$4 sm:$0xff]  }
 0x241   : > { %4555 = vmatprep.subr.bf16.mxu0 %v5941_v48  ;;  %4595 = vmatpush1.bf16.msra.mxu1 %v5936_v49  ;;  %v6032_v48 = vld [vmem:[%s7250_s18 + $0x734] ss:$8 sps:$4 sm:$0xff]   ;;  %v6027_v49 = vld [vmem:[%s7250_s18 + $0x630] ss:$8 sps:$4 sm:$0xff]  }
 0x242   : > { %4596 = vmatprep.subr.bf16.mxu1 %v5944_v50  ;;  %v6035_v50 = vld [vmem:[%s7250_s18 + $0x624] ss:$8 sps:$4 sm:$0xff]  }
 0x244   : > { %4556 = vmatpush1.bf16.msra.mxu0 %v5939_v51  ;;  %v6030_v51 = vld [vmem:[%s7250_s18 + $0x730] ss:$8 sps:$4 sm:$0xff]  }
 0x245   : > { %4557 = vmatprep.subr.bf16.mxu0 %v5947_v52  ;;  %4597 = vmatpush1.bf16.msra.mxu1 %v5942_v53  ;;  %v6038_v52 = vld [vmem:[%s7250_s18 + $0x724] ss:$8 sps:$4 sm:$0xff]   ;;  %v6033_v53 = vld [vmem:[%s7250_s18 + $0x620] ss:$8 sps:$4 sm:$0xff]  }
 0x246   : > { %4598 = vmatprep.subr.bf16.mxu1 %v5950_v54  ;;  %v6041_v54 = vld [vmem:[%s7250_s18 + $0x614] ss:$8 sps:$4 sm:$0xff]  }
 0x248   : > { %4558 = vmatpush1.bf16.msra.mxu0 %v5945_v55  ;;  %v6036_v55 = vld [vmem:[%s7250_s18 + $0x720] ss:$8 sps:$4 sm:$0xff]  }
 0x249   : > { %4559 = vmatprep.subr.bf16.mxu0 %v5953_v56  ;;  %4599 = vmatpush1.bf16.msra.mxu1 %v5948_v57  ;;  %v6044_v56 = vld [vmem:[%s7250_s18 + $0x714] ss:$8 sps:$4 sm:$0xff]   ;;  %v6039_v57 = vld [vmem:[%s7250_s18 + $0x610] ss:$8 sps:$4 sm:$0xff]  }
 0x24a   : > { %4600 = vmatprep.subr.bf16.mxu1 %v5956_v58  ;;  %v6047_v58 = vld [vmem:[%s7250_s18 + $0x604] ss:$8 sps:$4 sm:$0xff]  }
 0x24c   : > { %4560 = vmatpush2.bf16.msra.mxu0 %v5951_v59  ;;  %v6042_v59 = vld [vmem:[%s7250_s18 + $0x710] ss:$8 sps:$4 sm:$0xff]  }
 0x24d   : > { %4561 = vmatprep.subr.bf16.mxu0 %v5959_v60  ;;  %4601 = vmatpush2.bf16.msra.mxu1 %v5954_v61  ;;  %v6050_v60 = vld [vmem:[%s7250_s18 + $0x704] ss:$8 sps:$4 sm:$0xff]   ;;  %v6045_v61 = vld [vmem:[%s7250_s18 + $0x600] ss:$8 sps:$4 sm:$0xff]  }
 0x24e   : > { %4602 = vmatprep.subr.bf16.mxu1 %v5962_v62  ;;  %v6053_v62 = vld [vmem:[%s7250_s18 + $0x6f4] ss:$8 sps:$4 sm:$0xff]  }
 0x250   : > { %4562 = vmatpush2.bf16.msra.mxu0 %v5957_v63  ;;  %v6048_v63 = vld [vmem:[%s7250_s18 + $0x700] ss:$8 sps:$4 sm:$0xff]  }
 0x251   : > { %4563 = vmatprep.subr.bf16.mxu0 %v5965_v0  ;;  %4603 = vmatpush2.bf16.msra.mxu1 %v5960_v1  ;;  %v6056_v0 = vld [vmem:[%s7250_s18 + $0x7f4] ss:$8 sps:$4 sm:$0xff]   ;;  %v6051_v1 = vld [vmem:[%s7250_s18 + $0x6f0] ss:$8 sps:$4 sm:$0xff]  }
 0x252   : > { %4604 = vmatprep.subr.bf16.mxu1 %v5968_v2  ;;  %v6059_v2 = vld [vmem:[%s7250_s18 + $0x6e4] ss:$8 sps:$4 sm:$0xff]  }
 0x254   : > { %4564 = vmatpush2.bf16.msra.mxu0 %v5963_v3  ;;  %v6054_v3 = vld [vmem:[%s7250_s18 + $0x7f0] ss:$8 sps:$4 sm:$0xff]  }
 0x255   : > { %4565 = vmatprep.subr.bf16.mxu0 %v5971_v4  ;;  %4605 = vmatpush2.bf16.msra.mxu1 %v5966_v5  ;;  %v6062_v4 = vld [vmem:[%s7250_s18 + $0x7e4] ss:$8 sps:$4 sm:$0xff]   ;;  %v6057_v5 = vld [vmem:[%s7250_s18 + $0x6e0] ss:$8 sps:$4 sm:$0xff]  }
 0x256   : > { %4606 = vmatprep.subr.bf16.mxu1 %v5974_v6  ;;  %v6065_v6 = vld [vmem:[%s7250_s18 + $0x6d4] ss:$8 sps:$4 sm:$0xff]  }
 0x258   : > { %4566 = vmatpush2.bf16.msra.mxu0 %v5969_v7  ;;  %v6060_v7 = vld [vmem:[%s7250_s18 + $0x7e0] ss:$8 sps:$4 sm:$0xff]  }
 0x259   : > { %4567 = vmatprep.subr.bf16.mxu0 %v5977_v8  ;;  %4607 = vmatpush2.bf16.msra.mxu1 %v5972_v9  ;;  %v6068_v8 = vld [vmem:[%s7250_s18 + $0x7d4] ss:$8 sps:$4 sm:$0xff]   ;;  %v6063_v9 = vld [vmem:[%s7250_s18 + $0x6d0] ss:$8 sps:$4 sm:$0xff]  }
 0x25a   : > { %4608 = vmatprep.subr.bf16.mxu1 %v5980_v10  ;;  %v6071_v10 = vld [vmem:[%s7250_s18 + $0x6c4] ss:$8 sps:$4 sm:$0xff]  }
 0x25c   : > { %4568 = vmatpush2.bf16.msra.mxu0 %v5975_v11  ;;  %v6066_v11 = vld [vmem:[%s7250_s18 + $0x7d0] ss:$8 sps:$4 sm:$0xff]  }
 0x25d   : > { %4569 = vmatprep.subr.bf16.mxu0 %v5983_v12  ;;  %4609 = vmatpush2.bf16.msra.mxu1 %v5978_v13  ;;  %v6074_v12 = vld [vmem:[%s7250_s18 + $0x7c4] ss:$8 sps:$4 sm:$0xff]   ;;  %v6069_v13 = vld [vmem:[%s7250_s18 + $0x6c0] ss:$8 sps:$4 sm:$0xff]  }
 0x25e   : > { %4610 = vmatprep.subr.bf16.mxu1 %v5986_v14  ;;  %v6077_v14 = vld [vmem:[%s7250_s18 + $0x6b4] ss:$8 sps:$4 sm:$0xff]  }
 0x260   : > { %4570 = vmatpush2.bf16.msra.mxu0 %v5981_v15  ;;  %v6072_v15 = vld [vmem:[%s7250_s18 + $0x7c0] ss:$8 sps:$4 sm:$0xff]  }
 0x261   : > { %4571 = vmatprep.subr.bf16.mxu0 %v5989_v16  ;;  %4611 = vmatpush2.bf16.msra.mxu1 %v5984_v17  ;;  %v6080_v16 = vld [vmem:[%s7250_s18 + $0x7b4] ss:$8 sps:$4 sm:$0xff]   ;;  %v6075_v17 = vld [vmem:[%s7250_s18 + $0x6b0] ss:$8 sps:$4 sm:$0xff]  }
 0x262   : > { %4612 = vmatprep.subr.bf16.mxu1 %v5992_v18  ;;  %v6083_v18 = vld [vmem:[%s7250_s18 + $0x6a4] ss:$8 sps:$4 sm:$0xff]  }
 0x264   : > { %4572 = vmatpush2.bf16.msra.mxu0 %v5987_v19  ;;  %v6078_v19 = vld [vmem:[%s7250_s18 + $0x7b0] ss:$8 sps:$4 sm:$0xff]  }
 0x265   : > { %4573 = vmatprep.subr.bf16.mxu0 %v5995_v20  ;;  %4613 = vmatpush2.bf16.msra.mxu1 %v5990_v21  ;;  %v6086_v20 = vld [vmem:[%s7250_s18 + $0x7a4] ss:$8 sps:$4 sm:$0xff]   ;;  %v6081_v21 = vld [vmem:[%s7250_s18 + $0x6a0] ss:$8 sps:$4 sm:$0xff]  }
 0x266   : > { %4614 = vmatprep.subr.bf16.mxu1 %v5998_v23  ;;  %v6089_v23 = vld [vmem:[%s7250_s18 + $0x694] ss:$8 sps:$4 sm:$0xff]  }
 0x268   : > { %4574 = vmatpush2.bf16.msra.mxu0 %v5993_v22  ;;  %v2318_v22 = vlaneseq }
 0x269   : > { %4625 = vmatprep.subr.bf16.mxu0 %v6003_v24  ;;  %4615 = vmatpush2.bf16.msra.mxu1 %v5996_v27  ;;  %v6084_v24 = vld [vmem:[%s7250_s18 + $0x7a0] ss:$8 sps:$4 sm:$0xff]   ;;  %v6092_v27 = vld [vmem:[%s7250_s18 + $0x794] ss:$8 sps:$4 sm:$0xff]  }
 0x26a   : > { %4666 = vmatprep.subr.bf16.mxu1 %v6008_v29  ;;  %v2319_v29 = vshrl.u32 %v2318_v22, 7  ;;  %v6145_v22 = vld [vmem:[%s7250_s18 + $0x800] ss:$8 sps:$4 sm:$0xff]  }
 0x26b   : > { %4576 = vmatmul.mubr.bf16.vlgmr.msra.gmra.mxu0 %v5208_v28  ;;  %v6087_v28 = vld [vmem:[%s7250_s18 + $0x690] ss:$8 sps:$4 sm:$0xff]  }
 0x26c   : > { %4626 = vmatpush1.bf16.msra.mxu0 %v6001_v32  ;;  %4657 = vmatprep.mubr.bf16.mxu0 %v5213_v33  ;;  %v6090_v32 = vld [vmem:[%s7250_s18 + $0x790] ss:$8 sps:$4 sm:$0xff]   ;;  %v6095_v33 = vld [vmem:[%s7250_s18 + $0x684] ss:$8 sps:$4 sm:$0xff]  }
 0x26d   : > { %4617 = vmatmul.mubr.bf16.vlgmr.msra.gmra.mxu1 %v5210_v34  ;;  %4627 = vmatprep.subr.bf16.mxu0 %v6011_v35  ;;  %v6093_v34 = vld [vmem:[%s7250_s18 + $0x680] ss:$8 sps:$4 sm:$0xff]   ;;  %v6098_v35 = vld [vmem:[%s7250_s18 + $0x784] ss:$8 sps:$4 sm:$0xff]  }
 0x26e   : > { %4667 = vmatpush1.bf16.msra.mxu1 %v6006_v26  ;;  %4698 = vmatprep.mubr.bf16.mxu1 %v5215_v36  ;;  %v6096_v26 = vld [vmem:[%s7250_s18 + $0x780] ss:$8 sps:$4 sm:$0xff]  }
 0x26f   : > { %4668 = vmatprep.subr.bf16.mxu1 %v6014_v37  ;;  %v2316_v36 = vld [vmem:[%s1885_s15] sm:$0x3]  ;;  %v2320_v37 = vsub.s32 0, %v2319_v29 }
 0x270   : > { %4628 = vmatpush1.bf16.msra.mxu0 %v6009_v38  ;;  %v6103_v38 = vld [vmem:[%s7250_s18 + $0x874] ss:$8 sps:$4 sm:$0xff]  }
 0x271   : > { %4629 = vmatprep.subr.bf16.mxu0 %v6017_v30  ;;  %v7580_v30 = vld [vmem:[%s7804_s0 + $0x40] sm:$0xff] }
 0x272   : > { %4669 = vmatpush1.bf16.msra.mxu1 %v6012_v39  ;;  %v2324_v39 = vsub.s32 1, %v2319_v29  ;;  %v6159_v29 = vld [vmem:[%s7250_s18 + $0x8e4] ss:$8 sps:$4 sm:$0xff]  }
 0x273   : > { %4670 = vmatprep.subr.bf16.mxu1 %v6020_v40  ;;  %v6108_v40 = vld [vmem:[%s7250_s18 + $0x974] ss:$8 sps:$4 sm:$0xff]  }
 0x274   : > { %4630 = vmatpush1.bf16.msra.mxu0 %v6015_v41  ;;  %v5212_v41 = vcombine.low %v7492_v25, %v7492_v25  ;;  %v2325_v25 = vrot.slane %v2316_v36, %v2324_v39  ;;  %v6166_v39 = vld [vmem:[%s7250_s18 + $0x9d0] ss:$8 sps:$4 sm:$0xff]  }
 0x275   : > { %4631 = vmatprep.subr.bf16.mxu0 %v6023_v42  ;;  %v7588_v42 = vld [vmem:[%s7804_s0 + $0x48] sm:$0xff] }
 0x276   : > { %4671 = vmatpush1.bf16.msra.mxu1 %v6018_v43  ;;  %v2321_v43 = vrot.slane %v2316_v36, %v2320_v37  ;;  %v6168_v36 = vld [vmem:[%s7250_s18 + $0x9d4] ss:$8 sps:$4 sm:$0xff]   ;;  %v6163_v37 = vld [vmem:[%s7250_s18 + $0x8d0] ss:$8 sps:$4 sm:$0xff]  }
 0x277   : > { %4672 = vmatprep.subr.bf16.mxu1 %v6026_v44  ;;  %v6101_v44 = vld [vmem:[%s7250_s18 + $0x870] ss:$8 sps:$4 sm:$0xff]  }
 0x278   : > { %4632 = vmatpush1.bf16.msra.mxu0 %v6021_v45  ;;  %v5217_v45 = vcombine.high %v7580_v30, %v7580_v30 }
 0x279   : > { %4633 = vmatprep.subr.bf16.mxu0 %v6029_v46  ;;  %v5214_v46 = vcombine.low %v7501_v31, %v7501_v31 }
 0x27a   : > { %4673 = vmatpush1.bf16.msra.mxu1 %v6024_v47  ;;  %v6111_v47 = vld [vmem:[%s7250_s18 + $0x864] ss:$8 sps:$4 sm:$0xff]  }
 0x27b   : > { %4674 = vmatprep.subr.bf16.mxu1 %v6032_v48  ;;  %v6106_v48 = vld [vmem:[%s7250_s18 + $0x970] ss:$8 sps:$4 sm:$0xff]  }
 0x27c   : > { %4634 = vmatpush1.bf16.msra.mxu0 %v6027_v49  ;;  %v5219_v49 = vcombine.high %v7588_v42, %v7588_v42 }
 0x27d   : > { %4635 = vmatprep.subr.bf16.mxu0 %v6035_v50 }
 0x27e   : > { %4675 = vmatpush1.bf16.msra.mxu1 %v6030_v51  ;;  %v6114_v51 = vld [vmem:[%s7250_s18 + $0x964] ss:$8 sps:$4 sm:$0xff]  }
 0x27f   : > { %4676 = vmatprep.subr.bf16.mxu1 %v6038_v52 }
 0x280   : > { %4636 = vmatpush1.bf16.msra.mxu0 %v6033_v53  ;;  %v6109_v53 = vld [vmem:[%s7250_s18 + $0x860] ss:$8 sps:$4 sm:$0xff]  }
 0x281   : > { %4637 = vmatprep.subr.bf16.mxu0 %v6041_v54 }
 0x282   : > { %4677 = vmatpush1.bf16.msra.mxu1 %v6036_v55  ;;  %v6117_v55 = vld [vmem:[%s7250_s18 + $0x854] ss:$8 sps:$4 sm:$0xff]  }
 0x283   : > { %4678 = vmatprep.subr.bf16.mxu1 %v6044_v56 }
 0x284   : > { %4638 = vmatpush1.bf16.msra.mxu0 %v6039_v57 }
 0x285   : > { %4639 = vmatprep.subr.bf16.mxu0 %v6047_v58  ;;  %v6112_v58 = vld [vmem:[%s7250_s18 + $0x960] ss:$8 sps:$4 sm:$0xff]  }
 0x286   : > { %4679 = vmatpush1.bf16.msra.mxu1 %v6042_v59 }
 0x287   : > { %4680 = vmatprep.subr.bf16.mxu1 %v6050_v60 }
 0x288   : > { %4640 = vmatpush1.bf16.msra.mxu0 %v6045_v61  ;;  %v6115_v61 = vld [vmem:[%s7250_s18 + $0x850] ss:$8 sps:$4 sm:$0xff]  }
 0x289   : > { %4641 = vmatprep.subr.bf16.mxu0 %v6053_v62  ;;  %v6120_v62 = vld [vmem:[%s7250_s18 + $0x954] ss:$8 sps:$4 sm:$0xff]  }
 0x28a   : > { %4681 = vmatpush1.bf16.msra.mxu1 %v6048_v63 }
 0x28b   : > { %4682 = vmatprep.subr.bf16.mxu1 %v6056_v0  ;;  %v6118_v0 = vld [vmem:[%s7250_s18 + $0x950] ss:$8 sps:$4 sm:$0xff]  }
 0x28c   : > { %4642 = vmatpush2.bf16.msra.mxu0 %v6051_v1 }
 0x28d   : > { %4643 = vmatprep.subr.bf16.mxu0 %v6059_v2  ;;  %v6123_v2 = vld [vmem:[%s7250_s18 + $0x844] ss:$8 sps:$4 sm:$0xff]  }
 0x28e   : > { %4683 = vmatpush2.bf16.msra.mxu1 %v6054_v3 }
 0x28f   : > { %4684 = vmatprep.subr.bf16.mxu1 %v6062_v4  ;;  %v6126_v4 = vld [vmem:[%s7250_s18 + $0x944] ss:$8 sps:$4 sm:$0xff]  }
 0x290   : > { %4644 = vmatpush2.bf16.msra.mxu0 %v6057_v5  ;;  %v6121_v5 = vld [vmem:[%s7250_s18 + $0x840] ss:$8 sps:$4 sm:$0xff]  }
 0x291   : > { %4645 = vmatprep.subr.bf16.mxu0 %v6065_v6 }
 0x292   : > { %4685 = vmatpush2.bf16.msra.mxu1 %v6060_v7  ;;  %v6124_v7 = vld [vmem:[%s7250_s18 + $0x940] ss:$8 sps:$4 sm:$0xff]  }
 0x293   : > { %4686 = vmatprep.subr.bf16.mxu1 %v6068_v8  ;;  %v6129_v8 = vld [vmem:[%s7250_s18 + $0x834] ss:$8 sps:$4 sm:$0xff]  }
 0x294   : > { %4646 = vmatpush2.bf16.msra.mxu0 %v6063_v9  ;;  %v6132_v9 = vld [vmem:[%s7250_s18 + $0x934] ss:$8 sps:$4 sm:$0xff]  }
 0x295   : > { %4647 = vmatprep.subr.bf16.mxu0 %v6071_v10  ;;  %v6127_v10 = vld [vmem:[%s7250_s18 + $0x830] ss:$8 sps:$4 sm:$0xff]  }
 0x296   : > { %4687 = vmatpush2.bf16.msra.mxu1 %v6066_v11  ;;  %v6130_v11 = vld [vmem:[%s7250_s18 + $0x930] ss:$8 sps:$4 sm:$0xff]  }
 0x297   : > { %4688 = vmatprep.subr.bf16.mxu1 %v6074_v12  ;;  %v6135_v12 = vld [vmem:[%s7250_s18 + $0x824] ss:$8 sps:$4 sm:$0xff]  }
 0x298   : > { %4648 = vmatpush2.bf16.msra.mxu0 %v6069_v13  ;;  %v6138_v13 = vld [vmem:[%s7250_s18 + $0x924] ss:$8 sps:$4 sm:$0xff]  }
 0x299   : > { %4649 = vmatprep.subr.bf16.mxu0 %v6077_v14  ;;  %v6133_v14 = vld [vmem:[%s7250_s18 + $0x820] ss:$8 sps:$4 sm:$0xff]  }
 0x29a   : > { %4689 = vmatpush2.bf16.msra.mxu1 %v6072_v15  ;;  %v6141_v15 = vld [vmem:[%s7250_s18 + $0x814] ss:$8 sps:$4 sm:$0xff]  }
 0x29b   : > { %4690 = vmatprep.subr.bf16.mxu1 %v6080_v16  ;;  %v6136_v16 = vld [vmem:[%s7250_s18 + $0x920] ss:$8 sps:$4 sm:$0xff]  }
 0x29c   : > { %4650 = vmatpush2.bf16.msra.mxu0 %v6075_v17  ;;  %v6144_v17 = vld [vmem:[%s7250_s18 + $0x914] ss:$8 sps:$4 sm:$0xff]  }
 0x29d   : > { %4651 = vmatprep.subr.bf16.mxu0 %v6083_v18  ;;  %v6139_v18 = vld [vmem:[%s7250_s18 + $0x810] ss:$8 sps:$4 sm:$0xff]  }
 0x29e   : > { %4691 = vmatpush2.bf16.msra.mxu1 %v6078_v19  ;;  %v6147_v19 = vld [vmem:[%s7250_s18 + $0x804] ss:$8 sps:$4 sm:$0xff]  }
 0x29f   : > { %4692 = vmatprep.subr.bf16.mxu1 %v6086_v20  ;;  %v6142_v20 = vld [vmem:[%s7250_s18 + $0x910] ss:$8 sps:$4 sm:$0xff]  }
 0x2a0   : > { %4652 = vmatpush2.bf16.msra.mxu0 %v6081_v21  ;;  %v6150_v21 = vld [vmem:[%s7250_s18 + $0x904] ss:$8 sps:$4 sm:$0xff]  }
 0x2a1   : > { %4653 = vmatprep.subr.bf16.mxu0 %v6089_v23  ;;  %v6153_v23 = vld [vmem:[%s7250_s18 + $0x8f4] ss:$8 sps:$4 sm:$0xff]  }
 0x2a2   : > { %4693 = vmatpush2.bf16.msra.mxu1 %v6084_v24  ;;  %v6148_v24 = vld [vmem:[%s7250_s18 + $0x900] ss:$8 sps:$4 sm:$0xff]  }
 0x2a3   : > { %4694 = vmatprep.subr.bf16.mxu1 %v6092_v27  ;;  %v6156_v27 = vld [vmem:[%s7250_s18 + $0x9f4] ss:$8 sps:$4 sm:$0xff]  }
 0x2a4   : > { %4654 = vmatpush2.bf16.msra.mxu0 %v6087_v28  ;;  %v6151_v28 = vld [vmem:[%s7250_s18 + $0x8f0] ss:$8 sps:$4 sm:$0xff]  }
 0x2a5   : > { %4655 = vmatprep.subr.bf16.mxu0 %v6095_v33  ;;  %v6162_v33 = vld [vmem:[%s7250_s18 + $0x9e4] ss:$8 sps:$4 sm:$0xff]  }
 0x2a6   : > { %4695 = vmatpush2.bf16.msra.mxu1 %v6090_v32  ;;  %v6154_v32 = vld [vmem:[%s7250_s18 + $0x9f0] ss:$8 sps:$4 sm:$0xff]  }
 0x2a7   : > { %4696 = vmatprep.subr.bf16.mxu1 %v6098_v35  ;;  %v6165_v35 = vld [vmem:[%s7250_s18 + $0x8d4] ss:$8 sps:$4 sm:$0xff]  }
 0x2a8   : > { %4656 = vmatpush2.bf16.msra.mxu0 %v6093_v34  ;;  %v6157_v34 = vld [vmem:[%s7250_s18 + $0x8e0] ss:$8 sps:$4 sm:$0xff]  }
 0x2a9   : > { %4707 = vmatprep.subr.bf16.mxu0 %v6103_v38  ;;  %v6171_v38 = vld [vmem:[%s7250_s18 + $0x8c4] ss:$8 sps:$4 sm:$0xff]  }
 0x2aa   : > { %4697 = vmatpush2.bf16.msra.mxu1 %v6096_v26  ;;  %v6160_v26 = vld [vmem:[%s7250_s18 + $0x9e0] ss:$8 sps:$4 sm:$0xff]  }
 0x2ab   : > { %v4413_v50 = vpop.f32.mrf.mxu0  ;;  %4658 = vmatmul.mubr.bf16.vlgmr.msra.gmra.mxu0 %v5212_v41  ;;  %4748 = vmatprep.subr.bf16.mxu1 %v6108_v40  ;;  %v6174_v40 = vld [vmem:[%s7250_s18 + $0x9c4] ss:$8 sps:$4 sm:$0xff]   ;;  %v6169_v41 = vld [vmem:[%s7250_s18 + $0x8c0] ss:$8 sps:$4 sm:$0xff]  }
 0x2ac   : > { %v4414_v52 = vadd.f32 %v4413_v50, %v2321_v43  ;;  %4708 = vmatpush1.bf16.msra.mxu0 %v6101_v44  ;;  %4739 = vmatprep.mubr.bf16.mxu0 %v5217_v45  ;;  %v4454_v54 = vpop.f32.mrf.mxu1  ;;  %v6177_v43 = vld [vmem:[%s7250_s18 + $0x8b4] ss:$8 sps:$4 sm:$0xff]   ;;  %v6172_v44 = vld [vmem:[%s7250_s18 + $0x9c0] ss:$8 sps:$4 sm:$0xff]  }
 0x2ad   : > { %v4415_v31 = vpop.f32.mrf.mxu0  ;;  %4699 = vmatmul.mubr.bf16.vlgmr.msra.gmra.mxu1 %v5214_v46  ;;  %4709 = vmatprep.subr.bf16.mxu0 %v6111_v47  ;;  %v6180_v45 = vld [vmem:[%s7250_s18 + $0x9b4] ss:$8 sps:$4 sm:$0xff]   ;;  %v6175_v46 = vld [vmem:[%s7250_s18 + $0x8b0] ss:$8 sps:$4 sm:$0xff]   ;;  %v6183_v47 = vld [vmem:[%s7250_s18 + $0x8a4] ss:$8 sps:$4 sm:$0xff]  }
 0x2ae   : > { %v4416_v56 = vadd.f32 %v4415_v31, %v2325_v25  ;;  %v7602_v57 = vadd.f32 %v4454_v54, %v4414_v52  ;;  %4749 = vmatpush1.bf16.msra.mxu1 %v6106_v48  ;;  %4780 = vmatprep.mubr.bf16.mxu1 %v5219_v49  ;;  %v4456_v60 = vpop.f32.mrf.mxu1  ;;  %v6178_v25 = vld [vmem:[%s7250_s18 + $0x9b0] ss:$8 sps:$4 sm:$0xff]   ;;  %v6186_v48 = vld [vmem:[%s7250_s18 + $0x9a4] ss:$8 sps:$4 sm:$0xff]   ;;  %v6181_v49 = vld [vmem:[%s7250_s18 + $0x8a0] ss:$8 sps:$4 sm:$0xff]  }
 0x2af   : > { %v4417_v59 = vpop.f32.mrf.mxu0  ;;  %4750 = vmatprep.subr.bf16.mxu1 %v6114_v51  ;;  %v6189_v50 = vld [vmem:[%s7250_s18 + $0x894] ss:$8 sps:$4 sm:$0xff]   ;;  %v6184_v51 = vld [vmem:[%s7250_s18 + $0x9a0] ss:$8 sps:$4 sm:$0xff]   ;;  %v6195_v31 = vld [vmem:[%s7250_s18 + $0x884] ss:$8 sps:$4 sm:$0xff]  }
 0x2b0   : > { %v7607_v63 = vadd.f32 %v4456_v60, %v4416_v56  ;;  %4710 = vmatpush1.bf16.msra.mxu0 %v6109_v53  ;;  %v4458_v3 = vpop.f32.mrf.mxu1  ;;  %v6192_v52 = vld [vmem:[%s7250_s18 + $0x994] ss:$8 sps:$4 sm:$0xff]   ;;  %v6187_v53 = vld [vmem:[%s7250_s18 + $0x890] ss:$8 sps:$4 sm:$0xff]   ;;  %v6193_v56 = vld [vmem:[%s7250_s18 + $0x880] ss:$8 sps:$4 sm:$0xff]  }
 0x2b1   : > { %v4418_v1 = vpop.f32.mrf.mxu0  ;;  %4711 = vmatprep.subr.bf16.mxu0 %v6117_v55  ;;  %v6190_v54 = vld [vmem:[%s7250_s18 + $0x990] ss:$8 sps:$4 sm:$0xff]   ;;  %v6198_v55 = vld [vmem:[%s7250_s18 + $0x984] ss:$8 sps:$4 sm:$0xff]   ;;  %v6196_v60 = vld [vmem:[%s7250_s18 + $0x980] ss:$8 sps:$4 sm:$0xff]   ;;  %v5218_v3 = vcombine.low %v7588_v42, %v7588_v42 }
 0x2b2   : > { %4751 = vmatpush1.bf16.msra.mxu1 %v6112_v58  ;;  %v4459_v6 = vpop.f32.mrf.mxu1  ;;  %v6203_v58 = vld [vmem:[%s7250_s18 + $0xa74] ss:$8 sps:$4 sm:$0xff]   ;;  %v6201_v1 = vld [vmem:[%s7250_s18 + $0xa70] ss:$8 sps:$4 sm:$0xff]  }
 0x2b3   : > { %4752 = vmatprep.subr.bf16.mxu1 %v6120_v62  ;;  %v7665_v59 = vld [vmem:[%s7804_s0 + $0x50] sm:$0xff] }
 0x2b4   : > { %4712 = vmatpush1.bf16.msra.mxu0 %v6115_v61  ;;  %v5216_v61 = vcombine.low %v7580_v30, %v7580_v30  ;;  %v6208_v62 = vld [vmem:[%s7250_s18 + $0xb74] ss:$8 sps:$4 sm:$0xff]   ;;  %v6206_v30 = vld [vmem:[%s7250_s18 + $0xb70] ss:$8 sps:$4 sm:$0xff]  }
 0x2b5   : > { %4713 = vmatprep.subr.bf16.mxu0 %v6123_v2  ;;  %v5221_v2 = vcombine.high %v7665_v59, %v7665_v59 }
 0x2b6   : > { %4753 = vmatpush1.bf16.msra.mxu1 %v6118_v0  ;;  %v7674_v0 = vld [vmem:[%s7804_s0 + $0x58] sm:$0xff] }
 0x2b7   : > { %4754 = vmatprep.subr.bf16.mxu1 %v6126_v4  ;;  %v6211_v4 = vld [vmem:[%s7250_s18 + $0xa64] ss:$8 sps:$4 sm:$0xff]  }
 0x2b8   : > { %4714 = vmatpush1.bf16.msra.mxu0 %v6121_v5  ;;  %v5223_v5 = vcombine.high %v7674_v0, %v7674_v0 }
 0x2b9   : > { %4715 = vmatprep.subr.bf16.mxu0 %v6129_v8 }
 0x2ba   : > { %4755 = vmatpush1.bf16.msra.mxu1 %v6124_v7  ;;  %v6214_v7 = vld [vmem:[%s7250_s18 + $0xb64] ss:$8 sps:$4 sm:$0xff]  }
 0x2bb   : > { %4756 = vmatprep.subr.bf16.mxu1 %v6132_v9  ;;  %v6209_v9 = vld [vmem:[%s7250_s18 + $0xa60] ss:$8 sps:$4 sm:$0xff]  }
 0x2bc   : > { %4716 = vmatpush1.bf16.msra.mxu0 %v6127_v10 }
 0x2bd   : > { %4717 = vmatprep.subr.bf16.mxu0 %v6135_v12 }
 0x2be   : > { %4757 = vmatpush1.bf16.msra.mxu1 %v6130_v11  ;;  %v6217_v11 = vld [vmem:[%s7250_s18 + $0xa54] ss:$8 sps:$4 sm:$0xff]  }
 0x2bf   : > { %4758 = vmatprep.subr.bf16.mxu1 %v6138_v13 }
 0x2c0   : > { %4718 = vmatpush1.bf16.msra.mxu0 %v6133_v14  ;;  %v6212_v14 = vld [vmem:[%s7250_s18 + $0xb60] ss:$8 sps:$4 sm:$0xff]  }
 0x2c1   : > { %4719 = vmatprep.subr.bf16.mxu0 %v6141_v15 }
 0x2c2   : > { %4759 = vmatpush1.bf16.msra.mxu1 %v6136_v16  ;;  %v6220_v16 = vld [vmem:[%s7250_s18 + $0xb54] ss:$8 sps:$4 sm:$0xff]  }
 0x2c3   : > { %4760 = vmatprep.subr.bf16.mxu1 %v6144_v17 }
 0x2c4   : > { %4720 = vmatpush1.bf16.msra.mxu0 %v6139_v18  ;;  %v6215_v18 = vld [vmem:[%s7250_s18 + $0xa50] ss:$8 sps:$4 sm:$0xff]  }
 0x2c5   : > { %4721 = vmatprep.subr.bf16.mxu0 %v6147_v19 }
 0x2c6   : > { %4761 = vmatpush1.bf16.msra.mxu1 %v6142_v20 }
 0x2c7   : > { %4762 = vmatprep.subr.bf16.mxu1 %v6150_v21  ;;  %v6218_v21 = vld [vmem:[%s7250_s18 + $0xb50] ss:$8 sps:$4 sm:$0xff]  }
 0x2c8   : > { %4722 = vmatpush1.bf16.msra.mxu0 %v6145_v22  ;;  %v6226_v22 = vld [vmem:[%s7250_s18 + $0xb44] ss:$8 sps:$4 sm:$0xff]  }
 0x2c9   : > { %4723 = vmatprep.subr.bf16.mxu0 %v6153_v23 }
 0x2ca   : > { %4763 = vmatpush1.bf16.msra.mxu1 %v6148_v24  ;;  %v6221_v24 = vld [vmem:[%s7250_s18 + $0xa40] ss:$8 sps:$4 sm:$0xff]  }
 0x2cb   : > { %4764 = vmatprep.subr.bf16.mxu1 %v6156_v27  ;;  %v6229_v27 = vld [vmem:[%s7250_s18 + $0xa34] ss:$8 sps:$4 sm:$0xff]  }
 0x2cc   : > { %4724 = vmatpush2.bf16.msra.mxu0 %v6151_v28  ;;  %v6224_v28 = vld [vmem:[%s7250_s18 + $0xb40] ss:$8 sps:$4 sm:$0xff]  }
 0x2cd   : > { %4725 = vmatprep.subr.bf16.mxu0 %v6159_v29  ;;  %v6232_v29 = vld [vmem:[%s7250_s18 + $0xb34] ss:$8 sps:$4 sm:$0xff]  }
 0x2ce   : > { %4765 = vmatpush2.bf16.msra.mxu1 %v6154_v32  ;;  %v6227_v32 = vld [vmem:[%s7250_s18 + $0xa30] ss:$8 sps:$4 sm:$0xff]  }
 0x2cf   : > { %4766 = vmatprep.subr.bf16.mxu1 %v6162_v33  ;;  %v6235_v33 = vld [vmem:[%s7250_s18 + $0xa24] ss:$8 sps:$4 sm:$0xff]  }
 0x2d0   : > { %4726 = vmatpush2.bf16.msra.mxu0 %v6157_v34  ;;  %v6230_v34 = vld [vmem:[%s7250_s18 + $0xb30] ss:$8 sps:$4 sm:$0xff]  }
 0x2d1   : > { %4727 = vmatprep.subr.bf16.mxu0 %v6165_v35  ;;  %v6238_v35 = vld [vmem:[%s7250_s18 + $0xb24] ss:$8 sps:$4 sm:$0xff]  }
 0x2d2   : > { %4767 = vmatpush2.bf16.msra.mxu1 %v6160_v26  ;;  %v6233_v26 = vld [vmem:[%s7250_s18 + $0xa20] ss:$8 sps:$4 sm:$0xff]  }
 0x2d3   : > { %4768 = vmatprep.subr.bf16.mxu1 %v6168_v36  ;;  %v6241_v36 = vld [vmem:[%s7250_s18 + $0xa14] ss:$8 sps:$4 sm:$0xff]  }
 0x2d4   : > { %4728 = vmatpush2.bf16.msra.mxu0 %v6163_v37  ;;  %v6236_v37 = vld [vmem:[%s7250_s18 + $0xb20] ss:$8 sps:$4 sm:$0xff]  }
 0x2d5   : > { %4729 = vmatprep.subr.bf16.mxu0 %v6171_v38  ;;  %v6244_v38 = vld [vmem:[%s7250_s18 + $0xb14] ss:$8 sps:$4 sm:$0xff]  }
 0x2d6   : > { %4769 = vmatpush2.bf16.msra.mxu1 %v6166_v39  ;;  %v6239_v39 = vld [vmem:[%s7250_s18 + $0xa10] ss:$8 sps:$4 sm:$0xff]  }
 0x2d7   : > { %4770 = vmatprep.subr.bf16.mxu1 %v6174_v40  ;;  %v6247_v40 = vld [vmem:[%s7250_s18 + $0xa04] ss:$8 sps:$4 sm:$0xff]  }
 0x2d8   : > { %4730 = vmatpush2.bf16.msra.mxu0 %v6169_v41  ;;  %v6242_v41 = vld [vmem:[%s7250_s18 + $0xb10] ss:$8 sps:$4 sm:$0xff]  }
 0x2d9   : > { %4731 = vmatprep.subr.bf16.mxu0 %v6177_v43  ;;  %v6250_v43 = vld [vmem:[%s7250_s18 + $0xb04] ss:$8 sps:$4 sm:$0xff]  }
 0x2da   : > { %4771 = vmatpush2.bf16.msra.mxu1 %v6172_v44  ;;  %v6245_v44 = vld [vmem:[%s7250_s18 + $0xa00] ss:$8 sps:$4 sm:$0xff]  }
 0x2db   : > { %4772 = vmatprep.subr.bf16.mxu1 %v6180_v45  ;;  %v6253_v45 = vld [vmem:[%s7250_s18 + $0xaf4] ss:$8 sps:$4 sm:$0xff]  }
 0x2dc   : > { %4732 = vmatpush2.bf16.msra.mxu0 %v6175_v46  ;;  %v6248_v46 = vld [vmem:[%s7250_s18 + $0xb00] ss:$8 sps:$4 sm:$0xff]  }
 0x2dd   : > { %4733 = vmatprep.subr.bf16.mxu0 %v6183_v47  ;;  %v6256_v47 = vld [vmem:[%s7250_s18 + $0xbf4] ss:$8 sps:$4 sm:$0xff]  }
 0x2de   : > { %4773 = vmatpush2.bf16.msra.mxu1 %v6178_v25  ;;  %v6251_v25 = vld [vmem:[%s7250_s18 + $0xaf0] ss:$8 sps:$4 sm:$0xff]  }
 0x2df   : > { %4774 = vmatprep.subr.bf16.mxu1 %v6186_v48  ;;  %v6259_v48 = vld [vmem:[%s7250_s18 + $0xae4] ss:$8 sps:$4 sm:$0xff]  }
 0x2e0   : > { %4734 = vmatpush2.bf16.msra.mxu0 %v6181_v49  ;;  %v6254_v49 = vld [vmem:[%s7250_s18 + $0xbf0] ss:$8 sps:$4 sm:$0xff]  }
 0x2e1   : > { %4735 = vmatprep.subr.bf16.mxu0 %v6189_v50  ;;  %v6262_v50 = vld [vmem:[%s7250_s18 + $0xbe4] ss:$8 sps:$4 sm:$0xff]  }
 0x2e2   : > { %4775 = vmatpush2.bf16.msra.mxu1 %v6184_v51  ;;  %v6257_v51 = vld [vmem:[%s7250_s18 + $0xae0] ss:$8 sps:$4 sm:$0xff]  }
 0x2e3   : > { %4776 = vmatprep.subr.bf16.mxu1 %v6192_v52  ;;  %v6265_v52 = vld [vmem:[%s7250_s18 + $0xad4] ss:$8 sps:$4 sm:$0xff]  }
 0x2e4   : > { %4736 = vmatpush2.bf16.msra.mxu0 %v6187_v53  ;;  %v6260_v53 = vld [vmem:[%s7250_s18 + $0xbe0] ss:$8 sps:$4 sm:$0xff]  }
 0x2e5   : > { %4737 = vmatprep.subr.bf16.mxu0 %v6195_v31  ;;  %v6268_v31 = vld [vmem:[%s7250_s18 + $0xbd4] ss:$8 sps:$4 sm:$0xff]  }
 0x2e6   : > { %4777 = vmatpush2.bf16.msra.mxu1 %v6190_v54  ;;  %v6263_v54 = vld [vmem:[%s7250_s18 + $0xad0] ss:$8 sps:$4 sm:$0xff]  }
 0x2e7   : > { %4778 = vmatprep.subr.bf16.mxu1 %v6198_v55  ;;  %v6271_v55 = vld [vmem:[%s7250_s18 + $0xac4] ss:$8 sps:$4 sm:$0xff]  }
 0x2e8   : > { %4738 = vmatpush2.bf16.msra.mxu0 %v6193_v56  ;;  %v6266_v56 = vld [vmem:[%s7250_s18 + $0xbd0] ss:$8 sps:$4 sm:$0xff]  }
 0x2e9   : > { %4789 = vmatprep.subr.bf16.mxu0 %v6203_v58  ;;  %v6274_v58 = vld [vmem:[%s7250_s18 + $0xbc4] ss:$8 sps:$4 sm:$0xff]  }
 0x2ea   : > { %4779 = vmatpush2.bf16.msra.mxu1 %v6196_v60  ;;  %v6269_v60 = vld [vmem:[%s7250_s18 + $0xac0] ss:$8 sps:$4 sm:$0xff]  }
 0x2eb   : > { %v4495_v6 = vpop.f32.mrf.mxu0  ;;  %4740 = vmatmul.mubr.bf16.vlgmr.msra.gmra.mxu0 %v5216_v61  ;;  %4830 = vmatprep.subr.bf16.mxu1 %v6208_v62  ;;  %v6277_v61 = vld [vmem:[%s7250_s18 + $0xab4] ss:$8 sps:$4 sm:$0xff]   ;;  %v6272_v62 = vld [vmem:[%s7250_s18 + $0xbc0] ss:$8 sps:$4 sm:$0xff]  }
 0x2ec   : > { %v4496_v8 = vadd.f32 %v4495_v6, %v7602_v57  ;;  %4790 = vmatpush1.bf16.msra.mxu0 %v6201_v1  ;;  %4821 = vmatprep.mubr.bf16.mxu0 %v5221_v2  ;;  %v4536_v42 = vpop.f32.mrf.mxu1  ;;  %v6280_v1 = vld [vmem:[%s7250_s18 + $0xbb4] ss:$8 sps:$4 sm:$0xff]   ;;  %v6275_v2 = vld [vmem:[%s7250_s18 + $0xab0] ss:$8 sps:$4 sm:$0xff]  }
 0x2ed   : > { %v4497_v10 = vpop.f32.mrf.mxu0  ;;  %4781 = vmatmul.mubr.bf16.vlgmr.msra.gmra.mxu1 %v5218_v3  ;;  %4791 = vmatprep.subr.bf16.mxu0 %v6211_v4  ;;  %v6283_v3 = vld [vmem:[%s7250_s18 + $0xaa4] ss:$8 sps:$4 sm:$0xff]   ;;  %v6278_v4 = vld [vmem:[%s7250_s18 + $0xbb0] ss:$8 sps:$4 sm:$0xff]   ;;  %v6289_v6 = vld [vmem:[%s7250_s18 + $0xa94] ss:$8 sps:$4 sm:$0xff]  }
 0x2ee   : > { %v4498_v12 = vadd.f32 %v4497_v10, %v7607_v63  ;;  %v7690_v13 = vadd.f32 %v4536_v42, %v4496_v8  ;;  %4831 = vmatpush1.bf16.msra.mxu1 %v6206_v30  ;;  %4862 = vmatprep.mubr.bf16.mxu1 %v5223_v5  ;;  %v4538_v15 = vpop.f32.mrf.mxu1  ;;  %v6223_v63 = vld [vmem:[%s7250_s18 + $0xa44] ss:$8 sps:$4 sm:$0xff]   ;;  %v6281_v5 = vld [vmem:[%s7250_s18 + $0xaa0] ss:$8 sps:$4 sm:$0xff]   ;;  %v6292_v8 = vld [vmem:[%s7250_s18 + $0xb94] ss:$8 sps:$4 sm:$0xff]  }
 0x2ef   : > { %v4499_v57 = vpop.f32.mrf.mxu0  ;;  %4832 = vmatprep.subr.bf16.mxu1 %v6214_v7  ;;  %v6286_v30 = vld [vmem:[%s7250_s18 + $0xba4] ss:$8 sps:$4 sm:$0xff]   ;;  %v6284_v7 = vld [vmem:[%s7250_s18 + $0xba0] ss:$8 sps:$4 sm:$0xff]   ;;  %v6290_v42 = vld [vmem:[%s7250_s18 + $0xb90] ss:$8 sps:$4 sm:$0xff]  }
 0x2f0   : > { %v7694_v17 = vadd.f32 %v4538_v15, %v4498_v12  ;;  %4792 = vmatpush1.bf16.msra.mxu0 %v6209_v9  ;;  %v4540_v20 = vpop.f32.mrf.mxu1  ;;  %v6287_v9 = vld [vmem:[%s7250_s18 + $0xa90] ss:$8 sps:$4 sm:$0xff]   ;;  %v6295_v10 = vld [vmem:[%s7250_s18 + $0xa84] ss:$8 sps:$4 sm:$0xff]   ;;  %v6293_v12 = vld [vmem:[%s7250_s18 + $0xa80] ss:$8 sps:$4 sm:$0xff]   ;;  %v5220_v15 = vcombine.low %v7665_v59, %v7665_v59 }
 0x2f1   : > { %v4500_v19 = vpop.f32.mrf.mxu0  ;;  %4793 = vmatprep.subr.bf16.mxu0 %v6217_v11  ;;  %v6298_v11 = vld [vmem:[%s7250_s18 + $0xb84] ss:$8 sps:$4 sm:$0xff]   ;;  %v6296_v57 = vld [vmem:[%s7250_s18 + $0xb80] ss:$8 sps:$4 sm:$0xff]  }
 0x2f2   : > { %4833 = vmatpush1.bf16.msra.mxu1 %v6212_v14  ;;  %v4541_v23 = vpop.f32.mrf.mxu1  ;;  %v6303_v14 = vld [vmem:[%s7250_s18 + $0xc34] ss:$8 sps:$4 sm:$0xff]   ;;  %v6308_v19 = vld [vmem:[%s7250_s18 + $0xc24] ss:$8 sps:$4 sm:$0xff]  }
 0x2f3   : > { %4834 = vmatprep.subr.bf16.mxu1 %v6220_v16  ;;  %v6301_v16 = vld [vmem:[%s7250_s18 + $0xc30] ss:$8 sps:$4 sm:$0xff]  }
 0x2f4   : > { %4794 = vmatpush1.bf16.msra.mxu0 %v6215_v18  ;;  %v5222_v18 = vcombine.low %v7674_v0, %v7674_v0  ;;  %v6311_v0 = vld [vmem:[%s7250_s18 + $0xc14] ss:$8 sps:$4 sm:$0xff]  }
 0x2f5   : > { %4795 = vmatprep.subr.bf16.mxu0 %v6223_v63 }
 0x2f6   : > { %4835 = vmatpush1.bf16.msra.mxu1 %v6218_v21  ;;  %v6306_v21 = vld [vmem:[%s7250_s18 + $0xc20] ss:$8 sps:$4 sm:$0xff]  }
 0x2f7   : > { %4836 = vmatprep.subr.bf16.mxu1 %v6226_v22  ;;  %v6372_v22 = vmov 0  }
 0x2f8   : > { %4796 = vmatpush1.bf16.msra.mxu0 %v6221_v24 }
 0x2f9   : > { %4797 = vmatprep.subr.bf16.mxu0 %v6229_v27 }
 0x2fa   : > { %4837 = vmatpush1.bf16.msra.mxu1 %v6224_v28 }
 0x2fb   : > { %4838 = vmatprep.subr.bf16.mxu1 %v6232_v29 }
 0x2fc   : > { %4798 = vmatpush1.bf16.msra.mxu0 %v6227_v32  ;;  %v6309_v32 = vld [vmem:[%s7250_s18 + $0xc10] ss:$8 sps:$4 sm:$0xff]  }
 0x2fd   : > { %4799 = vmatprep.subr.bf16.mxu0 %v6235_v33 }
 0x2fe   : > { %4839 = vmatpush1.bf16.msra.mxu1 %v6230_v34  ;;  %v6314_v34 = vld [vmem:[%s7250_s18 + $0xc04] ss:$8 sps:$4 sm:$0xff]  }
 0x2ff   : > { %4840 = vmatprep.subr.bf16.mxu1 %v6238_v35 }
 0x300   : > { %4800 = vmatpush1.bf16.msra.mxu0 %v6233_v26 }
 0x301   : > { %4801 = vmatprep.subr.bf16.mxu0 %v6241_v36  ;;  %v6316_v36 = vld [vmem:[%s7248_s25 + $0x78] sm:$0xff]  }
 0x302   : > { %4841 = vmatpush1.bf16.msra.mxu1 %v6236_v37  ;;  %v6317_v37 = vld [vmem:[%s7248_s25 + $0x38] sm:$0xff]  }
 0x303   : > { %4842 = vmatprep.subr.bf16.mxu1 %v6244_v38  ;;  %v6318_v38 = vld [vmem:[%s7248_s25 + $0x70] sm:$0xff]  }
 0x304   : > { %4802 = vmatpush1.bf16.msra.mxu0 %v6239_v39  ;;  %v6319_v39 = vld [vmem:[%s7248_s25 + $0x30] sm:$0xff]  }
 0x305   : > { %4803 = vmatprep.subr.bf16.mxu0 %v6247_v40  ;;  %v6315_v40 = vld [vmem:[%s7804_s0 + $0x60] ss:$0 sps:$4 sm:$0xff]  }
 0x306   : > { %4843 = vmatpush1.bf16.msra.mxu1 %v6242_v41 }
 0x307   : > { %4844 = vmatprep.subr.bf16.mxu1 %v6250_v43  ;;  %v6320_v43 = vld [vmem:[%s7248_s25 + $0x68] sm:$0xff]  }
 0x308   : > { %4804 = vmatpush1.bf16.msra.mxu0 %v6245_v44 }
 0x309   : > { %4805 = vmatprep.subr.bf16.mxu0 %v6253_v45  ;;  %v6321_v45 = vld [vmem:[%s7248_s25 + $0x28] sm:$0xff]  }
 0x30a   : > { %4845 = vmatpush1.bf16.msra.mxu1 %v6248_v46 }
 0x30b   : > { %4846 = vmatprep.subr.bf16.mxu1 %v6256_v47 }
 0x30c   : > { %4806 = vmatpush2.bf16.msra.mxu0 %v6251_v25 }
 0x30d   : > { %4807 = vmatprep.subr.bf16.mxu0 %v6259_v48 }
 0x30e   : > { %4847 = vmatpush2.bf16.msra.mxu1 %v6254_v49 }
 0x30f   : > { %4848 = vmatprep.subr.bf16.mxu1 %v6262_v50 }
 0x310   : > { %4808 = vmatpush2.bf16.msra.mxu0 %v6257_v51  ;;  %v6322_v51 = vld [vmem:[%s7248_s25 + $0x60] sm:$0xff]  }
 0x311   : > { %4809 = vmatprep.subr.bf16.mxu0 %v6265_v52 }
 0x312   : > { %4849 = vmatpush2.bf16.msra.mxu1 %v6260_v53  ;;  %v6323_v53 = vld [vmem:[%s7248_s25 + $0x20] sm:$0xff]  }
 0x313   : > { %4850 = vmatprep.subr.bf16.mxu1 %v6268_v31 }
 0x314   : > { %4810 = vmatpush2.bf16.msra.mxu0 %v6263_v54 }
 0x315   : > { %4811 = vmatprep.subr.bf16.mxu0 %v6271_v55  ;;  %v6324_v55 = vld [vmem:[%s7248_s25 + $0x58] sm:$0xff]  }
 0x316   : > { %4851 = vmatpush2.bf16.msra.mxu1 %v6266_v56  ;;  %v6325_v56 = vld [vmem:[%s7248_s25 + $0x18] sm:$0xff]  }
 0x317   : > { %4852 = vmatprep.subr.bf16.mxu1 %v6274_v58 }
 0x318   : > { %4812 = vmatpush2.bf16.msra.mxu0 %v6269_v60  ;;  %v6326_v60 = vld [vmem:[%s7248_s25 + $0x50] sm:$0xff]  }
 0x319   : > { %4813 = vmatprep.subr.bf16.mxu0 %v6277_v61  ;;  %v6327_v61 = vld [vmem:[%s7248_s25 + $0x10] sm:$0xff]  }
 0x31a   : > { %4853 = vmatpush2.bf16.msra.mxu1 %v6272_v62  ;;  %v6328_v62 = vld [vmem:[%s7248_s25 + $0x48] sm:$0xff]  }
 0x31b   : > { %4854 = vmatprep.subr.bf16.mxu1 %v6280_v1  ;;  %v6329_v1 = vld [vmem:[%s7248_s25 + $0x8] sm:$0xff]  }
 0x31c   : > { %4814 = vmatpush2.bf16.msra.mxu0 %v6275_v2  ;;  %v6330_v2 = vld [vmem:[%s7248_s25 + $0x40] sm:$0xff]  }
 0x31d   : > { %4815 = vmatprep.subr.bf16.mxu0 %v6283_v3  ;;  %v6331_v3 = vld [vmem:[%s7248_s25] sm:$0xff]  }
 0x31e   : > { %4855 = vmatpush2.bf16.msra.mxu1 %v6278_v4 }
 0x31f   : > { %4856 = vmatprep.subr.bf16.mxu1 %v6286_v30 }
 0x320   : > { %4816 = vmatpush2.bf16.msra.mxu0 %v6281_v5 }
 0x321   : > { %4817 = vmatprep.subr.bf16.mxu0 %v6289_v6 }
 0x322   : > { %4857 = vmatpush2.bf16.msra.mxu1 %v6284_v7 }
 0x323   : > { %4858 = vmatprep.subr.bf16.mxu1 %v6292_v8 }
 0x324   : > { %4818 = vmatpush2.bf16.msra.mxu0 %v6287_v9 }
 0x325   : > { %4819 = vmatprep.subr.bf16.mxu0 %v6295_v10 }
 0x326   : > { %4859 = vmatpush2.bf16.msra.mxu1 %v6290_v42 }
 0x327   : > { %4860 = vmatprep.subr.bf16.mxu1 %v6298_v11 }
 0x328   : > { %4820 = vmatpush2.bf16.msra.mxu0 %v6293_v12 }
 0x329   : > { %4879 = vmatprep.subr.bf16.mxu0 %v6303_v14 }
 0x32a   : > { %4861 = vmatpush2.bf16.msra.mxu1 %v6296_v57 }
 0x32b   : > { %v4577_v63 = vpop.f32.mrf.mxu0  ;;  %4822 = vmatmul.mubr.bf16.vlgmr.msra.gmra.mxu0 %v5220_v15  ;;  %5638 = vmatprep.subr.bf16.mxu1 %v6316_v36 }
 0x32c   : > { %v4578_v20 = vadd.f32 %v4577_v63, %v7690_v13  ;;  %4880 = vmatpush1.bf16.msra.mxu0 %v6301_v16  ;;  %4903 = vmatprep.mubr.bf16.mxu0 %v6372_v22 }
 0x32d   : > { %v4579_v59 = vpop.f32.mrf.mxu0  ;;  %v4618_v23 = vpop.f32.mrf.mxu1  ;;  %4863 = vmatmul.mubr.bf16.vlgmr.msra.gmra.mxu1 %v5222_v18  ;;  %4881 = vmatprep.subr.bf16.mxu0 %v6308_v19 }
 0x32e   : > { %v4580_v24 = vadd.f32 %v4579_v59, %v7694_v17  ;;  %v4619_v27 = vadd.f32 %v4618_v23, %v4578_v20  ;;  %v6312_v17 = vld [vmem:[%s7250_s18 + $0xc00] ss:$8 sps:$4 sm:$0xff]   ;;  %5639 = vmatpush3.bf16.msra.mxu1 %v6317_v37 }
 0x32f   : > { %v4581_v28 = vpop.f32.mrf.mxu0  ;;  %v4620_v13 = vpop.f32.mrf.mxu1  ;;  %5640 = vmatprep.subr.bf16.mxu1 %v6318_v38  ;;  %v4914_v37 = vld [vmem:[%s7809_s5] sm:$0xff] }
 0x330   : > { %v4621_v29 = vadd.f32 %v4620_v13, %v4580_v24  ;;  %4882 = vmatpush1.bf16.msra.mxu0 %v6306_v21 }
 0x331   : > { %v4582_v33 = vpop.f32.mrf.mxu0  ;;  %4883 = vmatprep.subr.bf16.mxu0 %v6311_v0  ;;  %v4622_v35 = vpop.f32.mrf.mxu1 }
 0x332   : > { %5641 = vmatpush3.bf16.msra.mxu1 %v6319_v39 }
 0x333   : > { %v4623_v26 = vpop.f32.mrf.mxu1  ;;  %5642 = vmatprep.subr.bf16.mxu1 %v6320_v43 }
 0x334   : > { %4884 = vmatpush1.bf16.msra.mxu0 %v6309_v32 }
 0x335   : > { %4885 = vmatprep.subr.bf16.mxu0 %v6314_v34 }
 0x336   : > { %5643 = vmatpush3.bf16.msra.mxu1 %v6321_v45 }
 0x337   : > { %5644 = vmatprep.subr.bf16.mxu1 %v6322_v51 }
 0x338   : > { %4886 = vmatpush1.bf16.msra.mxu0 %v6312_v17 }
 0x33a   : > { %5645 = vmatpush3.bf16.msra.mxu1 %v6323_v53 }
 0x33b   : > { %5617 = vmatmul.mubr.msk.bf16.vlgmr.msra.gmra.mxu0 %vm4375_vm0, %v6315_v40  ;;  %5646 = vmatprep.subr.bf16.mxu1 %v6324_v55 }
 0x33e   : > { %5647 = vmatpush3.bf16.msra.mxu1 %v6325_v56 }
 0x33f   : > { %5648 = vmatprep.subr.bf16.mxu1 %v6326_v60 }
 0x342   : > { %5649 = vmatpush3.bf16.msra.mxu1 %v6327_v61 }
 0x343   : > { %5650 = vmatprep.subr.bf16.mxu1 %v6328_v62 }
 0x346   : > { %5651 = vmatpush3.bf16.msra.mxu1 %v6329_v1 }
 0x347   : > { %5652 = vmatprep.subr.bf16.mxu1 %v6330_v2 }
 0x34a   : > { %5653 = vmatpush3.bf16.msra.mxu1 %v6331_v3 }
 0x36b   : > { %v4659_v41 = vpop.f32.mrf.mxu0 }
 0x36c   : > { %v4660_v44 = vadd.f32 %v4659_v41, %v4619_v27 }
 0x36d   : > { %v4661_v46 = vpop.f32.mrf.mxu0  ;;  %v4700_v47 = vpop.f32.mrf.mxu1 }
 0x36e   : > { %v4662_v25 = vadd.f32 %v4661_v46, %v4621_v29  ;;  %v4701_v48 = vadd.f32 %v4700_v47, %v4660_v44 }
 0x36f   : > { %v4663_v49 = vpop.f32.mrf.mxu0  ;;  %v4702_v50 = vpop.f32.mrf.mxu1 }
 0x370   : > { %v4703_v52 = vadd.f32 %v4702_v50, %v4662_v25 }
 0x371   : > { %v4664_v31 = vpop.f32.mrf.mxu0  ;;  %v4704_v54 = vpop.f32.mrf.mxu1 }
 0x373   : > { %v4705_v58 = vpop.f32.mrf.mxu1 }
 0x3ab   : > { %v4741_v4 = vpop.f32.mrf.mxu0 }
 0x3ac   : > { %v4742_v30 = vadd.f32 %v4741_v4, %v4701_v48 }
 0x3ad   : > { %v4743_v5 = vpop.f32.mrf.mxu0  ;;  %v4782_v6 = vpop.f32.mrf.mxu1 }
 0x3ae   : > { %v4744_v7 = vadd.f32 %v4743_v5, %v4703_v52  ;;  %v4783_v8 = vadd.f32 %v4782_v6, %v4742_v30 }
 0x3af   : > { %v4745_v9 = vpop.f32.mrf.mxu0  ;;  %v4784_v10 = vpop.f32.mrf.mxu1 }
 0x3b0   : > { %v4785_v42 = vadd.f32 %v4784_v10, %v4744_v7 }
 0x3b1   : > { %v4746_v11 = vpop.f32.mrf.mxu0  ;;  %v4786_v12 = vpop.f32.mrf.mxu1 }
 0x3b3   : > { %v4787_v14 = vpop.f32.mrf.mxu1 }
 0x3eb   : > { %v4823_v57 = vpop.f32.mrf.mxu0 }
 0x3ec   : > { %v4824_v22 = vadd.f32 %v4823_v57, %v4783_v8 }
 0x3ed   : > { %v4825_v15 = vpop.f32.mrf.mxu0  ;;  %v4864_v16 = vpop.f32.mrf.mxu1 }
 0x3ee   : > { %v4826_v59 = vadd.f32 %v4825_v15, %v4785_v42  ;;  %v4865_v23 = vadd.f32 %v4864_v16, %v4824_v22 }
 0x3ef   : > { %v4827_v18 = vpop.f32.mrf.mxu0  ;;  %v4866_v19 = vpop.f32.mrf.mxu1 }
 0x3f0   : > { %v4867_v24 = vadd.f32 %v4866_v19, %v4826_v59 }
 0x3f1   : > { %v4828_v63 = vpop.f32.mrf.mxu0  ;;  %v4868_v20 = vpop.f32.mrf.mxu1 }
 0x3f3   : > { %v4869_v21 = vpop.f32.mrf.mxu1 }
 0x3fb   : > { %v4905_v0 = vpop.f32.mrf.mxu0 }
 0x3fc   : > { %v4906_v27 = vadd.f32 %v4905_v0, %v4865_v23 }
 0x3fd   : > { %v4907_v28 = vpop.f32.mrf.mxu0 }
 0x3fe   : > { %v4908_v13 = vadd.f32 %v4907_v28, %v4867_v24  ;;  %v4912_v29 = vmax.f32 %v4906_v27, 0.0 }
 0x3ff   : > { %v4909_v32 = vpop.f32.mrf.mxu0 }
 0x400   : > { %v4913_v33 = vmax.f32 %v4908_v13, 0.0  ;;  %v4915_v26 = vpack.c.bf16 %v4912_v29, %v4912_v29 }
 0x401   : > { %v4910_v34 = vpop.f32.mrf.mxu0 }
 0x402   : > { %v4916_v35 = vpack.c.bf16 %v4913_v33, %v4913_v33 }
 0x404   : > { %5077 = vmatprep.mubr.bf16.mxu1 %v4916_v35 }
 0x405   : > { %5078 = vmatmul.mubr.bf16.vlgmr.msra.gmra.mxu1 %v4915_v26 }
 0x4c5   : > { %v5654_v36 = vpop.f32.mrf.mxu1 }
 0x4c7   : > { %v5655_v38 = vpop.f32.mrf.mxu1 }
 0x4c8   : > { %v5656_v17 = vadd.f32 %v5655_v38, %v5654_v36 }
 0x4c9   : > { %v5657_v39 = vpop.f32.mrf.mxu1 }
 0x4ca   : > { %v5085_v40 = vadd.f32 %v5656_v17, %v4914_v37 }
 0x4cb   : > { %v5658_v41 = vpop.f32.mrf.mxu1 }
 0x4cc   : > { %5086 = vst [vmem:[%s7809_s5] sm:$0xff] %v5085_v40 }
 0x4cd PF: > { %s15_s22 = sadd.s32 1, %s6370_s22   ;;  %s7810_s18 = smov %s6358_s19 }
 0x4ce   : > { %p12_p12 = scmp.ge.s32.totalorder %s15_s22, 6   ;;  %s7811_s19 = smov %s6438_s26 }
 0x4cf   : > { %s7812_s20 = smov %s6366_s21  ;;  %s7813_s21 = smov %s7815_s23 }
 0x4d0   :  { %14 = sbr.rel (!%p12_p12) target bundleno = 3 (0x3), region = 126 }

</bundles_post_ra>
